<compile_context>
chip_gen: v7x
topology: tpu7x:2x2x1
jax: 0.10.0
libtpu: 0.0.40
codegen_flags: <defaults>
</compile_context>

<pallas_src>
import functools

import jax
import jax.numpy as jnp
from jax import lax
from jax.experimental import pallas as pl
from jax.experimental.pallas import tpu as pltpu


# ----------------------------------------------------------------------------
# Fused matmul + bias + activation Pallas kernel (the model's hot path).
# ----------------------------------------------------------------------------
def _matmul_bias_act_kernel(x_ref, w_ref, b_ref, o_ref, acc_ref, *, act, slope):
    @pl.when(pl.program_id(2) == 0)
    def _init():
        acc_ref[...] = jnp.zeros_like(acc_ref)

    acc_ref[...] += jnp.dot(x_ref[...], w_ref[...],
                            preferred_element_type=jnp.float32)

    @pl.when(pl.program_id(2) == pl.num_programs(2) - 1)
    def _finalize():
        y = acc_ref[...] + b_ref[...]
        if act == "relu":
            y = jnp.maximum(y, 0.0)
        elif act == "leaky_relu":
            y = jnp.where(y >= 0.0, y, slope * y)
        o_ref[...] = y.astype(o_ref.dtype)


def _round_up(x, m):
    return ((x + m - 1) // m) * m


def _pick_tile(dim, unit, cap):
    padded = _round_up(max(dim, unit), unit)
    tile = min(cap, padded)
    padded = _round_up(padded, tile)
    return padded, tile


def pallas_linear(x, w, b, act="none", slope=0.0):
    """y = act(x @ w + b), tiled Pallas matmul with fused epilogue.

    x: (M, K), w: (K, N), b: (N,). Zero-padding of M/K/N to tile multiples is
    sliced away afterwards (zeros do not perturb the matmul).
    """
    M, K = x.shape
    K2, N = w.shape
    assert K == K2
    Mp, tm = _pick_tile(M, 8, 256)
    Kp, tk = _pick_tile(K, 128, 1024)
    Np, tn = _pick_tile(N, 128, 256)

    xp = jnp.pad(x.astype(jnp.float32), ((0, Mp - M), (0, Kp - K)))
    wp = jnp.pad(w.astype(jnp.float32), ((0, Kp - K), (0, Np - N)))
    bp = jnp.pad(b.astype(jnp.float32).reshape(1, N), ((0, 0), (0, Np - N)))

    grid = (Mp // tm, Np // tn, Kp // tk)
    kernel = functools.partial(_matmul_bias_act_kernel, act=act, slope=slope)

    out = pl.pallas_call(
        kernel,
        out_shape=jax.ShapeDtypeStruct((Mp, Np), jnp.float32),
        grid=grid,
        in_specs=[
            pl.BlockSpec((tm, tk), lambda i, j, k: (i, k)),
            pl.BlockSpec((tk, tn), lambda i, j, k: (k, j)),
            pl.BlockSpec((1, tn), lambda i, j, k: (0, j)),
        ],
        out_specs=pl.BlockSpec((tm, tn), lambda i, j, k: (i, j)),
        scratch_shapes=[pltpu.VMEM((tm, tn), jnp.float32)],
        compiler_params=pltpu.CompilerParams(
            dimension_semantics=("parallel", "parallel", "arbitrary")),
    )(xp, wp, bp)
    return out[:M, :N]


def _linear_ref(x, w, b, act="none", slope=0.0):
    """Pure-JAX reference for the fused kernel (HIGHEST-precision matmul)."""
    y = jnp.dot(x, w, precision=lax.Precision.HIGHEST) + b
    if act == "relu":
        y = jnp.maximum(y, 0.0)
    elif act == "leaky_relu":
        y = jnp.where(y >= 0.0, y, slope * y)
    return y


# ----------------------------------------------------------------------------
# Layer helpers (parameter folding / metadata ops stay at the XLA level).
# ----------------------------------------------------------------------------
def fold_bn(w, b, gamma, beta, mean, var, eps=1e-5):
    """Fold eval-mode BatchNorm into the preceding conv/linear weights."""
    scale = gamma / jnp.sqrt(var + eps)
    w_f = w * scale.reshape((-1,) + (1,) * (w.ndim - 1))
    b_f = (b - mean) * scale + beta
    return w_f, b_f


def _im2col(x, kh, kw, stride, pad):
    B, C, H, W = x.shape
    Ho = (H + 2 * pad - kh) // stride + 1
    Wo = (W + 2 * pad - kw) // stride + 1
    xp = jnp.pad(x, ((0, 0), (0, 0), (pad, pad), (pad, pad)))
    cols = []
    for di in range(kh):
        for dj in range(kw):
            cols.append(xp[:, :, di:di + stride * (Ho - 1) + 1:stride,
                           dj:dj + stride * (Wo - 1) + 1:stride])
    col = jnp.stack(cols, axis=2)                        # (B, C, kh*kw, Ho, Wo)
    col = col.transpose(0, 3, 4, 1, 2).reshape(B * Ho * Wo, C * kh * kw)
    return col, Ho, Wo


def conv2d(x, w, b, stride, pad, act, linear_fn):
    """NCHW Conv2d as im2col (XLA slicing) + fused Pallas matmul."""
    O, C, kh, kw = w.shape
    B = x.shape[0]
    col, Ho, Wo = _im2col(x, kh, kw, stride, pad)
    wm = w.reshape(O, C * kh * kw).T
    y = linear_fn(col, wm, b, act=act)
    return y.reshape(B, Ho, Wo, O).transpose(0, 3, 1, 2)


def _smallest_eigvec_2x2(a, b, c):
    """Eigenvector of [[a,b],[b,c]] for the smallest eigenvalue (torch.symeig order)."""
    h = 0.5 * (a - c)
    r = jnp.sqrt(h * h + b * b)
    lam = 0.5 * (a + c) - r
    vx, vy = b, lam - a
    nrm = jnp.sqrt(vx * vx + vy * vy)
    degenerate = nrm < 1e-12
    vx = jnp.where(degenerate, 1.0, vx)
    vy = jnp.where(degenerate, 0.0, vy)
    nrm = jnp.where(degenerate, 1.0, nrm)
    return vx / nrm, vy / nrm


def _affine_grid(theta, H, W):
    # F.affine_grid, align_corners=False semantics.
    xs = (2.0 * jnp.arange(W, dtype=jnp.float32) + 1.0) / W - 1.0
    ys = (2.0 * jnp.arange(H, dtype=jnp.float32) + 1.0) / H - 1.0
    X, Y = jnp.meshgrid(xs, ys, indexing="xy")           # (H, W)
    base = jnp.stack([X, Y, jnp.ones_like(X)], axis=-1)  # (H, W, 3)
    grid = jnp.einsum("bij,hwj->bhwi", theta, base)      # (B, H, W, 2)
    return grid[..., 0], grid[..., 1]


def _grid_sample_bilinear(img, gx, gy):
    # TODO(synk): F.grid_sample's data-dependent bilinear gather is left to XLA;
    # a per-pixel dynamic gather has no clean (8,128)-layout Pallas formulation
    # at this size.
    B, C, H, W = img.shape
    ix = ((gx + 1.0) * W - 1.0) * 0.5
    iy = ((gy + 1.0) * H - 1.0) * 0.5
    x0 = jnp.floor(ix)
    y0 = jnp.floor(iy)
    x1, y1 = x0 + 1.0, y0 + 1.0
    wx1, wy1 = ix - x0, iy - y0
    wx0, wy0 = 1.0 - wx1, 1.0 - wy1
    flat = img.reshape(B, C, H * W)

    def gather(xi, yi):
        valid = (xi >= 0) & (xi <= W - 1) & (yi >= 0) & (yi <= H - 1)
        xc = jnp.clip(xi, 0, W - 1).astype(jnp.int32)
        yc = jnp.clip(yi, 0, H - 1).astype(jnp.int32)
        idx = (yc * W + xc).reshape(B, 1, -1)
        g = jnp.take_along_axis(
            flat, jnp.broadcast_to(idx, (B, C, idx.shape[-1])), axis=2)
        g = g.reshape(B, C, *xi.shape[1:])
        return g * valid[:, None, :, :].astype(img.dtype)

    return (gather(x0, y0) * (wx0 * wy0)[:, None]
            + gather(x1, y0) * (wx1 * wy0)[:, None]
            + gather(x0, y1) * (wx0 * wy1)[:, None]
            + gather(x1, y1) * (wx1 * wy1)[:, None])


# ----------------------------------------------------------------------------
# ADDA forward pass.
# ----------------------------------------------------------------------------
def adda_forward(params, x, u, use_pallas=True):
    """Returns (f, x_align, e, g) = ADDA.forward() with eval-mode BN/Dropout."""
    linear = pallas_linear if use_pallas else _linear_ref
    B = x.shape[0]
    nh = params["stn_w1"].shape[0]

    # --- EncoderSTN.stn: fc_stn -> convert_Avec_to_A -> symeig -> grid sample ---
    h = jnp.concatenate([u, x.reshape(B, -1)], axis=1)
    h = linear(h, params["stn_w1"].T, params["stn_b1"], act="leaky_relu", slope=0.2)
    # TODO(synk): Dropout layers are eval-mode no-ops (training RNG dropout omitted).
    w2, b2 = fold_bn(params["stn_w2"], params["stn_b2"], **params["stn_bn2"])
    h = linear(h, w2.T, b2, act="leaky_relu", slope=0.2)
    a_vec = linear(h, params["stn_w3"].T, params["stn_b3"], act="none")   # (B, 3)

    tcos, tsin = _smallest_eigvec_2x2(a_vec[:, 0], a_vec[:, 1], a_vec[:, 2])
    zero = jnp.zeros_like(tcos)
    theta = jnp.stack([jnp.stack([tcos, tsin, zero], axis=-1),
                       jnp.stack([-tsin, tcos, zero], axis=-1)], axis=1)  # (B, 2, 3)
    gx, gy = _affine_grid(theta, 28, 28)
    x_align = _grid_sample_bilinear(x, gx, gy)                            # (B,1,28,28)

    # --- EncoderSTN.conv (BatchNorm folded, eval semantics) ---
    c1w, c1b = fold_bn(params["c1_w"], params["c1_b"], **params["c1_bn"])
    h = conv2d(x_align, c1w, c1b, 2, 1, "relu", linear)                   # (B,256,14,14)
    c2w, c2b = fold_bn(params["c2_w"], params["c2_b"], **params["c2_bn"])
    h = conv2d(h, c2w, c2b, 2, 1, "relu", linear)                         # (B,256,7,7)
    c3w, c3b = fold_bn(params["c3_w"], params["c3_b"], **params["c3_bn"])
    h = conv2d(h, c3w, c3b, 2, 1, "relu", linear)                         # (B,256,4,4)
    e = conv2d(h, params["c4_w"], params["c4_b"], 1, 0, "relu", linear)   # (B,nz,1,1)

    # --- EncoderSTN.fc_pred: 1x1 convs on a 1x1 map == linears; nnSqueeze is a
    # pure metadata reshape (no copy kernel launched). ---
    nz = e.shape[1]
    z2 = e.reshape(B, nz)
    p1w, p1b = fold_bn(params["p1_w"], params["p1_b"], **params["p1_bn"])
    z2 = linear(z2, p1w.reshape(nh, nz).T, p1b, act="relu")
    p2w, p2b = fold_bn(params["p2_w"], params["p2_b"], **params["p2_bn"])
    z2 = linear(z2, p2w.reshape(nh, nh).T, p2b, act="relu")
    y = linear(z2, params["fc_w"].T, params["fc_b"], act="none")          # (B, 10)

    # log_softmax + argmax on a (B,10) tensor: trivially small, left to XLA.
    f = jax.nn.log_softmax(y, axis=1)
    g = jnp.argmax(f, axis=1)
    return f, x_align, e, g


def init_params(key, nu=2, nh=256, nz=32):
    ks = jax.random.split(key, 26)

    def w(k, shape, std=0.02):
        return std * jax.random.normal(k, shape, jnp.float32)

    def bn(k, c):
        k1, k2, k3, k4 = jax.random.split(k, 4)
        return dict(gamma=1.0 + 0.1 * jax.random.normal(k1, (c,), jnp.float32),
                    beta=0.1 * jax.random.normal(k2, (c,), jnp.float32),
                    mean=0.1 * jax.random.normal(k3, (c,), jnp.float32),
                    var=jax.random.uniform(k4, (c,), jnp.float32, 0.5, 1.5))

    p = {}
    p["stn_w1"] = w(ks[0], (nh, nu + 28 * 28)); p["stn_b1"] = w(ks[1], (nh,))
    p["stn_w2"] = w(ks[2], (nh, nh));           p["stn_b2"] = w(ks[3], (nh,))
    p["stn_bn2"] = bn(ks[4], nh)
    # Near-identity rotation bias, mirroring init_weight_STN.
    p["stn_w3"] = w(ks[5], (3, nh))
    p["stn_b3"] = w(ks[6], (3,)) + jnp.array([0.99, 0.01, 0.99], jnp.float32)
    p["c1_w"] = w(ks[7], (nh, 1, 3, 3));   p["c1_b"] = w(ks[8], (nh,));  p["c1_bn"] = bn(ks[9], nh)
    p["c2_w"] = w(ks[10], (nh, nh, 3, 3)); p["c2_b"] = w(ks[11], (nh,)); p["c2_bn"] = bn(ks[12], nh)
    p["c3_w"] = w(ks[13], (nh, nh, 3, 3)); p["c3_b"] = w(ks[14], (nh,)); p["c3_bn"] = bn(ks[15], nh)
    p["c4_w"] = w(ks[16], (nz, nh, 4, 4)); p["c4_b"] = w(ks[17], (nz,))
    p["p1_w"] = w(ks[18], (nh, nz, 1, 1)); p["p1_b"] = w(ks[19], (nh,)); p["p1_bn"] = bn(ks[20], nh)
    p["p2_w"] = w(ks[21], (nh, nh, 1, 1)); p["p2_b"] = w(ks[22], (nh,)); p["p2_bn"] = bn(ks[23], nh)
    p["fc_w"] = w(ks[24], (10, nh));       p["fc_b"] = w(ks[25], (10,))
    return p


if __name__ == "__main__":
    key = jax.random.PRNGKey(0)
    k_param, k_x, k_u = jax.random.split(key, 3)
    B, NU, NZ, NH = 2, 2, 32, 256
    x = jax.random.normal(k_x, (B, 1, 28, 28), dtype=jnp.float32)
    u = jax.random.uniform(k_u, (B, NU), dtype=jnp.float32)
    params = init_params(k_param, nu=NU, nh=NH, nz=NZ)

    fwd = jax.jit(functools.partial(adda_forward, use_pallas=True))
    f, x_align, e, g = jax.block_until_ready(fwd(params, x, u))

    # Pure-JAX reference of the same forward (HIGHEST-precision matmuls).
    ref = jax.jit(functools.partial(adda_forward, use_pallas=False))
    f_r, x_r, e_r, g_r = jax.block_until_ready(ref(params, x, u))

    def close(a, b, tol=2e-2):
        scale = float(jnp.maximum(jnp.max(jnp.abs(b)), 1e-6))
        return float(jnp.max(jnp.abs(a - b))) <= tol * scale

    assert f.shape == (B, 10) and f.dtype == jnp.float32
    assert x_align.shape == (B, 1, 28, 28)
    assert e.shape == (B, NZ, 1, 1)
    assert g.shape == (B,)
    assert close(f, f_r), "log-softmax mismatch vs reference"
    assert close(x_align, x_r), "STN-aligned image mismatch vs reference"
    assert close(e, e_r), "encoder feature mismatch vs reference"

    print("KERNEL_OK")
</pallas_src>

<mosaic_0001>
module attributes {stable_mosaic.version = 11 : i64} {
  func.func private @main(%arg0: i32) attributes {dimension_semantics = [#tpu.dimension_semantics<core_parallel>], iteration_bounds = array<i64: 2>, tpu.core_type = #tpu.core_type<sc_scalar_subcore>, window_params = []} {
    return
  }
}

module attributes {stable_mosaic.version = 11 : i64} {
  func.func private @main(%arg0: i32) attributes {dimension_semantics = [#tpu.dimension_semantics<core_parallel>], iteration_bounds = array<i64: 2>, tpu.core_type = #tpu.core_type<sc_scalar_subcore>, window_params = []} {
    return
  }
}

module attributes {stable_mosaic.version = 11 : i64} {
  func.func @_matmul_bias_act_kernel(%arg0: i32, %arg1: i32, %arg2: i32, %arg3: memref<8x896xf32, #tpu.memory_space<vmem>>, %arg4: memref<896x256xf32, #tpu.memory_space<vmem>>, %arg5: memref<1x256xf32, #tpu.memory_space<vmem>>, %arg6: memref<8x256xf32, #tpu.memory_space<vmem>>, %arg7: memref<8x256xf32, #tpu.memory_space<vmem>>) attributes {dimension_semantics = [#tpu.dimension_semantics<parallel>, #tpu.dimension_semantics<parallel>, #tpu.dimension_semantics<arbitrary>], iteration_bounds = array<i64: 1, 1, 1>, scalar_prefetch = 0 : i64, scratch_operands = 1 : i64, tpu.core_type = #tpu.core_type<tc>, window_params = [{transform_indices = @transform_0, window_bounds = array<i64: 8, 896>}, {transform_indices = @transform_1, window_bounds = array<i64: 896, 256>}, {transform_indices = @transform_2, window_bounds = array<i64: 1, 256>}, {transform_indices = @transform_3, window_bounds = array<i64: 8, 256>}]} {
    %c0_i32 = arith.constant 0 : i32
    %0 = arith.cmpi eq, %arg2, %c0_i32 : i32
    %1 = arith.extui %0 : i1 to i32
    %c0_i32_0 = arith.constant 0 : i32
    %2 = arith.cmpi ne, %1, %c0_i32_0 : i32
    scf.if %2 {
      %cst_10 = arith.constant 0.000000e+00 : f32
      %12 = vector.broadcast %cst_10 : f32 to vector<8x256xf32>
      %c0_11 = arith.constant 0 : index
      %c0_12 = arith.constant 0 : index
      %13 = vector.load %arg7[%c0_11, %c0_12] : memref<8x256xf32, #tpu.memory_space<vmem>>, vector<8x256xf32>
      tpu.vector_store %arg7[%c0_11, %c0_12], %12 {strides = array<i32>} : memref<8x256xf32, #tpu.memory_space<vmem>>, vector<8x256xf32>,
    } else {
    }
    %c0 = arith.constant 0 : index
    %c0_1 = arith.constant 0 : index
    %3 = vector.load %arg7[%c0, %c0_1] : memref<8x256xf32, #tpu.memory_space<vmem>>, vector<8x256xf32>
    %c0_2 = arith.constant 0 : index
    %c0_3 = arith.constant 0 : index
    %4 = vector.load %arg3[%c0_2, %c0_3] : memref<8x896xf32, #tpu.memory_space<vmem>>, vector<8x896xf32>
    %c0_4 = arith.constant 0 : index
    %c0_5 = arith.constant 0 : index
    %5 = vector.load %arg4[%c0_4, %c0_5] : memref<896x256xf32, #tpu.memory_space<vmem>>, vector<896x256xf32>
    %cst = arith.constant dense<0.000000e+00> : vector<8x256xf32>
    %6 = tpu.matmul %4, %5, %cst {dimension_numbers = #tpu.dot_dimension_numbers<[1], [0], [0], [1], [0, 0, 1, 1], [], []>} : vector<8x896xf32>, vector<896x256xf32>, vector<8x256xf32> -> vector<8x256xf32>
    %7 = arith.addf %3, %6 : vector<8x256xf32>
    %c0_6 = arith.constant 0 : index
    %c0_7 = arith.constant 0 : index
    %8 = vector.load %arg7[%c0_6, %c0_7] : memref<8x256xf32, #tpu.memory_space<vmem>>, vector<8x256xf32>
    tpu.vector_store %arg7[%c0_6, %c0_7], %7 {strides = array<i32>} : memref<8x256xf32, #tpu.memory_space<vmem>>, vector<8x256xf32>,
    %c0_i32_8 = arith.constant 0 : i32
    %9 = arith.cmpi eq, %arg2, %c0_i32_8 : i32
    %10 = arith.extui %9 : i1 to i32
    %c0_i32_9 = arith.constant 0 : i32
    %11 = arith.cmpi ne, %10, %c0_i32_9 : i32
    scf.if %11 {
      %c0_10 = arith.constant 0 : index
      %c0_11 = arith.constant 0 : index
      %12 = vector.load %arg7[%c0_10, %c0_11] : memref<8x256xf32, #tpu.memory_space<vmem>>, vector<8x256xf32>
      %c0_12 = arith.constant 0 : index
      %c0_13 = arith.constant 0 : index
      %13 = vector.load %arg5[%c0_12, %c0_13] : memref<1x256xf32, #tpu.memory_space<vmem>>, vector<1x256xf32>
      %14 = vector.broadcast %13 : vector<1x256xf32> to vector<8x256xf32>
      %15 = arith.addf %12, %14 : vector<8x256xf32>
      %cst_14 = arith.constant 0.000000e+00 : f32
      %16 = vector.broadcast %cst_14 : f32 to vector<8x256xf32>
      %17 = arith.cmpf oge, %15, %16 : vector<8x256xf32>
      %cst_15 = arith.constant 2.000000e-01 : f32
      %18 = vector.broadcast %cst_15 : f32 to vector<8x256xf32>
      %19 = arith.mulf %18, %15 : vector<8x256xf32>
      %20 = arith.select %17, %15, %19 : vector<8x256xi1>, vector<8x256xf32>
      %c0_16 = arith.constant 0 : index
      %c0_17 = arith.constant 0 : index
      %21 = vector.load %arg6[%c0_16, %c0_17] : memref<8x256xf32, #tpu.memory_space<vmem>>, vector<8x256xf32>
      tpu.vector_store %arg6[%c0_16, %c0_17], %20 {strides = array<i32>} : memref<8x256xf32, #tpu.memory_space<vmem>>, vector<8x256xf32>,
    } else {
    }
    return
  }
  func.func @transform_0(%arg0: i32, %arg1: i32, %arg2: i32) -> (i32, i32) {
    %c0_i32 = arith.constant 0 : i32
    return %arg0, %arg2 : i32, i32
  }
  func.func @transform_1(%arg0: i32, %arg1: i32, %arg2: i32) -> (i32, i32) {
    %c0_i32 = arith.constant 0 : i32
    return %arg2, %arg1 : i32, i32
  }
  func.func @transform_2(%arg0: i32, %arg1: i32, %arg2: i32) -> (i32, i32) {
    %c0_i32 = arith.constant 0 : i32
    %c0_i32_0 = arith.constant 0 : i32
    return %c0_i32, %arg1 : i32, i32
  }
  func.func @transform_3(%arg0: i32, %arg1: i32, %arg2: i32) -> (i32, i32) {
    %c0_i32 = arith.constant 0 : i32
    return %arg0, %arg1 : i32, i32
  }
}

module attributes {stable_mosaic.version = 11 : i64} {
  func.func @_matmul_bias_act_kernel(%arg0: i32, %arg1: i32, %arg2: i32, %arg3: memref<8x256xf32, #tpu.memory_space<vmem>>, %arg4: memref<256x256xf32, #tpu.memory_space<vmem>>, %arg5: memref<1x256xf32, #tpu.memory_space<vmem>>, %arg6: memref<8x256xf32, #tpu.memory_space<vmem>>, %arg7: memref<8x256xf32, #tpu.memory_space<vmem>>) attributes {dimension_semantics = [#tpu.dimension_semantics<parallel>, #tpu.dimension_semantics<parallel>, #tpu.dimension_semantics<arbitrary>], iteration_bounds = array<i64: 1, 1, 1>, scalar_prefetch = 0 : i64, scratch_operands = 1 : i64, tpu.core_type = #tpu.core_type<tc>, window_params = [{transform_indices = @transform_0, window_bounds = array<i64: 8, 256>}, {transform_indices = @transform_1, window_bounds = array<i64: 256, 256>}, {transform_indices = @transform_2, window_bounds = array<i64: 1, 256>}, {transform_indices = @transform_3, window_bounds = array<i64: 8, 256>}]} {
    %c0_i32 = arith.constant 0 : i32
    %0 = arith.cmpi eq, %arg2, %c0_i32 : i32
    %1 = arith.extui %0 : i1 to i32
    %c0_i32_0 = arith.constant 0 : i32
    %2 = arith.cmpi ne, %1, %c0_i32_0 : i32
    scf.if %2 {
      %cst_10 = arith.constant 0.000000e+00 : f32
      %12 = vector.broadcast %cst_10 : f32 to vector<8x256xf32>
      %c0_11 = arith.constant 0 : index
      %c0_12 = arith.constant 0 : index
      %13 = vector.load %arg7[%c0_11, %c0_12] : memref<8x256xf32, #tpu.memory_space<vmem>>, vector<8x256xf32>
      tpu.vector_store %arg7[%c0_11, %c0_12], %12 {strides = array<i32>} : memref<8x256xf32, #tpu.memory_space<vmem>>, vector<8x256xf32>,
    } else {
    }
    %c0 = arith.constant 0 : index
    %c0_1 = arith.constant 0 : index
    %3 = vector.load %arg7[%c0, %c0_1] : memref<8x256xf32, #tpu.memory_space<vmem>>, vector<8x256xf32>
    %c0_2 = arith.constant 0 : index
    %c0_3 = arith.constant 0 : index
    %4 = vector.load %arg3[%c0_2, %c0_3] : memref<8x256xf32, #tpu.memory_space<vmem>>, vector<8x256xf32>
    %c0_4 = arith.constant 0 : index
    %c0_5 = arith.constant 0 : index
    %5 = vector.load %arg4[%c0_4, %c0_5] : memref<256x256xf32, #tpu.memory_space<vmem>>, vector<256x256xf32>
    %cst = arith.constant dense<0.000000e+00> : vector<8x256xf32>
    %6 = tpu.matmul %4, %5, %cst {dimension_numbers = #tpu.dot_dimension_numbers<[1], [0], [0], [1], [0, 0, 1, 1], [], []>} : vector<8x256xf32>, vector<256x256xf32>, vector<8x256xf32> -> vector<8x256xf32>
    %7 = arith.addf %3, %6 : vector<8x256xf32>
    %c0_6 = arith.constant 0 : index
    %c0_7 = arith.constant 0 : index
    %8 = vector.load %arg7[%c0_6, %c0_7] : memref<8x256xf32, #tpu.memory_space<vmem>>, vector<8x256xf32>
    tpu.vector_store %arg7[%c0_6, %c0_7], %7 {strides = array<i32>} : memref<8x256xf32, #tpu.memory_space<vmem>>, vector<8x256xf32>,
    %c0_i32_8 = arith.constant 0 : i32
    %9 = arith.cmpi eq, %arg2, %c0_i32_8 : i32
    %10 = arith.extui %9 : i1 to i32
    %c0_i32_9 = arith.constant 0 : i32
    %11 = arith.cmpi ne, %10, %c0_i32_9 : i32
    scf.if %11 {
      %c0_10 = arith.constant 0 : index
      %c0_11 = arith.constant 0 : index
      %12 = vector.load %arg7[%c0_10, %c0_11] : memref<8x256xf32, #tpu.memory_space<vmem>>, vector<8x256xf32>
      %c0_12 = arith.constant 0 : index
      %c0_13 = arith.constant 0 : index
      %13 = vector.load %arg5[%c0_12, %c0_13] : memref<1x256xf32, #tpu.memory_space<vmem>>, vector<1x256xf32>
      %14 = vector.broadcast %13 : vector<1x256xf32> to vector<8x256xf32>
      %15 = arith.addf %12, %14 : vector<8x256xf32>
      %cst_14 = arith.constant 0.000000e+00 : f32
      %16 = vector.broadcast %cst_14 : f32 to vector<8x256xf32>
      %17 = arith.cmpf oge, %15, %16 : vector<8x256xf32>
      %cst_15 = arith.constant 2.000000e-01 : f32
      %18 = vector.broadcast %cst_15 : f32 to vector<8x256xf32>
      %19 = arith.mulf %18, %15 : vector<8x256xf32>
      %20 = arith.select %17, %15, %19 : vector<8x256xi1>, vector<8x256xf32>
      %c0_16 = arith.constant 0 : index
      %c0_17 = arith.constant 0 : index
      %21 = vector.load %arg6[%c0_16, %c0_17] : memref<8x256xf32, #tpu.memory_space<vmem>>, vector<8x256xf32>
      tpu.vector_store %arg6[%c0_16, %c0_17], %20 {strides = array<i32>} : memref<8x256xf32, #tpu.memory_space<vmem>>, vector<8x256xf32>,
    } else {
    }
    return
  }
  func.func @transform_0(%arg0: i32, %arg1: i32, %arg2: i32) -> (i32, i32) {
    %c0_i32 = arith.constant 0 : i32
    return %arg0, %arg2 : i32, i32
  }
  func.func @transform_1(%arg0: i32, %arg1: i32, %arg2: i32) -> (i32, i32) {
    %c0_i32 = arith.constant 0 : i32
    return %arg2, %arg1 : i32, i32
  }
  func.func @transform_2(%arg0: i32, %arg1: i32, %arg2: i32) -> (i32, i32) {
    %c0_i32 = arith.constant 0 : i32
    %c0_i32_0 = arith.constant 0 : i32
    return %c0_i32, %arg1 : i32, i32
  }
  func.func @transform_3(%arg0: i32, %arg1: i32, %arg2: i32) -> (i32, i32) {
    %c0_i32 = arith.constant 0 : i32
    return %arg0, %arg1 : i32, i32
  }
}

module attributes {stable_mosaic.version = 11 : i64} {
  func.func @_matmul_bias_act_kernel(%arg0: i32, %arg1: i32, %arg2: i32, %arg3: memref<8x256xf32, #tpu.memory_space<vmem>>, %arg4: memref<256x128xf32, #tpu.memory_space<vmem>>, %arg5: memref<1x128xf32, #tpu.memory_space<vmem>>, %arg6: memref<8x128xf32, #tpu.memory_space<vmem>>, %arg7: memref<8x128xf32, #tpu.memory_space<vmem>>) attributes {dimension_semantics = [#tpu.dimension_semantics<parallel>, #tpu.dimension_semantics<parallel>, #tpu.dimension_semantics<arbitrary>], iteration_bounds = array<i64: 1, 1, 1>, scalar_prefetch = 0 : i64, scratch_operands = 1 : i64, tpu.core_type = #tpu.core_type<tc>, window_params = [{transform_indices = @transform_0, window_bounds = array<i64: 8, 256>}, {transform_indices = @transform_1, window_bounds = array<i64: 256, 128>}, {transform_indices = @transform_2, window_bounds = array<i64: 1, 128>}, {transform_indices = @transform_3, window_bounds = array<i64: 8, 128>}]} {
    %c0_i32 = arith.constant 0 : i32
    %0 = arith.cmpi eq, %arg2, %c0_i32 : i32
    %1 = arith.extui %0 : i1 to i32
    %c0_i32_0 = arith.constant 0 : i32
    %2 = arith.cmpi ne, %1, %c0_i32_0 : i32
    scf.if %2 {
      %cst_10 = arith.constant 0.000000e+00 : f32
      %12 = vector.broadcast %cst_10 : f32 to vector<8x128xf32>
      %c0_11 = arith.constant 0 : index
      %c0_12 = arith.constant 0 : index
      %13 = vector.load %arg7[%c0_11, %c0_12] : memref<8x128xf32, #tpu.memory_space<vmem>>, vector<8x128xf32>
      tpu.vector_store %arg7[%c0_11, %c0_12], %12 {strides = array<i32>} : memref<8x128xf32, #tpu.memory_space<vmem>>, vector<8x128xf32>,
    } else {
    }
    %c0 = arith.constant 0 : index
    %c0_1 = arith.constant 0 : index
    %3 = vector.load %arg7[%c0, %c0_1] : memref<8x128xf32, #tpu.memory_space<vmem>>, vector<8x128xf32>
    %c0_2 = arith.constant 0 : index
    %c0_3 = arith.constant 0 : index
    %4 = vector.load %arg3[%c0_2, %c0_3] : memref<8x256xf32, #tpu.memory_space<vmem>>, vector<8x256xf32>
    %c0_4 = arith.constant 0 : index
    %c0_5 = arith.constant 0 : index
    %5 = vector.load %arg4[%c0_4, %c0_5] : memref<256x128xf32, #tpu.memory_space<vmem>>, vector<256x128xf32>
    %cst = arith.constant dense<0.000000e+00> : vector<8x128xf32>
    %6 = tpu.matmul %4, %5, %cst {dimension_numbers = #tpu.dot_dimension_numbers<[1], [0], [0], [1], [0, 0, 1, 1], [], []>} : vector<8x256xf32>, vector<256x128xf32>, vector<8x128xf32> -> vector<8x128xf32>
    %7 = arith.addf %3, %6 : vector<8x128xf32>
    %c0_6 = arith.constant 0 : index
    %c0_7 = arith.constant 0 : index
    %8 = vector.load %arg7[%c0_6, %c0_7] : memref<8x128xf32, #tpu.memory_space<vmem>>, vector<8x128xf32>
    tpu.vector_store %arg7[%c0_6, %c0_7], %7 {strides = array<i32>} : memref<8x128xf32, #tpu.memory_space<vmem>>, vector<8x128xf32>,
    %c0_i32_8 = arith.constant 0 : i32
    %9 = arith.cmpi eq, %arg2, %c0_i32_8 : i32
    %10 = arith.extui %9 : i1 to i32
    %c0_i32_9 = arith.constant 0 : i32
    %11 = arith.cmpi ne, %10, %c0_i32_9 : i32
    scf.if %11 {
      %c0_10 = arith.constant 0 : index
      %c0_11 = arith.constant 0 : index
      %12 = vector.load %arg7[%c0_10, %c0_11] : memref<8x128xf32, #tpu.memory_space<vmem>>, vector<8x128xf32>
      %c0_12 = arith.constant 0 : index
      %c0_13 = arith.constant 0 : index
      %13 = vector.load %arg5[%c0_12, %c0_13] : memref<1x128xf32, #tpu.memory_space<vmem>>, vector<1x128xf32>
      %14 = vector.broadcast %13 : vector<1x128xf32> to vector<8x128xf32>
      %15 = arith.addf %12, %14 : vector<8x128xf32>
      %c0_14 = arith.constant 0 : index
      %c0_15 = arith.constant 0 : index
      %16 = vector.load %arg6[%c0_14, %c0_15] : memref<8x128xf32, #tpu.memory_space<vmem>>, vector<8x128xf32>
      tpu.vector_store %arg6[%c0_14, %c0_15], %15 {strides = array<i32>} : memref<8x128xf32, #tpu.memory_space<vmem>>, vector<8x128xf32>,
    } else {
    }
    return
  }
  func.func @transform_0(%arg0: i32, %arg1: i32, %arg2: i32) -> (i32, i32) {
    %c0_i32 = arith.constant 0 : i32
    return %arg0, %arg2 : i32, i32
  }
  func.func @transform_1(%arg0: i32, %arg1: i32, %arg2: i32) -> (i32, i32) {
    %c0_i32 = arith.constant 0 : i32
    return %arg2, %arg1 : i32, i32
  }
  func.func @transform_2(%arg0: i32, %arg1: i32, %arg2: i32) -> (i32, i32) {
    %c0_i32 = arith.constant 0 : i32
    %c0_i32_0 = arith.constant 0 : i32
    return %c0_i32, %arg1 : i32, i32
  }
  func.func @transform_3(%arg0: i32, %arg1: i32, %arg2: i32) -> (i32, i32) {
    %c0_i32 = arith.constant 0 : i32
    return %arg0, %arg1 : i32, i32
  }
}

module attributes {stable_mosaic.version = 11 : i64} {
  func.func @_matmul_bias_act_kernel(%arg0: i32, %arg1: i32, %arg2: i32, %arg3: memref<256x128xf32, #tpu.memory_space<vmem>>, %arg4: memref<128x256xf32, #tpu.memory_space<vmem>>, %arg5: memref<1x256xf32, #tpu.memory_space<vmem>>, %arg6: memref<256x256xf32, #tpu.memory_space<vmem>>, %arg7: memref<256x256xf32, #tpu.memory_space<vmem>>) attributes {dimension_semantics = [#tpu.dimension_semantics<parallel>, #tpu.dimension_semantics<parallel>, #tpu.dimension_semantics<arbitrary>], iteration_bounds = array<i64: 2, 1, 1>, scalar_prefetch = 0 : i64, scratch_operands = 1 : i64, tpu.core_type = #tpu.core_type<tc>, window_params = [{transform_indices = @transform_0, window_bounds = array<i64: 256, 128>}, {transform_indices = @transform_1, window_bounds = array<i64: 128, 256>}, {transform_indices = @transform_2, window_bounds = array<i64: 1, 256>}, {transform_indices = @transform_3, window_bounds = array<i64: 256, 256>}]} {
    %c0_i32 = arith.constant 0 : i32
    %0 = arith.cmpi eq, %arg2, %c0_i32 : i32
    %1 = arith.extui %0 : i1 to i32
    %c0_i32_0 = arith.constant 0 : i32
    %2 = arith.cmpi ne, %1, %c0_i32_0 : i32
    scf.if %2 {
      %cst_10 = arith.constant 0.000000e+00 : f32
      %12 = vector.broadcast %cst_10 : f32 to vector<256x256xf32>
      %c0_11 = arith.constant 0 : index
      %c0_12 = arith.constant 0 : index
      %13 = vector.load %arg7[%c0_11, %c0_12] : memref<256x256xf32, #tpu.memory_space<vmem>>, vector<256x256xf32>
      tpu.vector_store %arg7[%c0_11, %c0_12], %12 {strides = array<i32>} : memref<256x256xf32, #tpu.memory_space<vmem>>, vector<256x256xf32>,
    } else {
    }
    %c0 = arith.constant 0 : index
    %c0_1 = arith.constant 0 : index
    %3 = vector.load %arg7[%c0, %c0_1] : memref<256x256xf32, #tpu.memory_space<vmem>>, vector<256x256xf32>
    %c0_2 = arith.constant 0 : index
    %c0_3 = arith.constant 0 : index
    %4 = vector.load %arg3[%c0_2, %c0_3] : memref<256x128xf32, #tpu.memory_space<vmem>>, vector<256x128xf32>
    %c0_4 = arith.constant 0 : index
    %c0_5 = arith.constant 0 : index
    %5 = vector.load %arg4[%c0_4, %c0_5] : memref<128x256xf32, #tpu.memory_space<vmem>>, vector<128x256xf32>
    %cst = arith.constant dense<0.000000e+00> : vector<256x256xf32>
    %6 = tpu.matmul %4, %5, %cst {dimension_numbers = #tpu.dot_dimension_numbers<[1], [0], [0], [1], [0, 0, 1, 1], [], []>} : vector<256x128xf32>, vector<128x256xf32>, vector<256x256xf32> -> vector<256x256xf32>
    %7 = arith.addf %3, %6 : vector<256x256xf32>
    %c0_6 = arith.constant 0 : index
    %c0_7 = arith.constant 0 : index
    %8 = vector.load %arg7[%c0_6, %c0_7] : memref<256x256xf32, #tpu.memory_space<vmem>>, vector<256x256xf32>
    tpu.vector_store %arg7[%c0_6, %c0_7], %7 {strides = array<i32>} : memref<256x256xf32, #tpu.memory_space<vmem>>, vector<256x256xf32>,
    %c0_i32_8 = arith.constant 0 : i32
    %9 = arith.cmpi eq, %arg2, %c0_i32_8 : i32
    %10 = arith.extui %9 : i1 to i32
    %c0_i32_9 = arith.constant 0 : i32
    %11 = arith.cmpi ne, %10, %c0_i32_9 : i32
    scf.if %11 {
      %c0_10 = arith.constant 0 : index
      %c0_11 = arith.constant 0 : index
      %12 = vector.load %arg7[%c0_10, %c0_11] : memref<256x256xf32, #tpu.memory_space<vmem>>, vector<256x256xf32>
      %c0_12 = arith.constant 0 : index
      %c0_13 = arith.constant 0 : index
      %13 = vector.load %arg5[%c0_12, %c0_13] : memref<1x256xf32, #tpu.memory_space<vmem>>, vector<1x256xf32>
      %14 = vector.broadcast %13 : vector<1x256xf32> to vector<256x256xf32>
      %15 = arith.addf %12, %14 : vector<256x256xf32>
      %cst_14 = arith.constant 0.000000e+00 : f32
      %16 = vector.broadcast %cst_14 : f32 to vector<256x256xf32>
      %17 = arith.maximumf %15, %16 : vector<256x256xf32>
      %c0_15 = arith.constant 0 : index
      %c0_16 = arith.constant 0 : index
      %18 = vector.load %arg6[%c0_15, %c0_16] : memref<256x256xf32, #tpu.memory_space<vmem>>, vector<256x256xf32>
      tpu.vector_store %arg6[%c0_15, %c0_16], %17 {strides = array<i32>} : memref<256x256xf32, #tpu.memory_space<vmem>>, vector<256x256xf32>,
    } else {
    }
    return
  }
  func.func @transform_0(%arg0: i32, %arg1: i32, %arg2: i32) -> (i32, i32) {
    %c0_i32 = arith.constant 0 : i32
    return %arg0, %arg2 : i32, i32
  }
  func.func @transform_1(%arg0: i32, %arg1: i32, %arg2: i32) -> (i32, i32) {
    %c0_i32 = arith.constant 0 : i32
    return %arg2, %arg1 : i32, i32
  }
  func.func @transform_2(%arg0: i32, %arg1: i32, %arg2: i32) -> (i32, i32) {
    %c0_i32 = arith.constant 0 : i32
    %c0_i32_0 = arith.constant 0 : i32
    return %c0_i32, %arg1 : i32, i32
  }
  func.func @transform_3(%arg0: i32, %arg1: i32, %arg2: i32) -> (i32, i32) {
    %c0_i32 = arith.constant 0 : i32
    return %arg0, %arg1 : i32, i32
  }
}

module attributes {stable_mosaic.version = 11 : i64} {
  func.func @_matmul_bias_act_kernel(%arg0: i32, %arg1: i32, %arg2: i32, %arg3: memref<104x1024xf32, #tpu.memory_space<vmem>>, %arg4: memref<1024x256xf32, #tpu.memory_space<vmem>>, %arg5: memref<1x256xf32, #tpu.memory_space<vmem>>, %arg6: memref<104x256xf32, #tpu.memory_space<vmem>>, %arg7: memref<104x256xf32, #tpu.memory_space<vmem>>) attributes {dimension_semantics = [#tpu.dimension_semantics<parallel>, #tpu.dimension_semantics<parallel>, #tpu.dimension_semantics<arbitrary>], iteration_bounds = array<i64: 1, 1, 3>, scalar_prefetch = 0 : i64, scratch_operands = 1 : i64, tpu.core_type = #tpu.core_type<tc>, window_params = [{transform_indices = @transform_0, window_bounds = array<i64: 104, 1024>}, {transform_indices = @transform_1, window_bounds = array<i64: 1024, 256>}, {transform_indices = @transform_2, window_bounds = array<i64: 1, 256>}, {transform_indices = @transform_3, window_bounds = array<i64: 104, 256>}]} {
    %c0_i32 = arith.constant 0 : i32
    %0 = arith.cmpi eq, %arg2, %c0_i32 : i32
    %1 = arith.extui %0 : i1 to i32
    %c0_i32_0 = arith.constant 0 : i32
    %2 = arith.cmpi ne, %1, %c0_i32_0 : i32
    scf.if %2 {
      %cst_9 = arith.constant 0.000000e+00 : f32
      %12 = vector.broadcast %cst_9 : f32 to vector<104x256xf32>
      %c0_10 = arith.constant 0 : index
      %c0_11 = arith.constant 0 : index
      %13 = vector.load %arg7[%c0_10, %c0_11] : memref<104x256xf32, #tpu.memory_space<vmem>>, vector<104x256xf32>
      tpu.vector_store %arg7[%c0_10, %c0_11], %12 {strides = array<i32>} : memref<104x256xf32, #tpu.memory_space<vmem>>, vector<104x256xf32>,
    } else {
    }
    %c0 = arith.constant 0 : index
    %c0_1 = arith.constant 0 : index
    %3 = vector.load %arg7[%c0, %c0_1] : memref<104x256xf32, #tpu.memory_space<vmem>>, vector<104x256xf32>
    %c0_2 = arith.constant 0 : index
    %c0_3 = arith.constant 0 : index
    %4 = vector.load %arg3[%c0_2, %c0_3] : memref<104x1024xf32, #tpu.memory_space<vmem>>, vector<104x1024xf32>
    %c0_4 = arith.constant 0 : index
    %c0_5 = arith.constant 0 : index
    %5 = vector.load %arg4[%c0_4, %c0_5] : memref<1024x256xf32, #tpu.memory_space<vmem>>, vector<1024x256xf32>
    %cst = arith.constant dense<0.000000e+00> : vector<104x256xf32>
    %6 = tpu.matmul %4, %5, %cst {dimension_numbers = #tpu.dot_dimension_numbers<[1], [0], [0], [1], [0, 0, 1, 1], [], []>} : vector<104x1024xf32>, vector<1024x256xf32>, vector<104x256xf32> -> vector<104x256xf32>
    %7 = arith.addf %3, %6 : vector<104x256xf32>
    %c0_6 = arith.constant 0 : index
    %c0_7 = arith.constant 0 : index
    %8 = vector.load %arg7[%c0_6, %c0_7] : memref<104x256xf32, #tpu.memory_space<vmem>>, vector<104x256xf32>
    tpu.vector_store %arg7[%c0_6, %c0_7], %7 {strides = array<i32>} : memref<104x256xf32, #tpu.memory_space<vmem>>, vector<104x256xf32>,
    %c2_i32 = arith.constant 2 : i32
    %9 = arith.cmpi eq, %arg2, %c2_i32 : i32
    %10 = arith.extui %9 : i1 to i32
    %c0_i32_8 = arith.constant 0 : i32
    %11 = arith.cmpi ne, %10, %c0_i32_8 : i32
    scf.if %11 {
      %c0_9 = arith.constant 0 : index
      %c0_10 = arith.constant 0 : index
      %12 = vector.load %arg7[%c0_9, %c0_10] : memref<104x256xf32, #tpu.memory_space<vmem>>, vector<104x256xf32>
      %c0_11 = arith.constant 0 : index
      %c0_12 = arith.constant 0 : index
      %13 = vector.load %arg5[%c0_11, %c0_12] : memref<1x256xf32, #tpu.memory_space<vmem>>, vector<1x256xf32>
      %14 = vector.broadcast %13 : vector<1x256xf32> to vector<104x256xf32>
      %15 = arith.addf %12, %14 : vector<104x256xf32>
      %cst_13 = arith.constant 0.000000e+00 : f32
      %16 = vector.broadcast %cst_13 : f32 to vector<104x256xf32>
      %17 = arith.maximumf %15, %16 : vector<104x256xf32>
      %c0_14 = arith.constant 0 : index
      %c0_15 = arith.constant 0 : index
      %18 = vector.load %arg6[%c0_14, %c0_15] : memref<104x256xf32, #tpu.memory_space<vmem>>, vector<104x256xf32>
      tpu.vector_store %arg6[%c0_14, %c0_15], %17 {strides = array<i32>} : memref<104x256xf32, #tpu.memory_space<vmem>>, vector<104x256xf32>,
    } else {
    }
    return
  }
  func.func @transform_0(%arg0: i32, %arg1: i32, %arg2: i32) -> (i32, i32) {
    %c0_i32 = arith.constant 0 : i32
    return %arg0, %arg2 : i32, i32
  }
  func.func @transform_1(%arg0: i32, %arg1: i32, %arg2: i32) -> (i32, i32) {
    %c0_i32 = arith.constant 0 : i32
    return %arg2, %arg1 : i32, i32
  }
  func.func @transform_2(%arg0: i32, %arg1: i32, %arg2: i32) -> (i32, i32) {
    %c0_i32 = arith.constant 0 : i32
    %c0_i32_0 = arith.constant 0 : i32
    return %c0_i32, %arg1 : i32, i32
  }
  func.func @transform_3(%arg0: i32, %arg1: i32, %arg2: i32) -> (i32, i32) {
    %c0_i32 = arith.constant 0 : i32
    return %arg0, %arg1 : i32, i32
  }
}

module attributes {stable_mosaic.version = 11 : i64} {
  func.func @_matmul_bias_act_kernel(%arg0: i32, %arg1: i32, %arg2: i32, %arg3: memref<32x1024xf32, #tpu.memory_space<vmem>>, %arg4: memref<1024x256xf32, #tpu.memory_space<vmem>>, %arg5: memref<1x256xf32, #tpu.memory_space<vmem>>, %arg6: memref<32x256xf32, #tpu.memory_space<vmem>>, %arg7: memref<32x256xf32, #tpu.memory_space<vmem>>) attributes {dimension_semantics = [#tpu.dimension_semantics<parallel>, #tpu.dimension_semantics<parallel>, #tpu.dimension_semantics<arbitrary>], iteration_bounds = array<i64: 1, 1, 3>, scalar_prefetch = 0 : i64, scratch_operands = 1 : i64, tpu.core_type = #tpu.core_type<tc>, window_params = [{transform_indices = @transform_0, window_bounds = array<i64: 32, 1024>}, {transform_indices = @transform_1, window_bounds = array<i64: 1024, 256>}, {transform_indices = @transform_2, window_bounds = array<i64: 1, 256>}, {transform_indices = @transform_3, window_bounds = array<i64: 32, 256>}]} {
    %c0_i32 = arith.constant 0 : i32
    %0 = arith.cmpi eq, %arg2, %c0_i32 : i32
    %1 = arith.extui %0 : i1 to i32
    %c0_i32_0 = arith.constant 0 : i32
    %2 = arith.cmpi ne, %1, %c0_i32_0 : i32
    scf.if %2 {
      %cst_9 = arith.constant 0.000000e+00 : f32
      %12 = vector.broadcast %cst_9 : f32 to vector<32x256xf32>
      %c0_10 = arith.constant 0 : index
      %c0_11 = arith.constant 0 : index
      %13 = vector.load %arg7[%c0_10, %c0_11] : memref<32x256xf32, #tpu.memory_space<vmem>>, vector<32x256xf32>
      tpu.vector_store %arg7[%c0_10, %c0_11], %12 {strides = array<i32>} : memref<32x256xf32, #tpu.memory_space<vmem>>, vector<32x256xf32>,
    } else {
    }
    %c0 = arith.constant 0 : index
    %c0_1 = arith.constant 0 : index
    %3 = vector.load %arg7[%c0, %c0_1] : memref<32x256xf32, #tpu.memory_space<vmem>>, vector<32x256xf32>
    %c0_2 = arith.constant 0 : index
    %c0_3 = arith.constant 0 : index
    %4 = vector.load %arg3[%c0_2, %c0_3] : memref<32x1024xf32, #tpu.memory_space<vmem>>, vector<32x1024xf32>
    %c0_4 = arith.constant 0 : index
    %c0_5 = arith.constant 0 : index
    %5 = vector.load %arg4[%c0_4, %c0_5] : memref<1024x256xf32, #tpu.memory_space<vmem>>, vector<1024x256xf32>
    %cst = arith.constant dense<0.000000e+00> : vector<32x256xf32>
    %6 = tpu.matmul %4, %5, %cst {dimension_numbers = #tpu.dot_dimension_numbers<[1], [0], [0], [1], [0, 0, 1, 1], [], []>} : vector<32x1024xf32>, vector<1024x256xf32>, vector<32x256xf32> -> vector<32x256xf32>
    %7 = arith.addf %3, %6 : vector<32x256xf32>
    %c0_6 = arith.constant 0 : index
    %c0_7 = arith.constant 0 : index
    %8 = vector.load %arg7[%c0_6, %c0_7] : memref<32x256xf32, #tpu.memory_space<vmem>>, vector<32x256xf32>
    tpu.vector_store %arg7[%c0_6, %c0_7], %7 {strides = array<i32>} : memref<32x256xf32, #tpu.memory_space<vmem>>, vector<32x256xf32>,
    %c2_i32 = arith.constant 2 : i32
    %9 = arith.cmpi eq, %arg2, %c2_i32 : i32
    %10 = arith.extui %9 : i1 to i32
    %c0_i32_8 = arith.constant 0 : i32
    %11 = arith.cmpi ne, %10, %c0_i32_8 : i32
    scf.if %11 {
      %c0_9 = arith.constant 0 : index
      %c0_10 = arith.constant 0 : index
      %12 = vector.load %arg7[%c0_9, %c0_10] : memref<32x256xf32, #tpu.memory_space<vmem>>, vector<32x256xf32>
      %c0_11 = arith.constant 0 : index
      %c0_12 = arith.constant 0 : index
      %13 = vector.load %arg5[%c0_11, %c0_12] : memref<1x256xf32, #tpu.memory_space<vmem>>, vector<1x256xf32>
      %14 = vector.broadcast %13 : vector<1x256xf32> to vector<32x256xf32>
      %15 = arith.addf %12, %14 : vector<32x256xf32>
      %cst_13 = arith.constant 0.000000e+00 : f32
      %16 = vector.broadcast %cst_13 : f32 to vector<32x256xf32>
      %17 = arith.maximumf %15, %16 : vector<32x256xf32>
      %c0_14 = arith.constant 0 : index
      %c0_15 = arith.constant 0 : index
      %18 = vector.load %arg6[%c0_14, %c0_15] : memref<32x256xf32, #tpu.memory_space<vmem>>, vector<32x256xf32>
      tpu.vector_store %arg6[%c0_14, %c0_15], %17 {strides = array<i32>} : memref<32x256xf32, #tpu.memory_space<vmem>>, vector<32x256xf32>,
    } else {
    }
    return
  }
  func.func @transform_0(%arg0: i32, %arg1: i32, %arg2: i32) -> (i32, i32) {
    %c0_i32 = arith.constant 0 : i32
    return %arg0, %arg2 : i32, i32
  }
  func.func @transform_1(%arg0: i32, %arg1: i32, %arg2: i32) -> (i32, i32) {
    %c0_i32 = arith.constant 0 : i32
    return %arg2, %arg1 : i32, i32
  }
  func.func @transform_2(%arg0: i32, %arg1: i32, %arg2: i32) -> (i32, i32) {
    %c0_i32 = arith.constant 0 : i32
    %c0_i32_0 = arith.constant 0 : i32
    return %c0_i32, %arg1 : i32, i32
  }
  func.func @transform_3(%arg0: i32, %arg1: i32, %arg2: i32) -> (i32, i32) {
    %c0_i32 = arith.constant 0 : i32
    return %arg0, %arg1 : i32, i32
  }
}

module attributes {stable_mosaic.version = 11 : i64} {
  func.func @_matmul_bias_act_kernel(%arg0: i32, %arg1: i32, %arg2: i32, %arg3: memref<8x1024xf32, #tpu.memory_space<vmem>>, %arg4: memref<1024x128xf32, #tpu.memory_space<vmem>>, %arg5: memref<1x128xf32, #tpu.memory_space<vmem>>, %arg6: memref<8x128xf32, #tpu.memory_space<vmem>>, %arg7: memref<8x128xf32, #tpu.memory_space<vmem>>) attributes {dimension_semantics = [#tpu.dimension_semantics<parallel>, #tpu.dimension_semantics<parallel>, #tpu.dimension_semantics<arbitrary>], iteration_bounds = array<i64: 1, 1, 4>, scalar_prefetch = 0 : i64, scratch_operands = 1 : i64, tpu.core_type = #tpu.core_type<tc>, window_params = [{transform_indices = @transform_0, window_bounds = array<i64: 8, 1024>}, {transform_indices = @transform_1, window_bounds = array<i64: 1024, 128>}, {transform_indices = @transform_2, window_bounds = array<i64: 1, 128>}, {transform_indices = @transform_3, window_bounds = array<i64: 8, 128>}]} {
    %c0_i32 = arith.constant 0 : i32
    %0 = arith.cmpi eq, %arg2, %c0_i32 : i32
    %1 = arith.extui %0 : i1 to i32
    %c0_i32_0 = arith.constant 0 : i32
    %2 = arith.cmpi ne, %1, %c0_i32_0 : i32
    scf.if %2 {
      %cst_9 = arith.constant 0.000000e+00 : f32
      %12 = vector.broadcast %cst_9 : f32 to vector<8x128xf32>
      %c0_10 = arith.constant 0 : index
      %c0_11 = arith.constant 0 : index
      %13 = vector.load %arg7[%c0_10, %c0_11] : memref<8x128xf32, #tpu.memory_space<vmem>>, vector<8x128xf32>
      tpu.vector_store %arg7[%c0_10, %c0_11], %12 {strides = array<i32>} : memref<8x128xf32, #tpu.memory_space<vmem>>, vector<8x128xf32>,
    } else {
    }
    %c0 = arith.constant 0 : index
    %c0_1 = arith.constant 0 : index
    %3 = vector.load %arg7[%c0, %c0_1] : memref<8x128xf32, #tpu.memory_space<vmem>>, vector<8x128xf32>
    %c0_2 = arith.constant 0 : index
    %c0_3 = arith.constant 0 : index
    %4 = vector.load %arg3[%c0_2, %c0_3] : memref<8x1024xf32, #tpu.memory_space<vmem>>, vector<8x1024xf32>
    %c0_4 = arith.constant 0 : index
    %c0_5 = arith.constant 0 : index
    %5 = vector.load %arg4[%c0_4, %c0_5] : memref<1024x128xf32, #tpu.memory_space<vmem>>, vector<1024x128xf32>
    %cst = arith.constant dense<0.000000e+00> : vector<8x128xf32>
    %6 = tpu.matmul %4, %5, %cst {dimension_numbers = #tpu.dot_dimension_numbers<[1], [0], [0], [1], [0, 0, 1, 1], [], []>} : vector<8x1024xf32>, vector<1024x128xf32>, vector<8x128xf32> -> vector<8x128xf32>
    %7 = arith.addf %3, %6 : vector<8x128xf32>
    %c0_6 = arith.constant 0 : index
    %c0_7 = arith.constant 0 : index
    %8 = vector.load %arg7[%c0_6, %c0_7] : memref<8x128xf32, #tpu.memory_space<vmem>>, vector<8x128xf32>
    tpu.vector_store %arg7[%c0_6, %c0_7], %7 {strides = array<i32>} : memref<8x128xf32, #tpu.memory_space<vmem>>, vector<8x128xf32>,
    %c3_i32 = arith.constant 3 : i32
    %9 = arith.cmpi eq, %arg2, %c3_i32 : i32
    %10 = arith.extui %9 : i1 to i32
    %c0_i32_8 = arith.constant 0 : i32
    %11 = arith.cmpi ne, %10, %c0_i32_8 : i32
    scf.if %11 {
      %c0_9 = arith.constant 0 : index
      %c0_10 = arith.constant 0 : index
      %12 = vector.load %arg7[%c0_9, %c0_10] : memref<8x128xf32, #tpu.memory_space<vmem>>, vector<8x128xf32>
      %c0_11 = arith.constant 0 : index
      %c0_12 = arith.constant 0 : index
      %13 = vector.load %arg5[%c0_11, %c0_12] : memref<1x128xf32, #tpu.memory_space<vmem>>, vector<1x128xf32>
      %14 = vector.broadcast %13 : vector<1x128xf32> to vector<8x128xf32>
      %15 = arith.addf %12, %14 : vector<8x128xf32>
      %cst_13 = arith.constant 0.000000e+00 : f32
      %16 = vector.broadcast %cst_13 : f32 to vector<8x128xf32>
      %17 = arith.maximumf %15, %16 : vector<8x128xf32>
      %c0_14 = arith.constant 0 : index
      %c0_15 = arith.constant 0 : index
      %18 = vector.load %arg6[%c0_14, %c0_15] : memref<8x128xf32, #tpu.memory_space<vmem>>, vector<8x128xf32>
      tpu.vector_store %arg6[%c0_14, %c0_15], %17 {strides = array<i32>} : memref<8x128xf32, #tpu.memory_space<vmem>>, vector<8x128xf32>,
    } else {
    }
    return
  }
  func.func @transform_0(%arg0: i32, %arg1: i32, %arg2: i32) -> (i32, i32) {
    %c0_i32 = arith.constant 0 : i32
    return %arg0, %arg2 : i32, i32
  }
  func.func @transform_1(%arg0: i32, %arg1: i32, %arg2: i32) -> (i32, i32) {
    %c0_i32 = arith.constant 0 : i32
    return %arg2, %arg1 : i32, i32
  }
  func.func @transform_2(%arg0: i32, %arg1: i32, %arg2: i32) -> (i32, i32) {
    %c0_i32 = arith.constant 0 : i32
    %c0_i32_0 = arith.constant 0 : i32
    return %c0_i32, %arg1 : i32, i32
  }
  func.func @transform_3(%arg0: i32, %arg1: i32, %arg2: i32) -> (i32, i32) {
    %c0_i32 = arith.constant 0 : i32
    return %arg0, %arg1 : i32, i32
  }
}

module attributes {stable_mosaic.version = 11 : i64} {
  func.func @_matmul_bias_act_kernel(%arg0: i32, %arg1: i32, %arg2: i32, %arg3: memref<8x128xf32, #tpu.memory_space<vmem>>, %arg4: memref<128x256xf32, #tpu.memory_space<vmem>>, %arg5: memref<1x256xf32, #tpu.memory_space<vmem>>, %arg6: memref<8x256xf32, #tpu.memory_space<vmem>>, %arg7: memref<8x256xf32, #tpu.memory_space<vmem>>) attributes {dimension_semantics = [#tpu.dimension_semantics<parallel>, #tpu.dimension_semantics<parallel>, #tpu.dimension_semantics<arbitrary>], iteration_bounds = array<i64: 1, 1, 1>, scalar_prefetch = 0 : i64, scratch_operands = 1 : i64, tpu.core_type = #tpu.core_type<tc>, window_params = [{transform_indices = @transform_0, window_bounds = array<i64: 8, 128>}, {transform_indices = @transform_1, window_bounds = array<i64: 128, 256>}, {transform_indices = @transform_2, window_bounds = array<i64: 1, 256>}, {transform_indices = @transform_3, window_bounds = array<i64: 8, 256>}]} {
    %c0_i32 = arith.constant 0 : i32
    %0 = arith.cmpi eq, %arg2, %c0_i32 : i32
    %1 = arith.extui %0 : i1 to i32
    %c0_i32_0 = arith.constant 0 : i32
    %2 = arith.cmpi ne, %1, %c0_i32_0 : i32
    scf.if %2 {
      %cst_10 = arith.constant 0.000000e+00 : f32
      %12 = vector.broadcast %cst_10 : f32 to vector<8x256xf32>
      %c0_11 = arith.constant 0 : index
      %c0_12 = arith.constant 0 : index
      %13 = vector.load %arg7[%c0_11, %c0_12] : memref<8x256xf32, #tpu.memory_space<vmem>>, vector<8x256xf32>
      tpu.vector_store %arg7[%c0_11, %c0_12], %12 {strides = array<i32>} : memref<8x256xf32, #tpu.memory_space<vmem>>, vector<8x256xf32>,
    } else {
    }
    %c0 = arith.constant 0 : index
    %c0_1 = arith.constant 0 : index
    %3 = vector.load %arg7[%c0, %c0_1] : memref<8x256xf32, #tpu.memory_space<vmem>>, vector<8x256xf32>
    %c0_2 = arith.constant 0 : index
    %c0_3 = arith.constant 0 : index
    %4 = vector.load %arg3[%c0_2, %c0_3] : memref<8x128xf32, #tpu.memory_space<vmem>>, vector<8x128xf32>
    %c0_4 = arith.constant 0 : index
    %c0_5 = arith.constant 0 : index
    %5 = vector.load %arg4[%c0_4, %c0_5] : memref<128x256xf32, #tpu.memory_space<vmem>>, vector<128x256xf32>
    %cst = arith.constant dense<0.000000e+00> : vector<8x256xf32>
    %6 = tpu.matmul %4, %5, %cst {dimension_numbers = #tpu.dot_dimension_numbers<[1], [0], [0], [1], [0, 0, 1, 1], [], []>} : vector<8x128xf32>, vector<128x256xf32>, vector<8x256xf32> -> vector<8x256xf32>
    %7 = arith.addf %3, %6 : vector<8x256xf32>
    %c0_6 = arith.constant 0 : index
    %c0_7 = arith.constant 0 : index
    %8 = vector.load %arg7[%c0_6, %c0_7] : memref<8x256xf32, #tpu.memory_space<vmem>>, vector<8x256xf32>
    tpu.vector_store %arg7[%c0_6, %c0_7], %7 {strides = array<i32>} : memref<8x256xf32, #tpu.memory_space<vmem>>, vector<8x256xf32>,
    %c0_i32_8 = arith.constant 0 : i32
    %9 = arith.cmpi eq, %arg2, %c0_i32_8 : i32
    %10 = arith.extui %9 : i1 to i32
    %c0_i32_9 = arith.constant 0 : i32
    %11 = arith.cmpi ne, %10, %c0_i32_9 : i32
    scf.if %11 {
      %c0_10 = arith.constant 0 : index
      %c0_11 = arith.constant 0 : index
      %12 = vector.load %arg7[%c0_10, %c0_11] : memref<8x256xf32, #tpu.memory_space<vmem>>, vector<8x256xf32>
      %c0_12 = arith.constant 0 : index
      %c0_13 = arith.constant 0 : index
      %13 = vector.load %arg5[%c0_12, %c0_13] : memref<1x256xf32, #tpu.memory_space<vmem>>, vector<1x256xf32>
      %14 = vector.broadcast %13 : vector<1x256xf32> to vector<8x256xf32>
      %15 = arith.addf %12, %14 : vector<8x256xf32>
      %cst_14 = arith.constant 0.000000e+00 : f32
      %16 = vector.broadcast %cst_14 : f32 to vector<8x256xf32>
      %17 = arith.maximumf %15, %16 : vector<8x256xf32>
      %c0_15 = arith.constant 0 : index
      %c0_16 = arith.constant 0 : index
      %18 = vector.load %arg6[%c0_15, %c0_16] : memref<8x256xf32, #tpu.memory_space<vmem>>, vector<8x256xf32>
      tpu.vector_store %arg6[%c0_15, %c0_16], %17 {strides = array<i32>} : memref<8x256xf32, #tpu.memory_space<vmem>>, vector<8x256xf32>,
    } else {
    }
    return
  }
  func.func @transform_0(%arg0: i32, %arg1: i32, %arg2: i32) -> (i32, i32) {
    %c0_i32 = arith.constant 0 : i32
    return %arg0, %arg2 : i32, i32
  }
  func.func @transform_1(%arg0: i32, %arg1: i32, %arg2: i32) -> (i32, i32) {
    %c0_i32 = arith.constant 0 : i32
    return %arg2, %arg1 : i32, i32
  }
  func.func @transform_2(%arg0: i32, %arg1: i32, %arg2: i32) -> (i32, i32) {
    %c0_i32 = arith.constant 0 : i32
    %c0_i32_0 = arith.constant 0 : i32
    return %c0_i32, %arg1 : i32, i32
  }
  func.func @transform_3(%arg0: i32, %arg1: i32, %arg2: i32) -> (i32, i32) {
    %c0_i32 = arith.constant 0 : i32
    return %arg0, %arg1 : i32, i32
  }
}

module attributes {stable_mosaic.version = 11 : i64} {
  func.func @_matmul_bias_act_kernel(%arg0: i32, %arg1: i32, %arg2: i32, %arg3: memref<8x256xf32, #tpu.memory_space<vmem>>, %arg4: memref<256x256xf32, #tpu.memory_space<vmem>>, %arg5: memref<1x256xf32, #tpu.memory_space<vmem>>, %arg6: memref<8x256xf32, #tpu.memory_space<vmem>>, %arg7: memref<8x256xf32, #tpu.memory_space<vmem>>) attributes {dimension_semantics = [#tpu.dimension_semantics<parallel>, #tpu.dimension_semantics<parallel>, #tpu.dimension_semantics<arbitrary>], iteration_bounds = array<i64: 1, 1, 1>, scalar_prefetch = 0 : i64, scratch_operands = 1 : i64, tpu.core_type = #tpu.core_type<tc>, window_params = [{transform_indices = @transform_0, window_bounds = array<i64: 8, 256>}, {transform_indices = @transform_1, window_bounds = array<i64: 256, 256>}, {transform_indices = @transform_2, window_bounds = array<i64: 1, 256>}, {transform_indices = @transform_3, window_bounds = array<i64: 8, 256>}]} {
    %c0_i32 = arith.constant 0 : i32
    %0 = arith.cmpi eq, %arg2, %c0_i32 : i32
    %1 = arith.extui %0 : i1 to i32
    %c0_i32_0 = arith.constant 0 : i32
    %2 = arith.cmpi ne, %1, %c0_i32_0 : i32
    scf.if %2 {
      %cst_10 = arith.constant 0.000000e+00 : f32
      %12 = vector.broadcast %cst_10 : f32 to vector<8x256xf32>
      %c0_11 = arith.constant 0 : index
      %c0_12 = arith.constant 0 : index
      %13 = vector.load %arg7[%c0_11, %c0_12] : memref<8x256xf32, #tpu.memory_space<vmem>>, vector<8x256xf32>
      tpu.vector_store %arg7[%c0_11, %c0_12], %12 {strides = array<i32>} : memref<8x256xf32, #tpu.memory_space<vmem>>, vector<8x256xf32>,
    } else {
    }
    %c0 = arith.constant 0 : index
    %c0_1 = arith.constant 0 : index
    %3 = vector.load %arg7[%c0, %c0_1] : memref<8x256xf32, #tpu.memory_space<vmem>>, vector<8x256xf32>
    %c0_2 = arith.constant 0 : index
    %c0_3 = arith.constant 0 : index
    %4 = vector.load %arg3[%c0_2, %c0_3] : memref<8x256xf32, #tpu.memory_space<vmem>>, vector<8x256xf32>
    %c0_4 = arith.constant 0 : index
    %c0_5 = arith.constant 0 : index
    %5 = vector.load %arg4[%c0_4, %c0_5] : memref<256x256xf32, #tpu.memory_space<vmem>>, vector<256x256xf32>
    %cst = arith.constant dense<0.000000e+00> : vector<8x256xf32>
    %6 = tpu.matmul %4, %5, %cst {dimension_numbers = #tpu.dot_dimension_numbers<[1], [0], [0], [1], [0, 0, 1, 1], [], []>} : vector<8x256xf32>, vector<256x256xf32>, vector<8x256xf32> -> vector<8x256xf32>
    %7 = arith.addf %3, %6 : vector<8x256xf32>
    %c0_6 = arith.constant 0 : index
    %c0_7 = arith.constant 0 : index
    %8 = vector.load %arg7[%c0_6, %c0_7] : memref<8x256xf32, #tpu.memory_space<vmem>>, vector<8x256xf32>
    tpu.vector_store %arg7[%c0_6, %c0_7], %7 {strides = array<i32>} : memref<8x256xf32, #tpu.memory_space<vmem>>, vector<8x256xf32>,
    %c0_i32_8 = arith.constant 0 : i32
    %9 = arith.cmpi eq, %arg2, %c0_i32_8 : i32
    %10 = arith.extui %9 : i1 to i32
    %c0_i32_9 = arith.constant 0 : i32
    %11 = arith.cmpi ne, %10, %c0_i32_9 : i32
    scf.if %11 {
      %c0_10 = arith.constant 0 : index
      %c0_11 = arith.constant 0 : index
      %12 = vector.load %arg7[%c0_10, %c0_11] : memref<8x256xf32, #tpu.memory_space<vmem>>, vector<8x256xf32>
      %c0_12 = arith.constant 0 : index
      %c0_13 = arith.constant 0 : index
      %13 = vector.load %arg5[%c0_12, %c0_13] : memref<1x256xf32, #tpu.memory_space<vmem>>, vector<1x256xf32>
      %14 = vector.broadcast %13 : vector<1x256xf32> to vector<8x256xf32>
      %15 = arith.addf %12, %14 : vector<8x256xf32>
      %cst_14 = arith.constant 0.000000e+00 : f32
      %16 = vector.broadcast %cst_14 : f32 to vector<8x256xf32>
      %17 = arith.maximumf %15, %16 : vector<8x256xf32>
      %c0_15 = arith.constant 0 : index
      %c0_16 = arith.constant 0 : index
      %18 = vector.load %arg6[%c0_15, %c0_16] : memref<8x256xf32, #tpu.memory_space<vmem>>, vector<8x256xf32>
      tpu.vector_store %arg6[%c0_15, %c0_16], %17 {strides = array<i32>} : memref<8x256xf32, #tpu.memory_space<vmem>>, vector<8x256xf32>,
    } else {
    }
    return
  }
  func.func @transform_0(%arg0: i32, %arg1: i32, %arg2: i32) -> (i32, i32) {
    %c0_i32 = arith.constant 0 : i32
    return %arg0, %arg2 : i32, i32
  }
  func.func @transform_1(%arg0: i32, %arg1: i32, %arg2: i32) -> (i32, i32) {
    %c0_i32 = arith.constant 0 : i32
    return %arg2, %arg1 : i32, i32
  }
  func.func @transform_2(%arg0: i32, %arg1: i32, %arg2: i32) -> (i32, i32) {
    %c0_i32 = arith.constant 0 : i32
    %c0_i32_0 = arith.constant 0 : i32
    return %c0_i32, %arg1 : i32, i32
  }
  func.func @transform_3(%arg0: i32, %arg1: i32, %arg2: i32) -> (i32, i32) {
    %c0_i32 = arith.constant 0 : i32
    return %arg0, %arg1 : i32, i32
  }
}

</mosaic_0001>

<bundles_post_ra>
// kernel: adda_forward.11
= control target key start
LH: loop header
LB: loop body
LE: loop exit
PB: predicated region body
PF: predicated region fallthrough
CT: control target
= control target key end

     0   :  { %s485_s1 = inlined_call_operand.vmem [shape: f32[256,256], index: 1, kind: input, shape index: {}]   ;;  %s486_s0 = inlined_call_operand.vmem [shape: f32[8,256], index: 0, kind: input, shape index: {}]   ;;  %s487_s2 = inlined_call_operand.vmem [shape: f32[1,256], index: 2, kind: input, shape index: {}]   ;;  %s488_s3 = inlined_call_operand.vmem [shape: f32[8,256], index: 3, kind: output, shape index: {}]  }
   0x1   :  { %v25_v0 = vld [vmem:[%s485_s1 + $0x8] sm:$0xff]  ;;  %v27_v1 = vld [vmem:[%s485_s1 + $0x18] sm:$0xff]  ;;  %v24_v2 = vld [vmem:[%s485_s1] sm:$0xff] }
   0x2   :  { %v194_v3 = vpack.c.bf16 %v27_v1, %v25_v0  ;;  %v26_v4 = vld [vmem:[%s485_s1 + $0x10] sm:$0xff]  ;;  %v29_v5 = vld [vmem:[%s485_s1 + $0x28] sm:$0xff]  ;;  %v31_v6 = vld [vmem:[%s485_s1 + $0x38] sm:$0xff] }
   0x3   :  { %v196_v7 = vpack.c.bf16 %v26_v4, %v24_v2  ;;  %v198_v8 = vpack.c.bf16 %v31_v6, %v29_v5  ;;  %v28_v9 = vld [vmem:[%s485_s1 + $0x20] sm:$0xff]  ;;  %v30_v10 = vld [vmem:[%s485_s1 + $0x30] sm:$0xff]  ;;  %v33_v11 = vld [vmem:[%s485_s1 + $0x48] sm:$0xff] }
   0x4   :  { %195 = vmatprep.subr.bf16.mxu0 %v194_v3  ;;  %v35_v12 = vld [vmem:[%s485_s1 + $0x58] sm:$0xff]  ;;  %v200_v13 = vpack.c.bf16 %v30_v10, %v28_v9  ;;  %v32_v15 = vld [vmem:[%s485_s1 + $0x40] sm:$0xff]  ;;  %v34_v16 = vld [vmem:[%s485_s1 + $0x50] sm:$0xff] }
   0x5   :  { %197 = vmatpush1.bf16.msra.mxu0 %v196_v7  ;;  %v202_v14 = vpack.c.bf16 %v35_v12, %v33_v11  ;;  %v37_v17 = vld [vmem:[%s485_s1 + $0x68] sm:$0xff]  ;;  %v39_v18 = vld [vmem:[%s485_s1 + $0x78] sm:$0xff]  ;;  %v204_v19 = vpack.c.bf16 %v34_v16, %v32_v15  ;;  %v36_v21 = vld [vmem:[%s485_s1 + $0x60] sm:$0xff] }
   0x6   :  { %199 = vmatprep.subr.bf16.mxu0 %v198_v8  ;;  %v206_v20 = vpack.c.bf16 %v39_v18, %v37_v17  ;;  %v38_v22 = vld [vmem:[%s485_s1 + $0x70] sm:$0xff]  ;;  %v41_v23 = vld [vmem:[%s485_s1 + $0x88] sm:$0xff]  ;;  %v43_v24 = vld [vmem:[%s485_s1 + $0x98] sm:$0xff] }
   0x7   :  { %v208_v25 = vpack.c.bf16 %v38_v22, %v36_v21  ;;  %v210_v26 = vpack.c.bf16 %v43_v24, %v41_v23  ;;  %v40_v27 = vld [vmem:[%s485_s1 + $0x80] sm:$0xff]  ;;  %v42_v28 = vld [vmem:[%s485_s1 + $0x90] sm:$0xff]  ;;  %v45_v29 = vld [vmem:[%s485_s1 + $0xa8] sm:$0xff] }
   0x8   :  { %v47_v30 = vld [vmem:[%s485_s1 + $0xb8] sm:$0xff]  ;;  %v212_v31 = vpack.c.bf16 %v42_v28, %v40_v27  ;;  %v44_v33 = vld [vmem:[%s485_s1 + $0xa0] sm:$0xff]  ;;  %v46_v34 = vld [vmem:[%s485_s1 + $0xb0] sm:$0xff] }
   0x9   :  { %201 = vmatpush1.bf16.msra.mxu0 %v200_v13  ;;  %v214_v32 = vpack.c.bf16 %v47_v30, %v45_v29  ;;  %v49_v35 = vld [vmem:[%s485_s1 + $0xc8] sm:$0xff]  ;;  %v51_v36 = vld [vmem:[%s485_s1 + $0xd8] sm:$0xff]  ;;  %v216_v37 = vpack.c.bf16 %v46_v34, %v44_v33  ;;  %v48_v39 = vld [vmem:[%s485_s1 + $0xc0] sm:$0xff]  ;;  %v170_v34 = vlaneseq }
   0xa   :  { %203 = vmatprep.subr.bf16.mxu0 %v202_v14  ;;  %v218_v38 = vpack.c.bf16 %v51_v36, %v49_v35  ;;  %v50_v40 = vld [vmem:[%s485_s1 + $0xd0] sm:$0xff]  ;;  %v23_v41 = vld [vmem:[%s486_s0 + $0x8] sm:$0xff]  ;;  %v55_v43 = vld [vmem:[%s485_s1 + $0xf8] sm:$0xff] }
   0xb   :  { %v53_v42 = vld [vmem:[%s485_s1 + $0xe8] sm:$0xff]  ;;  %152 = vmatprep.mubr.f32.mxu0 %v23_v41  ;;  %v220_v44 = vpack.c.bf16 %v50_v40, %v48_v39  ;;  %v52_v46 = vld [vmem:[%s485_s1 + $0xe0] sm:$0xff]  ;;  %v54_v47 = vld [vmem:[%s485_s1 + $0xf0] sm:$0xff]  ;;  %v171_v35 = vshrl.u32 %v170_v34, 7 }
   0xc   :  { %v222_v45 = vpack.c.bf16 %v55_v43, %v53_v42  ;;  %v57_v48 = vld [vmem:[%s485_s1 + $0x108] sm:$0xff]  ;;  %v59_v49 = vld [vmem:[%s485_s1 + $0x118] sm:$0xff]  ;;  %v224_v50 = vpack.c.bf16 %v54_v47, %v52_v46  ;;  %v56_v52 = vld [vmem:[%s485_s1 + $0x100] sm:$0xff] }
   0xd   :  { %205 = vmatpush1.bf16.msra.mxu0 %v204_v19  ;;  %v226_v51 = vpack.c.bf16 %v59_v49, %v57_v48  ;;  %v58_v53 = vld [vmem:[%s485_s1 + $0x110] sm:$0xff]  ;;  %v61_v54 = vld [vmem:[%s485_s1 + $0x128] sm:$0xff]  ;;  %v63_v55 = vld [vmem:[%s485_s1 + $0x138] sm:$0xff]  ;;  %v172_v36 = vsub.s32 0, %v171_v35 }
   0xe   :  { %207 = vmatprep.subr.bf16.mxu0 %v206_v20  ;;  %v228_v56 = vpack.c.bf16 %v58_v53, %v56_v52  ;;  %v230_v57 = vpack.c.bf16 %v63_v55, %v61_v54  ;;  %v60_v58 = vld [vmem:[%s485_s1 + $0x120] sm:$0xff]  ;;  %v62_v59 = vld [vmem:[%s485_s1 + $0x130] sm:$0xff]  ;;  %v65_v60 = vld [vmem:[%s485_s1 + $0x148] sm:$0xff] }
   0xf   :  { %v67_v61 = vld [vmem:[%s485_s1 + $0x158] sm:$0xff]  ;;  %v232_v62 = vpack.c.bf16 %v62_v59, %v60_v58  ;;  %v64_v0 = vld [vmem:[%s485_s1 + $0x140] sm:$0xff]  ;;  %v66_v1 = vld [vmem:[%s485_s1 + $0x150] sm:$0xff] }
  0x10   :  { %v234_v63 = vpack.c.bf16 %v67_v61, %v65_v60  ;;  %v69_v2 = vld [vmem:[%s485_s1 + $0x168] sm:$0xff]  ;;  %v71_v3 = vld [vmem:[%s485_s1 + $0x178] sm:$0xff]  ;;  %v236_v4 = vpack.c.bf16 %v66_v1, %v64_v0  ;;  %v68_v6 = vld [vmem:[%s485_s1 + $0x160] sm:$0xff] }
  0x11   :  { %209 = vmatpush1.bf16.msra.mxu0 %v208_v25  ;;  %v238_v5 = vpack.c.bf16 %v71_v3, %v69_v2  ;;  %v70_v7 = vld [vmem:[%s485_s1 + $0x170] sm:$0xff]  ;;  %v73_v8 = vld [vmem:[%s485_s1 + $0x188] sm:$0xff]  ;;  %v75_v9 = vld [vmem:[%s485_s1 + $0x198] sm:$0xff] }
  0x12   :  { %211 = vmatprep.subr.bf16.mxu0 %v210_v26  ;;  %v240_v10 = vpack.c.bf16 %v70_v7, %v68_v6  ;;  %v242_v11 = vpack.c.bf16 %v75_v9, %v73_v8  ;;  %v72_v12 = vld [vmem:[%s485_s1 + $0x180] sm:$0xff]  ;;  %v74_v13 = vld [vmem:[%s485_s1 + $0x190] sm:$0xff]  ;;  %v77_v14 = vld [vmem:[%s485_s1 + $0x1a8] sm:$0xff] }
  0x13   :  { %v79_v15 = vld [vmem:[%s485_s1 + $0x1b8] sm:$0xff]  ;;  %v244_v16 = vpack.c.bf16 %v74_v13, %v72_v12  ;;  %v76_v18 = vld [vmem:[%s485_s1 + $0x1a0] sm:$0xff]  ;;  %v78_v19 = vld [vmem:[%s485_s1 + $0x1b0] sm:$0xff] }
  0x14   :  { %v246_v17 = vpack.c.bf16 %v79_v15, %v77_v14  ;;  %v81_v20 = vld [vmem:[%s485_s1 + $0x1c8] sm:$0xff]  ;;  %v83_v21 = vld [vmem:[%s485_s1 + $0x1d8] sm:$0xff]  ;;  %v248_v22 = vpack.c.bf16 %v78_v19, %v76_v18  ;;  %v80_v24 = vld [vmem:[%s485_s1 + $0x1c0] sm:$0xff] }
  0x15   :  { %213 = vmatpush1.bf16.msra.mxu0 %v212_v31  ;;  %v250_v23 = vpack.c.bf16 %v83_v21, %v81_v20  ;;  %v82_v25 = vld [vmem:[%s485_s1 + $0x1d0] sm:$0xff]  ;;  %v85_v26 = vld [vmem:[%s485_s1 + $0x1e8] sm:$0xff]  ;;  %v87_v27 = vld [vmem:[%s485_s1 + $0x1f8] sm:$0xff] }
  0x16   :  { %215 = vmatprep.subr.bf16.mxu0 %v214_v32  ;;  %v252_v28 = vpack.c.bf16 %v82_v25, %v80_v24  ;;  %v254_v29 = vpack.c.bf16 %v87_v27, %v85_v26  ;;  %v84_v30 = vld [vmem:[%s485_s1 + $0x1e0] sm:$0xff]  ;;  %v86_v31 = vld [vmem:[%s485_s1 + $0x1f0] sm:$0xff] }
  0x17   :  { %v256_v32 = vpack.c.bf16 %v86_v31, %v84_v30  ;;  %v22_v33 = vld [vmem:[%s486_s0] sm:$0xff] }
  0x19   :  { %217 = vmatpush1.bf16.msra.mxu0 %v216_v37  ;;  %v168_v37 = vld [vmem:[%s487_s2] sm:$0x3] }
  0x1a   :  { %219 = vmatprep.subr.bf16.mxu0 %v218_v38  ;;  %v176_v38 = vsub.s32 1, %v171_v35  ;;  %v173_v39 = vrot.slane %v168_v37, %v172_v36 }
  0x1c   :  { %v177_v40 = vrot.slane %v168_v37, %v176_v38 }
  0x1d   :  { %221 = vmatpush1.bf16.msra.mxu0 %v220_v44 }
  0x1e   :  { %223 = vmatprep.subr.bf16.mxu0 %v222_v45 }
  0x21   :  { %225 = vmatpush1.bf16.msra.mxu0 %v224_v50 }
  0x22   :  { %227 = vmatprep.subr.bf16.mxu0 %v226_v51 }
  0x25   :  { %229 = vmatpush1.bf16.msra.mxu0 %v228_v56 }
  0x26   :  { %231 = vmatprep.subr.bf16.mxu0 %v230_v57 }
  0x29   :  { %233 = vmatpush1.bf16.msra.mxu0 %v232_v62 }
  0x2a   :  { %235 = vmatprep.subr.bf16.mxu0 %v234_v63 }
  0x2d   :  { %237 = vmatpush1.bf16.msra.mxu0 %v236_v4 }
  0x2e   :  { %239 = vmatprep.subr.bf16.mxu0 %v238_v5 }
  0x31   :  { %241 = vmatpush1.bf16.msra.mxu0 %v240_v10 }
  0x32   :  { %243 = vmatprep.subr.bf16.mxu0 %v242_v11 }
  0x35   :  { %245 = vmatpush1.bf16.msra.mxu0 %v244_v16 }
  0x36   :  { %247 = vmatprep.subr.bf16.mxu0 %v246_v17 }
  0x39   :  { %249 = vmatpush1.bf16.msra.mxu0 %v248_v22 }
  0x3a   :  { %251 = vmatprep.subr.bf16.mxu0 %v250_v23 }
  0x3d   :  { %253 = vmatpush1.bf16.msra.mxu0 %v252_v28 }
  0x3e   :  { %255 = vmatprep.subr.bf16.mxu0 %v254_v29 }
  0x41   :  { %257 = vmatpush1.bf16.msra.mxu0 %v256_v32 }
  0x44   :  { %153 = vmatmul.mubr.f32.vlgmr.msra.gmra.mrb[0].mxu0 %v22_v33 }
 0x117   :  { %v154_v41 = vpop.f32.mrb[0].mxu0 }
 0x118   :  { %v180_v42 = vadd.f32 %v173_v39, %v154_v41  ;;  %v156_v43 = vpop.f32.mrb[1].mxu0 }
 0x119   :  { %v181_v44 = vadd.f32 %v177_v40, %v156_v43 }
 0x11a   :  { %vm182_vm0 = vcmp.ge.f32.partialorder %v180_v42, 0.0  ;;  %v184_v45 = vmul.f32 0.2, %v180_v42 }
 0x11b   :  { %vm183_vm1 = vcmp.ge.f32.partialorder %v181_v44, 0.0  ;;  %v185_v46 = vmul.f32 0.2, %v181_v44 }
 0x11c   :  { %v186_v47 = vsel %vm182_vm0, %v180_v42, %v184_v45 }
 0x11d   :  { %188 = vst [vmem:[%s488_s3] sm:$0xff] %v186_v47  ;;  %v187_v48 = vsel %vm183_vm1, %v181_v44, %v185_v46 }
 0x11e   :  { %189 = vst [vmem:[%s488_s3 + $0x8] sm:$0xff] %v187_v48 }

// kernel: adda_forward.10
= control target key start
LH: loop header
LB: loop body
LE: loop exit
PB: predicated region body
PF: predicated region fallthrough
CT: control target
= control target key end

     0   :  { %s1526_s1 = inlined_call_operand.vmem [shape: f32[896,256], index: 1, kind: input, shape index: {}]   ;;  %s1527_s0 = inlined_call_operand.vmem [shape: f32[8,896], index: 0, kind: input, shape index: {}]   ;;  %s1528_s2 = inlined_call_operand.vmem [shape: f32[1,256], index: 2, kind: input, shape index: {}]   ;;  %s1529_s3 = inlined_call_operand.vmem [shape: f32[8,256], index: 3, kind: output, shape index: {}]  }
   0x1   :  { %v30_v0 = vld [vmem:[%s1526_s1 + $0x8] sm:$0xff]  ;;  %v32_v1 = vld [vmem:[%s1526_s1 + $0x18] sm:$0xff]  ;;  %v29_v5 = vld [vmem:[%s1526_s1] sm:$0xff] }
   0x2   :  { %v158_v2 = vld [vmem:[%s1526_s1 + $0x408] sm:$0xff]  ;;  %v572_v3 = vpack.c.bf16 %v32_v1, %v30_v0  ;;  %v160_v4 = vld [vmem:[%s1526_s1 + $0x418] sm:$0xff]  ;;  %v31_v6 = vld [vmem:[%s1526_s1 + $0x10] sm:$0xff] }
   0x3   :  { %v700_v7 = vpack.c.bf16 %v160_v4, %v158_v2  ;;  %v574_v8 = vpack.c.bf16 %v31_v6, %v29_v5  ;;  %v157_v9 = vld [vmem:[%s1526_s1 + $0x400] sm:$0xff]  ;;  %v159_v10 = vld [vmem:[%s1526_s1 + $0x410] sm:$0xff]  ;;  %v34_v11 = vld [vmem:[%s1526_s1 + $0x28] sm:$0xff] }
   0x4   :  { %573 = vmatprep.subr.bf16.mxu1 %v572_v3  ;;  %v702_v12 = vpack.c.bf16 %v159_v10, %v157_v9  ;;  %v36_v13 = vld [vmem:[%s1526_s1 + $0x38] sm:$0xff]  ;;  %v162_v14 = vld [vmem:[%s1526_s1 + $0x428] sm:$0xff]  ;;  %v33_v18 = vld [vmem:[%s1526_s1 + $0x20] sm:$0xff] }
   0x5   :  { %v164_v15 = vld [vmem:[%s1526_s1 + $0x438] sm:$0xff]  ;;  %701 = vmatprep.subr.bf16.mxu0 %v700_v7  ;;  %575 = vmatpush1.bf16.msra.mxu1 %v574_v8  ;;  %v576_v16 = vpack.c.bf16 %v36_v13, %v34_v11  ;;  %v35_v19 = vld [vmem:[%s1526_s1 + $0x30] sm:$0xff]  ;;  %v161_v20 = vld [vmem:[%s1526_s1 + $0x420] sm:$0xff] }
   0x6   :  { %v704_v17 = vpack.c.bf16 %v164_v15, %v162_v14  ;;  %703 = vmatpush1.bf16.msra.mxu0 %v702_v12  ;;  %v578_v21 = vpack.c.bf16 %v35_v19, %v33_v18  ;;  %v163_v22 = vld [vmem:[%s1526_s1 + $0x430] sm:$0xff]  ;;  %v38_v23 = vld [vmem:[%s1526_s1 + $0x48] sm:$0xff]  ;;  %v40_v24 = vld [vmem:[%s1526_s1 + $0x58] sm:$0xff] }
   0x7   :  { %577 = vmatprep.subr.bf16.mxu1 %v576_v16  ;;  %v706_v25 = vpack.c.bf16 %v163_v22, %v161_v20  ;;  %v580_v26 = vpack.c.bf16 %v40_v24, %v38_v23  ;;  %v166_v27 = vld [vmem:[%s1526_s1 + $0x448] sm:$0xff]  ;;  %v168_v28 = vld [vmem:[%s1526_s1 + $0x458] sm:$0xff]  ;;  %v37_v29 = vld [vmem:[%s1526_s1 + $0x40] sm:$0xff] }
   0x8   :  { %705 = vmatprep.subr.bf16.mxu0 %v704_v17  ;;  %v708_v30 = vpack.c.bf16 %v168_v28, %v166_v27  ;;  %v39_v31 = vld [vmem:[%s1526_s1 + $0x50] sm:$0xff]  ;;  %v165_v32 = vld [vmem:[%s1526_s1 + $0x440] sm:$0xff]  ;;  %v42_v35 = vld [vmem:[%s1526_s1 + $0x68] sm:$0xff] }
   0x9   :  { %v167_v33 = vld [vmem:[%s1526_s1 + $0x450] sm:$0xff]  ;;  %579 = vmatpush1.bf16.msra.mxu1 %v578_v21  ;;  %v582_v34 = vpack.c.bf16 %v39_v31, %v37_v29  ;;  %v44_v36 = vld [vmem:[%s1526_s1 + $0x78] sm:$0xff]  ;;  %v170_v37 = vld [vmem:[%s1526_s1 + $0x468] sm:$0xff] }
   0xa   :  { %707 = vmatpush1.bf16.msra.mxu0 %v706_v25  ;;  %581 = vmatprep.subr.bf16.mxu1 %v580_v26  ;;  %v710_v38 = vpack.c.bf16 %v167_v33, %v165_v32  ;;  %v584_v39 = vpack.c.bf16 %v44_v36, %v42_v35  ;;  %v172_v40 = vld [vmem:[%s1526_s1 + $0x478] sm:$0xff]  ;;  %v41_v41 = vld [vmem:[%s1526_s1 + $0x60] sm:$0xff]  ;;  %v43_v42 = vld [vmem:[%s1526_s1 + $0x70] sm:$0xff] }
   0xb   :  { %709 = vmatprep.subr.bf16.mxu0 %v708_v30  ;;  %v712_v43 = vpack.c.bf16 %v172_v40, %v170_v37  ;;  %v169_v44 = vld [vmem:[%s1526_s1 + $0x460] sm:$0xff]  ;;  %v171_v45 = vld [vmem:[%s1526_s1 + $0x470] sm:$0xff]  ;;  %v46_v46 = vld [vmem:[%s1526_s1 + $0x88] sm:$0xff]  ;;  %v586_v50 = vpack.c.bf16 %v43_v42, %v41_v41 }
   0xc   :  { %v48_v47 = vld [vmem:[%s1526_s1 + $0x98] sm:$0xff]  ;;  %v174_v48 = vld [vmem:[%s1526_s1 + $0x488] sm:$0xff]  ;;  %v714_v51 = vpack.c.bf16 %v171_v45, %v169_v44  ;;  %v45_v53 = vld [vmem:[%s1526_s1 + $0x80] sm:$0xff] }
   0xd   :  { %v176_v49 = vld [vmem:[%s1526_s1 + $0x498] sm:$0xff]  ;;  %583 = vmatpush1.bf16.msra.mxu1 %v582_v34  ;;  %v588_v52 = vpack.c.bf16 %v48_v47, %v46_v46  ;;  %v47_v54 = vld [vmem:[%s1526_s1 + $0x90] sm:$0xff]  ;;  %v173_v55 = vld [vmem:[%s1526_s1 + $0x480] sm:$0xff] }
   0xe   :  { %711 = vmatpush1.bf16.msra.mxu0 %v710_v38  ;;  %585 = vmatprep.subr.bf16.mxu1 %v584_v39  ;;  %v716_v56 = vpack.c.bf16 %v176_v49, %v174_v48  ;;  %v175_v57 = vld [vmem:[%s1526_s1 + $0x490] sm:$0xff]  ;;  %v50_v58 = vld [vmem:[%s1526_s1 + $0xa8] sm:$0xff]  ;;  %v52_v59 = vld [vmem:[%s1526_s1 + $0xb8] sm:$0xff]  ;;  %v590_v62 = vpack.c.bf16 %v47_v54, %v45_v53 }
   0xf   :  { %713 = vmatprep.subr.bf16.mxu0 %v712_v43  ;;  %v178_v60 = vld [vmem:[%s1526_s1 + $0x4a8] sm:$0xff]  ;;  %v180_v61 = vld [vmem:[%s1526_s1 + $0x4b8] sm:$0xff]  ;;  %v718_v63 = vpack.c.bf16 %v175_v57, %v173_v55  ;;  %v592_v0 = vpack.c.bf16 %v52_v59, %v50_v58  ;;  %v49_v1 = vld [vmem:[%s1526_s1 + $0xa0] sm:$0xff] }
  0x10   :  { %v51_v2 = vld [vmem:[%s1526_s1 + $0xb0] sm:$0xff]  ;;  %v177_v3 = vld [vmem:[%s1526_s1 + $0x4a0] sm:$0xff]  ;;  %v720_v4 = vpack.c.bf16 %v180_v61, %v178_v60  ;;  %v54_v6 = vld [vmem:[%s1526_s1 + $0xc8] sm:$0xff] }
  0x11   :  { %587 = vmatpush1.bf16.msra.mxu1 %v586_v50  ;;  %v179_v5 = vld [vmem:[%s1526_s1 + $0x4b0] sm:$0xff]  ;;  %v56_v7 = vld [vmem:[%s1526_s1 + $0xd8] sm:$0xff]  ;;  %v182_v8 = vld [vmem:[%s1526_s1 + $0x4c8] sm:$0xff]  ;;  %v594_v10 = vpack.c.bf16 %v51_v2, %v49_v1 }
  0x12   :  { %715 = vmatpush1.bf16.msra.mxu0 %v714_v51  ;;  %589 = vmatprep.subr.bf16.mxu1 %v588_v52  ;;  %v184_v9 = vld [vmem:[%s1526_s1 + $0x4d8] sm:$0xff]  ;;  %v722_v11 = vpack.c.bf16 %v179_v5, %v177_v3  ;;  %v596_v12 = vpack.c.bf16 %v56_v7, %v54_v6  ;;  %v53_v13 = vld [vmem:[%s1526_s1 + $0xc0] sm:$0xff]  ;;  %v55_v14 = vld [vmem:[%s1526_s1 + $0xd0] sm:$0xff] }
  0x13   :  { %717 = vmatprep.subr.bf16.mxu0 %v716_v56  ;;  %v181_v15 = vld [vmem:[%s1526_s1 + $0x4c0] sm:$0xff]  ;;  %v724_v16 = vpack.c.bf16 %v184_v9, %v182_v8  ;;  %v183_v17 = vld [vmem:[%s1526_s1 + $0x4d0] sm:$0xff]  ;;  %v58_v18 = vld [vmem:[%s1526_s1 + $0xe8] sm:$0xff]  ;;  %v598_v22 = vpack.c.bf16 %v55_v14, %v53_v13 }
  0x14   :  { %v60_v19 = vld [vmem:[%s1526_s1 + $0xf8] sm:$0xff]  ;;  %v186_v20 = vld [vmem:[%s1526_s1 + $0x4e8] sm:$0xff]  ;;  %v726_v23 = vpack.c.bf16 %v183_v17, %v181_v15  ;;  %v57_v25 = vld [vmem:[%s1526_s1 + $0xe0] sm:$0xff] }
  0x15   :  { %591 = vmatpush1.bf16.msra.mxu1 %v590_v62  ;;  %v188_v21 = vld [vmem:[%s1526_s1 + $0x4f8] sm:$0xff]  ;;  %v600_v24 = vpack.c.bf16 %v60_v19, %v58_v18  ;;  %v59_v26 = vld [vmem:[%s1526_s1 + $0xf0] sm:$0xff]  ;;  %v185_v27 = vld [vmem:[%s1526_s1 + $0x4e0] sm:$0xff] }
  0x16   :  { %719 = vmatpush1.bf16.msra.mxu0 %v718_v63  ;;  %593 = vmatprep.subr.bf16.mxu1 %v592_v0  ;;  %v728_v28 = vpack.c.bf16 %v188_v21, %v186_v20  ;;  %v187_v29 = vld [vmem:[%s1526_s1 + $0x4f0] sm:$0xff]  ;;  %v62_v30 = vld [vmem:[%s1526_s1 + $0x108] sm:$0xff]  ;;  %v64_v31 = vld [vmem:[%s1526_s1 + $0x118] sm:$0xff]  ;;  %v602_v34 = vpack.c.bf16 %v59_v26, %v57_v25 }
  0x17   :  { %721 = vmatprep.subr.bf16.mxu0 %v720_v4  ;;  %v190_v32 = vld [vmem:[%s1526_s1 + $0x508] sm:$0xff]  ;;  %v192_v33 = vld [vmem:[%s1526_s1 + $0x518] sm:$0xff]  ;;  %v730_v35 = vpack.c.bf16 %v187_v29, %v185_v27  ;;  %v604_v36 = vpack.c.bf16 %v64_v31, %v62_v30  ;;  %v61_v37 = vld [vmem:[%s1526_s1 + $0x100] sm:$0xff] }
  0x18   :  { %v63_v38 = vld [vmem:[%s1526_s1 + $0x110] sm:$0xff]  ;;  %v189_v39 = vld [vmem:[%s1526_s1 + $0x500] sm:$0xff]  ;;  %v732_v40 = vpack.c.bf16 %v192_v33, %v190_v32  ;;  %v66_v42 = vld [vmem:[%s1526_s1 + $0x128] sm:$0xff] }
  0x19   :  { %595 = vmatpush1.bf16.msra.mxu1 %v594_v10  ;;  %v191_v41 = vld [vmem:[%s1526_s1 + $0x510] sm:$0xff]  ;;  %v68_v43 = vld [vmem:[%s1526_s1 + $0x138] sm:$0xff]  ;;  %v194_v44 = vld [vmem:[%s1526_s1 + $0x528] sm:$0xff]  ;;  %v606_v46 = vpack.c.bf16 %v63_v38, %v61_v37 }
  0x1a   :  { %723 = vmatpush1.bf16.msra.mxu0 %v722_v11  ;;  %597 = vmatprep.subr.bf16.mxu1 %v596_v12  ;;  %v196_v45 = vld [vmem:[%s1526_s1 + $0x538] sm:$0xff]  ;;  %v734_v47 = vpack.c.bf16 %v191_v41, %v189_v39  ;;  %v608_v48 = vpack.c.bf16 %v68_v43, %v66_v42  ;;  %v65_v49 = vld [vmem:[%s1526_s1 + $0x120] sm:$0xff]  ;;  %v67_v50 = vld [vmem:[%s1526_s1 + $0x130] sm:$0xff] }
  0x1b   :  { %725 = vmatprep.subr.bf16.mxu0 %v724_v16  ;;  %v193_v51 = vld [vmem:[%s1526_s1 + $0x520] sm:$0xff]  ;;  %v736_v52 = vpack.c.bf16 %v196_v45, %v194_v44  ;;  %v195_v53 = vld [vmem:[%s1526_s1 + $0x530] sm:$0xff]  ;;  %v70_v54 = vld [vmem:[%s1526_s1 + $0x148] sm:$0xff]  ;;  %v610_v58 = vpack.c.bf16 %v67_v50, %v65_v49 }
  0x1c   :  { %v72_v55 = vld [vmem:[%s1526_s1 + $0x158] sm:$0xff]  ;;  %v198_v56 = vld [vmem:[%s1526_s1 + $0x548] sm:$0xff]  ;;  %v738_v59 = vpack.c.bf16 %v195_v53, %v193_v51  ;;  %v69_v61 = vld [vmem:[%s1526_s1 + $0x140] sm:$0xff] }
  0x1d   :  { %599 = vmatpush1.bf16.msra.mxu1 %v598_v22  ;;  %v200_v57 = vld [vmem:[%s1526_s1 + $0x558] sm:$0xff]  ;;  %v612_v60 = vpack.c.bf16 %v72_v55, %v70_v54  ;;  %v71_v62 = vld [vmem:[%s1526_s1 + $0x150] sm:$0xff]  ;;  %v197_v63 = vld [vmem:[%s1526_s1 + $0x540] sm:$0xff] }
  0x1e   :  { %727 = vmatpush1.bf16.msra.mxu0 %v726_v23  ;;  %601 = vmatprep.subr.bf16.mxu1 %v600_v24  ;;  %v740_v0 = vpack.c.bf16 %v200_v57, %v198_v56  ;;  %v199_v1 = vld [vmem:[%s1526_s1 + $0x550] sm:$0xff]  ;;  %v74_v2 = vld [vmem:[%s1526_s1 + $0x168] sm:$0xff]  ;;  %v76_v3 = vld [vmem:[%s1526_s1 + $0x178] sm:$0xff]  ;;  %v614_v6 = vpack.c.bf16 %v71_v62, %v69_v61 }
  0x1f   :  { %729 = vmatprep.subr.bf16.mxu0 %v728_v28  ;;  %v202_v4 = vld [vmem:[%s1526_s1 + $0x568] sm:$0xff]  ;;  %v204_v5 = vld [vmem:[%s1526_s1 + $0x578] sm:$0xff]  ;;  %v73_v7 = vld [vmem:[%s1526_s1 + $0x160] sm:$0xff]  ;;  %v742_v8 = vpack.c.bf16 %v199_v1, %v197_v63  ;;  %v616_v9 = vpack.c.bf16 %v76_v3, %v74_v2 }
  0x20   :  { %v75_v10 = vld [vmem:[%s1526_s1 + $0x170] sm:$0xff]  ;;  %v201_v11 = vld [vmem:[%s1526_s1 + $0x560] sm:$0xff]  ;;  %v744_v13 = vpack.c.bf16 %v204_v5, %v202_v4  ;;  %v78_v14 = vld [vmem:[%s1526_s1 + $0x188] sm:$0xff] }
  0x21   :  { %603 = vmatpush1.bf16.msra.mxu1 %v602_v34  ;;  %v203_v12 = vld [vmem:[%s1526_s1 + $0x570] sm:$0xff]  ;;  %v80_v15 = vld [vmem:[%s1526_s1 + $0x198] sm:$0xff]  ;;  %v23_v16 = vld [vmem:[%s1527_s0 + $0x8] sm:$0xff]  ;;  %v618_v20 = vpack.c.bf16 %v75_v10, %v73_v7 }
  0x22   :  { %731 = vmatpush1.bf16.msra.mxu0 %v730_v35  ;;  %605 = vmatprep.subr.bf16.mxu1 %v604_v36  ;;  %v206_v17 = vld [vmem:[%s1526_s1 + $0x588] sm:$0xff]  ;;  %v208_v18 = vld [vmem:[%s1526_s1 + $0x598] sm:$0xff]  ;;  %v746_v21 = vpack.c.bf16 %v203_v12, %v201_v11  ;;  %v620_v22 = vpack.c.bf16 %v80_v15, %v78_v14  ;;  %v77_v23 = vld [vmem:[%s1526_s1 + $0x180] sm:$0xff] }
  0x23   :  { %733 = vmatprep.subr.bf16.mxu0 %v732_v40  ;;  %317 = vmatprep.mubr.f32.mxu1 %v23_v16  ;;  %v27_v19 = vld [vmem:[%s1527_s0 + $0x28] sm:$0xff]  ;;  %v79_v24 = vld [vmem:[%s1526_s1 + $0x190] sm:$0xff]  ;;  %v205_v25 = vld [vmem:[%s1526_s1 + $0x580] sm:$0xff]  ;;  %v748_v26 = vpack.c.bf16 %v208_v18, %v206_v17 }
  0x24   :  { %459 = vmatprep.mubr.f32.mxu0 %v27_v19  ;;  %v207_v27 = vld [vmem:[%s1526_s1 + $0x590] sm:$0xff]  ;;  %v82_v28 = vld [vmem:[%s1526_s1 + $0x1a8] sm:$0xff]  ;;  %v84_v29 = vld [vmem:[%s1526_s1 + $0x1b8] sm:$0xff]  ;;  %v622_v32 = vpack.c.bf16 %v79_v24, %v77_v23 }
  0x25   :  { %607 = vmatpush1.bf16.msra.mxu1 %v606_v46  ;;  %v210_v30 = vld [vmem:[%s1526_s1 + $0x5a8] sm:$0xff]  ;;  %v212_v31 = vld [vmem:[%s1526_s1 + $0x5b8] sm:$0xff]  ;;  %v750_v33 = vpack.c.bf16 %v207_v27, %v205_v25  ;;  %v624_v34 = vpack.c.bf16 %v84_v29, %v82_v28  ;;  %v81_v35 = vld [vmem:[%s1526_s1 + $0x1a0] sm:$0xff] }
  0x26   :  { %735 = vmatpush1.bf16.msra.mxu0 %v734_v47  ;;  %609 = vmatprep.subr.bf16.mxu1 %v608_v48  ;;  %v83_v36 = vld [vmem:[%s1526_s1 + $0x1b0] sm:$0xff]  ;;  %v209_v37 = vld [vmem:[%s1526_s1 + $0x5a0] sm:$0xff]  ;;  %v752_v38 = vpack.c.bf16 %v212_v31, %v210_v30  ;;  %v86_v40 = vld [vmem:[%s1526_s1 + $0x1c8] sm:$0xff] }
  0x27   :  { %737 = vmatprep.subr.bf16.mxu0 %v736_v52  ;;  %v211_v39 = vld [vmem:[%s1526_s1 + $0x5b0] sm:$0xff]  ;;  %v88_v41 = vld [vmem:[%s1526_s1 + $0x1d8] sm:$0xff]  ;;  %v214_v42 = vld [vmem:[%s1526_s1 + $0x5c8] sm:$0xff]  ;;  %v626_v44 = vpack.c.bf16 %v83_v36, %v81_v35 }
  0x28   :  { %v216_v43 = vld [vmem:[%s1526_s1 + $0x5d8] sm:$0xff]  ;;  %v754_v45 = vpack.c.bf16 %v211_v39, %v209_v37  ;;  %v628_v46 = vpack.c.bf16 %v88_v41, %v86_v40  ;;  %v85_v47 = vld [vmem:[%s1526_s1 + $0x1c0] sm:$0xff]  ;;  %v87_v48 = vld [vmem:[%s1526_s1 + $0x1d0] sm:$0xff]  ;;  %v803_v40 = vmov 0.0  }
  0x29   :  { %611 = vmatpush1.bf16.msra.mxu1 %v610_v58  ;;  %v213_v49 = vld [vmem:[%s1526_s1 + $0x5c0] sm:$0xff]  ;;  %v756_v50 = vpack.c.bf16 %v216_v43, %v214_v42  ;;  %v215_v51 = vld [vmem:[%s1526_s1 + $0x5d0] sm:$0xff]  ;;  %v90_v52 = vld [vmem:[%s1526_s1 + $0x1e8] sm:$0xff]  ;;  %v630_v56 = vpack.c.bf16 %v87_v48, %v85_v47 }
  0x2a   :  { %739 = vmatpush1.bf16.msra.mxu0 %v738_v59  ;;  %613 = vmatprep.subr.bf16.mxu1 %v612_v60  ;;  %v92_v53 = vld [vmem:[%s1526_s1 + $0x1f8] sm:$0xff]  ;;  %v218_v54 = vld [vmem:[%s1526_s1 + $0x5e8] sm:$0xff]  ;;  %v758_v57 = vpack.c.bf16 %v215_v51, %v213_v49  ;;  %v89_v59 = vld [vmem:[%s1526_s1 + $0x1e0] sm:$0xff] }
  0x2b   :  { %741 = vmatprep.subr.bf16.mxu0 %v740_v0  ;;  %v220_v55 = vld [vmem:[%s1526_s1 + $0x5f8] sm:$0xff]  ;;  %v632_v58 = vpack.c.bf16 %v92_v53, %v90_v52  ;;  %v91_v60 = vld [vmem:[%s1526_s1 + $0x1f0] sm:$0xff]  ;;  %v217_v61 = vld [vmem:[%s1526_s1 + $0x5e0] sm:$0xff] }
  0x2c   :  { %v760_v62 = vpack.c.bf16 %v220_v55, %v218_v54  ;;  %v219_v63 = vld [vmem:[%s1526_s1 + $0x5f0] sm:$0xff]  ;;  %v94_v0 = vld [vmem:[%s1526_s1 + $0x208] sm:$0xff]  ;;  %v96_v1 = vld [vmem:[%s1526_s1 + $0x218] sm:$0xff]  ;;  %v634_v4 = vpack.c.bf16 %v91_v60, %v89_v59 }
  0x2d   :  { %615 = vmatpush1.bf16.msra.mxu1 %v614_v6  ;;  %v222_v2 = vld [vmem:[%s1526_s1 + $0x608] sm:$0xff]  ;;  %v224_v3 = vld [vmem:[%s1526_s1 + $0x618] sm:$0xff]  ;;  %v762_v5 = vpack.c.bf16 %v219_v63, %v217_v61  ;;  %v636_v6 = vpack.c.bf16 %v96_v1, %v94_v0  ;;  %v93_v7 = vld [vmem:[%s1526_s1 + $0x200] sm:$0xff] }
  0x2e   :  { %743 = vmatpush1.bf16.msra.mxu0 %v742_v8  ;;  %617 = vmatprep.subr.bf16.mxu1 %v616_v9  ;;  %v95_v8 = vld [vmem:[%s1526_s1 + $0x210] sm:$0xff]  ;;  %v221_v9 = vld [vmem:[%s1526_s1 + $0x600] sm:$0xff]  ;;  %v764_v10 = vpack.c.bf16 %v224_v3, %v222_v2  ;;  %v98_v12 = vld [vmem:[%s1526_s1 + $0x228] sm:$0xff] }
  0x2f   :  { %745 = vmatprep.subr.bf16.mxu0 %v744_v13  ;;  %v223_v11 = vld [vmem:[%s1526_s1 + $0x610] sm:$0xff]  ;;  %v100_v13 = vld [vmem:[%s1526_s1 + $0x238] sm:$0xff]  ;;  %v226_v14 = vld [vmem:[%s1526_s1 + $0x628] sm:$0xff]  ;;  %v638_v17 = vpack.c.bf16 %v95_v8, %v93_v7 }
  0x30   :  { %v228_v15 = vld [vmem:[%s1526_s1 + $0x638] sm:$0xff]  ;;  %v22_v16 = vld [vmem:[%s1527_s0] sm:$0xff]  ;;  %v766_v19 = vpack.c.bf16 %v223_v11, %v221_v9  ;;  %v227_v25 = vld [vmem:[%s1526_s1 + $0x630] sm:$0xff] }
  0x31   :  { %619 = vmatpush1.bf16.msra.mxu1 %v618_v20  ;;  %v26_v18 = vld [vmem:[%s1527_s0 + $0x20] sm:$0xff]  ;;  %v640_v20 = vpack.c.bf16 %v100_v13, %v98_v12  ;;  %v768_v24 = vpack.c.bf16 %v228_v15, %v226_v14  ;;  %v104_v27 = vld [vmem:[%s1526_s1 + $0x258] sm:$0xff]  ;;  %v230_v28 = vld [vmem:[%s1526_s1 + $0x648] sm:$0xff] }
  0x32   :  { %747 = vmatpush1.bf16.msra.mxu0 %v746_v21  ;;  %621 = vmatprep.subr.bf16.mxu1 %v620_v22  ;;  %v97_v21 = vld [vmem:[%s1526_s1 + $0x220] sm:$0xff]  ;;  %v99_v22 = vld [vmem:[%s1526_s1 + $0x230] sm:$0xff]  ;;  %v232_v29 = vld [vmem:[%s1526_s1 + $0x658] sm:$0xff] }
  0x33   :  { %749 = vmatprep.subr.bf16.mxu0 %v748_v26  ;;  %v225_v23 = vld [vmem:[%s1526_s1 + $0x620] sm:$0xff]  ;;  %v102_v26 = vld [vmem:[%s1526_s1 + $0x248] sm:$0xff]  ;;  %v642_v30 = vpack.c.bf16 %v99_v22, %v97_v21  ;;  %v772_v36 = vpack.c.bf16 %v232_v29, %v230_v28  ;;  %v231_v37 = vld [vmem:[%s1526_s1 + $0x650] sm:$0xff] }
  0x34   :  { %v770_v31 = vpack.c.bf16 %v227_v25, %v225_v23  ;;  %v229_v35 = vld [vmem:[%s1526_s1 + $0x640] sm:$0xff]  ;;  %v108_v39 = vld [vmem:[%s1526_s1 + $0x278] sm:$0xff]  ;;  %v234_v41 = vld [vmem:[%s1526_s1 + $0x668] sm:$0xff] }
  0x35   :  { %623 = vmatpush1.bf16.msra.mxu1 %v622_v32  ;;  %v644_v32 = vpack.c.bf16 %v104_v27, %v102_v26  ;;  %v236_v42 = vld [vmem:[%s1526_s1 + $0x678] sm:$0xff]  ;;  %v107_v47 = vld [vmem:[%s1526_s1 + $0x270] sm:$0xff]  ;;  %v233_v48 = vld [vmem:[%s1526_s1 + $0x660] sm:$0xff] }
  0x36   :  { %751 = vmatpush1.bf16.msra.mxu0 %v750_v33  ;;  %625 = vmatprep.subr.bf16.mxu1 %v624_v34  ;;  %v101_v33 = vld [vmem:[%s1526_s1 + $0x240] sm:$0xff]  ;;  %v103_v34 = vld [vmem:[%s1526_s1 + $0x250] sm:$0xff]  ;;  %v776_v49 = vpack.c.bf16 %v236_v42, %v234_v41  ;;  %v110_v51 = vld [vmem:[%s1526_s1 + $0x288] sm:$0xff] }
  0x37   :  { %753 = vmatprep.subr.bf16.mxu0 %v752_v38  ;;  %v106_v38 = vld [vmem:[%s1526_s1 + $0x268] sm:$0xff]  ;;  %v646_v43 = vpack.c.bf16 %v103_v34, %v101_v33  ;;  %v112_v52 = vld [vmem:[%s1526_s1 + $0x298] sm:$0xff]  ;;  %v109_v59 = vld [vmem:[%s1526_s1 + $0x280] sm:$0xff] }
  0x38   :  { %v238_v53 = vld [vmem:[%s1526_s1 + $0x688] sm:$0xff]  ;;  %v240_v54 = vld [vmem:[%s1526_s1 + $0x698] sm:$0xff]  ;;  %v111_v60 = vld [vmem:[%s1526_s1 + $0x290] sm:$0xff] }
  0x39   :  { %627 = vmatpush1.bf16.msra.mxu1 %v626_v44  ;;  %v774_v44 = vpack.c.bf16 %v231_v37, %v229_v35  ;;  %v237_v61 = vld [vmem:[%s1526_s1 + $0x680] sm:$0xff]  ;;  %v239_v63 = vld [vmem:[%s1526_s1 + $0x690] sm:$0xff]  ;;  %v114_v0 = vld [vmem:[%s1526_s1 + $0x2a8] sm:$0xff] }
  0x3a   :  { %755 = vmatpush1.bf16.msra.mxu0 %v754_v45  ;;  %629 = vmatprep.subr.bf16.mxu1 %v628_v46  ;;  %v648_v45 = vpack.c.bf16 %v108_v39, %v106_v38  ;;  %v105_v46 = vld [vmem:[%s1526_s1 + $0x260] sm:$0xff]  ;;  %v116_v1 = vld [vmem:[%s1526_s1 + $0x2b8] sm:$0xff]  ;;  %v242_v2 = vld [vmem:[%s1526_s1 + $0x6a8] sm:$0xff] }
  0x3b   :  { %757 = vmatprep.subr.bf16.mxu0 %v756_v50  ;;  %v235_v50 = vld [vmem:[%s1526_s1 + $0x670] sm:$0xff]  ;;  %v650_v55 = vpack.c.bf16 %v107_v47, %v105_v46  ;;  %v244_v3 = vld [vmem:[%s1526_s1 + $0x6b8] sm:$0xff]  ;;  %v113_v7 = vld [vmem:[%s1526_s1 + $0x2a0] sm:$0xff] }
  0x3c   :  { %v115_v8 = vld [vmem:[%s1526_s1 + $0x2b0] sm:$0xff]  ;;  %v241_v9 = vld [vmem:[%s1526_s1 + $0x6a0] sm:$0xff]  ;;  %v118_v12 = vld [vmem:[%s1526_s1 + $0x2c8] sm:$0xff] }
  0x3d   :  { %631 = vmatpush1.bf16.msra.mxu1 %v630_v56  ;;  %v25_v56 = vld [vmem:[%s1527_s0 + $0x18] sm:$0xff]  ;;  %v243_v11 = vld [vmem:[%s1526_s1 + $0x6b0] sm:$0xff]  ;;  %v246_v14 = vld [vmem:[%s1526_s1 + $0x6c8] sm:$0xff] }
  0x3e   :  { %759 = vmatpush1.bf16.msra.mxu0 %v758_v57  ;;  %633 = vmatprep.subr.bf16.mxu1 %v632_v58  ;;  %v778_v57 = vpack.c.bf16 %v235_v50, %v233_v48  ;;  %v652_v58 = vpack.c.bf16 %v112_v52, %v110_v51  ;;  %v120_v13 = vld [vmem:[%s1526_s1 + $0x2d8] sm:$0xff]  ;;  %v245_v21 = vld [vmem:[%s1526_s1 + $0x6c0] sm:$0xff]  ;;  %v247_v23 = vld [vmem:[%s1526_s1 + $0x6d0] sm:$0xff] }
  0x3f   :  { %761 = vmatprep.subr.bf16.mxu0 %v760_v62  ;;  %v780_v62 = vpack.c.bf16 %v240_v54, %v238_v53  ;;  %v248_v15 = vld [vmem:[%s1526_s1 + $0x6d8] sm:$0xff]  ;;  %v250_v26 = vld [vmem:[%s1526_s1 + $0x6e8] sm:$0xff]  ;;  %v790_v29 = vpack.c.bf16 %v247_v23, %v245_v21  ;;  %v249_v33 = vld [vmem:[%s1526_s1 + $0x6e0] sm:$0xff] }
  0x40   :  { %v788_v22 = vpack.c.bf16 %v248_v15, %v246_v14  ;;  %v124_v25 = vld [vmem:[%s1526_s1 + $0x2f8] sm:$0xff]  ;;  %v251_v35 = vld [vmem:[%s1526_s1 + $0x6f0] sm:$0xff]  ;;  %v125_v41 = vld [vmem:[%s1526_s1 + $0x300] sm:$0xff] }
  0x41   :  { %635 = vmatpush1.bf16.msra.mxu1 %v634_v4  ;;  %v654_v4 = vpack.c.bf16 %v111_v60, %v109_v59  ;;  %v252_v27 = vld [vmem:[%s1526_s1 + $0x6f8] sm:$0xff]  ;;  %v794_v39 = vpack.c.bf16 %v251_v35, %v249_v33  ;;  %v127_v42 = vld [vmem:[%s1526_s1 + $0x310] sm:$0xff]  ;;  %v129_v48 = vld [vmem:[%s1526_s1 + $0x320] sm:$0xff] }
  0x42   :  { %763 = vmatpush1.bf16.msra.mxu0 %v762_v5  ;;  %637 = vmatprep.subr.bf16.mxu1 %v636_v6  ;;  %v782_v5 = vpack.c.bf16 %v239_v63, %v237_v61  ;;  %v656_v6 = vpack.c.bf16 %v116_v1, %v114_v0  ;;  %v792_v34 = vpack.c.bf16 %v252_v27, %v250_v26  ;;  %v128_v37 = vld [vmem:[%s1526_s1 + $0x318] sm:$0xff]  ;;  %v28_v46 = vld [vmem:[%s1527_s0 + $0x30] sm:$0xff]  ;;  %v134_v50 = vld [vmem:[%s1526_s1 + $0x348] sm:$0xff]  ;;  %v548_v26 = vlaneseq }
  0x43   :  { %765 = vmatprep.subr.bf16.mxu0 %v764_v10  ;;  %v784_v10 = vpack.c.bf16 %v244_v3, %v242_v2  ;;  %v136_v51 = vld [vmem:[%s1526_s1 + $0x358] sm:$0xff]  ;;  %v133_v54 = vld [vmem:[%s1526_s1 + $0x340] sm:$0xff]  ;;  %v139_v61 = vld [vmem:[%s1526_s1 + $0x370] sm:$0xff] }
  0x44   :  { %318 = vmatmul.mubr.f32.vlgmr.msra.gmra.mrb[0].mxu1 %v22_v16  ;;  %v658_v16 = vpack.c.bf16 %v115_v8, %v113_v7  ;;  %v676_v53 = vpack.c.bf16 %v136_v51, %v134_v50  ;;  %v137_v60 = vld [vmem:[%s1526_s1 + $0x360] sm:$0xff]  ;;  %v144_v63 = vld [vmem:[%s1526_s1 + $0x398] sm:$0xff]  ;;  %v143_v3 = vld [vmem:[%s1526_s1 + $0x390] sm:$0xff]  ;;  %v549_v27 = vshrl.u32 %v548_v26, 7 }
  0x45   :  { %639 = vmatpush1.bf16.msra.mxu1 %v638_v17  ;;  %460 = vmatmul.mubr.f32.vlgmr.msra.gmra.mrb[0].mxu0 %v26_v18  ;;  %v786_v17 = vpack.c.bf16 %v243_v11, %v241_v9  ;;  %v660_v18 = vpack.c.bf16 %v120_v13, %v118_v12  ;;  %v682_v0 = vpack.c.bf16 %v139_v61, %v137_v60  ;;  %v141_v2 = vld [vmem:[%s1526_s1 + $0x380] sm:$0xff]  ;;  %v147_v9 = vld [vmem:[%s1526_s1 + $0x3b0] sm:$0xff]  ;;  %v152_v11 = vld [vmem:[%s1526_s1 + $0x3d8] sm:$0xff] }
  0x46   :  { %767 = vmatpush1.bf16.msra.mxu0 %v766_v19  ;;  %641 = vmatprep.subr.bf16.mxu1 %v640_v20  ;;  %v117_v19 = vld [vmem:[%s1526_s1 + $0x2c0] sm:$0xff]  ;;  %v119_v20 = vld [vmem:[%s1526_s1 + $0x2d0] sm:$0xff] }
  0x47   :  { %769 = vmatprep.subr.bf16.mxu0 %v768_v24  ;;  %530 = vmatprep.mubr.f32.mxu0 %v803_v40  ;;  %v122_v24 = vld [vmem:[%s1526_s1 + $0x2e8] sm:$0xff]  ;;  %v662_v28 = vpack.c.bf16 %v119_v20, %v117_v19  ;;  %v145_v8 = vld [vmem:[%s1526_s1 + $0x3a0] sm:$0xff]  ;;  %v151_v15 = vld [vmem:[%s1526_s1 + $0x3d0] sm:$0xff] }
  0x48   :  { %388 = vmatprep.mubr.f32.mxu1 %v25_v56  ;;  %v138_v56 = vld [vmem:[%s1526_s1 + $0x368] sm:$0xff]  ;;  %v690_v12 = vpack.c.bf16 %v147_v9, %v145_v8  ;;  %v149_v14 = vld [vmem:[%s1526_s1 + $0x3c0] sm:$0xff]  ;;  %v155_v21 = vld [vmem:[%s1526_s1 + $0x3f0] sm:$0xff] }
  0x49   :  { %643 = vmatpush1.bf16.msra.mxu1 %v642_v30  ;;  %v664_v30 = vpack.c.bf16 %v124_v25, %v122_v24  ;;  %v153_v20 = vld [vmem:[%s1526_s1 + $0x3e0] sm:$0xff]  ;;  %v24_v23 = vld [vmem:[%s1527_s0 + $0x10] sm:$0xff] }
  0x4a   :  { %771 = vmatpush1.bf16.msra.mxu0 %v770_v31  ;;  %645 = vmatprep.subr.bf16.mxu1 %v644_v32  ;;  %v121_v31 = vld [vmem:[%s1526_s1 + $0x2e0] sm:$0xff]  ;;  %v123_v32 = vld [vmem:[%s1526_s1 + $0x2f0] sm:$0xff] }
  0x4b   :  { %773 = vmatprep.subr.bf16.mxu0 %v772_v36  ;;  %v126_v36 = vld [vmem:[%s1526_s1 + $0x308] sm:$0xff]  ;;  %v666_v38 = vpack.c.bf16 %v123_v32, %v121_v31 }
  0x4c   :  { %v668_v40 = vpack.c.bf16 %v128_v37, %v126_v36 }
  0x4d   :  { %647 = vmatpush1.bf16.msra.mxu1 %v646_v43  ;;  %v130_v43 = vld [vmem:[%s1526_s1 + $0x328] sm:$0xff] }
  0x4e   :  { %775 = vmatpush1.bf16.msra.mxu0 %v774_v44  ;;  %649 = vmatprep.subr.bf16.mxu1 %v648_v45  ;;  %v132_v44 = vld [vmem:[%s1526_s1 + $0x338] sm:$0xff]  ;;  %v670_v45 = vpack.c.bf16 %v127_v42, %v125_v41 }
  0x4f   :  { %777 = vmatprep.subr.bf16.mxu0 %v776_v49  ;;  %v672_v47 = vpack.c.bf16 %v132_v44, %v130_v43  ;;  %v131_v49 = vld [vmem:[%s1526_s1 + $0x330] sm:$0xff] }
  0x50   :  { %v674_v52 = vpack.c.bf16 %v131_v49, %v129_v48 }
  0x51   :  { %651 = vmatpush1.bf16.msra.mxu1 %v650_v55  ;;  %v135_v55 = vld [vmem:[%s1526_s1 + $0x350] sm:$0xff] }
  0x52   :  { %779 = vmatpush1.bf16.msra.mxu0 %v778_v57  ;;  %653 = vmatprep.subr.bf16.mxu1 %v652_v58  ;;  %v140_v57 = vld [vmem:[%s1526_s1 + $0x378] sm:$0xff]  ;;  %v678_v58 = vpack.c.bf16 %v135_v55, %v133_v54 }
  0x53   :  { %781 = vmatprep.subr.bf16.mxu0 %v780_v62  ;;  %v680_v59 = vpack.c.bf16 %v140_v57, %v138_v56  ;;  %v142_v62 = vld [vmem:[%s1526_s1 + $0x388] sm:$0xff] }
  0x54   :  { %v684_v1 = vpack.c.bf16 %v144_v63, %v142_v62 }
  0x55   :  { %655 = vmatpush1.bf16.msra.mxu1 %v654_v4  ;;  %v146_v4 = vld [vmem:[%s1526_s1 + $0x3a8] sm:$0xff] }
  0x56   :  { %783 = vmatpush1.bf16.msra.mxu0 %v782_v5  ;;  %657 = vmatprep.subr.bf16.mxu1 %v656_v6  ;;  %v148_v5 = vld [vmem:[%s1526_s1 + $0x3b8] sm:$0xff]  ;;  %v686_v6 = vpack.c.bf16 %v143_v3, %v141_v2 }
  0x57   :  { %785 = vmatprep.subr.bf16.mxu0 %v784_v10  ;;  %v688_v7 = vpack.c.bf16 %v148_v5, %v146_v4  ;;  %v150_v10 = vld [vmem:[%s1526_s1 + $0x3c8] sm:$0xff] }
  0x58   :  { %v692_v13 = vpack.c.bf16 %v152_v11, %v150_v10 }
  0x59   :  { %659 = vmatpush1.bf16.msra.mxu1 %v658_v16  ;;  %v154_v16 = vld [vmem:[%s1526_s1 + $0x3e8] sm:$0xff] }
  0x5a   :  { %787 = vmatpush1.bf16.msra.mxu0 %v786_v17  ;;  %661 = vmatprep.subr.bf16.mxu1 %v660_v18  ;;  %v156_v17 = vld [vmem:[%s1526_s1 + $0x3f8] sm:$0xff]  ;;  %v694_v18 = vpack.c.bf16 %v151_v15, %v149_v14 }
  0x5b   :  { %789 = vmatprep.subr.bf16.mxu0 %v788_v22  ;;  %v696_v19 = vpack.c.bf16 %v156_v17, %v154_v16  ;;  %v698_v22 = vpack.c.bf16 %v155_v21, %v153_v20 }
  0x5d   :  { %663 = vmatpush1.bf16.msra.mxu1 %v662_v28  ;;  %v550_v28 = vsub.s32 0, %v549_v27 }
  0x5e   :  { %791 = vmatpush1.bf16.msra.mxu0 %v790_v29  ;;  %665 = vmatprep.subr.bf16.mxu1 %v664_v30  ;;  %v546_v29 = vld [vmem:[%s1528_s2] sm:$0x3]  ;;  %v554_v30 = vsub.s32 1, %v549_v27 }
  0x5f   :  { %793 = vmatprep.subr.bf16.mxu0 %v792_v34  ;;  %v551_v31 = vrot.slane %v546_v29, %v550_v28 }
  0x60   :  { %v555_v33 = vrot.slane %v546_v29, %v554_v30 }
  0x61   :  { %667 = vmatpush1.bf16.msra.mxu1 %v666_v38 }
  0x62   :  { %795 = vmatpush1.bf16.msra.mxu0 %v794_v39  ;;  %669 = vmatprep.subr.bf16.mxu1 %v668_v40 }
  0x65   :  { %531 = vmatmul.mubr.f32.vlgmr.msra.gmra.mrb[0].mxu0 %v28_v46  ;;  %671 = vmatpush1.bf16.msra.mxu1 %v670_v45 }
  0x66   :  { %673 = vmatprep.subr.bf16.mxu1 %v672_v47 }
  0x69   :  { %675 = vmatpush1.bf16.msra.mxu1 %v674_v52 }
  0x6a   :  { %677 = vmatprep.subr.bf16.mxu1 %v676_v53 }
  0x6d   :  { %679 = vmatpush1.bf16.msra.mxu1 %v678_v58 }
  0x6e   :  { %681 = vmatprep.subr.bf16.mxu1 %v680_v59 }
  0x71   :  { %683 = vmatpush1.bf16.msra.mxu1 %v682_v0 }
  0x72   :  { %685 = vmatprep.subr.bf16.mxu1 %v684_v1 }
  0x75   :  { %687 = vmatpush1.bf16.msra.mxu1 %v686_v6 }
  0x76   :  { %689 = vmatprep.subr.bf16.mxu1 %v688_v7 }
  0x79   :  { %691 = vmatpush1.bf16.msra.mxu1 %v690_v12 }
  0x7a   :  { %693 = vmatprep.subr.bf16.mxu1 %v692_v13 }
  0x7d   :  { %695 = vmatpush1.bf16.msra.mxu1 %v694_v18 }
  0x7e   :  { %697 = vmatprep.subr.bf16.mxu1 %v696_v19 }
  0x81   :  { %699 = vmatpush1.bf16.msra.mxu1 %v698_v22 }
  0x84   :  { %389 = vmatmul.mubr.f32.vlgmr.msra.gmra.mrb[0].mxu1 %v24_v23 }
 0x138   :  { %v532_v24 = vpop.f32.mrb[0].mxu0 }
 0x139   :  { %v534_v25 = vpop.f32.mrb[1].mxu0 }
 0x157   :  { %v390_v32 = vpop.f32.mrb[0].mxu1 }
 0x158   :  { %v796_v34 = vadd.f32 %v532_v24, %v390_v32  ;;  %v392_v35 = vpop.f32.mrb[1].mxu1 }
 0x159   :  { %v797_v36 = vadd.f32 %v534_v25, %v392_v35 }
 0x15a   :  { %v558_v37 = vadd.f32 %v796_v34, %v551_v31 }
 0x15b   :  { %v559_v38 = vadd.f32 %v797_v36, %v555_v33 }
 0x15c   :  { %vm560_vm0 = vcmp.ge.f32.partialorder %v558_v37, 0.0  ;;  %v562_v39 = vmul.f32 0.2, %v558_v37 }
 0x15d   :  { %vm561_vm1 = vcmp.ge.f32.partialorder %v559_v38, 0.0  ;;  %v563_v40 = vmul.f32 0.2, %v559_v38 }
 0x15e   :  { %v564_v41 = vsel %vm560_vm0, %v558_v37, %v562_v39 }
 0x15f   :  { %566 = vst [vmem:[%s1529_s3] sm:$0xff] %v564_v41  ;;  %v565_v42 = vsel %vm561_vm1, %v559_v38, %v563_v40 }
 0x160   :  { %567 = vst [vmem:[%s1529_s3 + $0x8] sm:$0xff] %v565_v42 }

// kernel: adda_forward.12
= control target key start
LH: loop header
LB: loop body
LE: loop exit
PB: predicated region body
PF: predicated region fallthrough
CT: control target
= control target key end

     0   :  { %s339_s1 = inlined_call_operand.vmem [shape: f32[256,128], index: 1, kind: input, shape index: {}]   ;;  %s340_s0 = inlined_call_operand.vmem [shape: f32[8,256], index: 0, kind: input, shape index: {}]   ;;  %s341_s2 = inlined_call_operand.vmem [shape: f32[1,128], index: 2, kind: input, shape index: {}]   ;;  %s342_s3 = inlined_call_operand.vmem [shape: f32[8,128], index: 3, kind: output, shape index: {}]  }
   0x1   :  { %v38_v0 = vld [vmem:[%s339_s1 + $0x80] sm:$0xff]  ;;  %v39_v1 = vld [vmem:[%s339_s1 + $0x88] sm:$0xff]  ;;  %v40_v5 = vld [vmem:[%s339_s1 + $0x90] sm:$0xff] }
   0x2   :  { %v22_v2 = vld [vmem:[%s339_s1] sm:$0xff]  ;;  %v179_v3 = vpack.c.bf16 %v39_v1, %v38_v0  ;;  %v23_v4 = vld [vmem:[%s339_s1 + $0x8] sm:$0xff]  ;;  %v41_v6 = vld [vmem:[%s339_s1 + $0x98] sm:$0xff] }
   0x3   :  { %v181_v7 = vpack.c.bf16 %v23_v4, %v22_v2  ;;  %v183_v8 = vpack.c.bf16 %v41_v6, %v40_v5  ;;  %v24_v9 = vld [vmem:[%s339_s1 + $0x10] sm:$0xff]  ;;  %v25_v10 = vld [vmem:[%s339_s1 + $0x18] sm:$0xff]  ;;  %v42_v11 = vld [vmem:[%s339_s1 + $0xa0] sm:$0xff] }
   0x4   :  { %180 = vmatprep.subr.bf16.mxu0 %v179_v3  ;;  %v43_v12 = vld [vmem:[%s339_s1 + $0xa8] sm:$0xff]  ;;  %v185_v13 = vpack.c.bf16 %v25_v10, %v24_v9  ;;  %v26_v15 = vld [vmem:[%s339_s1 + $0x20] sm:$0xff]  ;;  %v44_v17 = vld [vmem:[%s339_s1 + $0xb0] sm:$0xff] }
   0x5   :  { %182 = vmatpush3.bf16.msra.mxu0 %v181_v7  ;;  %v187_v14 = vpack.c.bf16 %v43_v12, %v42_v11  ;;  %v27_v16 = vld [vmem:[%s339_s1 + $0x28] sm:$0xff]  ;;  %v45_v18 = vld [vmem:[%s339_s1 + $0xb8] sm:$0xff]  ;;  %v28_v21 = vld [vmem:[%s339_s1 + $0x30] sm:$0xff] }
   0x6   :  { %184 = vmatprep.subr.bf16.mxu0 %v183_v8  ;;  %v189_v19 = vpack.c.bf16 %v27_v16, %v26_v15  ;;  %v191_v20 = vpack.c.bf16 %v45_v18, %v44_v17  ;;  %v29_v22 = vld [vmem:[%s339_s1 + $0x38] sm:$0xff]  ;;  %v46_v23 = vld [vmem:[%s339_s1 + $0xc0] sm:$0xff]  ;;  %v47_v24 = vld [vmem:[%s339_s1 + $0xc8] sm:$0xff] }
   0x7   :  { %v21_v25 = vld [vmem:[%s340_s0 + $0x8] sm:$0xff]  ;;  %v193_v26 = vpack.c.bf16 %v29_v22, %v28_v21  ;;  %v195_v27 = vpack.c.bf16 %v47_v24, %v46_v23  ;;  %v30_v28 = vld [vmem:[%s339_s1 + $0x40] sm:$0xff]  ;;  %v48_v30 = vld [vmem:[%s339_s1 + $0xd0] sm:$0xff] }
   0x8   :  { %118 = vmatprep.mubr.f32.mxu0 %v21_v25  ;;  %v31_v29 = vld [vmem:[%s339_s1 + $0x48] sm:$0xff]  ;;  %v49_v31 = vld [vmem:[%s339_s1 + $0xd8] sm:$0xff]  ;;  %v32_v34 = vld [vmem:[%s339_s1 + $0x50] sm:$0xff] }
   0x9   :  { %186 = vmatpush3.bf16.msra.mxu0 %v185_v13  ;;  %v197_v32 = vpack.c.bf16 %v31_v29, %v30_v28  ;;  %v199_v33 = vpack.c.bf16 %v49_v31, %v48_v30  ;;  %v33_v35 = vld [vmem:[%s339_s1 + $0x58] sm:$0xff]  ;;  %v50_v36 = vld [vmem:[%s339_s1 + $0xe0] sm:$0xff]  ;;  %v51_v37 = vld [vmem:[%s339_s1 + $0xe8] sm:$0xff] }
   0xa   :  { %188 = vmatprep.subr.bf16.mxu0 %v187_v14  ;;  %v201_v38 = vpack.c.bf16 %v33_v35, %v32_v34  ;;  %v203_v39 = vpack.c.bf16 %v51_v37, %v50_v36  ;;  %v34_v40 = vld [vmem:[%s339_s1 + $0x60] sm:$0xff]  ;;  %v35_v41 = vld [vmem:[%s339_s1 + $0x68] sm:$0xff]  ;;  %v52_v42 = vld [vmem:[%s339_s1 + $0xf0] sm:$0xff] }
   0xb   :  { %v53_v43 = vld [vmem:[%s339_s1 + $0xf8] sm:$0xff]  ;;  %v205_v44 = vpack.c.bf16 %v35_v41, %v34_v40  ;;  %v36_v46 = vld [vmem:[%s339_s1 + $0x70] sm:$0xff]  ;;  %v20_v49 = vld [vmem:[%s340_s0] sm:$0xff] }
   0xc   :  { %v207_v45 = vpack.c.bf16 %v53_v43, %v52_v42  ;;  %v37_v47 = vld [vmem:[%s339_s1 + $0x78] sm:$0xff]  ;;  %v143_v52 = vld [vmem:[%s341_s2] ss:$0 sm:$0xff] }
   0xd   :  { %190 = vmatpush3.bf16.msra.mxu0 %v189_v19  ;;  %v209_v48 = vpack.c.bf16 %v37_v47, %v36_v46 }
   0xe   :  { %192 = vmatprep.subr.bf16.mxu0 %v191_v20 }
  0x11   :  { %194 = vmatpush3.bf16.msra.mxu0 %v193_v26 }
  0x12   :  { %196 = vmatprep.subr.bf16.mxu0 %v195_v27 }
  0x15   :  { %198 = vmatpush3.bf16.msra.mxu0 %v197_v32 }
  0x16   :  { %200 = vmatprep.subr.bf16.mxu0 %v199_v33 }
  0x19   :  { %202 = vmatpush3.bf16.msra.mxu0 %v201_v38 }
  0x1a   :  { %204 = vmatprep.subr.bf16.mxu0 %v203_v39 }
  0x1d   :  { %206 = vmatpush3.bf16.msra.mxu0 %v205_v44 }
  0x1e   :  { %208 = vmatprep.subr.bf16.mxu0 %v207_v45 }
  0x21   :  { %210 = vmatpush3.bf16.msra.mxu0 %v209_v48 }
  0x24   :  { %119 = vmatmul.mubr.f32.vlgmr.msra.gmra.mrb[0].mxu0 %v20_v49 }
  0xf7   :  { %v176_v50 = vpop.f32.mrb[0].mxu0 }
  0xf8   :  { %v177_v51 = vpop.f32.mrb[1].mxu0 }
  0xf9   :  { %v178_v53 = vadd.f32 %v177_v51, %v176_v50 }
  0xfb   :  { %v137_v54 = vadd.f32 %v178_v53, %v143_v52 }
  0xfd   :  { %138 = vst [vmem:[%s342_s3] sm:$0xff] %v137_v54 }

// kernel: adda_forward.13
= control target key start
LH: loop header
LB: loop body
LE: loop exit
PB: predicated region body
PF: predicated region fallthrough
CT: control target
= control target key end

     0   :  { %s1385_s12 = smov 0   ;;  %s1387_s13 = smov 0   ;;  %s1724_s0 = inlined_call_operand.vmem [shape: f32[512,128], index: 0, kind: input, shape index: {}]   ;;  %s1725_s1 = inlined_call_operand.vmem [shape: f32[128,256], index: 1, kind: input, shape index: {}]   ;;  %s1726_s2 = inlined_call_operand.vmem [shape: f32[1,256], index: 2, kind: input, shape index: {}]   ;;  %s1727_s3 = inlined_call_operand.vmem [shape: f32[512,256], index: 3, kind: output, shape index: {}]  }
   0x1   :  { %s1389_s14 = smov 0  }
   0x2 LB: > { %s32_s15 = sadd.s32 1, %s1358_s13  ;;  %p1258_p0 = scmp.ge.s32.totalorder %s1362_s14, 1  ;;  %s1362_s14 = sphi %s1389_s14, %s13_s14   ;;  %s1358_s13 = sphi %s1387_s13, %s1729_s13   ;;  %s1354_s12 = sphi %s1385_s12, %s1728_s12  }
   0x3   : > { %p34_p1 = scmp.ge.s32.totalorder %s32_s15, 2  ;;  %p193_p2 = scmp.lt.s32.totalorder %s1362_s14, 3 }
   0x5   : > { %s1731_s15 = smov (%p34_p1, %s32_s15), 0  ;;  %p194_p3 = pnand %p1258_p0, %p193_p2 }
   0x6   : > { %v442_v0 = vld [vmem:[%s1725_s1 + $0x8] sm:$0xff] (!%p194_p3)  ;;  %v444_v1 = vld [vmem:[%s1725_s1 + $0x18] sm:$0xff] (!%p194_p3)  ;;  %v441_v2 = vld [vmem:[%s1725_s1] sm:$0xff] (!%p194_p3)  ;;  %v1364_v7 = vmov (!%p194_p3), 0.0   ;;  %s1259_s10 = sshll.u32 (!%p194_p3), %s1354_s12, 5 }
   0x7   : > { %197 = sbr.rel (%p194_p3) target bundleno = 319 (0x13f), region = 32  ;;  %v1267_v3 = vpack.c.bf16 (!%p194_p3), %v444_v1, %v442_v0  ;;  %v443_v4 = vld [vmem:[%s1725_s1 + $0x10] sm:$0xff] (!%p194_p3)  ;;  %v446_v5 = vld [vmem:[%s1725_s1 + $0x28] sm:$0xff] (!%p194_p3)  ;;  %v448_v6 = vld [vmem:[%s1725_s1 + $0x38] sm:$0xff] (!%p194_p3)  ;;  %537 = vmatprep.mubr.f32.mxu0 (!%p194_p3), %v1364_v7  ;;  %633 = vmatprep.mubr.f32.mxu1 (!%p194_p3), %v1364_v7  ;;  %p240_p4 = scmp.lt.s32.totalorder (!%p194_p3), %s1259_s10, 63 }
   0x8   : > { %v1269_v8 = vpack.c.bf16 (!%p194_p3), %v443_v4, %v441_v2  ;;  %v1271_v9 = vpack.c.bf16 (!%p194_p3), %v448_v6, %v446_v5  ;;  %v445_v10 = vld [vmem:[%s1725_s1 + $0x20] sm:$0xff] (!%p194_p3)  ;;  %v447_v11 = vld [vmem:[%s1725_s1 + $0x30] sm:$0xff] (!%p194_p3)  ;;  %v450_v12 = vld [vmem:[%s1725_s1 + $0x48] sm:$0xff] (!%p194_p3) }
   0x9   : > { %1268 = vmatprep.subr.bf16.mxu0 (!%p194_p3), %v1267_v3  ;;  %1299 = vmatprep.subr.bf16.mxu1 (!%p194_p3), %v1267_v3  ;;  %v452_v13 = vld [vmem:[%s1725_s1 + $0x58] sm:$0xff] (!%p194_p3)  ;;  %v1273_v14 = vpack.c.bf16 (!%p194_p3), %v447_v11, %v445_v10  ;;  %v449_v16 = vld [vmem:[%s1725_s1 + $0x40] sm:$0xff] (!%p194_p3)  ;;  %v451_v17 = vld [vmem:[%s1725_s1 + $0x50] sm:$0xff] (!%p194_p3) }
   0xa   : > { %1270 = vmatpush1.bf16.msra.mxu0 (!%p194_p3), %v1269_v8  ;;  %1307 = vmatpush1.bf16.msra.mxu1 (!%p194_p3), %v1269_v8  ;;  %v1275_v15 = vpack.c.bf16 (!%p194_p3), %v452_v13, %v450_v12  ;;  %v454_v18 = vld [vmem:[%s1725_s1 + $0x68] sm:$0xff] (!%p194_p3)  ;;  %v456_v19 = vld [vmem:[%s1725_s1 + $0x78] sm:$0xff] (!%p194_p3)  ;;  %v1277_v20 = vpack.c.bf16 (!%p194_p3), %v451_v17, %v449_v16  ;;  %v453_v22 = vld [vmem:[%s1725_s1 + $0x60] sm:$0xff] (!%p194_p3) }
   0xb   : > { %1272 = vmatprep.subr.bf16.mxu0 (!%p194_p3), %v1271_v9  ;;  %1300 = vmatprep.subr.bf16.mxu1 (!%p194_p3), %v1271_v9  ;;  %v1279_v21 = vpack.c.bf16 (!%p194_p3), %v456_v19, %v454_v18  ;;  %v455_v23 = vld [vmem:[%s1725_s1 + $0x70] sm:$0xff] (!%p194_p3)  ;;  %v458_v24 = vld [vmem:[%s1725_s1 + $0x88] sm:$0xff] (!%p194_p3)  ;;  %v460_v25 = vld [vmem:[%s1725_s1 + $0x98] sm:$0xff] (!%p194_p3)  ;;  %v927_v18 = vlaneseq (!%p194_p3) }
   0xc   : > { %v1281_v26 = vpack.c.bf16 (!%p194_p3), %v455_v23, %v453_v22  ;;  %v1283_v27 = vpack.c.bf16 (!%p194_p3), %v460_v25, %v458_v24  ;;  %v457_v28 = vld [vmem:[%s1725_s1 + $0x80] sm:$0xff] (!%p194_p3)  ;;  %v459_v29 = vld [vmem:[%s1725_s1 + $0x90] sm:$0xff] (!%p194_p3)  ;;  %v462_v30 = vld [vmem:[%s1725_s1 + $0xa8] sm:$0xff] (!%p194_p3) }
   0xd   : > { %v464_v31 = vld [vmem:[%s1725_s1 + $0xb8] sm:$0xff] (!%p194_p3)  ;;  %v1285_v32 = vpack.c.bf16 (!%p194_p3), %v459_v29, %v457_v28  ;;  %v461_v34 = vld [vmem:[%s1725_s1 + $0xa0] sm:$0xff] (!%p194_p3)  ;;  %v463_v35 = vld [vmem:[%s1725_s1 + $0xb0] sm:$0xff] (!%p194_p3)  ;;  %v928_v19 = vshrl.u32 (!%p194_p3), %v927_v18, 7 }
   0xe   : > { %1274 = vmatpush1.bf16.msra.mxu0 %v1273_v14  ;;  %1308 = vmatpush1.bf16.msra.mxu1 %v1273_v14  ;;  %v1287_v33 = vpack.c.bf16 %v464_v31, %v462_v30  ;;  %v466_v36 = vld [vmem:[%s1725_s1 + $0xc8] sm:$0xff]  ;;  %v468_v37 = vld [vmem:[%s1725_s1 + $0xd8] sm:$0xff]  ;;  %v1289_v38 = vpack.c.bf16 %v463_v35, %v461_v34  ;;  %v465_v40 = vld [vmem:[%s1725_s1 + $0xc0] sm:$0xff]  ;;  %s1733_s10 = smov (!%p240_p4, %s1259_s10), 63 }
   0xf   : > { %1276 = vmatprep.subr.bf16.mxu0 %v1275_v15  ;;  %1301 = vmatprep.subr.bf16.mxu1 %v1275_v15  ;;  %v1291_v39 = vpack.c.bf16 %v468_v37, %v466_v36  ;;  %v467_v41 = vld [vmem:[%s1725_s1 + $0xd0] sm:$0xff]  ;;  %v470_v42 = vld [vmem:[%s1725_s1 + $0xe8] sm:$0xff]  ;;  %v472_v43 = vld [vmem:[%s1725_s1 + $0xf8] sm:$0xff]  ;;  %s1260_s7 = sshll.u32 %s1733_s10, 3  ;;  %v933_v22 = vsub.s32 1, %v928_v19  ;;  %s1266_s18 = sshll.u32 %s1733_s10, 4 }
  0x10   : > { %v1293_v44 = vpack.c.bf16 %v467_v41, %v465_v40  ;;  %v1295_v45 = vpack.c.bf16 %v472_v43, %v470_v42  ;;  %v469_v46 = vld [vmem:[%s1725_s1 + $0xe0] sm:$0xff]  ;;  %v471_v47 = vld [vmem:[%s1725_s1 + $0xf0] sm:$0xff]  ;;  %s1510_s11 = scalar_lea.vmem %s1724_s0, %s1260_s7  ;;  %s1587_s21 = scalar_lea.vmem %s1727_s3, %s1266_s18 }
  0x11   : > { %v1297_v48 = vpack.c.bf16 %v471_v47, %v469_v46  ;;  %v409_v49 = vld [vmem:[%s1510_s11] sm:$0xff]  ;;  %v410_v51 = vld [vmem:[%s1510_s11 + $0x8] sm:$0xff]  ;;  %v411_v53 = vld [vmem:[%s1510_s11 + $0x10] sm:$0xff] }
  0x12   : > { %1278 = vmatpush1.bf16.msra.mxu0 %v1277_v20  ;;  %1309 = vmatpush1.bf16.msra.mxu1 %v1277_v20  ;;  %v425_v50 = vld [vmem:[%s1510_s11 + $0x80] sm:$0xff]  ;;  %v426_v52 = vld [vmem:[%s1510_s11 + $0x88] sm:$0xff]  ;;  %v427_v54 = vld [vmem:[%s1510_s11 + $0x90] sm:$0xff]  ;;  %v929_v20 = vsub.s32 0, %v928_v19 }
  0x13   : > { %1280 = vmatprep.subr.bf16.mxu0 %v1279_v21  ;;  %1302 = vmatprep.subr.bf16.mxu1 %v1279_v21  ;;  %v412_v55 = vld [vmem:[%s1510_s11 + $0x18] sm:$0xff]  ;;  %v413_v57 = vld [vmem:[%s1510_s11 + $0x20] sm:$0xff]  ;;  %v414_v59 = vld [vmem:[%s1510_s11 + $0x28] sm:$0xff] }
  0x14   : > { %v428_v56 = vld [vmem:[%s1510_s11 + $0x98] sm:$0xff]  ;;  %v429_v58 = vld [vmem:[%s1510_s11 + $0xa0] sm:$0xff]  ;;  %v430_v60 = vld [vmem:[%s1510_s11 + $0xa8] sm:$0xff] }
  0x15   : > { %v415_v61 = vld [vmem:[%s1510_s11 + $0x30] sm:$0xff]  ;;  %v416_v63 = vld [vmem:[%s1510_s11 + $0x38] sm:$0xff]  ;;  %v417_v1 = vld [vmem:[%s1510_s11 + $0x40] sm:$0xff] }
  0x16   : > { %1282 = vmatpush1.bf16.msra.mxu0 %v1281_v26  ;;  %1310 = vmatpush1.bf16.msra.mxu1 %v1281_v26  ;;  %v431_v62 = vld [vmem:[%s1510_s11 + $0xb0] sm:$0xff]  ;;  %v432_v0 = vld [vmem:[%s1510_s11 + $0xb8] sm:$0xff]  ;;  %v433_v2 = vld [vmem:[%s1510_s11 + $0xc0] sm:$0xff] }
  0x17   : > { %1284 = vmatprep.subr.bf16.mxu0 %v1283_v27  ;;  %1303 = vmatprep.subr.bf16.mxu1 %v1283_v27  ;;  %v418_v3 = vld [vmem:[%s1510_s11 + $0x48] sm:$0xff]  ;;  %v419_v5 = vld [vmem:[%s1510_s11 + $0x50] sm:$0xff]  ;;  %v420_v8 = vld [vmem:[%s1510_s11 + $0x58] sm:$0xff] }
  0x18   : > { %v434_v4 = vld [vmem:[%s1510_s11 + $0xc8] sm:$0xff]  ;;  %v435_v6 = vld [vmem:[%s1510_s11 + $0xd0] sm:$0xff]  ;;  %v436_v9 = vld [vmem:[%s1510_s11 + $0xd8] sm:$0xff] }
  0x19   : > { %v421_v10 = vld [vmem:[%s1510_s11 + $0x60] sm:$0xff]  ;;  %v422_v12 = vld [vmem:[%s1510_s11 + $0x68] sm:$0xff]  ;;  %v423_v14 = vld [vmem:[%s1510_s11 + $0x70] sm:$0xff] }
  0x1a   : > { %1286 = vmatpush1.bf16.msra.mxu0 %v1285_v32  ;;  %1311 = vmatpush1.bf16.msra.mxu1 %v1285_v32  ;;  %v437_v11 = vld [vmem:[%s1510_s11 + $0xe0] sm:$0xff]  ;;  %v438_v13 = vld [vmem:[%s1510_s11 + $0xe8] sm:$0xff]  ;;  %v439_v15 = vld [vmem:[%s1510_s11 + $0xf0] sm:$0xff] }
  0x1b   : > { %1288 = vmatprep.subr.bf16.mxu0 %v1287_v33  ;;  %1304 = vmatprep.subr.bf16.mxu1 %v1287_v33  ;;  %v424_v16 = vld [vmem:[%s1510_s11 + $0x78] sm:$0xff]  ;;  %v925_v21 = vld [vmem:[%s1726_s2] sm:$0x3] }
  0x1c   : > { %v440_v17 = vld [vmem:[%s1510_s11 + $0xf8] sm:$0xff]  ;;  %v1577_v23 = vrot.slane %v925_v21, %v929_v20  ;;  %v1579_v24 = vrot.slane %v925_v21, %v933_v22 }
  0x1e   : > { %1290 = vmatpush1.bf16.msra.mxu0 %v1289_v38  ;;  %1312 = vmatpush1.bf16.msra.mxu1 %v1289_v38 }
  0x1f   : > { %1292 = vmatprep.subr.bf16.mxu0 %v1291_v39  ;;  %1305 = vmatprep.subr.bf16.mxu1 %v1291_v39 }
  0x22   : > { %1294 = vmatpush1.bf16.msra.mxu0 %v1293_v44  ;;  %1313 = vmatpush1.bf16.msra.mxu1 %v1293_v44 }
  0x23   : > { %1296 = vmatprep.subr.bf16.mxu0 %v1295_v45  ;;  %1306 = vmatprep.subr.bf16.mxu1 %v1295_v45 }
  0x26   : > { %1298 = vmatpush1.bf16.msra.mxu0 %v1297_v48  ;;  %1314 = vmatpush1.bf16.msra.mxu1 %v1297_v48 }
  0x29   : > { %538 = vmatmul.mubr.f32.vlgmr.msra.gmra.mrb[0].mxu0 %v409_v49  ;;  %634 = vmatmul.mubr.f32.vlgmr.msra.gmra.mrb[0].mxu1 %v425_v50 }
  0x2a   : > { %543 = vmatprep.mubr.f32.mxu0 %v1364_v7  ;;  %639 = vmatprep.mubr.f32.mxu1 %v1364_v7 }
  0x2d   : > { %544 = vmatmul.mubr.f32.gmra.mrb[2].mxu0 %v410_v51  ;;  %640 = vmatmul.mubr.f32.gmra.mrb[2].mxu1 %v426_v52 }
  0x2e   : > { %549 = vmatprep.mubr.f32.mxu0 %v1364_v7  ;;  %645 = vmatprep.mubr.f32.mxu1 %v1364_v7 }
  0x31   : > { %550 = vmatmul.mubr.f32.gmra.mrb[4].mxu0 %v411_v53  ;;  %646 = vmatmul.mubr.f32.gmra.mrb[4].mxu1 %v427_v54 }
  0x32   : > { %555 = vmatprep.mubr.f32.mxu0 %v1364_v7  ;;  %651 = vmatprep.mubr.f32.mxu1 %v1364_v7 }
  0x35   : > { %556 = vmatmul.mubr.f32.gmra.mrb[6].mxu0 %v412_v55  ;;  %652 = vmatmul.mubr.f32.gmra.mrb[6].mxu1 %v428_v56 }
  0x36   : > { %561 = vmatprep.mubr.f32.mxu0 %v1364_v7  ;;  %657 = vmatprep.mubr.f32.mxu1 %v1364_v7 }
  0x39   : > { %562 = vmatmul.mubr.f32.gmra.mrb[8].mxu0 %v413_v57  ;;  %658 = vmatmul.mubr.f32.gmra.mrb[8].mxu1 %v429_v58 }
  0x3a   : > { %567 = vmatprep.mubr.f32.mxu0 %v1364_v7  ;;  %663 = vmatprep.mubr.f32.mxu1 %v1364_v7 }
  0x3d   : > { %568 = vmatmul.mubr.f32.gmra.mrb[10].mxu0 %v414_v59  ;;  %664 = vmatmul.mubr.f32.gmra.mrb[10].mxu1 %v430_v60 }
  0x3e   : > { %573 = vmatprep.mubr.f32.mxu0 %v1364_v7  ;;  %669 = vmatprep.mubr.f32.mxu1 %v1364_v7 }
  0x41   : > { %574 = vmatmul.mubr.f32.gmra.mrb[12].mxu0 %v415_v61  ;;  %670 = vmatmul.mubr.f32.gmra.mrb[12].mxu1 %v431_v62 }
  0x42   : > { %579 = vmatprep.mubr.f32.mxu0 %v1364_v7  ;;  %675 = vmatprep.mubr.f32.mxu1 %v1364_v7 }
  0x45   : > { %580 = vmatmul.mubr.f32.gmra.mrb[14].mxu0 %v416_v63  ;;  %676 = vmatmul.mubr.f32.gmra.mrb[14].mxu1 %v432_v0 }
  0x46   : > { %585 = vmatprep.mubr.f32.mxu0 %v1364_v7  ;;  %681 = vmatprep.mubr.f32.mxu1 %v1364_v7 }
  0x49   : > { %586 = vmatmul.mubr.f32.gmra.mrb[16].mxu0 %v417_v1  ;;  %682 = vmatmul.mubr.f32.gmra.mrb[16].mxu1 %v433_v2 }
  0x4a   : > { %591 = vmatprep.mubr.f32.mxu0 %v1364_v7  ;;  %687 = vmatprep.mubr.f32.mxu1 %v1364_v7 }
  0x4d   : > { %592 = vmatmul.mubr.f32.gmra.mrb[18].mxu0 %v418_v3  ;;  %688 = vmatmul.mubr.f32.gmra.mrb[18].mxu1 %v434_v4 }
  0x4e   : > { %597 = vmatprep.mubr.f32.mxu0 %v1364_v7  ;;  %693 = vmatprep.mubr.f32.mxu1 %v1364_v7 }
  0x51   : > { %598 = vmatmul.mubr.f32.gmra.mrb[20].mxu0 %v419_v5  ;;  %694 = vmatmul.mubr.f32.gmra.mrb[20].mxu1 %v435_v6 }
  0x52   : > { %603 = vmatprep.mubr.f32.mxu0 %v1364_v7  ;;  %699 = vmatprep.mubr.f32.mxu1 %v1364_v7 }
  0x55   : > { %604 = vmatmul.mubr.f32.gmra.mrb[22].mxu0 %v420_v8  ;;  %700 = vmatmul.mubr.f32.gmra.mrb[22].mxu1 %v436_v9 }
  0x56   : > { %609 = vmatprep.mubr.f32.mxu0 %v1364_v7  ;;  %705 = vmatprep.mubr.f32.mxu1 %v1364_v7 }
  0x59   : > { %610 = vmatmul.mubr.f32.gmra.mrb[24].mxu0 %v421_v10  ;;  %706 = vmatmul.mubr.f32.gmra.mrb[24].mxu1 %v437_v11 }
  0x5a   : > { %615 = vmatprep.mubr.f32.mxu0 %v1364_v7  ;;  %711 = vmatprep.mubr.f32.mxu1 %v1364_v7 }
  0x5d   : > { %616 = vmatmul.mubr.f32.gmra.mrb[26].mxu0 %v422_v12  ;;  %712 = vmatmul.mubr.f32.gmra.mrb[26].mxu1 %v438_v13 }
  0x5e   : > { %621 = vmatprep.mubr.f32.mxu0 %v1364_v7  ;;  %717 = vmatprep.mubr.f32.mxu1 %v1364_v7 }
  0x61   : > { %622 = vmatmul.mubr.f32.gmra.mrb[28].mxu0 %v423_v14  ;;  %718 = vmatmul.mubr.f32.gmra.mrb[28].mxu1 %v439_v15 }
  0x62   : > { %627 = vmatprep.mubr.f32.mxu0 %v1364_v7  ;;  %723 = vmatprep.mubr.f32.mxu1 %v1364_v7 }
  0x65   : > { %628 = vmatmul.mubr.f32.gmra.mrb[30].mxu0 %v424_v16  ;;  %724 = vmatmul.mubr.f32.gmra.mrb[30].mxu1 %v440_v17 }
  0xfc   : > { %v539_v25 = vpop.f32.mrb[0].mxu0  ;;  %v635_v26 = vpop.f32.mrb[0].mxu1 }
  0xfd   : > { %v937_v7 = vadd.f32 %v1577_v23, %v539_v25  ;;  %v969_v27 = vadd.f32 %v1577_v23, %v635_v26  ;;  %v541_v28 = vpop.f32.mrb[1].mxu0  ;;  %v637_v29 = vpop.f32.mrb[1].mxu1 }
  0xfe   : > { %v938_v30 = vadd.f32 %v1579_v24, %v541_v28  ;;  %v970_v31 = vadd.f32 %v1579_v24, %v637_v29 }
  0xff   : > { %v1001_v32 = vmax.f32 %v937_v7, 0.0  ;;  %v1033_v33 = vmax.f32 %v969_v27, 0.0 }
 0x100   : > { %v1002_v34 = vmax.f32 %v938_v30, 0.0  ;;  %v1034_v35 = vmax.f32 %v970_v31, 0.0  ;;  %v545_v36 = vpop.f32.mrb[2].mxu0  ;;  %v641_v37 = vpop.f32.mrb[2].mxu1 }
 0x101   : > { %1065 = vst [vmem:[%s1587_s21] sm:$0xff] %v1001_v32  ;;  %1097 = vst [vmem:[%s1587_s21 + $0x100] sm:$0xff] %v1033_v33  ;;  %v939_v38 = vadd.f32 %v1577_v23, %v545_v36  ;;  %v971_v39 = vadd.f32 %v1577_v23, %v641_v37  ;;  %v547_v40 = vpop.f32.mrb[3].mxu0  ;;  %v643_v41 = vpop.f32.mrb[3].mxu1 }
 0x102   : > { %1066 = vst [vmem:[%s1587_s21 + $0x8] sm:$0xff] %v1002_v34  ;;  %1098 = vst [vmem:[%s1587_s21 + $0x108] sm:$0xff] %v1034_v35  ;;  %v940_v42 = vadd.f32 %v1579_v24, %v547_v40  ;;  %v972_v43 = vadd.f32 %v1579_v24, %v643_v41 }
 0x103   : > { %v1003_v44 = vmax.f32 %v939_v38, 0.0  ;;  %v1035_v45 = vmax.f32 %v971_v39, 0.0 }
 0x104   : > { %v1004_v46 = vmax.f32 %v940_v42, 0.0  ;;  %v1036_v47 = vmax.f32 %v972_v43, 0.0  ;;  %v551_v48 = vpop.f32.mrb[4].mxu0  ;;  %v647_v49 = vpop.f32.mrb[4].mxu1 }
 0x105   : > { %1067 = vst [vmem:[%s1587_s21 + $0x10] sm:$0xff] %v1003_v44  ;;  %1099 = vst [vmem:[%s1587_s21 + $0x110] sm:$0xff] %v1035_v45  ;;  %v941_v50 = vadd.f32 %v1577_v23, %v551_v48  ;;  %v973_v51 = vadd.f32 %v1577_v23, %v647_v49  ;;  %v553_v52 = vpop.f32.mrb[5].mxu0  ;;  %v649_v53 = vpop.f32.mrb[5].mxu1 }
 0x106   : > { %1068 = vst [vmem:[%s1587_s21 + $0x18] sm:$0xff] %v1004_v46  ;;  %1100 = vst [vmem:[%s1587_s21 + $0x118] sm:$0xff] %v1036_v47  ;;  %v942_v54 = vadd.f32 %v1579_v24, %v553_v52  ;;  %v974_v55 = vadd.f32 %v1579_v24, %v649_v53 }
 0x107   : > { %v1005_v56 = vmax.f32 %v941_v50, 0.0  ;;  %v1037_v57 = vmax.f32 %v973_v51, 0.0 }
 0x108   : > { %v1006_v58 = vmax.f32 %v942_v54, 0.0  ;;  %v1038_v59 = vmax.f32 %v974_v55, 0.0  ;;  %v557_v60 = vpop.f32.mrb[6].mxu0  ;;  %v653_v61 = vpop.f32.mrb[6].mxu1 }
 0x109   : > { %1069 = vst [vmem:[%s1587_s21 + $0x20] sm:$0xff] %v1005_v56  ;;  %1101 = vst [vmem:[%s1587_s21 + $0x120] sm:$0xff] %v1037_v57  ;;  %v943_v62 = vadd.f32 %v1577_v23, %v557_v60  ;;  %v975_v63 = vadd.f32 %v1577_v23, %v653_v61  ;;  %v559_v0 = vpop.f32.mrb[7].mxu0  ;;  %v655_v1 = vpop.f32.mrb[7].mxu1 }
 0x10a   : > { %1070 = vst [vmem:[%s1587_s21 + $0x28] sm:$0xff] %v1006_v58  ;;  %1102 = vst [vmem:[%s1587_s21 + $0x128] sm:$0xff] %v1038_v59  ;;  %v944_v2 = vadd.f32 %v1579_v24, %v559_v0  ;;  %v976_v3 = vadd.f32 %v1579_v24, %v655_v1 }
 0x10b   : > { %v1007_v4 = vmax.f32 %v943_v62, 0.0  ;;  %v1039_v5 = vmax.f32 %v975_v63, 0.0 }
 0x10c   : > { %v1008_v6 = vmax.f32 %v944_v2, 0.0  ;;  %v1040_v8 = vmax.f32 %v976_v3, 0.0  ;;  %v563_v9 = vpop.f32.mrb[8].mxu0  ;;  %v659_v10 = vpop.f32.mrb[8].mxu1 }
 0x10d   : > { %1071 = vst [vmem:[%s1587_s21 + $0x30] sm:$0xff] %v1007_v4  ;;  %1103 = vst [vmem:[%s1587_s21 + $0x130] sm:$0xff] %v1039_v5  ;;  %v945_v11 = vadd.f32 %v1577_v23, %v563_v9  ;;  %v977_v12 = vadd.f32 %v1577_v23, %v659_v10  ;;  %v565_v13 = vpop.f32.mrb[9].mxu0  ;;  %v661_v14 = vpop.f32.mrb[9].mxu1 }
 0x10e   : > { %1072 = vst [vmem:[%s1587_s21 + $0x38] sm:$0xff] %v1008_v6  ;;  %1104 = vst [vmem:[%s1587_s21 + $0x138] sm:$0xff] %v1040_v8  ;;  %v946_v15 = vadd.f32 %v1579_v24, %v565_v13  ;;  %v978_v16 = vadd.f32 %v1579_v24, %v661_v14 }
 0x10f   : > { %v1009_v17 = vmax.f32 %v945_v11, 0.0  ;;  %v1041_v18 = vmax.f32 %v977_v12, 0.0 }
 0x110   : > { %v1010_v19 = vmax.f32 %v946_v15, 0.0  ;;  %v1042_v20 = vmax.f32 %v978_v16, 0.0  ;;  %v569_v21 = vpop.f32.mrb[10].mxu0  ;;  %v665_v22 = vpop.f32.mrb[10].mxu1 }
 0x111   : > { %1073 = vst [vmem:[%s1587_s21 + $0x40] sm:$0xff] %v1009_v17  ;;  %1105 = vst [vmem:[%s1587_s21 + $0x140] sm:$0xff] %v1041_v18  ;;  %v947_v25 = vadd.f32 %v1577_v23, %v569_v21  ;;  %v979_v26 = vadd.f32 %v1577_v23, %v665_v22  ;;  %v571_v7 = vpop.f32.mrb[11].mxu0  ;;  %v667_v27 = vpop.f32.mrb[11].mxu1 }
 0x112   : > { %1074 = vst [vmem:[%s1587_s21 + $0x48] sm:$0xff] %v1010_v19  ;;  %1106 = vst [vmem:[%s1587_s21 + $0x148] sm:$0xff] %v1042_v20  ;;  %v948_v28 = vadd.f32 %v1579_v24, %v571_v7  ;;  %v980_v29 = vadd.f32 %v1579_v24, %v667_v27 }
 0x113   : > { %v1011_v30 = vmax.f32 %v947_v25, 0.0  ;;  %v1043_v31 = vmax.f32 %v979_v26, 0.0 }
 0x114   : > { %v1012_v32 = vmax.f32 %v948_v28, 0.0  ;;  %v1044_v33 = vmax.f32 %v980_v29, 0.0  ;;  %v575_v34 = vpop.f32.mrb[12].mxu0  ;;  %v671_v35 = vpop.f32.mrb[12].mxu1 }
 0x115   : > { %1075 = vst [vmem:[%s1587_s21 + $0x50] sm:$0xff] %v1011_v30  ;;  %1107 = vst [vmem:[%s1587_s21 + $0x150] sm:$0xff] %v1043_v31  ;;  %v949_v36 = vadd.f32 %v1577_v23, %v575_v34  ;;  %v981_v37 = vadd.f32 %v1577_v23, %v671_v35  ;;  %v577_v38 = vpop.f32.mrb[13].mxu0  ;;  %v673_v39 = vpop.f32.mrb[13].mxu1 }
 0x116   : > { %1076 = vst [vmem:[%s1587_s21 + $0x58] sm:$0xff] %v1012_v32  ;;  %1108 = vst [vmem:[%s1587_s21 + $0x158] sm:$0xff] %v1044_v33  ;;  %v950_v40 = vadd.f32 %v1579_v24, %v577_v38  ;;  %v982_v41 = vadd.f32 %v1579_v24, %v673_v39 }
 0x117   : > { %v1013_v42 = vmax.f32 %v949_v36, 0.0  ;;  %v1045_v43 = vmax.f32 %v981_v37, 0.0 }
 0x118   : > { %v1014_v44 = vmax.f32 %v950_v40, 0.0  ;;  %v1046_v45 = vmax.f32 %v982_v41, 0.0  ;;  %v581_v46 = vpop.f32.mrb[14].mxu0  ;;  %v677_v47 = vpop.f32.mrb[14].mxu1 }
 0x119   : > { %1077 = vst [vmem:[%s1587_s21 + $0x60] sm:$0xff] %v1013_v42  ;;  %1109 = vst [vmem:[%s1587_s21 + $0x160] sm:$0xff] %v1045_v43  ;;  %v951_v48 = vadd.f32 %v1577_v23, %v581_v46  ;;  %v983_v49 = vadd.f32 %v1577_v23, %v677_v47  ;;  %v583_v50 = vpop.f32.mrb[15].mxu0  ;;  %v679_v51 = vpop.f32.mrb[15].mxu1 }
 0x11a   : > { %1078 = vst [vmem:[%s1587_s21 + $0x68] sm:$0xff] %v1014_v44  ;;  %1110 = vst [vmem:[%s1587_s21 + $0x168] sm:$0xff] %v1046_v45  ;;  %v952_v52 = vadd.f32 %v1579_v24, %v583_v50  ;;  %v984_v53 = vadd.f32 %v1579_v24, %v679_v51 }
 0x11b   : > { %v1015_v54 = vmax.f32 %v951_v48, 0.0  ;;  %v1047_v55 = vmax.f32 %v983_v49, 0.0 }
 0x11c   : > { %v1016_v56 = vmax.f32 %v952_v52, 0.0  ;;  %v1048_v57 = vmax.f32 %v984_v53, 0.0  ;;  %v587_v58 = vpop.f32.mrb[16].mxu0  ;;  %v683_v59 = vpop.f32.mrb[16].mxu1 }
 0x11d   : > { %1079 = vst [vmem:[%s1587_s21 + $0x70] sm:$0xff] %v1015_v54  ;;  %1111 = vst [vmem:[%s1587_s21 + $0x170] sm:$0xff] %v1047_v55  ;;  %v953_v60 = vadd.f32 %v1577_v23, %v587_v58  ;;  %v985_v61 = vadd.f32 %v1577_v23, %v683_v59  ;;  %v589_v62 = vpop.f32.mrb[17].mxu0  ;;  %v685_v63 = vpop.f32.mrb[17].mxu1 }
 0x11e   : > { %1080 = vst [vmem:[%s1587_s21 + $0x78] sm:$0xff] %v1016_v56  ;;  %1112 = vst [vmem:[%s1587_s21 + $0x178] sm:$0xff] %v1048_v57  ;;  %v954_v0 = vadd.f32 %v1579_v24, %v589_v62  ;;  %v986_v1 = vadd.f32 %v1579_v24, %v685_v63 }
 0x11f   : > { %v1017_v2 = vmax.f32 %v953_v60, 0.0  ;;  %v1049_v3 = vmax.f32 %v985_v61, 0.0 }
 0x120   : > { %v1018_v4 = vmax.f32 %v954_v0, 0.0  ;;  %v1050_v5 = vmax.f32 %v986_v1, 0.0  ;;  %v593_v6 = vpop.f32.mrb[18].mxu0  ;;  %v689_v8 = vpop.f32.mrb[18].mxu1 }
 0x121   : > { %1081 = vst [vmem:[%s1587_s21 + $0x80] sm:$0xff] %v1017_v2  ;;  %1113 = vst [vmem:[%s1587_s21 + $0x180] sm:$0xff] %v1049_v3  ;;  %v955_v9 = vadd.f32 %v1577_v23, %v593_v6  ;;  %v987_v10 = vadd.f32 %v1577_v23, %v689_v8  ;;  %v595_v11 = vpop.f32.mrb[19].mxu0  ;;  %v691_v12 = vpop.f32.mrb[19].mxu1 }
 0x122   : > { %1082 = vst [vmem:[%s1587_s21 + $0x88] sm:$0xff] %v1018_v4  ;;  %1114 = vst [vmem:[%s1587_s21 + $0x188] sm:$0xff] %v1050_v5  ;;  %v956_v13 = vadd.f32 %v1579_v24, %v595_v11  ;;  %v988_v14 = vadd.f32 %v1579_v24, %v691_v12 }
 0x123   : > { %v1019_v15 = vmax.f32 %v955_v9, 0.0  ;;  %v1051_v16 = vmax.f32 %v987_v10, 0.0 }
 0x124   : > { %v1020_v17 = vmax.f32 %v956_v13, 0.0  ;;  %v1052_v18 = vmax.f32 %v988_v14, 0.0  ;;  %v599_v19 = vpop.f32.mrb[20].mxu0  ;;  %v695_v20 = vpop.f32.mrb[20].mxu1 }
 0x125   : > { %1083 = vst [vmem:[%s1587_s21 + $0x90] sm:$0xff] %v1019_v15  ;;  %1115 = vst [vmem:[%s1587_s21 + $0x190] sm:$0xff] %v1051_v16  ;;  %v957_v21 = vadd.f32 %v1577_v23, %v599_v19  ;;  %v989_v22 = vadd.f32 %v1577_v23, %v695_v20  ;;  %v601_v25 = vpop.f32.mrb[21].mxu0  ;;  %v697_v26 = vpop.f32.mrb[21].mxu1 }
 0x126   : > { %1084 = vst [vmem:[%s1587_s21 + $0x98] sm:$0xff] %v1020_v17  ;;  %1116 = vst [vmem:[%s1587_s21 + $0x198] sm:$0xff] %v1052_v18  ;;  %v958_v7 = vadd.f32 %v1579_v24, %v601_v25  ;;  %v990_v27 = vadd.f32 %v1579_v24, %v697_v26 }
 0x127   : > { %v1021_v28 = vmax.f32 %v957_v21, 0.0  ;;  %v1053_v29 = vmax.f32 %v989_v22, 0.0 }
 0x128   : > { %v1022_v30 = vmax.f32 %v958_v7, 0.0  ;;  %v1054_v31 = vmax.f32 %v990_v27, 0.0  ;;  %v605_v32 = vpop.f32.mrb[22].mxu0  ;;  %v701_v33 = vpop.f32.mrb[22].mxu1 }
 0x129   : > { %1085 = vst [vmem:[%s1587_s21 + $0xa0] sm:$0xff] %v1021_v28  ;;  %1117 = vst [vmem:[%s1587_s21 + $0x1a0] sm:$0xff] %v1053_v29  ;;  %v959_v34 = vadd.f32 %v1577_v23, %v605_v32  ;;  %v991_v35 = vadd.f32 %v1577_v23, %v701_v33  ;;  %v607_v36 = vpop.f32.mrb[23].mxu0  ;;  %v703_v37 = vpop.f32.mrb[23].mxu1 }
 0x12a   : > { %1086 = vst [vmem:[%s1587_s21 + $0xa8] sm:$0xff] %v1022_v30  ;;  %1118 = vst [vmem:[%s1587_s21 + $0x1a8] sm:$0xff] %v1054_v31  ;;  %v960_v38 = vadd.f32 %v1579_v24, %v607_v36  ;;  %v992_v39 = vadd.f32 %v1579_v24, %v703_v37 }
 0x12b   : > { %v1023_v40 = vmax.f32 %v959_v34, 0.0  ;;  %v1055_v41 = vmax.f32 %v991_v35, 0.0 }
 0x12c   : > { %v1024_v42 = vmax.f32 %v960_v38, 0.0  ;;  %v1056_v43 = vmax.f32 %v992_v39, 0.0  ;;  %v611_v44 = vpop.f32.mrb[24].mxu0  ;;  %v707_v45 = vpop.f32.mrb[24].mxu1 }
 0x12d   : > { %1087 = vst [vmem:[%s1587_s21 + $0xb0] sm:$0xff] %v1023_v40  ;;  %1119 = vst [vmem:[%s1587_s21 + $0x1b0] sm:$0xff] %v1055_v41  ;;  %v961_v46 = vadd.f32 %v1577_v23, %v611_v44  ;;  %v993_v47 = vadd.f32 %v1577_v23, %v707_v45  ;;  %v613_v48 = vpop.f32.mrb[25].mxu0  ;;  %v709_v49 = vpop.f32.mrb[25].mxu1 }
 0x12e   : > { %1088 = vst [vmem:[%s1587_s21 + $0xb8] sm:$0xff] %v1024_v42  ;;  %1120 = vst [vmem:[%s1587_s21 + $0x1b8] sm:$0xff] %v1056_v43  ;;  %v962_v50 = vadd.f32 %v1579_v24, %v613_v48  ;;  %v994_v51 = vadd.f32 %v1579_v24, %v709_v49 }
 0x12f   : > { %v1025_v52 = vmax.f32 %v961_v46, 0.0  ;;  %v1057_v53 = vmax.f32 %v993_v47, 0.0 }
 0x130   : > { %v1026_v54 = vmax.f32 %v962_v50, 0.0  ;;  %v1058_v55 = vmax.f32 %v994_v51, 0.0  ;;  %v617_v56 = vpop.f32.mrb[26].mxu0  ;;  %v713_v57 = vpop.f32.mrb[26].mxu1 }
 0x131   : > { %1089 = vst [vmem:[%s1587_s21 + $0xc0] sm:$0xff] %v1025_v52  ;;  %1121 = vst [vmem:[%s1587_s21 + $0x1c0] sm:$0xff] %v1057_v53  ;;  %v963_v58 = vadd.f32 %v1577_v23, %v617_v56  ;;  %v995_v59 = vadd.f32 %v1577_v23, %v713_v57  ;;  %v619_v60 = vpop.f32.mrb[27].mxu0  ;;  %v715_v61 = vpop.f32.mrb[27].mxu1 }
 0x132   : > { %1090 = vst [vmem:[%s1587_s21 + $0xc8] sm:$0xff] %v1026_v54  ;;  %1122 = vst [vmem:[%s1587_s21 + $0x1c8] sm:$0xff] %v1058_v55  ;;  %v964_v62 = vadd.f32 %v1579_v24, %v619_v60  ;;  %v996_v63 = vadd.f32 %v1579_v24, %v715_v61 }
 0x133   : > { %v1027_v0 = vmax.f32 %v963_v58, 0.0  ;;  %v1059_v1 = vmax.f32 %v995_v59, 0.0 }
 0x134   : > { %v1028_v2 = vmax.f32 %v964_v62, 0.0  ;;  %v1060_v3 = vmax.f32 %v996_v63, 0.0  ;;  %v623_v4 = vpop.f32.mrb[28].mxu0  ;;  %v719_v5 = vpop.f32.mrb[28].mxu1 }
 0x135   : > { %1091 = vst [vmem:[%s1587_s21 + $0xd0] sm:$0xff] %v1027_v0  ;;  %1123 = vst [vmem:[%s1587_s21 + $0x1d0] sm:$0xff] %v1059_v1  ;;  %v965_v6 = vadd.f32 %v1577_v23, %v623_v4  ;;  %v997_v8 = vadd.f32 %v1577_v23, %v719_v5  ;;  %v625_v9 = vpop.f32.mrb[29].mxu0  ;;  %v721_v10 = vpop.f32.mrb[29].mxu1 }
 0x136   : > { %1092 = vst [vmem:[%s1587_s21 + $0xd8] sm:$0xff] %v1028_v2  ;;  %1124 = vst [vmem:[%s1587_s21 + $0x1d8] sm:$0xff] %v1060_v3  ;;  %v966_v11 = vadd.f32 %v1579_v24, %v625_v9  ;;  %v998_v12 = vadd.f32 %v1579_v24, %v721_v10 }
 0x137   : > { %v1029_v13 = vmax.f32 %v965_v6, 0.0  ;;  %v1061_v14 = vmax.f32 %v997_v8, 0.0 }
 0x138   : > { %v1030_v15 = vmax.f32 %v966_v11, 0.0  ;;  %v1062_v16 = vmax.f32 %v998_v12, 0.0  ;;  %v629_v17 = vpop.f32.mrb[30].mxu0  ;;  %v725_v18 = vpop.f32.mrb[30].mxu1 }
 0x139   : > { %1093 = vst [vmem:[%s1587_s21 + $0xe0] sm:$0xff] %v1029_v13  ;;  %1125 = vst [vmem:[%s1587_s21 + $0x1e0] sm:$0xff] %v1061_v14  ;;  %v967_v19 = vadd.f32 %v1577_v23, %v629_v17  ;;  %v999_v20 = vadd.f32 %v1577_v23, %v725_v18  ;;  %v631_v21 = vpop.f32.mrb[31].mxu0  ;;  %v727_v22 = vpop.f32.mrb[31].mxu1 }
 0x13a   : > { %1094 = vst [vmem:[%s1587_s21 + $0xe8] sm:$0xff] %v1030_v15  ;;  %1126 = vst [vmem:[%s1587_s21 + $0x1e8] sm:$0xff] %v1062_v16  ;;  %v968_v25 = vadd.f32 %v1579_v24, %v631_v21  ;;  %v1000_v26 = vadd.f32 %v1579_v24, %v727_v22 }
 0x13b   : > { %v1031_v7 = vmax.f32 %v967_v19, 0.0  ;;  %v1063_v27 = vmax.f32 %v999_v20, 0.0 }
 0x13c   : > { %v1032_v28 = vmax.f32 %v968_v25, 0.0  ;;  %v1064_v29 = vmax.f32 %v1000_v26, 0.0 }
 0x13d   : > { %1095 = vst [vmem:[%s1587_s21 + $0xf0] sm:$0xff] %v1031_v7  ;;  %1127 = vst [vmem:[%s1587_s21 + $0x1f0] sm:$0xff] %v1063_v27 }
 0x13e   : > { %1096 = vst [vmem:[%s1587_s21 + $0xf8] sm:$0xff] %v1032_v28  ;;  %1128 = vst [vmem:[%s1587_s21 + $0x1f8] sm:$0xff] %v1064_v29 }
 0x13f PF: > { %s13_s14 = sadd.s32 1, %s1362_s14   ;;  %s1728_s12 = smov %s1358_s13 }
 0x140   : > { %p10_p5 = scmp.ge.s32.totalorder %s13_s14, 4   ;;  %s1729_s13 = smov %s1731_s15 }
 0x142   :  { %12 = sbr.rel (!%p10_p5) target bundleno = 2 (0x2), region = 76 }

// kernel: adda_forward.14
= control target key start
LH: loop header
LB: loop body
LE: loop exit
PB: predicated region body
PF: predicated region fallthrough
CT: control target
= control target key end

     0   :  { %s2236_s12 = smov 0   ;;  %s2238_s13 = smov 0   ;;  %s2990_s0 = inlined_call_operand.vmem [shape: f32[104,3072], index: 0, kind: input, shape index: {}]   ;;  %s2991_s1 = inlined_call_operand.vmem [shape: f32[3072,256], index: 1, kind: input, shape index: {}]   ;;  %s2992_s2 = inlined_call_operand.vmem [shape: f32[1,256], index: 2, kind: input, shape index: {}]   ;;  %s2993_s3 = inlined_call_operand.vmem [shape: f32[104,256], index: 3, kind: output, shape index: {}]  }
   0x1   :  { %s2240_s14 = smov 0   ;;  %s2242_s15 = smov 0  }
   0x2   :  { %s2244_s16 = smov 0  }
   0x3 LB: > { %s25_s17 = sadd.s32 1, %s2209_s15  ;;  %p48_p1 = scmp.ne.s32.totalorder %s2201_s13, %s2197_s12  ;;  %s2213_s16 = sphi %s2244_s16, %s13_s16   ;;  %s2209_s15 = sphi %s2242_s15, %s2997_s15   ;;  %s2205_s14 = sphi %s2240_s14, %s2996_s14   ;;  %s2201_s13 = sphi %s2238_s13, %s2995_s13   ;;  %s2197_s12 = sphi %s2236_s12, %s2994_s12  }
   0x4   : > { %p26_p0 = scmp.ge.s32.totalorder %s25_s17, 3  ;;  %p49_p2 = scmp.eq.s32.totalorder %s2213_s16, 0 }
   0x5   : > { %s41_s19 = sadd.s32 1, %s2201_s13  ;;  %p1783_p5 = scmp.ge.s32.totalorder %s2213_s16, 3 }
   0x6   : > { %s2999_s17 = smov (%p26_p0, %s25_s17), 0  ;;  %p50_p3 = por %p49_p2, %p48_p1 }
   0x7   : > { %s37_s18 = ssub.s32 %s2209_s15, %s2999_s17  ;;  %164 = sbr.rel (%p1783_p5) target bundleno = 71 (0x47), region = 20 }
   0x8   : > { %p39_p4 = scmp.eq.s32.totalorder %s37_s18, 0 }
   0xa   : > { %s2271_s20 = scalar_select %p39_p4, %s2201_s13, %s41_s19  }
   0xe   : > { %167 = sbr.rel (!%p50_p3) target bundleno = 71 (0x47), region = 24  ;;  %s169_s21 = sand.u32 (%p50_p3), 1, %s2201_s13  }
   0xf   : > { %s1796_s22 = sshll.u32 (%p50_p3), %s2209_s15, 6  ;;  %s2132_s23 = smul.u32 (%p50_p3), 832, %s169_s21 }
  0x10   : > { %s2279_s26 = scalar_lea.vmem (%p50_p3), %s2990_s0, %s1796_s22 }
  0x11   : > { %v190_v0 = vld [vmem:[%s2279_s26] sm:$0xff] (%p50_p3)  ;;  %v192_v1 = vld [vmem:[%s2279_s26 + $0x8] sm:$0xff] (%p50_p3)  ;;  %v194_v2 = vld [vmem:[%s2279_s26 + $0x10] sm:$0xff] (%p50_p3)  ;;  %s2287_s27 = scalar_lea.vmem (%p50_p3), [#allocation3], %s2132_s23 }
  0x12   : > { %v196_v3 = vld [vmem:[%s2279_s26 + $0x18] sm:$0xff] (%p50_p3)  ;;  %v198_v4 = vld [vmem:[%s2279_s26 + $0x20] sm:$0xff] (%p50_p3)  ;;  %v200_v5 = vld [vmem:[%s2279_s26 + $0x28] sm:$0xff] (%p50_p3)  ;;  %191 = vst [vmem:[%s2287_s27] sm:$0xff] (%p50_p3), %v190_v0 }
  0x13   : > { %193 = vst [vmem:[%s2287_s27 + $0x8] sm:$0xff] (%p50_p3), %v192_v1  ;;  %195 = vst [vmem:[%s2287_s27 + $0x10] sm:$0xff] (%p50_p3), %v194_v2  ;;  %v202_v6 = vld [vmem:[%s2279_s26 + $0x30] sm:$0xff] (%p50_p3)  ;;  %v204_v7 = vld [vmem:[%s2279_s26 + $0x38] sm:$0xff] (%p50_p3) }
  0x14   : > { %197 = vst [vmem:[%s2287_s27 + $0x18] sm:$0xff] (%p50_p3), %v196_v3  ;;  %199 = vst [vmem:[%s2287_s27 + $0x20] sm:$0xff] (%p50_p3), %v198_v4  ;;  %v206_v8 = vld [vmem:[%s2279_s26 + $0xc0] sm:$0xff] (%p50_p3)  ;;  %v208_v9 = vld [vmem:[%s2279_s26 + $0xc8] sm:$0xff] (%p50_p3) }
  0x15   : > { %201 = vst [vmem:[%s2287_s27 + $0x28] sm:$0xff] %v200_v5  ;;  %203 = vst [vmem:[%s2287_s27 + $0x30] sm:$0xff] %v202_v6  ;;  %v210_v10 = vld [vmem:[%s2279_s26 + $0xd0] sm:$0xff]  ;;  %v212_v11 = vld [vmem:[%s2279_s26 + $0xd8] sm:$0xff] }
  0x16   : > { %205 = vst [vmem:[%s2287_s27 + $0x38] sm:$0xff] %v204_v7  ;;  %207 = vst [vmem:[%s2287_s27 + $0x40] sm:$0xff] %v206_v8  ;;  %v214_v12 = vld [vmem:[%s2279_s26 + $0xe0] sm:$0xff]  ;;  %v216_v13 = vld [vmem:[%s2279_s26 + $0xe8] sm:$0xff] }
  0x17   : > { %209 = vst [vmem:[%s2287_s27 + $0x48] sm:$0xff] %v208_v9  ;;  %211 = vst [vmem:[%s2287_s27 + $0x50] sm:$0xff] %v210_v10  ;;  %v218_v14 = vld [vmem:[%s2279_s26 + $0xf0] sm:$0xff]  ;;  %v220_v15 = vld [vmem:[%s2279_s26 + $0xf8] sm:$0xff] }
  0x18   : > { %213 = vst [vmem:[%s2287_s27 + $0x58] sm:$0xff] %v212_v11  ;;  %215 = vst [vmem:[%s2287_s27 + $0x60] sm:$0xff] %v214_v12  ;;  %v222_v16 = vld [vmem:[%s2279_s26 + $0x180] sm:$0xff]  ;;  %v224_v17 = vld [vmem:[%s2279_s26 + $0x188] sm:$0xff] }
  0x19   : > { %217 = vst [vmem:[%s2287_s27 + $0x68] sm:$0xff] %v216_v13  ;;  %219 = vst [vmem:[%s2287_s27 + $0x70] sm:$0xff] %v218_v14  ;;  %v226_v18 = vld [vmem:[%s2279_s26 + $0x190] sm:$0xff]  ;;  %v228_v19 = vld [vmem:[%s2279_s26 + $0x198] sm:$0xff] }
  0x1a   : > { %221 = vst [vmem:[%s2287_s27 + $0x78] sm:$0xff] %v220_v15  ;;  %223 = vst [vmem:[%s2287_s27 + $0x80] sm:$0xff] %v222_v16  ;;  %v230_v20 = vld [vmem:[%s2279_s26 + $0x1a0] sm:$0xff]  ;;  %v232_v21 = vld [vmem:[%s2279_s26 + $0x1a8] sm:$0xff] }
  0x1b   : > { %225 = vst [vmem:[%s2287_s27 + $0x88] sm:$0xff] %v224_v17  ;;  %227 = vst [vmem:[%s2287_s27 + $0x90] sm:$0xff] %v226_v18  ;;  %v234_v22 = vld [vmem:[%s2279_s26 + $0x1b0] sm:$0xff]  ;;  %v236_v23 = vld [vmem:[%s2279_s26 + $0x1b8] sm:$0xff] }
  0x1c   : > { %229 = vst [vmem:[%s2287_s27 + $0x98] sm:$0xff] %v228_v19  ;;  %231 = vst [vmem:[%s2287_s27 + $0xa0] sm:$0xff] %v230_v20  ;;  %v238_v24 = vld [vmem:[%s2279_s26 + $0x240] sm:$0xff]  ;;  %v240_v25 = vld [vmem:[%s2279_s26 + $0x248] sm:$0xff] }
  0x1d   : > { %233 = vst [vmem:[%s2287_s27 + $0xa8] sm:$0xff] %v232_v21  ;;  %235 = vst [vmem:[%s2287_s27 + $0xb0] sm:$0xff] %v234_v22  ;;  %v242_v26 = vld [vmem:[%s2279_s26 + $0x250] sm:$0xff]  ;;  %v244_v27 = vld [vmem:[%s2279_s26 + $0x258] sm:$0xff] }
  0x1e   : > { %237 = vst [vmem:[%s2287_s27 + $0xb8] sm:$0xff] %v236_v23  ;;  %239 = vst [vmem:[%s2287_s27 + $0xc0] sm:$0xff] %v238_v24  ;;  %v246_v28 = vld [vmem:[%s2279_s26 + $0x260] sm:$0xff]  ;;  %v248_v29 = vld [vmem:[%s2279_s26 + $0x268] sm:$0xff] }
  0x1f   : > { %241 = vst [vmem:[%s2287_s27 + $0xc8] sm:$0xff] %v240_v25  ;;  %243 = vst [vmem:[%s2287_s27 + $0xd0] sm:$0xff] %v242_v26  ;;  %v250_v30 = vld [vmem:[%s2279_s26 + $0x270] sm:$0xff]  ;;  %v252_v31 = vld [vmem:[%s2279_s26 + $0x278] sm:$0xff] }
  0x20   : > { %245 = vst [vmem:[%s2287_s27 + $0xd8] sm:$0xff] %v244_v27  ;;  %247 = vst [vmem:[%s2287_s27 + $0xe0] sm:$0xff] %v246_v28  ;;  %v254_v32 = vld [vmem:[%s2279_s26 + $0x300] sm:$0xff]  ;;  %v256_v33 = vld [vmem:[%s2279_s26 + $0x308] sm:$0xff] }
  0x21   : > { %249 = vst [vmem:[%s2287_s27 + $0xe8] sm:$0xff] %v248_v29  ;;  %251 = vst [vmem:[%s2287_s27 + $0xf0] sm:$0xff] %v250_v30  ;;  %v258_v34 = vld [vmem:[%s2279_s26 + $0x310] sm:$0xff]  ;;  %v260_v35 = vld [vmem:[%s2279_s26 + $0x318] sm:$0xff] }
  0x22   : > { %253 = vst [vmem:[%s2287_s27 + $0xf8] sm:$0xff] %v252_v31  ;;  %255 = vst [vmem:[%s2287_s27 + $0x100] sm:$0xff] %v254_v32  ;;  %v262_v36 = vld [vmem:[%s2279_s26 + $0x320] sm:$0xff]  ;;  %v264_v37 = vld [vmem:[%s2279_s26 + $0x328] sm:$0xff] }
  0x23   : > { %257 = vst [vmem:[%s2287_s27 + $0x108] sm:$0xff] %v256_v33  ;;  %259 = vst [vmem:[%s2287_s27 + $0x110] sm:$0xff] %v258_v34  ;;  %v266_v38 = vld [vmem:[%s2279_s26 + $0x330] sm:$0xff]  ;;  %v268_v39 = vld [vmem:[%s2279_s26 + $0x338] sm:$0xff] }
  0x24   : > { %261 = vst [vmem:[%s2287_s27 + $0x118] sm:$0xff] %v260_v35  ;;  %263 = vst [vmem:[%s2287_s27 + $0x120] sm:$0xff] %v262_v36  ;;  %v270_v40 = vld [vmem:[%s2279_s26 + $0x3c0] sm:$0xff]  ;;  %v272_v41 = vld [vmem:[%s2279_s26 + $0x3c8] sm:$0xff] }
  0x25   : > { %265 = vst [vmem:[%s2287_s27 + $0x128] sm:$0xff] %v264_v37  ;;  %267 = vst [vmem:[%s2287_s27 + $0x130] sm:$0xff] %v266_v38  ;;  %v274_v42 = vld [vmem:[%s2279_s26 + $0x3d0] sm:$0xff]  ;;  %v276_v43 = vld [vmem:[%s2279_s26 + $0x3d8] sm:$0xff] }
  0x26   : > { %269 = vst [vmem:[%s2287_s27 + $0x138] sm:$0xff] %v268_v39  ;;  %271 = vst [vmem:[%s2287_s27 + $0x140] sm:$0xff] %v270_v40  ;;  %v278_v44 = vld [vmem:[%s2279_s26 + $0x3e0] sm:$0xff]  ;;  %v280_v45 = vld [vmem:[%s2279_s26 + $0x3e8] sm:$0xff] }
  0x27   : > { %273 = vst [vmem:[%s2287_s27 + $0x148] sm:$0xff] %v272_v41  ;;  %275 = vst [vmem:[%s2287_s27 + $0x150] sm:$0xff] %v274_v42  ;;  %v282_v46 = vld [vmem:[%s2279_s26 + $0x3f0] sm:$0xff]  ;;  %v284_v47 = vld [vmem:[%s2279_s26 + $0x3f8] sm:$0xff] }
  0x28   : > { %277 = vst [vmem:[%s2287_s27 + $0x158] sm:$0xff] %v276_v43  ;;  %279 = vst [vmem:[%s2287_s27 + $0x160] sm:$0xff] %v278_v44  ;;  %v286_v48 = vld [vmem:[%s2279_s26 + $0x480] sm:$0xff]  ;;  %v288_v49 = vld [vmem:[%s2279_s26 + $0x488] sm:$0xff] }
  0x29   : > { %281 = vst [vmem:[%s2287_s27 + $0x168] sm:$0xff] %v280_v45  ;;  %283 = vst [vmem:[%s2287_s27 + $0x170] sm:$0xff] %v282_v46  ;;  %v290_v50 = vld [vmem:[%s2279_s26 + $0x490] sm:$0xff]  ;;  %v292_v51 = vld [vmem:[%s2279_s26 + $0x498] sm:$0xff] }
  0x2a   : > { %285 = vst [vmem:[%s2287_s27 + $0x178] sm:$0xff] %v284_v47  ;;  %287 = vst [vmem:[%s2287_s27 + $0x180] sm:$0xff] %v286_v48  ;;  %v294_v52 = vld [vmem:[%s2279_s26 + $0x4a0] sm:$0xff]  ;;  %v296_v53 = vld [vmem:[%s2279_s26 + $0x4a8] sm:$0xff] }
  0x2b   : > { %289 = vst [vmem:[%s2287_s27 + $0x188] sm:$0xff] %v288_v49  ;;  %291 = vst [vmem:[%s2287_s27 + $0x190] sm:$0xff] %v290_v50  ;;  %v298_v54 = vld [vmem:[%s2279_s26 + $0x4b0] sm:$0xff]  ;;  %v300_v55 = vld [vmem:[%s2279_s26 + $0x4b8] sm:$0xff] }
  0x2c   : > { %293 = vst [vmem:[%s2287_s27 + $0x198] sm:$0xff] %v292_v51  ;;  %295 = vst [vmem:[%s2287_s27 + $0x1a0] sm:$0xff] %v294_v52  ;;  %v302_v56 = vld [vmem:[%s2279_s26 + $0x540] sm:$0xff]  ;;  %v304_v57 = vld [vmem:[%s2279_s26 + $0x548] sm:$0xff] }
  0x2d   : > { %297 = vst [vmem:[%s2287_s27 + $0x1a8] sm:$0xff] %v296_v53  ;;  %299 = vst [vmem:[%s2287_s27 + $0x1b0] sm:$0xff] %v298_v54  ;;  %v306_v58 = vld [vmem:[%s2279_s26 + $0x550] sm:$0xff]  ;;  %v308_v59 = vld [vmem:[%s2279_s26 + $0x558] sm:$0xff] }
  0x2e   : > { %301 = vst [vmem:[%s2287_s27 + $0x1b8] sm:$0xff] %v300_v55  ;;  %303 = vst [vmem:[%s2287_s27 + $0x1c0] sm:$0xff] %v302_v56  ;;  %v310_v60 = vld [vmem:[%s2279_s26 + $0x560] sm:$0xff]  ;;  %v312_v61 = vld [vmem:[%s2279_s26 + $0x568] sm:$0xff] }
  0x2f   : > { %305 = vst [vmem:[%s2287_s27 + $0x1c8] sm:$0xff] %v304_v57  ;;  %307 = vst [vmem:[%s2287_s27 + $0x1d0] sm:$0xff] %v306_v58  ;;  %v314_v62 = vld [vmem:[%s2279_s26 + $0x570] sm:$0xff]  ;;  %v316_v63 = vld [vmem:[%s2279_s26 + $0x578] sm:$0xff] }
  0x30   : > { %309 = vst [vmem:[%s2287_s27 + $0x1d8] sm:$0xff] %v308_v59  ;;  %311 = vst [vmem:[%s2287_s27 + $0x1e0] sm:$0xff] %v310_v60  ;;  %v318_v0 = vld [vmem:[%s2279_s26 + $0x600] sm:$0xff]  ;;  %v320_v1 = vld [vmem:[%s2279_s26 + $0x608] sm:$0xff] }
  0x31   : > { %313 = vst [vmem:[%s2287_s27 + $0x1e8] sm:$0xff] %v312_v61  ;;  %315 = vst [vmem:[%s2287_s27 + $0x1f0] sm:$0xff] %v314_v62  ;;  %v322_v2 = vld [vmem:[%s2279_s26 + $0x610] sm:$0xff]  ;;  %v324_v3 = vld [vmem:[%s2279_s26 + $0x618] sm:$0xff] }
  0x32   : > { %317 = vst [vmem:[%s2287_s27 + $0x1f8] sm:$0xff] %v316_v63  ;;  %319 = vst [vmem:[%s2287_s27 + $0x200] sm:$0xff] %v318_v0  ;;  %v326_v4 = vld [vmem:[%s2279_s26 + $0x620] sm:$0xff]  ;;  %v328_v5 = vld [vmem:[%s2279_s26 + $0x628] sm:$0xff] }
  0x33   : > { %321 = vst [vmem:[%s2287_s27 + $0x208] sm:$0xff] %v320_v1  ;;  %323 = vst [vmem:[%s2287_s27 + $0x210] sm:$0xff] %v322_v2  ;;  %v330_v6 = vld [vmem:[%s2279_s26 + $0x630] sm:$0xff]  ;;  %v332_v7 = vld [vmem:[%s2279_s26 + $0x638] sm:$0xff] }
  0x34   : > { %325 = vst [vmem:[%s2287_s27 + $0x218] sm:$0xff] %v324_v3  ;;  %327 = vst [vmem:[%s2287_s27 + $0x220] sm:$0xff] %v326_v4  ;;  %v334_v8 = vld [vmem:[%s2279_s26 + $0x6c0] sm:$0xff]  ;;  %v336_v9 = vld [vmem:[%s2279_s26 + $0x6c8] sm:$0xff] }
  0x35   : > { %329 = vst [vmem:[%s2287_s27 + $0x228] sm:$0xff] %v328_v5  ;;  %331 = vst [vmem:[%s2287_s27 + $0x230] sm:$0xff] %v330_v6  ;;  %v338_v10 = vld [vmem:[%s2279_s26 + $0x6d0] sm:$0xff]  ;;  %v340_v11 = vld [vmem:[%s2279_s26 + $0x6d8] sm:$0xff] }
  0x36   : > { %333 = vst [vmem:[%s2287_s27 + $0x238] sm:$0xff] %v332_v7  ;;  %335 = vst [vmem:[%s2287_s27 + $0x240] sm:$0xff] %v334_v8  ;;  %v342_v12 = vld [vmem:[%s2279_s26 + $0x6e0] sm:$0xff]  ;;  %v344_v13 = vld [vmem:[%s2279_s26 + $0x6e8] sm:$0xff] }
  0x37   : > { %337 = vst [vmem:[%s2287_s27 + $0x248] sm:$0xff] %v336_v9  ;;  %339 = vst [vmem:[%s2287_s27 + $0x250] sm:$0xff] %v338_v10  ;;  %v346_v14 = vld [vmem:[%s2279_s26 + $0x6f0] sm:$0xff]  ;;  %v348_v15 = vld [vmem:[%s2279_s26 + $0x6f8] sm:$0xff] }
  0x38   : > { %341 = vst [vmem:[%s2287_s27 + $0x258] sm:$0xff] %v340_v11  ;;  %343 = vst [vmem:[%s2287_s27 + $0x260] sm:$0xff] %v342_v12  ;;  %v350_v16 = vld [vmem:[%s2279_s26 + $0x780] sm:$0xff]  ;;  %v352_v17 = vld [vmem:[%s2279_s26 + $0x788] sm:$0xff] }
  0x39   : > { %345 = vst [vmem:[%s2287_s27 + $0x268] sm:$0xff] %v344_v13  ;;  %347 = vst [vmem:[%s2287_s27 + $0x270] sm:$0xff] %v346_v14  ;;  %v354_v18 = vld [vmem:[%s2279_s26 + $0x790] sm:$0xff]  ;;  %v356_v19 = vld [vmem:[%s2279_s26 + $0x798] sm:$0xff] }
  0x3a   : > { %349 = vst [vmem:[%s2287_s27 + $0x278] sm:$0xff] %v348_v15  ;;  %351 = vst [vmem:[%s2287_s27 + $0x280] sm:$0xff] %v350_v16  ;;  %v358_v20 = vld [vmem:[%s2279_s26 + $0x7a0] sm:$0xff]  ;;  %v360_v21 = vld [vmem:[%s2279_s26 + $0x7a8] sm:$0xff] }
  0x3b   : > { %353 = vst [vmem:[%s2287_s27 + $0x288] sm:$0xff] %v352_v17  ;;  %355 = vst [vmem:[%s2287_s27 + $0x290] sm:$0xff] %v354_v18  ;;  %v362_v22 = vld [vmem:[%s2279_s26 + $0x7b0] sm:$0xff]  ;;  %v364_v23 = vld [vmem:[%s2279_s26 + $0x7b8] sm:$0xff] }
  0x3c   : > { %357 = vst [vmem:[%s2287_s27 + $0x298] sm:$0xff] %v356_v19  ;;  %359 = vst [vmem:[%s2287_s27 + $0x2a0] sm:$0xff] %v358_v20  ;;  %v366_v24 = vld [vmem:[%s2279_s26 + $0x840] sm:$0xff]  ;;  %v368_v25 = vld [vmem:[%s2279_s26 + $0x848] sm:$0xff] }
  0x3d   : > { %361 = vst [vmem:[%s2287_s27 + $0x2a8] sm:$0xff] %v360_v21  ;;  %363 = vst [vmem:[%s2287_s27 + $0x2b0] sm:$0xff] %v362_v22  ;;  %v370_v26 = vld [vmem:[%s2279_s26 + $0x850] sm:$0xff]  ;;  %v372_v27 = vld [vmem:[%s2279_s26 + $0x858] sm:$0xff] }
  0x3e   : > { %365 = vst [vmem:[%s2287_s27 + $0x2b8] sm:$0xff] %v364_v23  ;;  %367 = vst [vmem:[%s2287_s27 + $0x2c0] sm:$0xff] %v366_v24  ;;  %v374_v28 = vld [vmem:[%s2279_s26 + $0x860] sm:$0xff]  ;;  %v376_v29 = vld [vmem:[%s2279_s26 + $0x868] sm:$0xff] }
  0x3f   : > { %369 = vst [vmem:[%s2287_s27 + $0x2c8] sm:$0xff] %v368_v25  ;;  %371 = vst [vmem:[%s2287_s27 + $0x2d0] sm:$0xff] %v370_v26  ;;  %v378_v30 = vld [vmem:[%s2279_s26 + $0x870] sm:$0xff]  ;;  %v380_v31 = vld [vmem:[%s2279_s26 + $0x878] sm:$0xff] }
  0x40   : > { %373 = vst [vmem:[%s2287_s27 + $0x2d8] sm:$0xff] %v372_v27  ;;  %375 = vst [vmem:[%s2287_s27 + $0x2e0] sm:$0xff] %v374_v28  ;;  %v382_v32 = vld [vmem:[%s2279_s26 + $0x900] sm:$0xff]  ;;  %v384_v33 = vld [vmem:[%s2279_s26 + $0x908] sm:$0xff] }
  0x41   : > { %377 = vst [vmem:[%s2287_s27 + $0x2e8] sm:$0xff] %v376_v29  ;;  %379 = vst [vmem:[%s2287_s27 + $0x2f0] sm:$0xff] %v378_v30  ;;  %v386_v34 = vld [vmem:[%s2279_s26 + $0x910] sm:$0xff]  ;;  %v388_v35 = vld [vmem:[%s2279_s26 + $0x918] sm:$0xff] }
  0x42   : > { %381 = vst [vmem:[%s2287_s27 + $0x2f8] sm:$0xff] %v380_v31  ;;  %383 = vst [vmem:[%s2287_s27 + $0x300] sm:$0xff] %v382_v32  ;;  %v390_v36 = vld [vmem:[%s2279_s26 + $0x920] sm:$0xff]  ;;  %v392_v37 = vld [vmem:[%s2279_s26 + $0x928] sm:$0xff] }
  0x43   : > { %385 = vst [vmem:[%s2287_s27 + $0x308] sm:$0xff] %v384_v33  ;;  %387 = vst [vmem:[%s2287_s27 + $0x310] sm:$0xff] %v386_v34  ;;  %v394_v38 = vld [vmem:[%s2279_s26 + $0x930] sm:$0xff]  ;;  %v396_v39 = vld [vmem:[%s2279_s26 + $0x938] sm:$0xff] }
  0x44   : > { %389 = vst [vmem:[%s2287_s27 + $0x318] sm:$0xff] %v388_v35  ;;  %391 = vst [vmem:[%s2287_s27 + $0x320] sm:$0xff] %v390_v36 }
  0x45   : > { %393 = vst [vmem:[%s2287_s27 + $0x328] sm:$0xff] %v392_v37  ;;  %395 = vst [vmem:[%s2287_s27 + $0x330] sm:$0xff] %v394_v38 }
  0x46   : > { %397 = vst [vmem:[%s2287_s27 + $0x338] sm:$0xff] %v396_v39 }
  0x47 PF: > { %p1786_p6 = scmp.ge.s32.totalorder %s2213_s16, 1  ;;  %p417_p7 = scmp.lt.s32.totalorder %s2213_s16, 4 }
  0x49   : > { %p418_p8 = pnand %p1786_p6, %p417_p7 }
  0x4a   : > { %s424_s28 = sand.u32 (!%p418_p8), 1, %s2197_s12   ;;  %s1787_s29 = sshll.u32 (!%p418_p8), %s2205_s14, 7 }
  0x4b   : > { %421 = sbr.rel (%p418_p8) target bundleno = 507 (0x1fb), region = 51  ;;  %p470_p9 = scmp.lt.s32.totalorder (!%p418_p8), %s1787_s29, 383 }
  0x4c   : > { %s2133_s30 = smul.u32 (!%p418_p8), 832, %s424_s28  ;;  %p1790_p10 = scmp.ne.s32.totalorder (!%p418_p8), %s2205_s14, 0 }
  0x4e   : > { %s2500_s8 = scalar_lea.vmem (!%p418_p8), [#allocation3], %s2133_s30 }
  0x52   : > { %s3001_s29 = smov (!%p470_p9, %s1787_s29), 383  ;;  %500 = sbr.rel (%p1790_p10) target bundleno = 97 (0x61), region = 59 }
  0x53   : > { %s1797_s4 = sshll.u32 %s3001_s29, 4  ;;  %v2215_v40 = vmov (!%p1790_p10), 0.0  }
  0x54   : > { %s2498_s7 = scalar_lea.vmem %s2991_s1, %s1797_s4  ;;  %501 = vst [vmem:[#allocation2] sm:$0xff] (!%p1790_p10), %v2215_v40  ;;  %502 = vst [vmem:[#allocation2 + $0x8] sm:$0xff] (!%p1790_p10), %v2215_v40 }
  0x55   : > { %503 = vst [vmem:[#allocation2 + $0x10] sm:$0xff] (!%p1790_p10), %v2215_v40  ;;  %504 = vst [vmem:[#allocation2 + $0x18] sm:$0xff] (!%p1790_p10), %v2215_v40 }
  0x56   : > { %505 = vst [vmem:[#allocation2 + $0x20] sm:$0xff] (!%p1790_p10), %v2215_v40  ;;  %506 = vst [vmem:[#allocation2 + $0x28] sm:$0xff] (!%p1790_p10), %v2215_v40 }
  0x57   : > { %507 = vst [vmem:[#allocation2 + $0x30] sm:$0xff] (!%p1790_p10), %v2215_v40  ;;  %508 = vst [vmem:[#allocation2 + $0x38] sm:$0xff] (!%p1790_p10), %v2215_v40 }
  0x58   : > { %509 = vst [vmem:[#allocation2 + $0x40] sm:$0xff] (!%p1790_p10), %v2215_v40  ;;  %510 = vst [vmem:[#allocation2 + $0x48] sm:$0xff] (!%p1790_p10), %v2215_v40 }
  0x59   : > { %511 = vst [vmem:[#allocation2 + $0x50] sm:$0xff] %v2215_v40  ;;  %512 = vst [vmem:[#allocation2 + $0x58] sm:$0xff] %v2215_v40 }
  0x5a   : > { %513 = vst [vmem:[#allocation2 + $0x60] sm:$0xff] %v2215_v40  ;;  %514 = vst [vmem:[#allocation2 + $0x68] sm:$0xff] %v2215_v40 }
  0x5b   : > { %515 = vst [vmem:[#allocation2 + $0x70] sm:$0xff] %v2215_v40  ;;  %516 = vst [vmem:[#allocation2 + $0x78] sm:$0xff] %v2215_v40 }
  0x5c   : > { %517 = vst [vmem:[#allocation2 + $0x80] sm:$0xff] %v2215_v40  ;;  %518 = vst [vmem:[#allocation2 + $0x88] sm:$0xff] %v2215_v40 }
  0x5d   : > { %519 = vst [vmem:[#allocation2 + $0x90] sm:$0xff] %v2215_v40  ;;  %520 = vst [vmem:[#allocation2 + $0x98] sm:$0xff] %v2215_v40 }
  0x5e   : > { %521 = vst [vmem:[#allocation2 + $0xa0] sm:$0xff] %v2215_v40  ;;  %522 = vst [vmem:[#allocation2 + $0xa8] sm:$0xff] %v2215_v40 }
  0x5f   : > { %523 = vst [vmem:[#allocation2 + $0xb0] sm:$0xff] %v2215_v40  ;;  %524 = vst [vmem:[#allocation2 + $0xb8] sm:$0xff] %v2215_v40 }
  0x60   : > { %525 = vst [vmem:[#allocation2 + $0xc0] sm:$0xff] %v2215_v40  ;;  %526 = vst [vmem:[#allocation2 + $0xc8] sm:$0xff] %v2215_v40 }
  0x61 PF: > { %v658_v41 = vld [vmem:[%s2498_s7 + $0x8] sm:$0xff]  ;;  %v660_v42 = vld [vmem:[%s2498_s7 + $0x18] sm:$0xff]  ;;  %v657_v46 = vld [vmem:[%s2498_s7] sm:$0xff]  ;;  %p1791_p11 = scmp.ne.s32.totalorder %s2205_s14, 2 }
  0x62   : > { %v786_v43 = vld [vmem:[%s2498_s7 + $0x408] sm:$0xff]  ;;  %v1798_v44 = vpack.c.bf16 %v660_v42, %v658_v41  ;;  %v788_v45 = vld [vmem:[%s2498_s7 + $0x418] sm:$0xff]  ;;  %v659_v47 = vld [vmem:[%s2498_s7 + $0x10] sm:$0xff] }
  0x63   : > { %v1926_v48 = vpack.c.bf16 %v788_v45, %v786_v43  ;;  %v1800_v49 = vpack.c.bf16 %v659_v47, %v657_v46  ;;  %v785_v50 = vld [vmem:[%s2498_s7 + $0x400] sm:$0xff]  ;;  %v787_v51 = vld [vmem:[%s2498_s7 + $0x410] sm:$0xff]  ;;  %v662_v52 = vld [vmem:[%s2498_s7 + $0x28] sm:$0xff] }
  0x64   : > { %1799 = vmatprep.subr.bf16.mxu1 %v1798_v44  ;;  %v1928_v53 = vpack.c.bf16 %v787_v51, %v785_v50  ;;  %v664_v54 = vld [vmem:[%s2498_s7 + $0x38] sm:$0xff]  ;;  %v790_v55 = vld [vmem:[%s2498_s7 + $0x428] sm:$0xff]  ;;  %v661_v59 = vld [vmem:[%s2498_s7 + $0x20] sm:$0xff] }
  0x65   : > { %v792_v56 = vld [vmem:[%s2498_s7 + $0x438] sm:$0xff]  ;;  %1927 = vmatprep.subr.bf16.mxu0 %v1926_v48  ;;  %1801 = vmatpush1.bf16.msra.mxu1 %v1800_v49  ;;  %v1802_v57 = vpack.c.bf16 %v664_v54, %v662_v52  ;;  %v663_v60 = vld [vmem:[%s2498_s7 + $0x30] sm:$0xff]  ;;  %v789_v61 = vld [vmem:[%s2498_s7 + $0x420] sm:$0xff] }
  0x66   : > { %v1930_v58 = vpack.c.bf16 %v792_v56, %v790_v55  ;;  %1929 = vmatpush1.bf16.msra.mxu0 %v1928_v53  ;;  %v1804_v62 = vpack.c.bf16 %v663_v60, %v661_v59  ;;  %v791_v63 = vld [vmem:[%s2498_s7 + $0x430] sm:$0xff]  ;;  %v666_v0 = vld [vmem:[%s2498_s7 + $0x48] sm:$0xff]  ;;  %v668_v1 = vld [vmem:[%s2498_s7 + $0x58] sm:$0xff] }
  0x67   : > { %1803 = vmatprep.subr.bf16.mxu1 %v1802_v57  ;;  %v1932_v2 = vpack.c.bf16 %v791_v63, %v789_v61  ;;  %v1806_v3 = vpack.c.bf16 %v668_v1, %v666_v0  ;;  %v794_v4 = vld [vmem:[%s2498_s7 + $0x448] sm:$0xff]  ;;  %v796_v5 = vld [vmem:[%s2498_s7 + $0x458] sm:$0xff]  ;;  %v665_v6 = vld [vmem:[%s2498_s7 + $0x40] sm:$0xff] }
  0x68   : > { %1931 = vmatprep.subr.bf16.mxu0 %v1930_v58  ;;  %v1934_v7 = vpack.c.bf16 %v796_v5, %v794_v4  ;;  %v667_v8 = vld [vmem:[%s2498_s7 + $0x50] sm:$0xff]  ;;  %v793_v9 = vld [vmem:[%s2498_s7 + $0x440] sm:$0xff]  ;;  %v670_v12 = vld [vmem:[%s2498_s7 + $0x68] sm:$0xff] }
  0x69   : > { %v795_v10 = vld [vmem:[%s2498_s7 + $0x450] sm:$0xff]  ;;  %1805 = vmatpush1.bf16.msra.mxu1 %v1804_v62  ;;  %v1808_v11 = vpack.c.bf16 %v667_v8, %v665_v6  ;;  %v672_v13 = vld [vmem:[%s2498_s7 + $0x78] sm:$0xff]  ;;  %v798_v14 = vld [vmem:[%s2498_s7 + $0x468] sm:$0xff] }
  0x6a   : > { %1933 = vmatpush1.bf16.msra.mxu0 %v1932_v2  ;;  %1807 = vmatprep.subr.bf16.mxu1 %v1806_v3  ;;  %v1936_v15 = vpack.c.bf16 %v795_v10, %v793_v9  ;;  %v1810_v16 = vpack.c.bf16 %v672_v13, %v670_v12  ;;  %v800_v17 = vld [vmem:[%s2498_s7 + $0x478] sm:$0xff]  ;;  %v669_v18 = vld [vmem:[%s2498_s7 + $0x60] sm:$0xff]  ;;  %v671_v19 = vld [vmem:[%s2498_s7 + $0x70] sm:$0xff] }
  0x6b   : > { %1935 = vmatprep.subr.bf16.mxu0 %v1934_v7  ;;  %v1938_v20 = vpack.c.bf16 %v800_v17, %v798_v14  ;;  %v797_v21 = vld [vmem:[%s2498_s7 + $0x460] sm:$0xff]  ;;  %v799_v22 = vld [vmem:[%s2498_s7 + $0x470] sm:$0xff]  ;;  %v674_v23 = vld [vmem:[%s2498_s7 + $0x88] sm:$0xff]  ;;  %v1812_v27 = vpack.c.bf16 %v671_v19, %v669_v18 }
  0x6c   : > { %v676_v24 = vld [vmem:[%s2498_s7 + $0x98] sm:$0xff]  ;;  %v802_v25 = vld [vmem:[%s2498_s7 + $0x488] sm:$0xff]  ;;  %v1940_v28 = vpack.c.bf16 %v799_v22, %v797_v21  ;;  %v673_v30 = vld [vmem:[%s2498_s7 + $0x80] sm:$0xff] }
  0x6d   : > { %v804_v26 = vld [vmem:[%s2498_s7 + $0x498] sm:$0xff]  ;;  %1809 = vmatpush1.bf16.msra.mxu1 %v1808_v11  ;;  %v1814_v29 = vpack.c.bf16 %v676_v24, %v674_v23  ;;  %v675_v31 = vld [vmem:[%s2498_s7 + $0x90] sm:$0xff]  ;;  %v801_v32 = vld [vmem:[%s2498_s7 + $0x480] sm:$0xff] }
  0x6e   : > { %1937 = vmatpush1.bf16.msra.mxu0 %v1936_v15  ;;  %1811 = vmatprep.subr.bf16.mxu1 %v1810_v16  ;;  %v1942_v33 = vpack.c.bf16 %v804_v26, %v802_v25  ;;  %v803_v34 = vld [vmem:[%s2498_s7 + $0x490] sm:$0xff]  ;;  %v678_v35 = vld [vmem:[%s2498_s7 + $0xa8] sm:$0xff]  ;;  %v680_v36 = vld [vmem:[%s2498_s7 + $0xb8] sm:$0xff]  ;;  %v1816_v39 = vpack.c.bf16 %v675_v31, %v673_v30 }
  0x6f   : > { %1939 = vmatprep.subr.bf16.mxu0 %v1938_v20  ;;  %v806_v37 = vld [vmem:[%s2498_s7 + $0x4a8] sm:$0xff]  ;;  %v808_v38 = vld [vmem:[%s2498_s7 + $0x4b8] sm:$0xff]  ;;  %v1944_v40 = vpack.c.bf16 %v803_v34, %v801_v32  ;;  %v1818_v41 = vpack.c.bf16 %v680_v36, %v678_v35  ;;  %v677_v42 = vld [vmem:[%s2498_s7 + $0xa0] sm:$0xff] }
  0x70   : > { %v679_v43 = vld [vmem:[%s2498_s7 + $0xb0] sm:$0xff]  ;;  %v805_v44 = vld [vmem:[%s2498_s7 + $0x4a0] sm:$0xff]  ;;  %v1946_v45 = vpack.c.bf16 %v808_v38, %v806_v37  ;;  %v682_v47 = vld [vmem:[%s2498_s7 + $0xc8] sm:$0xff] }
  0x71   : > { %1813 = vmatpush1.bf16.msra.mxu1 %v1812_v27  ;;  %v807_v46 = vld [vmem:[%s2498_s7 + $0x4b0] sm:$0xff]  ;;  %v684_v48 = vld [vmem:[%s2498_s7 + $0xd8] sm:$0xff]  ;;  %v810_v49 = vld [vmem:[%s2498_s7 + $0x4c8] sm:$0xff]  ;;  %v1820_v51 = vpack.c.bf16 %v679_v43, %v677_v42 }
  0x72   : > { %1941 = vmatpush1.bf16.msra.mxu0 %v1940_v28  ;;  %1815 = vmatprep.subr.bf16.mxu1 %v1814_v29  ;;  %v812_v50 = vld [vmem:[%s2498_s7 + $0x4d8] sm:$0xff]  ;;  %v1948_v52 = vpack.c.bf16 %v807_v46, %v805_v44  ;;  %v1822_v53 = vpack.c.bf16 %v684_v48, %v682_v47  ;;  %v681_v54 = vld [vmem:[%s2498_s7 + $0xc0] sm:$0xff]  ;;  %v683_v55 = vld [vmem:[%s2498_s7 + $0xd0] sm:$0xff] }
  0x73   : > { %1943 = vmatprep.subr.bf16.mxu0 %v1942_v33  ;;  %v809_v56 = vld [vmem:[%s2498_s7 + $0x4c0] sm:$0xff]  ;;  %v1950_v57 = vpack.c.bf16 %v812_v50, %v810_v49  ;;  %v811_v58 = vld [vmem:[%s2498_s7 + $0x4d0] sm:$0xff]  ;;  %v686_v59 = vld [vmem:[%s2498_s7 + $0xe8] sm:$0xff]  ;;  %v1824_v63 = vpack.c.bf16 %v683_v55, %v681_v54 }
  0x74   : > { %v688_v60 = vld [vmem:[%s2498_s7 + $0xf8] sm:$0xff]  ;;  %v814_v61 = vld [vmem:[%s2498_s7 + $0x4e8] sm:$0xff]  ;;  %v1952_v0 = vpack.c.bf16 %v811_v58, %v809_v56  ;;  %v685_v2 = vld [vmem:[%s2498_s7 + $0xe0] sm:$0xff] }
  0x75   : > { %1817 = vmatpush1.bf16.msra.mxu1 %v1816_v39  ;;  %v816_v62 = vld [vmem:[%s2498_s7 + $0x4f8] sm:$0xff]  ;;  %v1826_v1 = vpack.c.bf16 %v688_v60, %v686_v59  ;;  %v687_v3 = vld [vmem:[%s2498_s7 + $0xf0] sm:$0xff]  ;;  %v813_v4 = vld [vmem:[%s2498_s7 + $0x4e0] sm:$0xff] }
  0x76   : > { %1945 = vmatpush1.bf16.msra.mxu0 %v1944_v40  ;;  %1819 = vmatprep.subr.bf16.mxu1 %v1818_v41  ;;  %v1954_v5 = vpack.c.bf16 %v816_v62, %v814_v61  ;;  %v815_v6 = vld [vmem:[%s2498_s7 + $0x4f0] sm:$0xff]  ;;  %v690_v7 = vld [vmem:[%s2498_s7 + $0x108] sm:$0xff]  ;;  %v692_v8 = vld [vmem:[%s2498_s7 + $0x118] sm:$0xff]  ;;  %v1828_v11 = vpack.c.bf16 %v687_v3, %v685_v2 }
  0x77   : > { %1947 = vmatprep.subr.bf16.mxu0 %v1946_v45  ;;  %v818_v9 = vld [vmem:[%s2498_s7 + $0x508] sm:$0xff]  ;;  %v820_v10 = vld [vmem:[%s2498_s7 + $0x518] sm:$0xff]  ;;  %v1956_v12 = vpack.c.bf16 %v815_v6, %v813_v4  ;;  %v1830_v13 = vpack.c.bf16 %v692_v8, %v690_v7  ;;  %v689_v14 = vld [vmem:[%s2498_s7 + $0x100] sm:$0xff] }
  0x78   : > { %v691_v15 = vld [vmem:[%s2498_s7 + $0x110] sm:$0xff]  ;;  %v817_v16 = vld [vmem:[%s2498_s7 + $0x500] sm:$0xff]  ;;  %v1958_v17 = vpack.c.bf16 %v820_v10, %v818_v9  ;;  %v694_v19 = vld [vmem:[%s2498_s7 + $0x128] sm:$0xff] }
  0x79   : > { %1821 = vmatpush1.bf16.msra.mxu1 %v1820_v51  ;;  %v819_v18 = vld [vmem:[%s2498_s7 + $0x510] sm:$0xff]  ;;  %v696_v20 = vld [vmem:[%s2498_s7 + $0x138] sm:$0xff]  ;;  %v822_v21 = vld [vmem:[%s2498_s7 + $0x528] sm:$0xff]  ;;  %v1832_v23 = vpack.c.bf16 %v691_v15, %v689_v14 }
  0x7a   : > { %1949 = vmatpush1.bf16.msra.mxu0 %v1948_v52  ;;  %1823 = vmatprep.subr.bf16.mxu1 %v1822_v53  ;;  %v824_v22 = vld [vmem:[%s2498_s7 + $0x538] sm:$0xff]  ;;  %v1960_v24 = vpack.c.bf16 %v819_v18, %v817_v16  ;;  %v1834_v25 = vpack.c.bf16 %v696_v20, %v694_v19  ;;  %v693_v26 = vld [vmem:[%s2498_s7 + $0x120] sm:$0xff]  ;;  %v695_v27 = vld [vmem:[%s2498_s7 + $0x130] sm:$0xff] }
  0x7b   : > { %1951 = vmatprep.subr.bf16.mxu0 %v1950_v57  ;;  %v821_v28 = vld [vmem:[%s2498_s7 + $0x520] sm:$0xff]  ;;  %v1962_v29 = vpack.c.bf16 %v824_v22, %v822_v21  ;;  %v823_v30 = vld [vmem:[%s2498_s7 + $0x530] sm:$0xff]  ;;  %v698_v31 = vld [vmem:[%s2498_s7 + $0x148] sm:$0xff]  ;;  %v1836_v35 = vpack.c.bf16 %v695_v27, %v693_v26 }
  0x7c   : > { %v700_v32 = vld [vmem:[%s2498_s7 + $0x158] sm:$0xff]  ;;  %v826_v33 = vld [vmem:[%s2498_s7 + $0x548] sm:$0xff]  ;;  %v1964_v36 = vpack.c.bf16 %v823_v30, %v821_v28  ;;  %v697_v38 = vld [vmem:[%s2498_s7 + $0x140] sm:$0xff] }
  0x7d   : > { %1825 = vmatpush1.bf16.msra.mxu1 %v1824_v63  ;;  %v828_v34 = vld [vmem:[%s2498_s7 + $0x558] sm:$0xff]  ;;  %v1838_v37 = vpack.c.bf16 %v700_v32, %v698_v31  ;;  %v699_v39 = vld [vmem:[%s2498_s7 + $0x150] sm:$0xff]  ;;  %v825_v40 = vld [vmem:[%s2498_s7 + $0x540] sm:$0xff] }
  0x7e   : > { %1953 = vmatpush1.bf16.msra.mxu0 %v1952_v0  ;;  %1827 = vmatprep.subr.bf16.mxu1 %v1826_v1  ;;  %v1966_v41 = vpack.c.bf16 %v828_v34, %v826_v33  ;;  %v827_v42 = vld [vmem:[%s2498_s7 + $0x550] sm:$0xff]  ;;  %v702_v43 = vld [vmem:[%s2498_s7 + $0x168] sm:$0xff]  ;;  %v704_v44 = vld [vmem:[%s2498_s7 + $0x178] sm:$0xff]  ;;  %v1840_v47 = vpack.c.bf16 %v699_v39, %v697_v38 }
  0x7f   : > { %1955 = vmatprep.subr.bf16.mxu0 %v1954_v5  ;;  %v830_v45 = vld [vmem:[%s2498_s7 + $0x568] sm:$0xff]  ;;  %v832_v46 = vld [vmem:[%s2498_s7 + $0x578] sm:$0xff]  ;;  %v701_v48 = vld [vmem:[%s2498_s7 + $0x160] sm:$0xff]  ;;  %v1968_v49 = vpack.c.bf16 %v827_v42, %v825_v40  ;;  %v1842_v50 = vpack.c.bf16 %v704_v44, %v702_v43 }
  0x80   : > { %v703_v51 = vld [vmem:[%s2498_s7 + $0x170] sm:$0xff]  ;;  %v829_v52 = vld [vmem:[%s2498_s7 + $0x560] sm:$0xff]  ;;  %v1970_v54 = vpack.c.bf16 %v832_v46, %v830_v45  ;;  %v706_v55 = vld [vmem:[%s2498_s7 + $0x188] sm:$0xff] }
  0x81   : > { %1829 = vmatpush1.bf16.msra.mxu1 %v1828_v11  ;;  %v831_v53 = vld [vmem:[%s2498_s7 + $0x570] sm:$0xff]  ;;  %v708_v56 = vld [vmem:[%s2498_s7 + $0x198] sm:$0xff]  ;;  %v834_v58 = vld [vmem:[%s2498_s7 + $0x588] sm:$0xff]  ;;  %v1844_v61 = vpack.c.bf16 %v703_v51, %v701_v48 }
  0x82   : > { %1957 = vmatpush1.bf16.msra.mxu0 %v1956_v12  ;;  %1831 = vmatprep.subr.bf16.mxu1 %v1830_v13  ;;  %v554_v57 = vld [vmem:[%s2500_s8 + $0x8] sm:$0xff]  ;;  %v1972_v62 = vpack.c.bf16 %v831_v53, %v829_v52  ;;  %v1846_v63 = vpack.c.bf16 %v708_v56, %v706_v55  ;;  %v705_v0 = vld [vmem:[%s2498_s7 + $0x180] sm:$0xff]  ;;  %v707_v1 = vld [vmem:[%s2498_s7 + $0x190] sm:$0xff] }
  0x83   : > { %1959 = vmatprep.subr.bf16.mxu0 %v1958_v17  ;;  %v836_v59 = vld [vmem:[%s2498_s7 + $0x598] sm:$0xff]  ;;  %977 = vmatprep.mubr.f32.mxu1 %v554_v57  ;;  %v833_v2 = vld [vmem:[%s2498_s7 + $0x580] sm:$0xff]  ;;  %v835_v4 = vld [vmem:[%s2498_s7 + $0x590] sm:$0xff]  ;;  %v1848_v9 = vpack.c.bf16 %v707_v1, %v705_v0 }
  0x84   : > { %v558_v60 = vld [vmem:[%s2500_s8 + $0x28] sm:$0xff]  ;;  %v1974_v3 = vpack.c.bf16 %v836_v59, %v834_v58  ;;  %v710_v5 = vld [vmem:[%s2498_s7 + $0x1a8] sm:$0xff]  ;;  %v1976_v10 = vpack.c.bf16 %v835_v4, %v833_v2  ;;  %v709_v12 = vld [vmem:[%s2498_s7 + $0x1a0] sm:$0xff] }
  0x85   : > { %1833 = vmatpush1.bf16.msra.mxu1 %v1832_v23  ;;  %1263 = vmatprep.mubr.f32.mxu0 %v558_v60  ;;  %v712_v6 = vld [vmem:[%s2498_s7 + $0x1b8] sm:$0xff]  ;;  %v838_v7 = vld [vmem:[%s2498_s7 + $0x5a8] sm:$0xff]  ;;  %v711_v13 = vld [vmem:[%s2498_s7 + $0x1b0] sm:$0xff] }
  0x86   : > { %1961 = vmatpush1.bf16.msra.mxu0 %v1960_v24  ;;  %1835 = vmatprep.subr.bf16.mxu1 %v1834_v25  ;;  %v840_v8 = vld [vmem:[%s2498_s7 + $0x5b8] sm:$0xff]  ;;  %v1850_v11 = vpack.c.bf16 %v712_v6, %v710_v5  ;;  %v837_v14 = vld [vmem:[%s2498_s7 + $0x5a0] sm:$0xff]  ;;  %v839_v16 = vld [vmem:[%s2498_s7 + $0x5b0] sm:$0xff]  ;;  %v1852_v21 = vpack.c.bf16 %v711_v13, %v709_v12 }
  0x87   : > { %1963 = vmatprep.subr.bf16.mxu0 %v1962_v29  ;;  %v1978_v15 = vpack.c.bf16 %v840_v8, %v838_v7  ;;  %v714_v17 = vld [vmem:[%s2498_s7 + $0x1c8] sm:$0xff]  ;;  %v716_v18 = vld [vmem:[%s2498_s7 + $0x1d8] sm:$0xff]  ;;  %v1980_v22 = vpack.c.bf16 %v839_v16, %v837_v14  ;;  %v713_v24 = vld [vmem:[%s2498_s7 + $0x1c0] sm:$0xff] }
  0x88   : > { %v842_v19 = vld [vmem:[%s2498_s7 + $0x5c8] sm:$0xff]  ;;  %v844_v20 = vld [vmem:[%s2498_s7 + $0x5d8] sm:$0xff]  ;;  %v1854_v23 = vpack.c.bf16 %v716_v18, %v714_v17  ;;  %v715_v25 = vld [vmem:[%s2498_s7 + $0x1d0] sm:$0xff] }
  0x89   : > { %1837 = vmatpush1.bf16.msra.mxu1 %v1836_v35  ;;  %v841_v26 = vld [vmem:[%s2498_s7 + $0x5c0] sm:$0xff]  ;;  %v1982_v27 = vpack.c.bf16 %v844_v20, %v842_v19  ;;  %v843_v28 = vld [vmem:[%s2498_s7 + $0x5d0] sm:$0xff]  ;;  %v718_v29 = vld [vmem:[%s2498_s7 + $0x1e8] sm:$0xff]  ;;  %v1856_v33 = vpack.c.bf16 %v715_v25, %v713_v24 }
  0x8a   : > { %1965 = vmatpush1.bf16.msra.mxu0 %v1964_v36  ;;  %1839 = vmatprep.subr.bf16.mxu1 %v1838_v37  ;;  %v720_v30 = vld [vmem:[%s2498_s7 + $0x1f8] sm:$0xff]  ;;  %v846_v31 = vld [vmem:[%s2498_s7 + $0x5e8] sm:$0xff]  ;;  %v1984_v34 = vpack.c.bf16 %v843_v28, %v841_v26  ;;  %v717_v36 = vld [vmem:[%s2498_s7 + $0x1e0] sm:$0xff] }
  0x8b   : > { %1967 = vmatprep.subr.bf16.mxu0 %v1966_v41  ;;  %v848_v32 = vld [vmem:[%s2498_s7 + $0x5f8] sm:$0xff]  ;;  %v1858_v35 = vpack.c.bf16 %v720_v30, %v718_v29  ;;  %v719_v37 = vld [vmem:[%s2498_s7 + $0x1f0] sm:$0xff]  ;;  %v845_v38 = vld [vmem:[%s2498_s7 + $0x5e0] sm:$0xff] }
  0x8c   : > { %v1986_v39 = vpack.c.bf16 %v848_v32, %v846_v31  ;;  %v847_v40 = vld [vmem:[%s2498_s7 + $0x5f0] sm:$0xff]  ;;  %v722_v41 = vld [vmem:[%s2498_s7 + $0x208] sm:$0xff]  ;;  %v724_v42 = vld [vmem:[%s2498_s7 + $0x218] sm:$0xff]  ;;  %v1860_v45 = vpack.c.bf16 %v719_v37, %v717_v36 }
  0x8d   : > { %1841 = vmatpush1.bf16.msra.mxu1 %v1840_v47  ;;  %v850_v43 = vld [vmem:[%s2498_s7 + $0x608] sm:$0xff]  ;;  %v852_v44 = vld [vmem:[%s2498_s7 + $0x618] sm:$0xff]  ;;  %v1988_v46 = vpack.c.bf16 %v847_v40, %v845_v38  ;;  %v1862_v47 = vpack.c.bf16 %v724_v42, %v722_v41  ;;  %v721_v48 = vld [vmem:[%s2498_s7 + $0x200] sm:$0xff] }
  0x8e   : > { %1969 = vmatpush1.bf16.msra.mxu0 %v1968_v49  ;;  %1843 = vmatprep.subr.bf16.mxu1 %v1842_v50  ;;  %v723_v49 = vld [vmem:[%s2498_s7 + $0x210] sm:$0xff]  ;;  %v849_v50 = vld [vmem:[%s2498_s7 + $0x600] sm:$0xff]  ;;  %v1990_v51 = vpack.c.bf16 %v852_v44, %v850_v43  ;;  %v726_v53 = vld [vmem:[%s2498_s7 + $0x228] sm:$0xff] }
  0x8f   : > { %1971 = vmatprep.subr.bf16.mxu0 %v1970_v54  ;;  %v851_v52 = vld [vmem:[%s2498_s7 + $0x610] sm:$0xff]  ;;  %v728_v54 = vld [vmem:[%s2498_s7 + $0x238] sm:$0xff]  ;;  %v854_v55 = vld [vmem:[%s2498_s7 + $0x628] sm:$0xff]  ;;  %v1864_v58 = vpack.c.bf16 %v723_v49, %v721_v48 }
  0x90   : > { %v856_v56 = vld [vmem:[%s2498_s7 + $0x638] sm:$0xff]  ;;  %v553_v57 = vld [vmem:[%s2500_s8] sm:$0xff]  ;;  %v1992_v60 = vpack.c.bf16 %v851_v52, %v849_v50  ;;  %v853_v0 = vld [vmem:[%s2498_s7 + $0x620] sm:$0xff] }
  0x91   : > { %1845 = vmatpush1.bf16.msra.mxu1 %v1844_v61  ;;  %v557_v59 = vld [vmem:[%s2500_s8 + $0x20] sm:$0xff]  ;;  %v1866_v61 = vpack.c.bf16 %v728_v54, %v726_v53  ;;  %v1994_v1 = vpack.c.bf16 %v856_v56, %v854_v55  ;;  %v732_v4 = vld [vmem:[%s2498_s7 + $0x258] sm:$0xff]  ;;  %v858_v5 = vld [vmem:[%s2498_s7 + $0x648] sm:$0xff] }
  0x92   : > { %1973 = vmatpush1.bf16.msra.mxu0 %v1972_v62  ;;  %1847 = vmatprep.subr.bf16.mxu1 %v1846_v63  ;;  %v725_v62 = vld [vmem:[%s2498_s7 + $0x220] sm:$0xff]  ;;  %v727_v63 = vld [vmem:[%s2498_s7 + $0x230] sm:$0xff]  ;;  %v860_v6 = vld [vmem:[%s2498_s7 + $0x658] sm:$0xff] }
  0x93   : > { %1975 = vmatprep.subr.bf16.mxu0 %v1974_v3  ;;  %v855_v2 = vld [vmem:[%s2498_s7 + $0x630] sm:$0xff]  ;;  %v730_v3 = vld [vmem:[%s2498_s7 + $0x248] sm:$0xff]  ;;  %v562_v7 = vld [vmem:[%s2500_s8 + $0x48] sm:$0xff]  ;;  %v1868_v8 = vpack.c.bf16 %v727_v63, %v725_v62  ;;  %v1998_v17 = vpack.c.bf16 %v860_v6, %v858_v5 }
  0x94   : > { %v1996_v12 = vpack.c.bf16 %v855_v2, %v853_v0  ;;  %v1870_v13 = vpack.c.bf16 %v732_v4, %v730_v3  ;;  %v731_v14 = vld [vmem:[%s2498_s7 + $0x250] sm:$0xff]  ;;  %v734_v19 = vld [vmem:[%s2498_s7 + $0x268] sm:$0xff]  ;;  %v736_v20 = vld [vmem:[%s2498_s7 + $0x278] sm:$0xff] }
  0x95   : > { %1849 = vmatpush1.bf16.msra.mxu1 %v1848_v9  ;;  %v729_v9 = vld [vmem:[%s2498_s7 + $0x240] sm:$0xff]  ;;  %v565_v16 = vld [vmem:[%s2500_s8 + $0x60] sm:$0xff]  ;;  %v574_v26 = vld [vmem:[%s2500_s8 + $0xa8] sm:$0xff]  ;;  %v1874_v29 = vpack.c.bf16 %v736_v20, %v734_v19 }
  0x96   : > { %1977 = vmatpush1.bf16.msra.mxu0 %v1976_v10  ;;  %1851 = vmatprep.subr.bf16.mxu1 %v1850_v11  ;;  %v566_v10 = vld [vmem:[%s2500_s8 + $0x68] sm:$0xff]  ;;  %v561_v11 = vld [vmem:[%s2500_s8 + $0x40] sm:$0xff]  ;;  %v1872_v24 = vpack.c.bf16 %v731_v14, %v729_v9  ;;  %v733_v25 = vld [vmem:[%s2498_s7 + $0x260] sm:$0xff] }
  0x97   : > { %1979 = vmatprep.subr.bf16.mxu0 %v1978_v15  ;;  %v857_v15 = vld [vmem:[%s2498_s7 + $0x640] sm:$0xff]  ;;  %v859_v18 = vld [vmem:[%s2498_s7 + $0x650] sm:$0xff]  ;;  %v740_v36 = vld [vmem:[%s2498_s7 + $0x298] sm:$0xff] }
  0x98   : > { %v2000_v28 = vpack.c.bf16 %v859_v18, %v857_v15  ;;  %v735_v30 = vld [vmem:[%s2498_s7 + $0x270] sm:$0xff]  ;;  %v861_v31 = vld [vmem:[%s2498_s7 + $0x660] sm:$0xff]  ;;  %v866_v37 = vld [vmem:[%s2498_s7 + $0x688] sm:$0xff] }
  0x99   : > { %1853 = vmatpush1.bf16.msra.mxu1 %v1852_v21  ;;  %v862_v21 = vld [vmem:[%s2498_s7 + $0x668] sm:$0xff]  ;;  %v573_v32 = vld [vmem:[%s2500_s8 + $0xa0] sm:$0xff]  ;;  %v868_v38 = vld [vmem:[%s2498_s7 + $0x698] sm:$0xff]  ;;  %v1876_v40 = vpack.c.bf16 %v735_v30, %v733_v25 }
  0x9a   : > { %1981 = vmatpush1.bf16.msra.mxu0 %v1980_v22  ;;  %1855 = vmatprep.subr.bf16.mxu1 %v1854_v23  ;;  %v864_v22 = vld [vmem:[%s2498_s7 + $0x678] sm:$0xff]  ;;  %v737_v41 = vld [vmem:[%s2498_s7 + $0x280] sm:$0xff]  ;;  %v577_v43 = vld [vmem:[%s2500_s8 + $0xc0] sm:$0xff]  ;;  %v2006_v49 = vpack.c.bf16 %v868_v38, %v866_v37 }
  0x9b   : > { %1983 = vmatprep.subr.bf16.mxu0 %v1982_v27  ;;  %v570_v23 = vld [vmem:[%s2500_s8 + $0x88] sm:$0xff]  ;;  %v569_v27 = vld [vmem:[%s2500_s8 + $0x80] sm:$0xff]  ;;  %v870_v53 = vld [vmem:[%s2498_s7 + $0x6a8] sm:$0xff] }
  0x9c   : > { %v582_v42 = vld [vmem:[%s2500_s8 + $0xe8] sm:$0xff]  ;;  %v581_v48 = vld [vmem:[%s2500_s8 + $0xe0] sm:$0xff]  ;;  %v869_v63 = vld [vmem:[%s2498_s7 + $0x6a0] sm:$0xff] }
  0x9d   : > { %1857 = vmatpush1.bf16.msra.mxu1 %v1856_v33  ;;  %v2002_v33 = vpack.c.bf16 %v864_v22, %v862_v21  ;;  %v867_v50 = vld [vmem:[%s2498_s7 + $0x690] sm:$0xff]  ;;  %v744_v52 = vld [vmem:[%s2498_s7 + $0x2b8] sm:$0xff]  ;;  %v746_v3 = vld [vmem:[%s2498_s7 + $0x2c8] sm:$0xff] }
  0x9e   : > { %1985 = vmatpush1.bf16.msra.mxu0 %v1984_v34  ;;  %1859 = vmatprep.subr.bf16.mxu1 %v1858_v35  ;;  %v863_v34 = vld [vmem:[%s2498_s7 + $0x670] sm:$0xff]  ;;  %v738_v35 = vld [vmem:[%s2498_s7 + $0x288] sm:$0xff]  ;;  %v872_v54 = vld [vmem:[%s2498_s7 + $0x6b8] sm:$0xff] }
  0x9f   : > { %1987 = vmatprep.subr.bf16.mxu0 %v1986_v39  ;;  %v578_v39 = vld [vmem:[%s2500_s8 + $0xc8] sm:$0xff]  ;;  %v2004_v44 = vpack.c.bf16 %v863_v34, %v861_v31  ;;  %v743_v62 = vld [vmem:[%s2498_s7 + $0x2b0] sm:$0xff]  ;;  %v874_v5 = vld [vmem:[%s2498_s7 + $0x6c8] sm:$0xff] }
  0xa0   : > { %v586_v55 = vld [vmem:[%s2500_s8 + $0x108] sm:$0xff]  ;;  %v589_v0 = vld [vmem:[%s2500_s8 + $0x120] sm:$0xff]  ;;  %v745_v9 = vld [vmem:[%s2498_s7 + $0x2c0] sm:$0xff] }
  0xa1   : > { %1861 = vmatpush1.bf16.msra.mxu1 %v1860_v45  ;;  %v1878_v45 = vpack.c.bf16 %v740_v36, %v738_v35  ;;  %v871_v2 = vld [vmem:[%s2498_s7 + $0x6b0] sm:$0xff]  ;;  %v748_v4 = vld [vmem:[%s2498_s7 + $0x2d8] sm:$0xff]  ;;  %v873_v15 = vld [vmem:[%s2498_s7 + $0x6c0] sm:$0xff] }
  0xa2   : > { %1989 = vmatpush1.bf16.msra.mxu0 %v1988_v46  ;;  %1863 = vmatprep.subr.bf16.mxu1 %v1862_v47  ;;  %v739_v46 = vld [vmem:[%s2498_s7 + $0x290] sm:$0xff]  ;;  %v865_v47 = vld [vmem:[%s2498_s7 + $0x680] sm:$0xff]  ;;  %v876_v6 = vld [vmem:[%s2498_s7 + $0x6d8] sm:$0xff] }
  0xa3   : > { %1991 = vmatprep.subr.bf16.mxu0 %v1990_v51  ;;  %v742_v51 = vld [vmem:[%s2498_s7 + $0x2a8] sm:$0xff]  ;;  %v1880_v56 = vpack.c.bf16 %v739_v46, %v737_v41  ;;  %v747_v14 = vld [vmem:[%s2498_s7 + $0x2d0] sm:$0xff]  ;;  %v752_v20 = vld [vmem:[%s2498_s7 + $0x2f8] sm:$0xff] }
  0xa4   : > { %978 = vmatmul.mubr.f32.vlgmr.msra.gmra.mrb[0].mxu1 %v553_v57  ;;  %v741_v57 = vld [vmem:[%s2498_s7 + $0x2a0] sm:$0xff]  ;;  %v875_v18 = vld [vmem:[%s2498_s7 + $0x6d0] sm:$0xff]  ;;  %v750_v19 = vld [vmem:[%s2498_s7 + $0x2e8] sm:$0xff] }
  0xa5   : > { %1865 = vmatpush1.bf16.msra.mxu1 %v1864_v58  ;;  %1264 = vmatmul.mubr.f32.vlgmr.msra.gmra.mrb[0].mxu0 %v557_v59  ;;  %v590_v58 = vld [vmem:[%s2500_s8 + $0x128] sm:$0xff]  ;;  %v585_v59 = vld [vmem:[%s2500_s8 + $0x100] sm:$0xff]  ;;  %v878_v21 = vld [vmem:[%s2498_s7 + $0x6e8] sm:$0xff] }
  0xa6   : > { %1993 = vmatpush1.bf16.msra.mxu0 %v1992_v60  ;;  %1867 = vmatprep.subr.bf16.mxu1 %v1866_v61  ;;  %v2008_v60 = vpack.c.bf16 %v867_v50, %v865_v47  ;;  %v1882_v61 = vpack.c.bf16 %v744_v52, %v742_v51  ;;  %v880_v22 = vld [vmem:[%s2498_s7 + $0x6f8] sm:$0xff]  ;;  %v749_v25 = vld [vmem:[%s2498_s7 + $0x2e0] sm:$0xff]  ;;  %v751_v30 = vld [vmem:[%s2498_s7 + $0x2f0] sm:$0xff] }
  0xa7   : > { %1995 = vmatprep.subr.bf16.mxu0 %v1994_v1  ;;  %983 = vmatprep.mubr.f32.mxu1 %v562_v7  ;;  %v2010_v1 = vpack.c.bf16 %v872_v54, %v870_v53  ;;  %v594_v7 = vld [vmem:[%s2500_s8 + $0x148] sm:$0xff]  ;;  %v877_v31 = vld [vmem:[%s2498_s7 + $0x6e0] sm:$0xff]  ;;  %v879_v34 = vld [vmem:[%s2498_s7 + $0x6f0] sm:$0xff] }
  0xa8   : > { %1269 = vmatprep.mubr.f32.mxu0 %v566_v10  ;;  %984 = vmatmul.mubr.f32.gmra.mrb[2].mxu1 %v561_v11  ;;  %v598_v10 = vld [vmem:[%s2500_s8 + $0x168] sm:$0xff]  ;;  %v593_v11 = vld [vmem:[%s2500_s8 + $0x140] sm:$0xff]  ;;  %v754_v35 = vld [vmem:[%s2498_s7 + $0x308] sm:$0xff] }
  0xa9   : > { %1869 = vmatpush1.bf16.msra.mxu1 %v1868_v8  ;;  %1270 = vmatmul.mubr.f32.gmra.mrb[2].mxu0 %v565_v16  ;;  %v1884_v8 = vpack.c.bf16 %v743_v62, %v741_v57  ;;  %v597_v16 = vld [vmem:[%s2500_s8 + $0x160] sm:$0xff]  ;;  %v756_v36 = vld [vmem:[%s2498_s7 + $0x318] sm:$0xff]  ;;  %v882_v37 = vld [vmem:[%s2498_s7 + $0x708] sm:$0xff] }
  0xaa   : > { %1997 = vmatpush1.bf16.msra.mxu0 %v1996_v12  ;;  %1871 = vmatprep.subr.bf16.mxu1 %v1870_v13  ;;  %v2012_v12 = vpack.c.bf16 %v871_v2, %v869_v63  ;;  %v1886_v13 = vpack.c.bf16 %v748_v4, %v746_v3  ;;  %v884_v38 = vld [vmem:[%s2498_s7 + $0x718] sm:$0xff]  ;;  %v753_v41 = vld [vmem:[%s2498_s7 + $0x300] sm:$0xff]  ;;  %v755_v46 = vld [vmem:[%s2498_s7 + $0x310] sm:$0xff] }
  0xab   : > { %1999 = vmatprep.subr.bf16.mxu0 %v1998_v17  ;;  %989 = vmatprep.mubr.f32.mxu1 %v570_v23  ;;  %v2014_v17 = vpack.c.bf16 %v876_v6, %v874_v5  ;;  %v602_v23 = vld [vmem:[%s2500_s8 + $0x188] sm:$0xff]  ;;  %v881_v47 = vld [vmem:[%s2498_s7 + $0x700] sm:$0xff]  ;;  %v883_v50 = vld [vmem:[%s2498_s7 + $0x710] sm:$0xff] }
  0xac   : > { %1275 = vmatprep.mubr.f32.mxu0 %v574_v26  ;;  %990 = vmatmul.mubr.f32.gmra.mrb[4].mxu1 %v569_v27  ;;  %v606_v26 = vld [vmem:[%s2500_s8 + $0x1a8] sm:$0xff]  ;;  %v601_v27 = vld [vmem:[%s2500_s8 + $0x180] sm:$0xff]  ;;  %v758_v51 = vld [vmem:[%s2498_s7 + $0x328] sm:$0xff] }
  0xad   : > { %1873 = vmatpush1.bf16.msra.mxu1 %v1872_v24  ;;  %1276 = vmatmul.mubr.f32.gmra.mrb[4].mxu0 %v573_v32  ;;  %v1888_v24 = vpack.c.bf16 %v747_v14, %v745_v9  ;;  %v605_v32 = vld [vmem:[%s2500_s8 + $0x1a0] sm:$0xff]  ;;  %v760_v52 = vld [vmem:[%s2498_s7 + $0x338] sm:$0xff]  ;;  %v886_v53 = vld [vmem:[%s2498_s7 + $0x728] sm:$0xff] }
  0xae   : > { %2001 = vmatpush1.bf16.msra.mxu0 %v2000_v28  ;;  %1875 = vmatprep.subr.bf16.mxu1 %v1874_v29  ;;  %v2016_v28 = vpack.c.bf16 %v875_v18, %v873_v15  ;;  %v1890_v29 = vpack.c.bf16 %v752_v20, %v750_v19  ;;  %v888_v54 = vld [vmem:[%s2498_s7 + $0x738] sm:$0xff]  ;;  %v757_v57 = vld [vmem:[%s2498_s7 + $0x320] sm:$0xff]  ;;  %v759_v62 = vld [vmem:[%s2498_s7 + $0x330] sm:$0xff] }
  0xaf   : > { %2003 = vmatprep.subr.bf16.mxu0 %v2002_v33  ;;  %995 = vmatprep.mubr.f32.mxu1 %v578_v39  ;;  %v2018_v33 = vpack.c.bf16 %v880_v22, %v878_v21  ;;  %v610_v39 = vld [vmem:[%s2500_s8 + $0x1c8] sm:$0xff]  ;;  %v885_v63 = vld [vmem:[%s2498_s7 + $0x720] sm:$0xff]  ;;  %v887_v2 = vld [vmem:[%s2498_s7 + $0x730] sm:$0xff] }
  0xb0   : > { %1281 = vmatprep.mubr.f32.mxu0 %v582_v42  ;;  %996 = vmatmul.mubr.f32.gmra.mrb[6].mxu1 %v577_v43  ;;  %v614_v42 = vld [vmem:[%s2500_s8 + $0x1e8] sm:$0xff]  ;;  %v609_v43 = vld [vmem:[%s2500_s8 + $0x1c0] sm:$0xff]  ;;  %v762_v3 = vld [vmem:[%s2498_s7 + $0x348] sm:$0xff] }
  0xb1   : > { %1877 = vmatpush1.bf16.msra.mxu1 %v1876_v40  ;;  %1282 = vmatmul.mubr.f32.gmra.mrb[6].mxu0 %v581_v48  ;;  %v1892_v40 = vpack.c.bf16 %v751_v30, %v749_v25  ;;  %v613_v48 = vld [vmem:[%s2500_s8 + $0x1e0] sm:$0xff]  ;;  %v764_v4 = vld [vmem:[%s2498_s7 + $0x358] sm:$0xff]  ;;  %v890_v5 = vld [vmem:[%s2498_s7 + $0x748] sm:$0xff] }
  0xb2   : > { %2005 = vmatpush1.bf16.msra.mxu0 %v2004_v44  ;;  %1879 = vmatprep.subr.bf16.mxu1 %v1878_v45  ;;  %v2020_v44 = vpack.c.bf16 %v879_v34, %v877_v31  ;;  %v1894_v45 = vpack.c.bf16 %v756_v36, %v754_v35  ;;  %v892_v6 = vld [vmem:[%s2498_s7 + $0x758] sm:$0xff]  ;;  %v761_v9 = vld [vmem:[%s2498_s7 + $0x340] sm:$0xff]  ;;  %v763_v14 = vld [vmem:[%s2498_s7 + $0x350] sm:$0xff] }
  0xb3   : > { %2007 = vmatprep.subr.bf16.mxu0 %v2006_v49  ;;  %1001 = vmatprep.mubr.f32.mxu1 %v586_v55  ;;  %v2022_v49 = vpack.c.bf16 %v884_v38, %v882_v37  ;;  %v618_v55 = vld [vmem:[%s2500_s8 + $0x208] sm:$0xff]  ;;  %v889_v15 = vld [vmem:[%s2498_s7 + $0x740] sm:$0xff]  ;;  %v891_v18 = vld [vmem:[%s2498_s7 + $0x750] sm:$0xff] }
  0xb4   : > { %1287 = vmatprep.mubr.f32.mxu0 %v590_v58  ;;  %1002 = vmatmul.mubr.f32.gmra.mrb[8].mxu1 %v585_v59  ;;  %v622_v58 = vld [vmem:[%s2500_s8 + $0x228] sm:$0xff]  ;;  %v617_v59 = vld [vmem:[%s2500_s8 + $0x200] sm:$0xff]  ;;  %v766_v19 = vld [vmem:[%s2498_s7 + $0x368] sm:$0xff] }
  0xb5   : > { %1881 = vmatpush1.bf16.msra.mxu1 %v1880_v56  ;;  %1288 = vmatmul.mubr.f32.gmra.mrb[8].mxu0 %v589_v0  ;;  %v1896_v56 = vpack.c.bf16 %v755_v46, %v753_v41  ;;  %v621_v0 = vld [vmem:[%s2500_s8 + $0x220] sm:$0xff]  ;;  %v768_v20 = vld [vmem:[%s2498_s7 + $0x378] sm:$0xff]  ;;  %v894_v21 = vld [vmem:[%s2498_s7 + $0x768] sm:$0xff] }
  0xb6   : > { %2009 = vmatpush1.bf16.msra.mxu0 %v2008_v60  ;;  %1883 = vmatprep.subr.bf16.mxu1 %v1882_v61  ;;  %v2024_v60 = vpack.c.bf16 %v883_v50, %v881_v47  ;;  %v1898_v61 = vpack.c.bf16 %v760_v52, %v758_v51  ;;  %v896_v22 = vld [vmem:[%s2498_s7 + $0x778] sm:$0xff]  ;;  %v765_v25 = vld [vmem:[%s2498_s7 + $0x360] sm:$0xff]  ;;  %v767_v30 = vld [vmem:[%s2498_s7 + $0x370] sm:$0xff] }
  0xb7   : > { %2011 = vmatprep.subr.bf16.mxu0 %v2010_v1  ;;  %1007 = vmatprep.mubr.f32.mxu1 %v594_v7  ;;  %v2026_v1 = vpack.c.bf16 %v888_v54, %v886_v53  ;;  %v626_v7 = vld [vmem:[%s2500_s8 + $0x248] sm:$0xff]  ;;  %v893_v31 = vld [vmem:[%s2498_s7 + $0x760] sm:$0xff]  ;;  %v895_v34 = vld [vmem:[%s2498_s7 + $0x770] sm:$0xff] }
  0xb8   : > { %1293 = vmatprep.mubr.f32.mxu0 %v598_v10  ;;  %1008 = vmatmul.mubr.f32.gmra.mrb[10].mxu1 %v593_v11  ;;  %v630_v10 = vld [vmem:[%s2500_s8 + $0x268] sm:$0xff]  ;;  %v625_v11 = vld [vmem:[%s2500_s8 + $0x240] sm:$0xff]  ;;  %v770_v35 = vld [vmem:[%s2498_s7 + $0x388] sm:$0xff] }
  0xb9   : > { %1885 = vmatpush1.bf16.msra.mxu1 %v1884_v8  ;;  %1294 = vmatmul.mubr.f32.gmra.mrb[10].mxu0 %v597_v16  ;;  %v1900_v8 = vpack.c.bf16 %v759_v62, %v757_v57  ;;  %v629_v16 = vld [vmem:[%s2500_s8 + $0x260] sm:$0xff]  ;;  %v772_v36 = vld [vmem:[%s2498_s7 + $0x398] sm:$0xff]  ;;  %v898_v37 = vld [vmem:[%s2498_s7 + $0x788] sm:$0xff] }
  0xba   : > { %2013 = vmatpush1.bf16.msra.mxu0 %v2012_v12  ;;  %1887 = vmatprep.subr.bf16.mxu1 %v1886_v13  ;;  %v2028_v12 = vpack.c.bf16 %v887_v2, %v885_v63  ;;  %v1902_v13 = vpack.c.bf16 %v764_v4, %v762_v3  ;;  %v900_v38 = vld [vmem:[%s2498_s7 + $0x798] sm:$0xff]  ;;  %v769_v41 = vld [vmem:[%s2498_s7 + $0x380] sm:$0xff]  ;;  %v771_v46 = vld [vmem:[%s2498_s7 + $0x390] sm:$0xff] }
  0xbb   : > { %2015 = vmatprep.subr.bf16.mxu0 %v2014_v17  ;;  %1013 = vmatprep.mubr.f32.mxu1 %v602_v23  ;;  %v2030_v17 = vpack.c.bf16 %v892_v6, %v890_v5  ;;  %v634_v23 = vld [vmem:[%s2500_s8 + $0x288] sm:$0xff]  ;;  %v897_v47 = vld [vmem:[%s2498_s7 + $0x780] sm:$0xff]  ;;  %v899_v50 = vld [vmem:[%s2498_s7 + $0x790] sm:$0xff] }
  0xbc   : > { %1299 = vmatprep.mubr.f32.mxu0 %v606_v26  ;;  %1014 = vmatmul.mubr.f32.gmra.mrb[12].mxu1 %v601_v27  ;;  %v638_v26 = vld [vmem:[%s2500_s8 + $0x2a8] sm:$0xff]  ;;  %v633_v27 = vld [vmem:[%s2500_s8 + $0x280] sm:$0xff]  ;;  %v774_v51 = vld [vmem:[%s2498_s7 + $0x3a8] sm:$0xff] }
  0xbd   : > { %1889 = vmatpush1.bf16.msra.mxu1 %v1888_v24  ;;  %1300 = vmatmul.mubr.f32.gmra.mrb[12].mxu0 %v605_v32  ;;  %v1904_v24 = vpack.c.bf16 %v763_v14, %v761_v9  ;;  %v637_v32 = vld [vmem:[%s2500_s8 + $0x2a0] sm:$0xff]  ;;  %v776_v52 = vld [vmem:[%s2498_s7 + $0x3b8] sm:$0xff]  ;;  %v902_v53 = vld [vmem:[%s2498_s7 + $0x7a8] sm:$0xff] }
  0xbe   : > { %2017 = vmatpush1.bf16.msra.mxu0 %v2016_v28  ;;  %1891 = vmatprep.subr.bf16.mxu1 %v1890_v29  ;;  %v2032_v28 = vpack.c.bf16 %v891_v18, %v889_v15  ;;  %v1906_v29 = vpack.c.bf16 %v768_v20, %v766_v19  ;;  %v904_v54 = vld [vmem:[%s2498_s7 + $0x7b8] sm:$0xff]  ;;  %v773_v57 = vld [vmem:[%s2498_s7 + $0x3a0] sm:$0xff]  ;;  %v775_v62 = vld [vmem:[%s2498_s7 + $0x3b0] sm:$0xff] }
  0xbf   : > { %2019 = vmatprep.subr.bf16.mxu0 %v2018_v33  ;;  %1019 = vmatprep.mubr.f32.mxu1 %v610_v39  ;;  %v2034_v33 = vpack.c.bf16 %v896_v22, %v894_v21  ;;  %v642_v39 = vld [vmem:[%s2500_s8 + $0x2c8] sm:$0xff]  ;;  %v901_v63 = vld [vmem:[%s2498_s7 + $0x7a0] sm:$0xff]  ;;  %v903_v2 = vld [vmem:[%s2498_s7 + $0x7b0] sm:$0xff] }
  0xc0   : > { %1305 = vmatprep.mubr.f32.mxu0 %v614_v42  ;;  %1020 = vmatmul.mubr.f32.gmra.mrb[14].mxu1 %v609_v43  ;;  %v646_v42 = vld [vmem:[%s2500_s8 + $0x2e8] sm:$0xff]  ;;  %v641_v43 = vld [vmem:[%s2500_s8 + $0x2c0] sm:$0xff]  ;;  %v778_v3 = vld [vmem:[%s2498_s7 + $0x3c8] sm:$0xff] }
  0xc1   : > { %1893 = vmatpush1.bf16.msra.mxu1 %v1892_v40  ;;  %1306 = vmatmul.mubr.f32.gmra.mrb[14].mxu0 %v613_v48  ;;  %v1908_v40 = vpack.c.bf16 %v767_v30, %v765_v25  ;;  %v645_v48 = vld [vmem:[%s2500_s8 + $0x2e0] sm:$0xff]  ;;  %v780_v4 = vld [vmem:[%s2498_s7 + $0x3d8] sm:$0xff]  ;;  %v906_v5 = vld [vmem:[%s2498_s7 + $0x7c8] sm:$0xff] }
  0xc2   : > { %2021 = vmatpush1.bf16.msra.mxu0 %v2020_v44  ;;  %1895 = vmatprep.subr.bf16.mxu1 %v1894_v45  ;;  %v2036_v44 = vpack.c.bf16 %v895_v34, %v893_v31  ;;  %v1910_v45 = vpack.c.bf16 %v772_v36, %v770_v35  ;;  %v908_v6 = vld [vmem:[%s2498_s7 + $0x7d8] sm:$0xff]  ;;  %v560_v9 = vld [vmem:[%s2500_s8 + $0x38] sm:$0xff]  ;;  %v905_v14 = vld [vmem:[%s2498_s7 + $0x7c0] sm:$0xff] }
  0xc3   : > { %2023 = vmatprep.subr.bf16.mxu0 %v2022_v49  ;;  %1025 = vmatprep.mubr.f32.mxu1 %v618_v55  ;;  %v2038_v49 = vpack.c.bf16 %v900_v38, %v898_v37  ;;  %v650_v55 = vld [vmem:[%s2500_s8 + $0x308] sm:$0xff]  ;;  %v2046_v15 = vpack.c.bf16 %v908_v6, %v906_v5  ;;  %v910_v19 = vld [vmem:[%s2498_s7 + $0x7e8] sm:$0xff]  ;;  %v783_v25 = vld [vmem:[%s2498_s7 + $0x3f0] sm:$0xff] }
  0xc4   : > { %1311 = vmatprep.mubr.f32.mxu0 %v622_v58  ;;  %1026 = vmatmul.mubr.f32.gmra.mrb[16].mxu1 %v617_v59  ;;  %v654_v58 = vld [vmem:[%s2500_s8 + $0x328] sm:$0xff]  ;;  %v649_v59 = vld [vmem:[%s2500_s8 + $0x300] sm:$0xff]  ;;  %v555_v31 = vld [vmem:[%s2500_s8 + $0x10] sm:$0xff] }
  0xc5   : > { %1897 = vmatpush1.bf16.msra.mxu1 %v1896_v56  ;;  %1312 = vmatmul.mubr.f32.gmra.mrb[16].mxu0 %v621_v0  ;;  %v1912_v56 = vpack.c.bf16 %v771_v46, %v769_v41  ;;  %v653_v0 = vld [vmem:[%s2500_s8 + $0x320] sm:$0xff]  ;;  %v784_v18 = vld [vmem:[%s2498_s7 + $0x3f8] sm:$0xff]  ;;  %v568_v34 = vld [vmem:[%s2500_s8 + $0x78] sm:$0xff] }
  0xc6   : > { %2025 = vmatpush1.bf16.msra.mxu0 %v2024_v60  ;;  %1899 = vmatprep.subr.bf16.mxu1 %v1898_v61  ;;  %v2040_v60 = vpack.c.bf16 %v899_v50, %v897_v47  ;;  %v1914_v61 = vpack.c.bf16 %v776_v52, %v774_v51  ;;  %v912_v20 = vld [vmem:[%s2498_s7 + $0x7f8] sm:$0xff]  ;;  %v563_v35 = vld [vmem:[%s2500_s8 + $0x50] sm:$0xff]  ;;  %v572_v37 = vld [vmem:[%s2500_s8 + $0x98] sm:$0xff] }
  0xc7   : > { %2027 = vmatprep.subr.bf16.mxu0 %v2026_v1  ;;  %1031 = vmatprep.mubr.f32.mxu1 %v626_v7  ;;  %v2042_v1 = vpack.c.bf16 %v904_v54, %v902_v53  ;;  %v556_v7 = vld [vmem:[%s2500_s8 + $0x18] sm:$0xff]  ;;  %v567_v36 = vld [vmem:[%s2500_s8 + $0x70] sm:$0xff] }
  0xc8   : > { %1317 = vmatprep.mubr.f32.mxu0 %v630_v10  ;;  %1032 = vmatmul.mubr.f32.gmra.mrb[18].mxu1 %v625_v11  ;;  %v2044_v10 = vpack.c.bf16 %v903_v2, %v901_v63  ;;  %v1918_v11 = vpack.c.bf16 %v780_v4, %v778_v3  ;;  %v576_v38 = vld [vmem:[%s2500_s8 + $0xb8] sm:$0xff]  ;;  %v587_v47 = vld [vmem:[%s2500_s8 + $0x110] sm:$0xff] }
  0xc9   : > { %1901 = vmatpush1.bf16.msra.mxu1 %v1900_v8  ;;  %1318 = vmatmul.mubr.f32.gmra.mrb[18].mxu0 %v629_v16  ;;  %v1916_v8 = vpack.c.bf16 %v775_v62, %v773_v57  ;;  %v907_v16 = vld [vmem:[%s2498_s7 + $0x7d0] sm:$0xff]  ;;  %v580_v41 = vld [vmem:[%s2500_s8 + $0xd8] sm:$0xff]  ;;  %v595_v51 = vld [vmem:[%s2500_s8 + $0x150] sm:$0xff] }
  0xca   : > { %2029 = vmatpush1.bf16.msra.mxu0 %v2028_v12  ;;  %1903 = vmatprep.subr.bf16.mxu1 %v1902_v13  ;;  %v777_v12 = vld [vmem:[%s2498_s7 + $0x3c0] sm:$0xff]  ;;  %v779_v13 = vld [vmem:[%s2498_s7 + $0x3d0] sm:$0xff]  ;;  %v2048_v22 = vpack.c.bf16 %v907_v16, %v905_v14  ;;  %v592_v46 = vld [vmem:[%s2500_s8 + $0x138] sm:$0xff] }
  0xcb   : > { %2031 = vmatprep.subr.bf16.mxu0 %v2030_v17  ;;  %1037 = vmatprep.mubr.f32.mxu1 %v634_v23  ;;  %v782_v17 = vld [vmem:[%s2498_s7 + $0x3e8] sm:$0xff]  ;;  %v1920_v21 = vpack.c.bf16 %v779_v13, %v777_v12  ;;  %v599_v52 = vld [vmem:[%s2500_s8 + $0x170] sm:$0xff] }
  0xcc   : > { %1323 = vmatprep.mubr.f32.mxu0 %v638_v26  ;;  %1038 = vmatmul.mubr.f32.gmra.mrb[20].mxu1 %v633_v27  ;;  %v1922_v23 = vpack.c.bf16 %v784_v18, %v782_v17  ;;  %v2050_v26 = vpack.c.bf16 %v912_v20, %v910_v19  ;;  %v909_v27 = vld [vmem:[%s2498_s7 + $0x7e0] sm:$0xff]  ;;  %v600_v50 = vld [vmem:[%s2500_s8 + $0x178] sm:$0xff] }
  0xcd   : > { %1905 = vmatpush1.bf16.msra.mxu1 %v1904_v24  ;;  %1324 = vmatmul.mubr.f32.gmra.mrb[20].mxu0 %v637_v32  ;;  %v781_v24 = vld [vmem:[%s2498_s7 + $0x3e0] sm:$0xff]  ;;  %v604_v53 = vld [vmem:[%s2500_s8 + $0x198] sm:$0xff] }
  0xce   : > { %2033 = vmatpush1.bf16.msra.mxu0 %v2032_v28  ;;  %1907 = vmatprep.subr.bf16.mxu1 %v1906_v29  ;;  %v911_v28 = vld [vmem:[%s2498_s7 + $0x7f0] sm:$0xff]  ;;  %v1924_v29 = vpack.c.bf16 %v783_v25, %v781_v24  ;;  %v559_v32 = vld [vmem:[%s2500_s8 + $0x30] sm:$0xff]  ;;  %v608_v54 = vld [vmem:[%s2500_s8 + $0x1b8] sm:$0xff] }
  0xcf   : > { %2035 = vmatprep.subr.bf16.mxu0 %v2034_v33  ;;  %1043 = vmatprep.mubr.f32.mxu1 %v642_v39  ;;  %v2052_v30 = vpack.c.bf16 %v911_v28, %v909_v27  ;;  %v564_v33 = vld [vmem:[%s2500_s8 + $0x58] sm:$0xff]  ;;  %v571_v39 = vld [vmem:[%s2500_s8 + $0x90] sm:$0xff]  ;;  %v529_v28 = vld [vmem:[#allocation2 + $0x10] sm:$0xff] }
  0xd0   : > { %1329 = vmatprep.mubr.f32.mxu0 %v646_v42  ;;  %1044 = vmatmul.mubr.f32.gmra.mrb[22].mxu1 %v641_v43  ;;  %v584_v42 = vld [vmem:[%s2500_s8 + $0xf8] sm:$0xff]  ;;  %v579_v43 = vld [vmem:[%s2500_s8 + $0xd0] sm:$0xff] }
  0xd1   : > { %1909 = vmatpush1.bf16.msra.mxu1 %v1908_v40  ;;  %1330 = vmatmul.mubr.f32.gmra.mrb[22].mxu0 %v645_v48  ;;  %v575_v40 = vld [vmem:[%s2500_s8 + $0xb0] sm:$0xff]  ;;  %v612_v57 = vld [vmem:[%s2500_s8 + $0x1d8] sm:$0xff] }
  0xd2   : > { %2037 = vmatpush1.bf16.msra.mxu0 %v2036_v44  ;;  %1911 = vmatprep.subr.bf16.mxu1 %v1910_v45  ;;  %v583_v44 = vld [vmem:[%s2500_s8 + $0xf0] sm:$0xff]  ;;  %v588_v45 = vld [vmem:[%s2500_s8 + $0x118] sm:$0xff] }
  0xd3   : > { %2039 = vmatprep.subr.bf16.mxu0 %v2038_v49  ;;  %1049 = vmatprep.mubr.f32.mxu1 %v650_v55  ;;  %v591_v48 = vld [vmem:[%s2500_s8 + $0x130] sm:$0xff]  ;;  %v596_v49 = vld [vmem:[%s2500_s8 + $0x158] sm:$0xff] }
  0xd4   : > { %1335 = vmatprep.mubr.f32.mxu0 %v654_v58  ;;  %1050 = vmatmul.mubr.f32.gmra.mrb[24].mxu1 %v649_v59  ;;  %v603_v55 = vld [vmem:[%s2500_s8 + $0x190] sm:$0xff]  ;;  %v616_v58 = vld [vmem:[%s2500_s8 + $0x1f8] sm:$0xff] }
  0xd5   : > { %1913 = vmatpush1.bf16.msra.mxu1 %v1912_v56  ;;  %1336 = vmatmul.mubr.f32.gmra.mrb[24].mxu0 %v653_v0  ;;  %v607_v56 = vld [vmem:[%s2500_s8 + $0x1b0] sm:$0xff]  ;;  %v624_v62 = vld [vmem:[%s2500_s8 + $0x238] sm:$0xff] }
  0xd6   : > { %2041 = vmatpush1.bf16.msra.mxu0 %v2040_v60  ;;  %1915 = vmatprep.subr.bf16.mxu1 %v1914_v61  ;;  %v611_v59 = vld [vmem:[%s2500_s8 + $0x1d0] sm:$0xff]  ;;  %v620_v61 = vld [vmem:[%s2500_s8 + $0x218] sm:$0xff] }
  0xd7   : > { %2043 = vmatprep.subr.bf16.mxu0 %v2042_v1  ;;  %1120 = vmatprep.mubr.f32.mxu1 %v556_v7  ;;  %v615_v60 = vld [vmem:[%s2500_s8 + $0x1f0] sm:$0xff]  ;;  %v628_v1 = vld [vmem:[%s2500_s8 + $0x258] sm:$0xff] }
  0xd8   : > { %1406 = vmatprep.mubr.f32.mxu0 %v560_v9  ;;  %v619_v63 = vld [vmem:[%s2500_s8 + $0x210] sm:$0xff]  ;;  %v632_v2 = vld [vmem:[%s2500_s8 + $0x278] sm:$0xff] }
  0xd9   : > { %1917 = vmatpush1.bf16.msra.mxu1 %v1916_v8  ;;  %v623_v0 = vld [vmem:[%s2500_s8 + $0x230] sm:$0xff]  ;;  %v636_v5 = vld [vmem:[%s2500_s8 + $0x298] sm:$0xff] }
  0xda   : > { %2045 = vmatpush1.bf16.msra.mxu0 %v2044_v10  ;;  %1919 = vmatprep.subr.bf16.mxu1 %v1918_v11  ;;  %v627_v3 = vld [vmem:[%s2500_s8 + $0x250] sm:$0xff]  ;;  %v640_v6 = vld [vmem:[%s2500_s8 + $0x2b8] sm:$0xff] }
  0xdb   : > { %2047 = vmatprep.subr.bf16.mxu0 %v2046_v15  ;;  %v631_v4 = vld [vmem:[%s2500_s8 + $0x270] sm:$0xff]  ;;  %v644_v9 = vld [vmem:[%s2500_s8 + $0x2d8] sm:$0xff] }
  0xdc   : > { %v635_v7 = vld [vmem:[%s2500_s8 + $0x290] sm:$0xff]  ;;  %v648_v10 = vld [vmem:[%s2500_s8 + $0x2f8] sm:$0xff] }
  0xdd   : > { %1921 = vmatpush1.bf16.msra.mxu1 %v1920_v21  ;;  %v639_v8 = vld [vmem:[%s2500_s8 + $0x2b0] sm:$0xff]  ;;  %v652_v13 = vld [vmem:[%s2500_s8 + $0x318] sm:$0xff] }
  0xde   : > { %2049 = vmatpush1.bf16.msra.mxu0 %v2048_v22  ;;  %1923 = vmatprep.subr.bf16.mxu1 %v1922_v23  ;;  %v643_v11 = vld [vmem:[%s2500_s8 + $0x2d0] sm:$0xff]  ;;  %v656_v14 = vld [vmem:[%s2500_s8 + $0x338] sm:$0xff] }
  0xdf   : > { %2051 = vmatprep.subr.bf16.mxu0 %v2050_v26  ;;  %v647_v12 = vld [vmem:[%s2500_s8 + $0x2f0] sm:$0xff]  ;;  %v528_v22 = vld [vmem:[#allocation2 + $0x8] sm:$0xff] }
  0xe0   : > { %v651_v15 = vld [vmem:[%s2500_s8 + $0x310] sm:$0xff] }
  0xe1   : > { %1925 = vmatpush1.bf16.msra.mxu1 %v1924_v29  ;;  %v655_v16 = vld [vmem:[%s2500_s8 + $0x330] sm:$0xff] }
  0xe2   : > { %2053 = vmatpush1.bf16.msra.mxu0 %v2052_v30  ;;  %v527_v18 = vld [vmem:[#allocation2] sm:$0xff] }
  0xe4   : > { %1121 = vmatmul.mubr.f32.vlgmr.msra.gmra.mrb[0].mxu1 %v555_v31 }
  0xe5   : > { %1407 = vmatmul.mubr.f32.vlgmr.msra.gmra.mrb[0].mxu0 %v559_v32  ;;  %1126 = vmatprep.mubr.f32.mxu1 %v564_v33  ;;  %v530_v32 = vld [vmem:[#allocation2 + $0x18] sm:$0xff] }
  0xe6   : > { %1412 = vmatprep.mubr.f32.mxu0 %v568_v34 }
  0xe8   : > { %1127 = vmatmul.mubr.f32.gmra.mrb[2].mxu1 %v563_v35 }
  0xe9   : > { %1413 = vmatmul.mubr.f32.gmra.mrb[2].mxu0 %v567_v36  ;;  %1132 = vmatprep.mubr.f32.mxu1 %v572_v37 }
  0xea   : > { %1418 = vmatprep.mubr.f32.mxu0 %v576_v38  ;;  %v531_v38 = vld [vmem:[#allocation2 + $0x20] sm:$0xff] }
  0xec   : > { %1133 = vmatmul.mubr.f32.gmra.mrb[4].mxu1 %v571_v39 }
  0xed   : > { %1419 = vmatmul.mubr.f32.gmra.mrb[4].mxu0 %v575_v40  ;;  %1138 = vmatprep.mubr.f32.mxu1 %v580_v41 }
  0xee   : > { %1424 = vmatprep.mubr.f32.mxu0 %v584_v42  ;;  %v532_v42 = vld [vmem:[#allocation2 + $0x28] sm:$0xff] }
  0xf0   : > { %1139 = vmatmul.mubr.f32.gmra.mrb[6].mxu1 %v579_v43 }
  0xf1   : > { %1425 = vmatmul.mubr.f32.gmra.mrb[6].mxu0 %v583_v44  ;;  %1144 = vmatprep.mubr.f32.mxu1 %v588_v45 }
  0xf2   : > { %1430 = vmatprep.mubr.f32.mxu0 %v592_v46 }
  0xf4   : > { %1145 = vmatmul.mubr.f32.gmra.mrb[8].mxu1 %v587_v47 }
  0xf5   : > { %1431 = vmatmul.mubr.f32.gmra.mrb[8].mxu0 %v591_v48  ;;  %1150 = vmatprep.mubr.f32.mxu1 %v596_v49  ;;  %v533_v48 = vld [vmem:[#allocation2 + $0x30] sm:$0xff] }
  0xf6   : > { %1436 = vmatprep.mubr.f32.mxu0 %v600_v50 }
  0xf8   : > { %1151 = vmatmul.mubr.f32.gmra.mrb[10].mxu1 %v595_v51 }
  0xf9   : > { %1437 = vmatmul.mubr.f32.gmra.mrb[10].mxu0 %v599_v52  ;;  %1156 = vmatprep.mubr.f32.mxu1 %v604_v53  ;;  %v534_v52 = vld [vmem:[#allocation2 + $0x38] sm:$0xff] }
  0xfa   : > { %1442 = vmatprep.mubr.f32.mxu0 %v608_v54 }
  0xfc   : > { %1157 = vmatmul.mubr.f32.gmra.mrb[12].mxu1 %v603_v55 }
  0xfd   : > { %1443 = vmatmul.mubr.f32.gmra.mrb[12].mxu0 %v607_v56  ;;  %1162 = vmatprep.mubr.f32.mxu1 %v612_v57 }
  0xfe   : > { %1448 = vmatprep.mubr.f32.mxu0 %v616_v58  ;;  %v535_v58 = vld [vmem:[#allocation2 + $0x40] sm:$0xff] }
 0x100   : > { %1163 = vmatmul.mubr.f32.gmra.mrb[14].mxu1 %v611_v59 }
 0x101   : > { %1449 = vmatmul.mubr.f32.gmra.mrb[14].mxu0 %v615_v60  ;;  %1168 = vmatprep.mubr.f32.mxu1 %v620_v61 }
 0x102   : > { %1454 = vmatprep.mubr.f32.mxu0 %v624_v62  ;;  %v536_v62 = vld [vmem:[#allocation2 + $0x48] sm:$0xff] }
 0x104   : > { %1169 = vmatmul.mubr.f32.gmra.mrb[16].mxu1 %v619_v63 }
 0x105   : > { %1455 = vmatmul.mubr.f32.gmra.mrb[16].mxu0 %v623_v0  ;;  %1174 = vmatprep.mubr.f32.mxu1 %v628_v1 }
 0x106   : > { %1460 = vmatprep.mubr.f32.mxu0 %v632_v2 }
 0x108   : > { %1175 = vmatmul.mubr.f32.gmra.mrb[18].mxu1 %v627_v3 }
 0x109   : > { %1461 = vmatmul.mubr.f32.gmra.mrb[18].mxu0 %v631_v4  ;;  %1180 = vmatprep.mubr.f32.mxu1 %v636_v5  ;;  %v537_v4 = vld [vmem:[#allocation2 + $0x50] sm:$0xff] }
 0x10a   : > { %1466 = vmatprep.mubr.f32.mxu0 %v640_v6 }
 0x10c   : > { %1181 = vmatmul.mubr.f32.gmra.mrb[20].mxu1 %v635_v7 }
 0x10d   : > { %1467 = vmatmul.mubr.f32.gmra.mrb[20].mxu0 %v639_v8  ;;  %1186 = vmatprep.mubr.f32.mxu1 %v644_v9  ;;  %v538_v8 = vld [vmem:[#allocation2 + $0x58] sm:$0xff] }
 0x10e   : > { %1472 = vmatprep.mubr.f32.mxu0 %v648_v10 }
 0x110   : > { %1187 = vmatmul.mubr.f32.gmra.mrb[22].mxu1 %v643_v11 }
 0x111   : > { %1473 = vmatmul.mubr.f32.gmra.mrb[22].mxu0 %v647_v12  ;;  %1192 = vmatprep.mubr.f32.mxu1 %v652_v13 }
 0x112   : > { %1478 = vmatprep.mubr.f32.mxu0 %v656_v14  ;;  %v539_v14 = vld [vmem:[#allocation2 + $0x60] sm:$0xff] }
 0x114   : > { %1193 = vmatmul.mubr.f32.gmra.mrb[24].mxu1 %v651_v15 }
 0x115   : > { %1479 = vmatmul.mubr.f32.gmra.mrb[24].mxu0 %v655_v16 }
 0x1b7   : > { %v1122_v17 = vpop.f32.mrb[0].mxu1 }
 0x1b8   : > { %v1408_v19 = vpop.f32.mrb[0].mxu0  ;;  %v1124_v20 = vpop.f32.mrb[1].mxu1 }
 0x1b9   : > { %v2054_v21 = vadd.f32 %v1408_v19, %v1122_v17  ;;  %v1410_v23 = vpop.f32.mrb[1].mxu0 }
 0x1ba   : > { %v2055_v24 = vadd.f32 %v1410_v23, %v1124_v20 }
 0x1bb   : > { %v1485_v25 = vadd.f32 %v2054_v21, %v527_v18  ;;  %v1128_v26 = vpop.f32.mrb[2].mxu1  ;;  %v540_v18 = vld [vmem:[#allocation2 + $0x68] sm:$0xff] }
 0x1bc   : > { %v1486_v27 = vadd.f32 %v2055_v24, %v528_v22  ;;  %v1414_v29 = vpop.f32.mrb[2].mxu0  ;;  %v1130_v30 = vpop.f32.mrb[3].mxu1  ;;  %v541_v24 = vld [vmem:[#allocation2 + $0x70] sm:$0xff] }
 0x1bd   : > { %1511 = vst [vmem:[#allocation2] sm:$0xff] %v1485_v25  ;;  %v2056_v31 = vadd.f32 %v1414_v29, %v1128_v26  ;;  %v1416_v33 = vpop.f32.mrb[3].mxu0 }
 0x1be   : > { %1512 = vst [vmem:[#allocation2 + $0x8] sm:$0xff] %v1486_v27  ;;  %v2057_v34 = vadd.f32 %v1416_v33, %v1130_v30 }
 0x1bf   : > { %v1487_v35 = vadd.f32 %v2056_v31, %v529_v28  ;;  %v1134_v36 = vpop.f32.mrb[4].mxu1  ;;  %v542_v28 = vld [vmem:[#allocation2 + $0x78] sm:$0xff] }
 0x1c0   : > { %v1488_v37 = vadd.f32 %v2057_v34, %v530_v32  ;;  %v1420_v39 = vpop.f32.mrb[4].mxu0  ;;  %v1136_v40 = vpop.f32.mrb[5].mxu1  ;;  %v543_v34 = vld [vmem:[#allocation2 + $0x80] sm:$0xff] }
 0x1c1   : > { %1513 = vst [vmem:[#allocation2 + $0x10] sm:$0xff] %v1487_v35  ;;  %v2058_v41 = vadd.f32 %v1420_v39, %v1134_v36  ;;  %v1422_v43 = vpop.f32.mrb[5].mxu0 }
 0x1c2   : > { %1514 = vst [vmem:[#allocation2 + $0x18] sm:$0xff] %v1488_v37  ;;  %v2059_v44 = vadd.f32 %v1422_v43, %v1136_v40 }
 0x1c3   : > { %v1489_v45 = vadd.f32 %v2058_v41, %v531_v38  ;;  %v1140_v46 = vpop.f32.mrb[6].mxu1  ;;  %v544_v38 = vld [vmem:[#allocation2 + $0x88] sm:$0xff] }
 0x1c4   : > { %v1490_v47 = vadd.f32 %v2059_v44, %v532_v42  ;;  %v1426_v49 = vpop.f32.mrb[6].mxu0  ;;  %v1142_v50 = vpop.f32.mrb[7].mxu1  ;;  %v545_v44 = vld [vmem:[#allocation2 + $0x90] sm:$0xff] }
 0x1c5   : > { %1515 = vst [vmem:[#allocation2 + $0x20] sm:$0xff] %v1489_v45  ;;  %v2060_v51 = vadd.f32 %v1426_v49, %v1140_v46  ;;  %v1428_v53 = vpop.f32.mrb[7].mxu0 }
 0x1c6   : > { %1516 = vst [vmem:[#allocation2 + $0x28] sm:$0xff] %v1490_v47  ;;  %v2061_v54 = vadd.f32 %v1428_v53, %v1142_v50 }
 0x1c7   : > { %v1491_v55 = vadd.f32 %v2060_v51, %v533_v48  ;;  %v1146_v56 = vpop.f32.mrb[8].mxu1  ;;  %v546_v48 = vld [vmem:[#allocation2 + $0x98] sm:$0xff] }
 0x1c8   : > { %v1492_v57 = vadd.f32 %v2061_v54, %v534_v52  ;;  %v1432_v59 = vpop.f32.mrb[8].mxu0  ;;  %v1148_v60 = vpop.f32.mrb[9].mxu1  ;;  %v547_v54 = vld [vmem:[#allocation2 + $0xa0] sm:$0xff] }
 0x1c9   : > { %1517 = vst [vmem:[#allocation2 + $0x30] sm:$0xff] %v1491_v55  ;;  %v2062_v61 = vadd.f32 %v1432_v59, %v1146_v56  ;;  %v1434_v63 = vpop.f32.mrb[9].mxu0 }
 0x1ca   : > { %1518 = vst [vmem:[#allocation2 + $0x38] sm:$0xff] %v1492_v57  ;;  %v2063_v0 = vadd.f32 %v1434_v63, %v1148_v60 }
 0x1cb   : > { %v1493_v1 = vadd.f32 %v2062_v61, %v535_v58  ;;  %v1152_v2 = vpop.f32.mrb[10].mxu1  ;;  %v548_v58 = vld [vmem:[#allocation2 + $0xa8] sm:$0xff] }
 0x1cc   : > { %v1494_v3 = vadd.f32 %v2063_v0, %v536_v62  ;;  %v1438_v5 = vpop.f32.mrb[10].mxu0  ;;  %v1154_v6 = vpop.f32.mrb[11].mxu1  ;;  %v549_v0 = vld [vmem:[#allocation2 + $0xb0] sm:$0xff] }
 0x1cd   : > { %1519 = vst [vmem:[#allocation2 + $0x40] sm:$0xff] %v1493_v1  ;;  %v2064_v7 = vadd.f32 %v1438_v5, %v1152_v2  ;;  %v1440_v9 = vpop.f32.mrb[11].mxu0 }
 0x1ce   : > { %1520 = vst [vmem:[#allocation2 + $0x48] sm:$0xff] %v1494_v3  ;;  %v2065_v10 = vadd.f32 %v1440_v9, %v1154_v6 }
 0x1cf   : > { %v1495_v11 = vadd.f32 %v2064_v7, %v537_v4  ;;  %v1158_v12 = vpop.f32.mrb[12].mxu1  ;;  %v550_v4 = vld [vmem:[#allocation2 + $0xb8] sm:$0xff] }
 0x1d0   : > { %v1496_v13 = vadd.f32 %v2065_v10, %v538_v8  ;;  %v1444_v15 = vpop.f32.mrb[12].mxu0  ;;  %v1160_v16 = vpop.f32.mrb[13].mxu1  ;;  %v551_v10 = vld [vmem:[#allocation2 + $0xc0] sm:$0xff] }
 0x1d1   : > { %1521 = vst [vmem:[#allocation2 + $0x50] sm:$0xff] %v1495_v11  ;;  %v2066_v17 = vadd.f32 %v1444_v15, %v1158_v12  ;;  %v1446_v19 = vpop.f32.mrb[13].mxu0 }
 0x1d2   : > { %1522 = vst [vmem:[#allocation2 + $0x58] sm:$0xff] %v1496_v13  ;;  %v2067_v20 = vadd.f32 %v1446_v19, %v1160_v16  ;;  %v1569_v19 = vlaneseq (!%p1791_p11) }
 0x1d3   : > { %v1497_v21 = vadd.f32 %v2066_v17, %v539_v14  ;;  %v1164_v22 = vpop.f32.mrb[14].mxu1  ;;  %v552_v14 = vld [vmem:[#allocation2 + $0xc8] sm:$0xff] }
 0x1d4   : > { %v1498_v23 = vadd.f32 %v2067_v20, %v540_v18  ;;  %v1450_v25 = vpop.f32.mrb[14].mxu0  ;;  %v1166_v26 = vpop.f32.mrb[15].mxu1  ;;  %v1570_v20 = vshrl.u32 (!%p1791_p11), %v1569_v19, 7 }
 0x1d5   : > { %1523 = vst [vmem:[#allocation2 + $0x60] sm:$0xff] %v1497_v21  ;;  %v2068_v27 = vadd.f32 %v1450_v25, %v1164_v22  ;;  %v1452_v29 = vpop.f32.mrb[15].mxu0  ;;  %v1567_v21 = vld [vmem:[%s2992_s2] sm:$0x3] (!%p1791_p11) }
 0x1d6   : > { %1524 = vst [vmem:[#allocation2 + $0x68] sm:$0xff] %v1498_v23  ;;  %v2069_v30 = vadd.f32 %v1452_v29, %v1166_v26  ;;  %v1541_v22 = vld [vmem:[#allocation2] sm:$0xff] (!%p1791_p11)  ;;  %v1571_v23 = vsub.s32 (!%p1791_p11), 0, %v1570_v20  ;;  %v1575_v25 = vsub.s32 (!%p1791_p11), 1, %v1570_v20  ;;  %v1543_v26 = vld [vmem:[#allocation2 + $0x10] sm:$0xff] (!%p1791_p11) }
 0x1d7   : > { %v1499_v31 = vadd.f32 %v2068_v27, %v541_v24  ;;  %v1170_v32 = vpop.f32.mrb[16].mxu1  ;;  %v1542_v24 = vld [vmem:[#allocation2 + $0x8] sm:$0xff] (!%p1791_p11)  ;;  %v1544_v27 = vld [vmem:[#allocation2 + $0x18] sm:$0xff] (!%p1791_p11) }
 0x1d8   : > { %v1500_v33 = vadd.f32 %v2069_v30, %v542_v28  ;;  %v1456_v35 = vpop.f32.mrb[16].mxu0  ;;  %v1172_v36 = vpop.f32.mrb[17].mxu1  ;;  %v1545_v28 = vld [vmem:[#allocation2 + $0x20] sm:$0xff] (!%p1791_p11)  ;;  %v2867_v29 = vrot.slane (!%p1791_p11), %v1567_v21, %v1571_v23  ;;  %v2869_v30 = vrot.slane (!%p1791_p11), %v1567_v21, %v1575_v25 }
 0x1d9   : > { %1525 = vst [vmem:[#allocation2 + $0x70] sm:$0xff] %v1499_v31  ;;  %v2070_v37 = vadd.f32 %v1456_v35, %v1170_v32  ;;  %v1458_v39 = vpop.f32.mrb[17].mxu0  ;;  %v1546_v31 = vld [vmem:[#allocation2 + $0x28] sm:$0xff] (!%p1791_p11)  ;;  %v1547_v32 = vld [vmem:[#allocation2 + $0x30] sm:$0xff] (!%p1791_p11) }
 0x1da   : > { %1526 = vst [vmem:[#allocation2 + $0x78] sm:$0xff] %v1500_v33  ;;  %v2071_v40 = vadd.f32 %v1458_v39, %v1172_v36  ;;  %v1548_v33 = vld [vmem:[#allocation2 + $0x38] sm:$0xff] (!%p1791_p11)  ;;  %v1580_v35 = vadd.f32 (!%p1791_p11), %v2869_v30, %v1542_v24  ;;  %v1581_v36 = vadd.f32 (!%p1791_p11), %v2867_v29, %v1543_v26  ;;  %v1550_v39 = vld [vmem:[#allocation2 + $0x48] sm:$0xff] (!%p1791_p11) }
 0x1db   : > { %v1501_v41 = vadd.f32 %v2070_v37, %v543_v34  ;;  %v1176_v42 = vpop.f32.mrb[18].mxu1  ;;  %v1579_v34 = vadd.f32 (!%p1791_p11), %v2867_v29, %v1541_v22  ;;  %v1582_v37 = vadd.f32 (!%p1791_p11), %v2869_v30, %v1544_v27 }
 0x1dc   : > { %v1502_v43 = vadd.f32 %v2071_v40, %v544_v38  ;;  %v1462_v45 = vpop.f32.mrb[18].mxu0  ;;  %v1178_v46 = vpop.f32.mrb[19].mxu1  ;;  %v1549_v38 = vld [vmem:[#allocation2 + $0x40] sm:$0xff] (!%p1791_p11)  ;;  %v1551_v40 = vld [vmem:[#allocation2 + $0x50] sm:$0xff] (!%p1791_p11) }
 0x1dd   : > { %1527 = vst [vmem:[#allocation2 + $0x80] sm:$0xff] %v1501_v41  ;;  %v2072_v47 = vadd.f32 %v1462_v45, %v1176_v42  ;;  %v1464_v49 = vpop.f32.mrb[19].mxu0  ;;  %v1583_v41 = vadd.f32 (!%p1791_p11), %v2867_v29, %v1545_v28  ;;  %v1584_v42 = vadd.f32 (!%p1791_p11), %v2869_v30, %v1546_v31  ;;  %v1552_v45 = vld [vmem:[#allocation2 + $0x58] sm:$0xff] (!%p1791_p11) }
 0x1de   : > { %1528 = vst [vmem:[#allocation2 + $0x88] sm:$0xff] %v1502_v43  ;;  %v2073_v50 = vadd.f32 %v1464_v49, %v1178_v46  ;;  %v1585_v43 = vadd.f32 (!%p1791_p11), %v2867_v29, %v1547_v32  ;;  %v1553_v46 = vld [vmem:[#allocation2 + $0x60] sm:$0xff] (!%p1791_p11)  ;;  %v1606_v49 = vmax.f32 (!%p1791_p11), %v1580_v35, 0.0 }
 0x1df   : > { %v1503_v51 = vadd.f32 %v2072_v47, %v545_v44  ;;  %v1182_v52 = vpop.f32.mrb[20].mxu1  ;;  %v1586_v44 = vadd.f32 (!%p1791_p11), %v2869_v30, %v1548_v33  ;;  %v1554_v47 = vld [vmem:[#allocation2 + $0x68] sm:$0xff] (!%p1791_p11) }
 0x1e0   : > { %v1504_v53 = vadd.f32 %v2073_v50, %v546_v48  ;;  %v1468_v55 = vpop.f32.mrb[20].mxu0  ;;  %v1184_v56 = vpop.f32.mrb[21].mxu1  ;;  %v1605_v48 = vmax.f32 (!%p1791_p11), %v1579_v34, 0.0  ;;  %v1607_v50 = vmax.f32 (!%p1791_p11), %v1581_v36, 0.0  ;;  %1632 = vst [vmem:[%s2993_s3 + $0x8] sm:$0xff] (!%p1791_p11), %v1606_v49 }
 0x1e1   : > { %1529 = vst [vmem:[#allocation2 + $0x90] sm:$0xff] %v1503_v51  ;;  %v2074_v57 = vadd.f32 %v1468_v55, %v1182_v52  ;;  %v1470_v59 = vpop.f32.mrb[21].mxu0  ;;  %v1608_v51 = vmax.f32 (!%p1791_p11), %v1582_v37, 0.0  ;;  %v1555_v52 = vld [vmem:[#allocation2 + $0x70] sm:$0xff] (!%p1791_p11)  ;;  %v1610_v55 = vmax.f32 (!%p1791_p11), %v1584_v42, 0.0 }
 0x1e2   : > { %1530 = vst [vmem:[#allocation2 + $0x98] sm:$0xff] %v1504_v53  ;;  %v2075_v60 = vadd.f32 %v1470_v59, %v1184_v56  ;;  %v1556_v53 = vld [vmem:[#allocation2 + $0x78] sm:$0xff] (!%p1791_p11)  ;;  %v1611_v56 = vmax.f32 (!%p1791_p11), %v1585_v43, 0.0  ;;  %1631 = vst [vmem:[%s2993_s3] sm:$0xff] (!%p1791_p11), %v1605_v48  ;;  %v1588_v59 = vadd.f32 (!%p1791_p11), %v2869_v30, %v1550_v39 }
 0x1e3   : > { %v1505_v61 = vadd.f32 %v2074_v57, %v547_v54  ;;  %v1188_v62 = vpop.f32.mrb[22].mxu1  ;;  %v1609_v54 = vmax.f32 (!%p1791_p11), %v1583_v41, 0.0  ;;  %v1612_v57 = vmax.f32 (!%p1791_p11), %v1586_v44, 0.0  ;;  %1633 = vst [vmem:[%s2993_s3 + $0x10] sm:$0xff] (!%p1791_p11), %v1607_v50  ;;  %1634 = vst [vmem:[%s2993_s3 + $0x18] sm:$0xff] (!%p1791_p11), %v1608_v51 }
 0x1e4   : > { %v1506_v63 = vadd.f32 %v2075_v60, %v548_v58  ;;  %v1474_v1 = vpop.f32.mrb[22].mxu0  ;;  %v1190_v2 = vpop.f32.mrb[23].mxu1  ;;  %v1587_v58 = vadd.f32 (!%p1791_p11), %v2867_v29, %v1549_v38  ;;  %v1589_v60 = vadd.f32 (!%p1791_p11), %v2867_v29, %v1551_v40  ;;  %1636 = vst [vmem:[%s2993_s3 + $0x28] sm:$0xff] (!%p1791_p11), %v1610_v55  ;;  %1637 = vst [vmem:[%s2993_s3 + $0x30] sm:$0xff] (!%p1791_p11), %v1611_v56 }
 0x1e5   : > { %1531 = vst [vmem:[#allocation2 + $0xa0] sm:$0xff] %v1505_v61  ;;  %v2076_v3 = vadd.f32 %v1474_v1, %v1188_v62  ;;  %v1476_v5 = vpop.f32.mrb[23].mxu0  ;;  %v1590_v61 = vadd.f32 (!%p1791_p11), %v2869_v30, %v1552_v45  ;;  %v1557_v62 = vld [vmem:[#allocation2 + $0x80] sm:$0xff] (!%p1791_p11)  ;;  %1635 = vst [vmem:[%s2993_s3 + $0x20] sm:$0xff] (!%p1791_p11), %v1609_v54  ;;  %v1591_v1 = vadd.f32 (!%p1791_p11), %v2867_v29, %v1553_v46 }
 0x1e6   : > { %1532 = vst [vmem:[#allocation2 + $0xa8] sm:$0xff] %v1506_v63  ;;  %v2077_v6 = vadd.f32 %v1476_v5, %v1190_v2  ;;  %v1558_v63 = vld [vmem:[#allocation2 + $0x88] sm:$0xff] (!%p1791_p11)  ;;  %1638 = vst [vmem:[%s2993_s3 + $0x38] sm:$0xff] (!%p1791_p11), %v1612_v57  ;;  %v1592_v2 = vadd.f32 (!%p1791_p11), %v2869_v30, %v1554_v47 }
 0x1e7   : > { %v1507_v7 = vadd.f32 %v2076_v3, %v549_v0  ;;  %v1194_v8 = vpop.f32.mrb[24].mxu1  ;;  %v1593_v3 = vadd.f32 (!%p1791_p11), %v2867_v29, %v1555_v52  ;;  %v1596_v19 = vadd.f32 (!%p1791_p11), %v2869_v30, %v1558_v63 }
 0x1e8   : > { %v1508_v9 = vadd.f32 %v2077_v6, %v550_v4  ;;  %v1480_v11 = vpop.f32.mrb[24].mxu0  ;;  %v1196_v12 = vpop.f32.mrb[25].mxu1  ;;  %1540 = sbr.rel (%p1791_p11) target bundleno = 507 (0x1fb), region = 63  ;;  %v1559_v0 = vld [vmem:[#allocation2 + $0x90] sm:$0xff] (!%p1791_p11)  ;;  %v1594_v4 = vadd.f32 (!%p1791_p11), %v2869_v30, %v1556_v53 }
 0x1e9   : > { %1533 = vst [vmem:[#allocation2 + $0xb0] sm:$0xff] %v1507_v7  ;;  %v2078_v13 = vadd.f32 %v1480_v11, %v1194_v8  ;;  %v1482_v15 = vpop.f32.mrb[25].mxu0  ;;  %v1560_v5 = vld [vmem:[#allocation2 + $0x98] sm:$0xff] (!%p1791_p11)  ;;  %v1613_v8 = vmax.f32 (!%p1791_p11), %v1587_v58, 0.0  ;;  %v1616_v11 = vmax.f32 (!%p1791_p11), %v1590_v61, 0.0  ;;  %v1597_v20 = vadd.f32 (!%p1791_p11), %v2867_v29, %v1559_v0 }
 0x1ea   : > { %1534 = vst [vmem:[#allocation2 + $0xb8] sm:$0xff] %v1508_v9  ;;  %v2079_v16 = vadd.f32 %v1482_v15, %v1196_v12  ;;  %v1614_v9 = vmax.f32 (!%p1791_p11), %v1588_v59, 0.0  ;;  %v1618_v15 = vmax.f32 (!%p1791_p11), %v1592_v2, 0.0  ;;  %v1598_v21 = vadd.f32 (!%p1791_p11), %v2869_v30, %v1560_v5 }
 0x1eb   : > { %v1509_v17 = vadd.f32 %v2078_v13, %v551_v10  ;;  %v1615_v10 = vmax.f32 (!%p1791_p11), %v1589_v60, 0.0  ;;  %1639 = vst [vmem:[%s2993_s3 + $0x40] sm:$0xff] (!%p1791_p11), %v1613_v8  ;;  %1642 = vst [vmem:[%s2993_s3 + $0x58] sm:$0xff] (!%p1791_p11), %v1616_v11  ;;  %v1622_v31 = vmax.f32 (!%p1791_p11), %v1596_v19, 0.0  ;;  %v1623_v32 = vmax.f32 (!%p1791_p11), %v1597_v20, 0.0 }
 0x1ec   : > { %v1510_v18 = vadd.f32 %v2079_v16, %v552_v14  ;;  %v1561_v6 = vld [vmem:[#allocation2 + $0xa0] sm:$0xff] (!%p1791_p11)  ;;  %v1617_v14 = vmax.f32 (!%p1791_p11), %v1591_v1, 0.0  ;;  %v1619_v16 = vmax.f32 (!%p1791_p11), %v1593_v3, 0.0  ;;  %1640 = vst [vmem:[%s2993_s3 + $0x48] sm:$0xff] (!%p1791_p11), %v1614_v9  ;;  %1644 = vst [vmem:[%s2993_s3 + $0x68] sm:$0xff] (!%p1791_p11), %v1618_v15  ;;  %v1624_v33 = vmax.f32 (!%p1791_p11), %v1598_v21, 0.0 }
 0x1ed   : > { %1535 = vst [vmem:[#allocation2 + $0xc0] sm:$0xff] %v1509_v17  ;;  %v1562_v7 = vld [vmem:[#allocation2 + $0xa8] sm:$0xff] (!%p1791_p11)  ;;  %v1620_v17 = vmax.f32 (!%p1791_p11), %v1594_v4, 0.0  ;;  %1641 = vst [vmem:[%s2993_s3 + $0x50] sm:$0xff] (!%p1791_p11), %v1615_v10  ;;  %v1599_v22 = vadd.f32 (!%p1791_p11), %v2867_v29, %v1561_v6 }
 0x1ee   : > { %1536 = vst [vmem:[#allocation2 + $0xc8] sm:$0xff] %v1510_v18  ;;  %v1595_v18 = vadd.f32 (!%p1791_p11), %v2867_v29, %v1557_v62  ;;  %1643 = vst [vmem:[%s2993_s3 + $0x60] sm:$0xff] (!%p1791_p11), %v1617_v14  ;;  %v1600_v23 = vadd.f32 (!%p1791_p11), %v2869_v30, %v1562_v7 }
 0x1ef   : > { %1645 = vst [vmem:[%s2993_s3 + $0x70] sm:$0xff] %v1619_v16  ;;  %1646 = vst [vmem:[%s2993_s3 + $0x78] sm:$0xff] %v1620_v17  ;;  %v1625_v34 = vmax.f32 %v1599_v22, 0.0 }
 0x1f0   : > { %v1563_v12 = vld [vmem:[#allocation2 + $0xb0] sm:$0xff]  ;;  %v1621_v28 = vmax.f32 %v1595_v18, 0.0  ;;  %v1626_v35 = vmax.f32 %v1600_v23, 0.0  ;;  %1648 = vst [vmem:[%s2993_s3 + $0x88] sm:$0xff] %v1622_v31  ;;  %1649 = vst [vmem:[%s2993_s3 + $0x90] sm:$0xff] %v1623_v32 }
 0x1f1   : > { %v1564_v13 = vld [vmem:[#allocation2 + $0xb8] sm:$0xff]  ;;  %v1601_v24 = vadd.f32 %v2867_v29, %v1563_v12  ;;  %1650 = vst [vmem:[%s2993_s3 + $0x98] sm:$0xff] %v1624_v33  ;;  %1651 = vst [vmem:[%s2993_s3 + $0xa0] sm:$0xff] %v1625_v34 }
 0x1f2   : > { %v1602_v25 = vadd.f32 %v2869_v30, %v1564_v13  ;;  %1647 = vst [vmem:[%s2993_s3 + $0x80] sm:$0xff] %v1621_v28  ;;  %1652 = vst [vmem:[%s2993_s3 + $0xa8] sm:$0xff] %v1626_v35 }
 0x1f3   : > { %v1627_v36 = vmax.f32 %v1601_v24, 0.0 }
 0x1f4   : > { %v1565_v26 = vld [vmem:[#allocation2 + $0xc0] sm:$0xff]  ;;  %v1628_v37 = vmax.f32 %v1602_v25, 0.0 }
 0x1f5   : > { %v1566_v27 = vld [vmem:[#allocation2 + $0xc8] sm:$0xff]  ;;  %v1603_v38 = vadd.f32 %v2867_v29, %v1565_v26  ;;  %1653 = vst [vmem:[%s2993_s3 + $0xb0] sm:$0xff] %v1627_v36 }
 0x1f6   : > { %v1604_v39 = vadd.f32 %v2869_v30, %v1566_v27  ;;  %1654 = vst [vmem:[%s2993_s3 + $0xb8] sm:$0xff] %v1628_v37 }
 0x1f7   : > { %v1629_v40 = vmax.f32 %v1603_v38, 0.0 }
 0x1f8   : > { %v1630_v29 = vmax.f32 %v1604_v39, 0.0 }
 0x1f9   : > { %1655 = vst [vmem:[%s2993_s3 + $0xc0] sm:$0xff] %v1629_v40 }
 0x1fa   : > { %1656 = vst [vmem:[%s2993_s3 + $0xc8] sm:$0xff] %v1630_v29 }
 0x1fb PF: > { %s13_s16 = sadd.s32 1, %s2213_s16   ;;  %s2994_s12 = smov %s2201_s13 }
 0x1fc   : > { %p10_p12 = scmp.ge.s32.totalorder %s13_s16, 5   ;;  %s2995_s13 = smov %s2271_s20 }
 0x1fd   : > { %s2996_s14 = smov %s2209_s15  ;;  %s2997_s15 = smov %s2999_s17 }
 0x1fe   :  { %12 = sbr.rel (!%p10_p12) target bundleno = 3 (0x3), region = 104 }

// kernel: adda_forward.15
= control target key start
LH: loop header
LB: loop body
LE: loop exit
PB: predicated region body
PF: predicated region fallthrough
CT: control target
= control target key end

     0   :  { %s1606_s12 = smov 0   ;;  %s1608_s13 = smov 0   ;;  %s2060_s0 = inlined_call_operand.vmem [shape: f32[32,3072], index: 0, kind: input, shape index: {}]   ;;  %s2061_s1 = inlined_call_operand.vmem [shape: f32[3072,256], index: 1, kind: input, shape index: {}]   ;;  %s2062_s2 = inlined_call_operand.vmem [shape: f32[1,256], index: 2, kind: input, shape index: {}]   ;;  %s2063_s3 = inlined_call_operand.vmem [shape: f32[32,256], index: 3, kind: output, shape index: {}]  }
   0x1   :  { %s1610_s14 = smov 0   ;;  %s1612_s15 = smov 0  }
   0x2   :  { %s1614_s16 = smov 0  }
   0x3 LB: > { %s25_s17 = sadd.s32 1, %s1579_s15  ;;  %p48_p1 = scmp.ne.s32.totalorder %s1571_s13, %s1567_s12  ;;  %s1583_s16 = sphi %s1614_s16, %s13_s16   ;;  %s1579_s15 = sphi %s1612_s15, %s2067_s15   ;;  %s1575_s14 = sphi %s1610_s14, %s2066_s14   ;;  %s1571_s13 = sphi %s1608_s13, %s2065_s13   ;;  %s1567_s12 = sphi %s1606_s12, %s2064_s12  }
   0x4   : > { %p26_p0 = scmp.ge.s32.totalorder %s25_s17, 3  ;;  %p49_p2 = scmp.eq.s32.totalorder %s1583_s16, 0 }
   0x5   : > { %s41_s19 = sadd.s32 1, %s1571_s13  ;;  %p1207_p5 = scmp.ge.s32.totalorder %s1583_s16, 3 }
   0x6   : > { %s2069_s17 = smov (%p26_p0, %s25_s17), 0  ;;  %p50_p3 = por %p49_p2, %p48_p1 }
   0x7   : > { %s37_s18 = ssub.s32 %s1579_s15, %s2069_s17  ;;  %164 = sbr.rel (%p1207_p5) target bundleno = 34 (0x22), region = 20 }
   0x8   : > { %p39_p4 = scmp.eq.s32.totalorder %s37_s18, 0 }
   0xa   : > { %s1641_s20 = scalar_select %p39_p4, %s1571_s13, %s41_s19  }
   0xe   : > { %167 = sbr.rel (!%p50_p3) target bundleno = 34 (0x22), region = 24  ;;  %s169_s21 = sand.u32 (%p50_p3), 1, %s1571_s13  }
   0xf   : > { %s1222_s22 = sshll.u32 (%p50_p3), %s1579_s15, 6  ;;  %s1208_s23 = sshll.u32 (%p50_p3), %s169_s21, 8 }
  0x10   : > { %s1649_s26 = scalar_lea.vmem (%p50_p3), %s2060_s0, %s1222_s22  ;;  %s1654_s27 = scalar_lea.vmem (%p50_p3), [#allocation3], %s1208_s23 }
  0x11   : > { %v190_v0 = vld [vmem:[%s1649_s26] sm:$0xff] (%p50_p3)  ;;  %v192_v1 = vld [vmem:[%s1649_s26 + $0x8] sm:$0xff] (%p50_p3)  ;;  %v194_v2 = vld [vmem:[%s1649_s26 + $0x10] sm:$0xff] (%p50_p3) }
  0x12   : > { %191 = vst [vmem:[%s1654_s27] sm:$0xff] (%p50_p3), %v190_v0  ;;  %193 = vst [vmem:[%s1654_s27 + $0x8] sm:$0xff] (%p50_p3), %v192_v1  ;;  %v196_v3 = vld [vmem:[%s1649_s26 + $0x18] sm:$0xff] (%p50_p3)  ;;  %v198_v4 = vld [vmem:[%s1649_s26 + $0x20] sm:$0xff] (%p50_p3) }
  0x13   : > { %195 = vst [vmem:[%s1654_s27 + $0x10] sm:$0xff] (%p50_p3), %v194_v2  ;;  %v200_v5 = vld [vmem:[%s1649_s26 + $0x28] sm:$0xff] (%p50_p3)  ;;  %197 = vst [vmem:[%s1654_s27 + $0x18] sm:$0xff] (%p50_p3), %v196_v3  ;;  %v202_v6 = vld [vmem:[%s1649_s26 + $0x30] sm:$0xff] (%p50_p3) }
  0x14   : > { %199 = vst [vmem:[%s1654_s27 + $0x20] sm:$0xff] (%p50_p3), %v198_v4  ;;  %201 = vst [vmem:[%s1654_s27 + $0x28] sm:$0xff] (%p50_p3), %v200_v5  ;;  %v204_v7 = vld [vmem:[%s1649_s26 + $0x38] sm:$0xff] (%p50_p3)  ;;  %v206_v8 = vld [vmem:[%s1649_s26 + $0xc0] sm:$0xff] (%p50_p3) }
  0x15   : > { %203 = vst [vmem:[%s1654_s27 + $0x30] sm:$0xff] %v202_v6  ;;  %205 = vst [vmem:[%s1654_s27 + $0x38] sm:$0xff] %v204_v7  ;;  %v208_v9 = vld [vmem:[%s1649_s26 + $0xc8] sm:$0xff]  ;;  %v210_v10 = vld [vmem:[%s1649_s26 + $0xd0] sm:$0xff] }
  0x16   : > { %207 = vst [vmem:[%s1654_s27 + $0x40] sm:$0xff] %v206_v8  ;;  %v212_v11 = vld [vmem:[%s1649_s26 + $0xd8] sm:$0xff]  ;;  %209 = vst [vmem:[%s1654_s27 + $0x48] sm:$0xff] %v208_v9  ;;  %v214_v12 = vld [vmem:[%s1649_s26 + $0xe0] sm:$0xff] }
  0x17   : > { %211 = vst [vmem:[%s1654_s27 + $0x50] sm:$0xff] %v210_v10  ;;  %213 = vst [vmem:[%s1654_s27 + $0x58] sm:$0xff] %v212_v11  ;;  %v216_v13 = vld [vmem:[%s1649_s26 + $0xe8] sm:$0xff]  ;;  %v218_v14 = vld [vmem:[%s1649_s26 + $0xf0] sm:$0xff] }
  0x18   : > { %215 = vst [vmem:[%s1654_s27 + $0x60] sm:$0xff] %v214_v12  ;;  %217 = vst [vmem:[%s1654_s27 + $0x68] sm:$0xff] %v216_v13  ;;  %v220_v15 = vld [vmem:[%s1649_s26 + $0xf8] sm:$0xff]  ;;  %v222_v16 = vld [vmem:[%s1649_s26 + $0x180] sm:$0xff] }
  0x19   : > { %219 = vst [vmem:[%s1654_s27 + $0x70] sm:$0xff] %v218_v14  ;;  %v224_v17 = vld [vmem:[%s1649_s26 + $0x188] sm:$0xff]  ;;  %221 = vst [vmem:[%s1654_s27 + $0x78] sm:$0xff] %v220_v15  ;;  %v226_v18 = vld [vmem:[%s1649_s26 + $0x190] sm:$0xff] }
  0x1a   : > { %223 = vst [vmem:[%s1654_s27 + $0x80] sm:$0xff] %v222_v16  ;;  %225 = vst [vmem:[%s1654_s27 + $0x88] sm:$0xff] %v224_v17  ;;  %v228_v19 = vld [vmem:[%s1649_s26 + $0x198] sm:$0xff]  ;;  %v230_v20 = vld [vmem:[%s1649_s26 + $0x1a0] sm:$0xff] }
  0x1b   : > { %227 = vst [vmem:[%s1654_s27 + $0x90] sm:$0xff] %v226_v18  ;;  %229 = vst [vmem:[%s1654_s27 + $0x98] sm:$0xff] %v228_v19  ;;  %v232_v21 = vld [vmem:[%s1649_s26 + $0x1a8] sm:$0xff]  ;;  %v234_v22 = vld [vmem:[%s1649_s26 + $0x1b0] sm:$0xff] }
  0x1c   : > { %231 = vst [vmem:[%s1654_s27 + $0xa0] sm:$0xff] %v230_v20  ;;  %v236_v23 = vld [vmem:[%s1649_s26 + $0x1b8] sm:$0xff]  ;;  %233 = vst [vmem:[%s1654_s27 + $0xa8] sm:$0xff] %v232_v21  ;;  %v238_v24 = vld [vmem:[%s1649_s26 + $0x240] sm:$0xff] }
  0x1d   : > { %235 = vst [vmem:[%s1654_s27 + $0xb0] sm:$0xff] %v234_v22  ;;  %237 = vst [vmem:[%s1654_s27 + $0xb8] sm:$0xff] %v236_v23  ;;  %v240_v25 = vld [vmem:[%s1649_s26 + $0x248] sm:$0xff]  ;;  %v242_v26 = vld [vmem:[%s1649_s26 + $0x250] sm:$0xff] }
  0x1e   : > { %239 = vst [vmem:[%s1654_s27 + $0xc0] sm:$0xff] %v238_v24  ;;  %241 = vst [vmem:[%s1654_s27 + $0xc8] sm:$0xff] %v240_v25  ;;  %v244_v27 = vld [vmem:[%s1649_s26 + $0x258] sm:$0xff]  ;;  %v246_v28 = vld [vmem:[%s1649_s26 + $0x260] sm:$0xff] }
  0x1f   : > { %243 = vst [vmem:[%s1654_s27 + $0xd0] sm:$0xff] %v242_v26  ;;  %v248_v29 = vld [vmem:[%s1649_s26 + $0x268] sm:$0xff]  ;;  %245 = vst [vmem:[%s1654_s27 + $0xd8] sm:$0xff] %v244_v27  ;;  %v250_v30 = vld [vmem:[%s1649_s26 + $0x270] sm:$0xff] }
  0x20   : > { %247 = vst [vmem:[%s1654_s27 + $0xe0] sm:$0xff] %v246_v28  ;;  %249 = vst [vmem:[%s1654_s27 + $0xe8] sm:$0xff] %v248_v29  ;;  %v252_v31 = vld [vmem:[%s1649_s26 + $0x278] sm:$0xff] }
  0x21   : > { %251 = vst [vmem:[%s1654_s27 + $0xf0] sm:$0xff] %v250_v30  ;;  %253 = vst [vmem:[%s1654_s27 + $0xf8] sm:$0xff] %v252_v31 }
  0x22 PF: > { %p1211_p6 = scmp.ge.s32.totalorder %s1583_s16, 1  ;;  %p273_p7 = scmp.lt.s32.totalorder %s1583_s16, 4 }
  0x24   : > { %p274_p8 = pnand %p1211_p6, %p273_p7 }
  0x25   : > { %s280_s28 = sand.u32 (!%p274_p8), 1, %s1567_s12   ;;  %s1213_s29 = sshll.u32 (!%p274_p8), %s1575_s14, 7 }
  0x26   : > { %277 = sbr.rel (%p274_p8) target bundleno = 426 (0x1aa), region = 51  ;;  %s1212_s30 = sshll.u32 (!%p274_p8), %s280_s28, 8 }
  0x27   : > { %p326_p9 = scmp.lt.s32.totalorder (!%p274_p8), %s1213_s29, 383  ;;  %s1726_s8 = scalar_lea.vmem (!%p274_p8), [#allocation3], %s1212_s30 }
  0x28   : > { %p1216_p10 = scmp.ne.s32.totalorder (!%p274_p8), %s1575_s14, 0 }
  0x2d   : > { %s2071_s29 = smov (!%p326_p9, %s1213_s29), 383  ;;  %356 = sbr.rel (%p1216_p10) target bundleno = 52 (0x34), region = 59 }
  0x2e   : > { %s1223_s4 = sshll.u32 %s2071_s29, 4  ;;  %v1585_v32 = vmov (!%p1216_p10), 0.0  }
  0x2f   : > { %s1724_s7 = scalar_lea.vmem %s2061_s1, %s1223_s4  ;;  %357 = vst [vmem:[#allocation2] sm:$0xff] (!%p1216_p10), %v1585_v32  ;;  %358 = vst [vmem:[#allocation2 + $0x8] sm:$0xff] (!%p1216_p10), %v1585_v32 }
  0x30   : > { %359 = vst [vmem:[#allocation2 + $0x10] sm:$0xff] (!%p1216_p10), %v1585_v32  ;;  %360 = vst [vmem:[#allocation2 + $0x18] sm:$0xff] (!%p1216_p10), %v1585_v32 }
  0x31   : > { %361 = vst [vmem:[#allocation2 + $0x20] sm:$0xff] (!%p1216_p10), %v1585_v32  ;;  %362 = vst [vmem:[#allocation2 + $0x28] sm:$0xff] (!%p1216_p10), %v1585_v32 }
  0x32   : > { %363 = vst [vmem:[#allocation2 + $0x30] sm:$0xff] (!%p1216_p10), %v1585_v32  ;;  %364 = vst [vmem:[#allocation2 + $0x38] sm:$0xff] (!%p1216_p10), %v1585_v32 }
  0x34 PF: > { %v406_v33 = vld [vmem:[%s1724_s7 + $0x8] sm:$0xff]  ;;  %v408_v34 = vld [vmem:[%s1724_s7 + $0x18] sm:$0xff]  ;;  %v405_v38 = vld [vmem:[%s1724_s7] sm:$0xff]  ;;  %p1217_p11 = scmp.ne.s32.totalorder %s1575_s14, 2 }
  0x35   : > { %v534_v35 = vld [vmem:[%s1724_s7 + $0x408] sm:$0xff]  ;;  %v1224_v36 = vpack.c.bf16 %v408_v34, %v406_v33  ;;  %v536_v37 = vld [vmem:[%s1724_s7 + $0x418] sm:$0xff]  ;;  %v407_v39 = vld [vmem:[%s1724_s7 + $0x10] sm:$0xff] }
  0x36   : > { %v1352_v40 = vpack.c.bf16 %v536_v37, %v534_v35  ;;  %v1226_v41 = vpack.c.bf16 %v407_v39, %v405_v38  ;;  %v533_v42 = vld [vmem:[%s1724_s7 + $0x400] sm:$0xff]  ;;  %v535_v43 = vld [vmem:[%s1724_s7 + $0x410] sm:$0xff]  ;;  %v410_v44 = vld [vmem:[%s1724_s7 + $0x28] sm:$0xff] }
  0x37   : > { %1225 = vmatprep.subr.bf16.mxu1 %v1224_v36  ;;  %v1354_v45 = vpack.c.bf16 %v535_v43, %v533_v42  ;;  %v412_v46 = vld [vmem:[%s1724_s7 + $0x38] sm:$0xff]  ;;  %v538_v47 = vld [vmem:[%s1724_s7 + $0x428] sm:$0xff]  ;;  %v409_v51 = vld [vmem:[%s1724_s7 + $0x20] sm:$0xff] }
  0x38   : > { %v540_v48 = vld [vmem:[%s1724_s7 + $0x438] sm:$0xff]  ;;  %1353 = vmatprep.subr.bf16.mxu0 %v1352_v40  ;;  %1227 = vmatpush1.bf16.msra.mxu1 %v1226_v41  ;;  %v1228_v49 = vpack.c.bf16 %v412_v46, %v410_v44  ;;  %v411_v52 = vld [vmem:[%s1724_s7 + $0x30] sm:$0xff]  ;;  %v537_v53 = vld [vmem:[%s1724_s7 + $0x420] sm:$0xff] }
  0x39   : > { %v1356_v50 = vpack.c.bf16 %v540_v48, %v538_v47  ;;  %1355 = vmatpush1.bf16.msra.mxu0 %v1354_v45  ;;  %v1230_v54 = vpack.c.bf16 %v411_v52, %v409_v51  ;;  %v539_v55 = vld [vmem:[%s1724_s7 + $0x430] sm:$0xff]  ;;  %v414_v56 = vld [vmem:[%s1724_s7 + $0x48] sm:$0xff]  ;;  %v416_v57 = vld [vmem:[%s1724_s7 + $0x58] sm:$0xff] }
  0x3a   : > { %1229 = vmatprep.subr.bf16.mxu1 %v1228_v49  ;;  %v1358_v58 = vpack.c.bf16 %v539_v55, %v537_v53  ;;  %v1232_v59 = vpack.c.bf16 %v416_v57, %v414_v56  ;;  %v542_v60 = vld [vmem:[%s1724_s7 + $0x448] sm:$0xff]  ;;  %v544_v61 = vld [vmem:[%s1724_s7 + $0x458] sm:$0xff]  ;;  %v413_v62 = vld [vmem:[%s1724_s7 + $0x40] sm:$0xff] }
  0x3b   : > { %1357 = vmatprep.subr.bf16.mxu0 %v1356_v50  ;;  %v1360_v63 = vpack.c.bf16 %v544_v61, %v542_v60  ;;  %v415_v0 = vld [vmem:[%s1724_s7 + $0x50] sm:$0xff]  ;;  %v541_v1 = vld [vmem:[%s1724_s7 + $0x440] sm:$0xff]  ;;  %v418_v4 = vld [vmem:[%s1724_s7 + $0x68] sm:$0xff] }
  0x3c   : > { %v543_v2 = vld [vmem:[%s1724_s7 + $0x450] sm:$0xff]  ;;  %1231 = vmatpush1.bf16.msra.mxu1 %v1230_v54  ;;  %v1234_v3 = vpack.c.bf16 %v415_v0, %v413_v62  ;;  %v420_v5 = vld [vmem:[%s1724_s7 + $0x78] sm:$0xff]  ;;  %v546_v6 = vld [vmem:[%s1724_s7 + $0x468] sm:$0xff] }
  0x3d   : > { %1359 = vmatpush1.bf16.msra.mxu0 %v1358_v58  ;;  %1233 = vmatprep.subr.bf16.mxu1 %v1232_v59  ;;  %v1362_v7 = vpack.c.bf16 %v543_v2, %v541_v1  ;;  %v1236_v8 = vpack.c.bf16 %v420_v5, %v418_v4  ;;  %v548_v9 = vld [vmem:[%s1724_s7 + $0x478] sm:$0xff]  ;;  %v417_v10 = vld [vmem:[%s1724_s7 + $0x60] sm:$0xff]  ;;  %v419_v11 = vld [vmem:[%s1724_s7 + $0x70] sm:$0xff] }
  0x3e   : > { %1361 = vmatprep.subr.bf16.mxu0 %v1360_v63  ;;  %v1364_v12 = vpack.c.bf16 %v548_v9, %v546_v6  ;;  %v545_v13 = vld [vmem:[%s1724_s7 + $0x460] sm:$0xff]  ;;  %v547_v14 = vld [vmem:[%s1724_s7 + $0x470] sm:$0xff]  ;;  %v422_v15 = vld [vmem:[%s1724_s7 + $0x88] sm:$0xff]  ;;  %v1238_v19 = vpack.c.bf16 %v419_v11, %v417_v10 }
  0x3f   : > { %v424_v16 = vld [vmem:[%s1724_s7 + $0x98] sm:$0xff]  ;;  %v550_v17 = vld [vmem:[%s1724_s7 + $0x488] sm:$0xff]  ;;  %v1366_v20 = vpack.c.bf16 %v547_v14, %v545_v13  ;;  %v421_v22 = vld [vmem:[%s1724_s7 + $0x80] sm:$0xff] }
  0x40   : > { %v552_v18 = vld [vmem:[%s1724_s7 + $0x498] sm:$0xff]  ;;  %1235 = vmatpush1.bf16.msra.mxu1 %v1234_v3  ;;  %v1240_v21 = vpack.c.bf16 %v424_v16, %v422_v15  ;;  %v423_v23 = vld [vmem:[%s1724_s7 + $0x90] sm:$0xff]  ;;  %v549_v24 = vld [vmem:[%s1724_s7 + $0x480] sm:$0xff] }
  0x41   : > { %1363 = vmatpush1.bf16.msra.mxu0 %v1362_v7  ;;  %1237 = vmatprep.subr.bf16.mxu1 %v1236_v8  ;;  %v1368_v25 = vpack.c.bf16 %v552_v18, %v550_v17  ;;  %v551_v26 = vld [vmem:[%s1724_s7 + $0x490] sm:$0xff]  ;;  %v426_v27 = vld [vmem:[%s1724_s7 + $0xa8] sm:$0xff]  ;;  %v428_v28 = vld [vmem:[%s1724_s7 + $0xb8] sm:$0xff]  ;;  %v1242_v31 = vpack.c.bf16 %v423_v23, %v421_v22 }
  0x42   : > { %1365 = vmatprep.subr.bf16.mxu0 %v1364_v12  ;;  %v554_v29 = vld [vmem:[%s1724_s7 + $0x4a8] sm:$0xff]  ;;  %v556_v30 = vld [vmem:[%s1724_s7 + $0x4b8] sm:$0xff]  ;;  %v1370_v32 = vpack.c.bf16 %v551_v26, %v549_v24  ;;  %v1244_v33 = vpack.c.bf16 %v428_v28, %v426_v27  ;;  %v425_v34 = vld [vmem:[%s1724_s7 + $0xa0] sm:$0xff] }
  0x43   : > { %v427_v35 = vld [vmem:[%s1724_s7 + $0xb0] sm:$0xff]  ;;  %v553_v36 = vld [vmem:[%s1724_s7 + $0x4a0] sm:$0xff]  ;;  %v1372_v37 = vpack.c.bf16 %v556_v30, %v554_v29  ;;  %v430_v39 = vld [vmem:[%s1724_s7 + $0xc8] sm:$0xff] }
  0x44   : > { %1239 = vmatpush1.bf16.msra.mxu1 %v1238_v19  ;;  %v555_v38 = vld [vmem:[%s1724_s7 + $0x4b0] sm:$0xff]  ;;  %v432_v40 = vld [vmem:[%s1724_s7 + $0xd8] sm:$0xff]  ;;  %v558_v41 = vld [vmem:[%s1724_s7 + $0x4c8] sm:$0xff]  ;;  %v1246_v43 = vpack.c.bf16 %v427_v35, %v425_v34 }
  0x45   : > { %1367 = vmatpush1.bf16.msra.mxu0 %v1366_v20  ;;  %1241 = vmatprep.subr.bf16.mxu1 %v1240_v21  ;;  %v560_v42 = vld [vmem:[%s1724_s7 + $0x4d8] sm:$0xff]  ;;  %v1374_v44 = vpack.c.bf16 %v555_v38, %v553_v36  ;;  %v1248_v45 = vpack.c.bf16 %v432_v40, %v430_v39  ;;  %v429_v46 = vld [vmem:[%s1724_s7 + $0xc0] sm:$0xff]  ;;  %v431_v47 = vld [vmem:[%s1724_s7 + $0xd0] sm:$0xff] }
  0x46   : > { %1369 = vmatprep.subr.bf16.mxu0 %v1368_v25  ;;  %v557_v48 = vld [vmem:[%s1724_s7 + $0x4c0] sm:$0xff]  ;;  %v1376_v49 = vpack.c.bf16 %v560_v42, %v558_v41  ;;  %v559_v50 = vld [vmem:[%s1724_s7 + $0x4d0] sm:$0xff]  ;;  %v434_v51 = vld [vmem:[%s1724_s7 + $0xe8] sm:$0xff]  ;;  %v1250_v55 = vpack.c.bf16 %v431_v47, %v429_v46 }
  0x47   : > { %v436_v52 = vld [vmem:[%s1724_s7 + $0xf8] sm:$0xff]  ;;  %v562_v53 = vld [vmem:[%s1724_s7 + $0x4e8] sm:$0xff]  ;;  %v1378_v56 = vpack.c.bf16 %v559_v50, %v557_v48  ;;  %v433_v58 = vld [vmem:[%s1724_s7 + $0xe0] sm:$0xff] }
  0x48   : > { %1243 = vmatpush1.bf16.msra.mxu1 %v1242_v31  ;;  %v564_v54 = vld [vmem:[%s1724_s7 + $0x4f8] sm:$0xff]  ;;  %v1252_v57 = vpack.c.bf16 %v436_v52, %v434_v51  ;;  %v435_v59 = vld [vmem:[%s1724_s7 + $0xf0] sm:$0xff]  ;;  %v561_v60 = vld [vmem:[%s1724_s7 + $0x4e0] sm:$0xff] }
  0x49   : > { %1371 = vmatpush1.bf16.msra.mxu0 %v1370_v32  ;;  %1245 = vmatprep.subr.bf16.mxu1 %v1244_v33  ;;  %v1380_v61 = vpack.c.bf16 %v564_v54, %v562_v53  ;;  %v563_v62 = vld [vmem:[%s1724_s7 + $0x4f0] sm:$0xff]  ;;  %v438_v63 = vld [vmem:[%s1724_s7 + $0x108] sm:$0xff]  ;;  %v440_v0 = vld [vmem:[%s1724_s7 + $0x118] sm:$0xff]  ;;  %v1254_v3 = vpack.c.bf16 %v435_v59, %v433_v58 }
  0x4a   : > { %1373 = vmatprep.subr.bf16.mxu0 %v1372_v37  ;;  %v566_v1 = vld [vmem:[%s1724_s7 + $0x508] sm:$0xff]  ;;  %v568_v2 = vld [vmem:[%s1724_s7 + $0x518] sm:$0xff]  ;;  %v1382_v4 = vpack.c.bf16 %v563_v62, %v561_v60  ;;  %v1256_v5 = vpack.c.bf16 %v440_v0, %v438_v63  ;;  %v437_v6 = vld [vmem:[%s1724_s7 + $0x100] sm:$0xff] }
  0x4b   : > { %v439_v7 = vld [vmem:[%s1724_s7 + $0x110] sm:$0xff]  ;;  %v565_v8 = vld [vmem:[%s1724_s7 + $0x500] sm:$0xff]  ;;  %v1384_v9 = vpack.c.bf16 %v568_v2, %v566_v1  ;;  %v442_v11 = vld [vmem:[%s1724_s7 + $0x128] sm:$0xff] }
  0x4c   : > { %1247 = vmatpush1.bf16.msra.mxu1 %v1246_v43  ;;  %v567_v10 = vld [vmem:[%s1724_s7 + $0x510] sm:$0xff]  ;;  %v444_v12 = vld [vmem:[%s1724_s7 + $0x138] sm:$0xff]  ;;  %v570_v13 = vld [vmem:[%s1724_s7 + $0x528] sm:$0xff]  ;;  %v1258_v15 = vpack.c.bf16 %v439_v7, %v437_v6 }
  0x4d   : > { %1375 = vmatpush1.bf16.msra.mxu0 %v1374_v44  ;;  %1249 = vmatprep.subr.bf16.mxu1 %v1248_v45  ;;  %v572_v14 = vld [vmem:[%s1724_s7 + $0x538] sm:$0xff]  ;;  %v1386_v16 = vpack.c.bf16 %v567_v10, %v565_v8  ;;  %v1260_v17 = vpack.c.bf16 %v444_v12, %v442_v11  ;;  %v441_v18 = vld [vmem:[%s1724_s7 + $0x120] sm:$0xff]  ;;  %v443_v19 = vld [vmem:[%s1724_s7 + $0x130] sm:$0xff] }
  0x4e   : > { %1377 = vmatprep.subr.bf16.mxu0 %v1376_v49  ;;  %v569_v20 = vld [vmem:[%s1724_s7 + $0x520] sm:$0xff]  ;;  %v1388_v21 = vpack.c.bf16 %v572_v14, %v570_v13  ;;  %v571_v22 = vld [vmem:[%s1724_s7 + $0x530] sm:$0xff]  ;;  %v446_v23 = vld [vmem:[%s1724_s7 + $0x148] sm:$0xff]  ;;  %v1262_v27 = vpack.c.bf16 %v443_v19, %v441_v18 }
  0x4f   : > { %v448_v24 = vld [vmem:[%s1724_s7 + $0x158] sm:$0xff]  ;;  %v574_v25 = vld [vmem:[%s1724_s7 + $0x548] sm:$0xff]  ;;  %v1390_v28 = vpack.c.bf16 %v571_v22, %v569_v20  ;;  %v445_v30 = vld [vmem:[%s1724_s7 + $0x140] sm:$0xff] }
  0x50   : > { %1251 = vmatpush1.bf16.msra.mxu1 %v1250_v55  ;;  %v576_v26 = vld [vmem:[%s1724_s7 + $0x558] sm:$0xff]  ;;  %v1264_v29 = vpack.c.bf16 %v448_v24, %v446_v23  ;;  %v447_v31 = vld [vmem:[%s1724_s7 + $0x150] sm:$0xff]  ;;  %v573_v32 = vld [vmem:[%s1724_s7 + $0x540] sm:$0xff] }
  0x51   : > { %1379 = vmatpush1.bf16.msra.mxu0 %v1378_v56  ;;  %1253 = vmatprep.subr.bf16.mxu1 %v1252_v57  ;;  %v1392_v33 = vpack.c.bf16 %v576_v26, %v574_v25  ;;  %v575_v34 = vld [vmem:[%s1724_s7 + $0x550] sm:$0xff]  ;;  %v450_v35 = vld [vmem:[%s1724_s7 + $0x168] sm:$0xff]  ;;  %v452_v36 = vld [vmem:[%s1724_s7 + $0x178] sm:$0xff]  ;;  %v1266_v39 = vpack.c.bf16 %v447_v31, %v445_v30 }
  0x52   : > { %1381 = vmatprep.subr.bf16.mxu0 %v1380_v61  ;;  %v578_v37 = vld [vmem:[%s1724_s7 + $0x568] sm:$0xff]  ;;  %v580_v38 = vld [vmem:[%s1724_s7 + $0x578] sm:$0xff]  ;;  %v449_v40 = vld [vmem:[%s1724_s7 + $0x160] sm:$0xff]  ;;  %v1394_v41 = vpack.c.bf16 %v575_v34, %v573_v32  ;;  %v1268_v42 = vpack.c.bf16 %v452_v36, %v450_v35 }
  0x53   : > { %v451_v43 = vld [vmem:[%s1724_s7 + $0x170] sm:$0xff]  ;;  %v577_v44 = vld [vmem:[%s1724_s7 + $0x560] sm:$0xff]  ;;  %v1396_v46 = vpack.c.bf16 %v580_v38, %v578_v37  ;;  %v454_v47 = vld [vmem:[%s1724_s7 + $0x188] sm:$0xff] }
  0x54   : > { %1255 = vmatpush1.bf16.msra.mxu1 %v1254_v3  ;;  %v579_v45 = vld [vmem:[%s1724_s7 + $0x570] sm:$0xff]  ;;  %v456_v48 = vld [vmem:[%s1724_s7 + $0x198] sm:$0xff]  ;;  %v374_v49 = vld [vmem:[%s1726_s8 + $0x8] sm:$0xff]  ;;  %v1270_v53 = vpack.c.bf16 %v451_v43, %v449_v40 }
  0x55   : > { %1383 = vmatpush1.bf16.msra.mxu0 %v1382_v4  ;;  %1257 = vmatprep.subr.bf16.mxu1 %v1256_v5  ;;  %v582_v50 = vld [vmem:[%s1724_s7 + $0x588] sm:$0xff]  ;;  %v584_v51 = vld [vmem:[%s1724_s7 + $0x598] sm:$0xff]  ;;  %v1398_v54 = vpack.c.bf16 %v579_v45, %v577_v44  ;;  %v1272_v55 = vpack.c.bf16 %v456_v48, %v454_v47  ;;  %v453_v56 = vld [vmem:[%s1724_s7 + $0x180] sm:$0xff] }
  0x56   : > { %1385 = vmatprep.subr.bf16.mxu0 %v1384_v9  ;;  %725 = vmatprep.mubr.f32.mxu1 %v374_v49  ;;  %v378_v52 = vld [vmem:[%s1726_s8 + $0x28] sm:$0xff]  ;;  %v455_v57 = vld [vmem:[%s1724_s7 + $0x190] sm:$0xff]  ;;  %v581_v58 = vld [vmem:[%s1724_s7 + $0x580] sm:$0xff]  ;;  %v1400_v59 = vpack.c.bf16 %v584_v51, %v582_v50 }
  0x57   : > { %903 = vmatprep.mubr.f32.mxu0 %v378_v52  ;;  %v583_v60 = vld [vmem:[%s1724_s7 + $0x590] sm:$0xff]  ;;  %v458_v61 = vld [vmem:[%s1724_s7 + $0x1a8] sm:$0xff]  ;;  %v460_v62 = vld [vmem:[%s1724_s7 + $0x1b8] sm:$0xff]  ;;  %v1274_v1 = vpack.c.bf16 %v455_v57, %v453_v56 }
  0x58   : > { %1259 = vmatpush1.bf16.msra.mxu1 %v1258_v15  ;;  %v586_v63 = vld [vmem:[%s1724_s7 + $0x5a8] sm:$0xff]  ;;  %v588_v0 = vld [vmem:[%s1724_s7 + $0x5b8] sm:$0xff]  ;;  %v1402_v2 = vpack.c.bf16 %v583_v60, %v581_v58  ;;  %v1276_v3 = vpack.c.bf16 %v460_v62, %v458_v61  ;;  %v457_v4 = vld [vmem:[%s1724_s7 + $0x1a0] sm:$0xff] }
  0x59   : > { %1387 = vmatpush1.bf16.msra.mxu0 %v1386_v16  ;;  %1261 = vmatprep.subr.bf16.mxu1 %v1260_v17  ;;  %v459_v5 = vld [vmem:[%s1724_s7 + $0x1b0] sm:$0xff]  ;;  %v585_v6 = vld [vmem:[%s1724_s7 + $0x5a0] sm:$0xff]  ;;  %v1404_v7 = vpack.c.bf16 %v588_v0, %v586_v63  ;;  %v462_v9 = vld [vmem:[%s1724_s7 + $0x1c8] sm:$0xff] }
  0x5a   : > { %1389 = vmatprep.subr.bf16.mxu0 %v1388_v21  ;;  %v587_v8 = vld [vmem:[%s1724_s7 + $0x5b0] sm:$0xff]  ;;  %v464_v10 = vld [vmem:[%s1724_s7 + $0x1d8] sm:$0xff]  ;;  %v590_v11 = vld [vmem:[%s1724_s7 + $0x5c8] sm:$0xff]  ;;  %v1278_v13 = vpack.c.bf16 %v459_v5, %v457_v4 }
  0x5b   : > { %v592_v12 = vld [vmem:[%s1724_s7 + $0x5d8] sm:$0xff]  ;;  %v1406_v14 = vpack.c.bf16 %v587_v8, %v585_v6  ;;  %v1280_v15 = vpack.c.bf16 %v464_v10, %v462_v9  ;;  %v461_v16 = vld [vmem:[%s1724_s7 + $0x1c0] sm:$0xff]  ;;  %v463_v17 = vld [vmem:[%s1724_s7 + $0x1d0] sm:$0xff] }
  0x5c   : > { %1263 = vmatpush1.bf16.msra.mxu1 %v1262_v27  ;;  %v589_v18 = vld [vmem:[%s1724_s7 + $0x5c0] sm:$0xff]  ;;  %v1408_v19 = vpack.c.bf16 %v592_v12, %v590_v11  ;;  %v591_v20 = vld [vmem:[%s1724_s7 + $0x5d0] sm:$0xff]  ;;  %v466_v21 = vld [vmem:[%s1724_s7 + $0x1e8] sm:$0xff]  ;;  %v1282_v25 = vpack.c.bf16 %v463_v17, %v461_v16 }
  0x5d   : > { %1391 = vmatpush1.bf16.msra.mxu0 %v1390_v28  ;;  %1265 = vmatprep.subr.bf16.mxu1 %v1264_v29  ;;  %v468_v22 = vld [vmem:[%s1724_s7 + $0x1f8] sm:$0xff]  ;;  %v594_v23 = vld [vmem:[%s1724_s7 + $0x5e8] sm:$0xff]  ;;  %v1410_v26 = vpack.c.bf16 %v591_v20, %v589_v18  ;;  %v465_v28 = vld [vmem:[%s1724_s7 + $0x1e0] sm:$0xff] }
  0x5e   : > { %1393 = vmatprep.subr.bf16.mxu0 %v1392_v33  ;;  %v596_v24 = vld [vmem:[%s1724_s7 + $0x5f8] sm:$0xff]  ;;  %v1284_v27 = vpack.c.bf16 %v468_v22, %v466_v21  ;;  %v467_v29 = vld [vmem:[%s1724_s7 + $0x1f0] sm:$0xff]  ;;  %v593_v30 = vld [vmem:[%s1724_s7 + $0x5e0] sm:$0xff] }
  0x5f   : > { %v1412_v31 = vpack.c.bf16 %v596_v24, %v594_v23  ;;  %v595_v32 = vld [vmem:[%s1724_s7 + $0x5f0] sm:$0xff]  ;;  %v470_v33 = vld [vmem:[%s1724_s7 + $0x208] sm:$0xff]  ;;  %v472_v34 = vld [vmem:[%s1724_s7 + $0x218] sm:$0xff]  ;;  %v1286_v37 = vpack.c.bf16 %v467_v29, %v465_v28 }
  0x60   : > { %1267 = vmatpush1.bf16.msra.mxu1 %v1266_v39  ;;  %v598_v35 = vld [vmem:[%s1724_s7 + $0x608] sm:$0xff]  ;;  %v600_v36 = vld [vmem:[%s1724_s7 + $0x618] sm:$0xff]  ;;  %v1414_v38 = vpack.c.bf16 %v595_v32, %v593_v30  ;;  %v1288_v39 = vpack.c.bf16 %v472_v34, %v470_v33  ;;  %v469_v40 = vld [vmem:[%s1724_s7 + $0x200] sm:$0xff] }
  0x61   : > { %1395 = vmatpush1.bf16.msra.mxu0 %v1394_v41  ;;  %1269 = vmatprep.subr.bf16.mxu1 %v1268_v42  ;;  %v471_v41 = vld [vmem:[%s1724_s7 + $0x210] sm:$0xff]  ;;  %v597_v42 = vld [vmem:[%s1724_s7 + $0x600] sm:$0xff]  ;;  %v1416_v43 = vpack.c.bf16 %v600_v36, %v598_v35  ;;  %v474_v45 = vld [vmem:[%s1724_s7 + $0x228] sm:$0xff] }
  0x62   : > { %1397 = vmatprep.subr.bf16.mxu0 %v1396_v46  ;;  %v599_v44 = vld [vmem:[%s1724_s7 + $0x610] sm:$0xff]  ;;  %v476_v46 = vld [vmem:[%s1724_s7 + $0x238] sm:$0xff]  ;;  %v602_v47 = vld [vmem:[%s1724_s7 + $0x628] sm:$0xff]  ;;  %v1290_v50 = vpack.c.bf16 %v471_v41, %v469_v40 }
  0x63   : > { %v604_v48 = vld [vmem:[%s1724_s7 + $0x638] sm:$0xff]  ;;  %v373_v49 = vld [vmem:[%s1726_s8] sm:$0xff]  ;;  %v1418_v52 = vpack.c.bf16 %v599_v44, %v597_v42  ;;  %v603_v58 = vld [vmem:[%s1724_s7 + $0x630] sm:$0xff] }
  0x64   : > { %1271 = vmatpush1.bf16.msra.mxu1 %v1270_v53  ;;  %v377_v51 = vld [vmem:[%s1726_s8 + $0x20] sm:$0xff]  ;;  %v1292_v53 = vpack.c.bf16 %v476_v46, %v474_v45  ;;  %v1420_v57 = vpack.c.bf16 %v604_v48, %v602_v47  ;;  %v480_v60 = vld [vmem:[%s1724_s7 + $0x258] sm:$0xff]  ;;  %v606_v61 = vld [vmem:[%s1724_s7 + $0x648] sm:$0xff] }
  0x65   : > { %1399 = vmatpush1.bf16.msra.mxu0 %v1398_v54  ;;  %1273 = vmatprep.subr.bf16.mxu1 %v1272_v55  ;;  %v473_v54 = vld [vmem:[%s1724_s7 + $0x220] sm:$0xff]  ;;  %v475_v55 = vld [vmem:[%s1724_s7 + $0x230] sm:$0xff]  ;;  %v608_v62 = vld [vmem:[%s1724_s7 + $0x658] sm:$0xff] }
  0x66   : > { %1401 = vmatprep.subr.bf16.mxu0 %v1400_v59  ;;  %v601_v56 = vld [vmem:[%s1724_s7 + $0x620] sm:$0xff]  ;;  %v478_v59 = vld [vmem:[%s1724_s7 + $0x248] sm:$0xff]  ;;  %v1294_v63 = vpack.c.bf16 %v475_v55, %v473_v54  ;;  %v1424_v5 = vpack.c.bf16 %v608_v62, %v606_v61  ;;  %v607_v6 = vld [vmem:[%s1724_s7 + $0x650] sm:$0xff] }
  0x67   : > { %v1422_v0 = vpack.c.bf16 %v603_v58, %v601_v56  ;;  %v605_v4 = vld [vmem:[%s1724_s7 + $0x640] sm:$0xff]  ;;  %v484_v8 = vld [vmem:[%s1724_s7 + $0x278] sm:$0xff]  ;;  %v610_v9 = vld [vmem:[%s1724_s7 + $0x668] sm:$0xff] }
  0x68   : > { %1275 = vmatpush1.bf16.msra.mxu1 %v1274_v1  ;;  %v1296_v1 = vpack.c.bf16 %v480_v60, %v478_v59  ;;  %v612_v10 = vld [vmem:[%s1724_s7 + $0x678] sm:$0xff]  ;;  %v1426_v12 = vpack.c.bf16 %v607_v6, %v605_v4  ;;  %v609_v16 = vld [vmem:[%s1724_s7 + $0x660] sm:$0xff]  ;;  %v611_v18 = vld [vmem:[%s1724_s7 + $0x670] sm:$0xff] }
  0x69   : > { %1403 = vmatpush1.bf16.msra.mxu0 %v1402_v2  ;;  %1277 = vmatprep.subr.bf16.mxu1 %v1276_v3  ;;  %v477_v2 = vld [vmem:[%s1724_s7 + $0x240] sm:$0xff]  ;;  %v479_v3 = vld [vmem:[%s1724_s7 + $0x250] sm:$0xff]  ;;  %v1428_v17 = vpack.c.bf16 %v612_v10, %v610_v9  ;;  %v488_v20 = vld [vmem:[%s1724_s7 + $0x298] sm:$0xff] }
  0x6a   : > { %1405 = vmatprep.subr.bf16.mxu0 %v1404_v7  ;;  %v482_v7 = vld [vmem:[%s1724_s7 + $0x268] sm:$0xff]  ;;  %v1298_v11 = vpack.c.bf16 %v479_v3, %v477_v2  ;;  %v616_v22 = vld [vmem:[%s1724_s7 + $0x698] sm:$0xff]  ;;  %v485_v24 = vld [vmem:[%s1724_s7 + $0x280] sm:$0xff] }
  0x6b   : > { %v614_v21 = vld [vmem:[%s1724_s7 + $0x688] sm:$0xff]  ;;  %v613_v28 = vld [vmem:[%s1724_s7 + $0x680] sm:$0xff]  ;;  %v615_v29 = vld [vmem:[%s1724_s7 + $0x690] sm:$0xff] }
  0x6c   : > { %1279 = vmatpush1.bf16.msra.mxu1 %v1278_v13  ;;  %v1300_v13 = vpack.c.bf16 %v484_v8, %v482_v7  ;;  %v490_v30 = vld [vmem:[%s1724_s7 + $0x2a8] sm:$0xff]  ;;  %v492_v32 = vld [vmem:[%s1724_s7 + $0x2b8] sm:$0xff]  ;;  %v491_v40 = vld [vmem:[%s1724_s7 + $0x2b0] sm:$0xff]  ;;  %v1434_v42 = vpack.c.bf16 %v615_v29, %v613_v28 }
  0x6d   : > { %1407 = vmatpush1.bf16.msra.mxu0 %v1406_v14  ;;  %1281 = vmatprep.subr.bf16.mxu1 %v1280_v15  ;;  %v481_v14 = vld [vmem:[%s1724_s7 + $0x260] sm:$0xff]  ;;  %v483_v15 = vld [vmem:[%s1724_s7 + $0x270] sm:$0xff]  ;;  %v618_v33 = vld [vmem:[%s1724_s7 + $0x6a8] sm:$0xff] }
  0x6e   : > { %1409 = vmatprep.subr.bf16.mxu0 %v1408_v19  ;;  %v486_v19 = vld [vmem:[%s1724_s7 + $0x288] sm:$0xff]  ;;  %v1302_v23 = vpack.c.bf16 %v483_v15, %v481_v14  ;;  %v620_v35 = vld [vmem:[%s1724_s7 + $0x6b8] sm:$0xff]  ;;  %v385_v41 = vld [vmem:[%s1726_s8 + $0x60] sm:$0xff] }
  0x6f   : > { %v382_v34 = vld [vmem:[%s1726_s8 + $0x48] sm:$0xff]  ;;  %v617_v44 = vld [vmem:[%s1724_s7 + $0x6a0] sm:$0xff]  ;;  %v619_v45 = vld [vmem:[%s1724_s7 + $0x6b0] sm:$0xff]  ;;  %v1436_v47 = vpack.c.bf16 %v620_v35, %v618_v33 }
  0x70   : > { %1283 = vmatpush1.bf16.msra.mxu1 %v1282_v25  ;;  %v487_v25 = vld [vmem:[%s1724_s7 + $0x290] sm:$0xff]  ;;  %v386_v36 = vld [vmem:[%s1726_s8 + $0x68] sm:$0xff]  ;;  %v496_v48 = vld [vmem:[%s1724_s7 + $0x2d8] sm:$0xff]  ;;  %v1438_v58 = vpack.c.bf16 %v619_v45, %v617_v44 }
  0x71   : > { %1411 = vmatpush1.bf16.msra.mxu0 %v1410_v26  ;;  %1285 = vmatprep.subr.bf16.mxu1 %v1284_v27  ;;  %v1430_v26 = vpack.c.bf16 %v611_v18, %v609_v16  ;;  %v1304_v27 = vpack.c.bf16 %v488_v20, %v486_v19  ;;  %v494_v46 = vld [vmem:[%s1724_s7 + $0x2c8] sm:$0xff]  ;;  %v493_v55 = vld [vmem:[%s1724_s7 + $0x2c0] sm:$0xff]  ;;  %v495_v56 = vld [vmem:[%s1724_s7 + $0x2d0] sm:$0xff] }
  0x72   : > { %1413 = vmatprep.subr.bf16.mxu0 %v1412_v31  ;;  %v1432_v31 = vpack.c.bf16 %v616_v22, %v614_v21  ;;  %v1312_v59 = vpack.c.bf16 %v496_v48, %v494_v46  ;;  %v621_v60 = vld [vmem:[%s1724_s7 + $0x6c0] sm:$0xff]  ;;  %v623_v61 = vld [vmem:[%s1724_s7 + $0x6d0] sm:$0xff]  ;;  %v498_v62 = vld [vmem:[%s1724_s7 + $0x2e8] sm:$0xff]  ;;  %v1314_v6 = vpack.c.bf16 %v495_v56, %v493_v55 }
  0x73   : > { %v398_v2 = vld [vmem:[%s1726_s8 + $0xc8] sm:$0xff]  ;;  %v628_v3 = vld [vmem:[%s1724_s7 + $0x6f8] sm:$0xff]  ;;  %v497_v7 = vld [vmem:[%s1724_s7 + $0x2e0] sm:$0xff]  ;;  %v1442_v9 = vpack.c.bf16 %v623_v61, %v621_v60 }
  0x74   : > { %1287 = vmatpush1.bf16.msra.mxu1 %v1286_v37  ;;  %v381_v37 = vld [vmem:[%s1726_s8 + $0x40] sm:$0xff]  ;;  %v402_v4 = vld [vmem:[%s1726_s8 + $0xe8] sm:$0xff]  ;;  %v504_v16 = vld [vmem:[%s1724_s7 + $0x318] sm:$0xff] }
  0x75   : > { %1415 = vmatpush1.bf16.msra.mxu0 %v1414_v38  ;;  %1289 = vmatprep.subr.bf16.mxu1 %v1288_v39  ;;  %v1306_v38 = vpack.c.bf16 %v487_v25, %v485_v24  ;;  %v489_v39 = vld [vmem:[%s1724_s7 + $0x2a0] sm:$0xff]  ;;  %v502_v15 = vld [vmem:[%s1724_s7 + $0x308] sm:$0xff]  ;;  %v632_v19 = vld [vmem:[%s1724_s7 + $0x718] sm:$0xff] }
  0x76   : > { %1417 = vmatprep.subr.bf16.mxu0 %v1416_v43  ;;  %v1308_v43 = vpack.c.bf16 %v492_v32, %v490_v30  ;;  %v1310_v54 = vpack.c.bf16 %v491_v40, %v489_v39  ;;  %v401_v8 = vld [vmem:[%s1726_s8 + $0xe0] sm:$0xff]  ;;  %v630_v18 = vld [vmem:[%s1724_s7 + $0x708] sm:$0xff]  ;;  %v380_v20 = vld [vmem:[%s1726_s8 + $0x38] sm:$0xff] }
  0x77   : > { %726 = vmatmul.mubr.f32.vlgmr.msra.gmra.mrb[0].mxu1 %v373_v49  ;;  %v622_v49 = vld [vmem:[%s1724_s7 + $0x6c8] sm:$0xff]  ;;  %v501_v24 = vld [vmem:[%s1724_s7 + $0x300] sm:$0xff]  ;;  %v503_v25 = vld [vmem:[%s1724_s7 + $0x310] sm:$0xff] }
  0x78   : > { %1291 = vmatpush1.bf16.msra.mxu1 %v1290_v50  ;;  %904 = vmatmul.mubr.f32.vlgmr.msra.gmra.mrb[0].mxu0 %v377_v51  ;;  %v390_v50 = vld [vmem:[%s1726_s8 + $0x88] sm:$0xff]  ;;  %v624_v51 = vld [vmem:[%s1724_s7 + $0x6d8] sm:$0xff]  ;;  %v631_v28 = vld [vmem:[%s1724_s7 + $0x710] sm:$0xff]  ;;  %v1322_v33 = vpack.c.bf16 %v503_v25, %v501_v24 }
  0x79   : > { %1419 = vmatpush1.bf16.msra.mxu0 %v1418_v52  ;;  %1293 = vmatprep.subr.bf16.mxu1 %v1292_v53  ;;  %v394_v52 = vld [vmem:[%s1726_s8 + $0xa8] sm:$0xff]  ;;  %v389_v53 = vld [vmem:[%s1726_s8 + $0x80] sm:$0xff]  ;;  %v508_v30 = vld [vmem:[%s1724_s7 + $0x338] sm:$0xff] }
  0x7a   : > { %1421 = vmatprep.subr.bf16.mxu0 %v1420_v57  ;;  %731 = vmatprep.mubr.f32.mxu1 %v382_v34  ;;  %v393_v57 = vld [vmem:[%s1726_s8 + $0xa0] sm:$0xff]  ;;  %v506_v29 = vld [vmem:[%s1724_s7 + $0x328] sm:$0xff]  ;;  %v636_v32 = vld [vmem:[%s1724_s7 + $0x738] sm:$0xff] }
  0x7b   : > { %909 = vmatprep.mubr.f32.mxu0 %v386_v36  ;;  %732 = vmatmul.mubr.f32.gmra.mrb[2].mxu1 %v381_v37  ;;  %v1324_v35 = vpack.c.bf16 %v508_v30, %v506_v29  ;;  %v505_v36 = vld [vmem:[%s1724_s7 + $0x320] sm:$0xff]  ;;  %v507_v37 = vld [vmem:[%s1724_s7 + $0x330] sm:$0xff]  ;;  %v640_v44 = vld [vmem:[%s1724_s7 + $0x758] sm:$0xff] }
  0x7c   : > { %1295 = vmatpush1.bf16.msra.mxu1 %v1294_v63  ;;  %910 = vmatmul.mubr.f32.gmra.mrb[2].mxu0 %v385_v41  ;;  %v1440_v63 = vpack.c.bf16 %v624_v51, %v622_v49  ;;  %v635_v40 = vld [vmem:[%s1724_s7 + $0x730] sm:$0xff]  ;;  %v510_v41 = vld [vmem:[%s1724_s7 + $0x348] sm:$0xff]  ;;  %v1326_v45 = vpack.c.bf16 %v507_v37, %v505_v36  ;;  %v509_v48 = vld [vmem:[%s1724_s7 + $0x340] sm:$0xff] }
  0x7d   : > { %1423 = vmatpush1.bf16.msra.mxu0 %v1422_v0  ;;  %1297 = vmatprep.subr.bf16.mxu1 %v1296_v1  ;;  %v500_v0 = vld [vmem:[%s1724_s7 + $0x2f8] sm:$0xff]  ;;  %v626_v1 = vld [vmem:[%s1724_s7 + $0x6e8] sm:$0xff]  ;;  %v511_v49 = vld [vmem:[%s1724_s7 + $0x350] sm:$0xff] }
  0x7e   : > { %1425 = vmatprep.subr.bf16.mxu0 %v1424_v5  ;;  %737 = vmatprep.mubr.f32.mxu1 %v390_v50  ;;  %v397_v5 = vld [vmem:[%s1726_s8 + $0xc0] sm:$0xff]  ;;  %v1316_v10 = vpack.c.bf16 %v500_v0, %v498_v62  ;;  %v1444_v14 = vpack.c.bf16 %v628_v3, %v626_v1  ;;  %v642_v55 = vld [vmem:[%s1724_s7 + $0x768] sm:$0xff]  ;;  %v644_v56 = vld [vmem:[%s1724_s7 + $0x778] sm:$0xff] }
  0x7f   : > { %915 = vmatprep.mubr.f32.mxu0 %v394_v52  ;;  %738 = vmatmul.mubr.f32.gmra.mrb[4].mxu1 %v389_v53  ;;  %v637_v50 = vld [vmem:[%s1724_s7 + $0x740] sm:$0xff]  ;;  %v639_v52 = vld [vmem:[%s1724_s7 + $0x750] sm:$0xff]  ;;  %v514_v53 = vld [vmem:[%s1724_s7 + $0x368] sm:$0xff] }
  0x80   : > { %1299 = vmatpush1.bf16.msra.mxu1 %v1298_v11  ;;  %916 = vmatmul.mubr.f32.gmra.mrb[4].mxu0 %v393_v57  ;;  %v499_v11 = vld [vmem:[%s1724_s7 + $0x2f0] sm:$0xff]  ;;  %v1330_v57 = vpack.c.bf16 %v511_v49, %v509_v48  ;;  %v513_v60 = vld [vmem:[%s1724_s7 + $0x360] sm:$0xff]  ;;  %v518_v1 = vld [vmem:[%s1724_s7 + $0x388] sm:$0xff] }
  0x81   : > { %1427 = vmatpush1.bf16.msra.mxu0 %v1426_v12  ;;  %1301 = vmatprep.subr.bf16.mxu1 %v1300_v13  ;;  %v625_v12 = vld [vmem:[%s1724_s7 + $0x6e0] sm:$0xff]  ;;  %v627_v13 = vld [vmem:[%s1724_s7 + $0x6f0] sm:$0xff]  ;;  %v1318_v21 = vpack.c.bf16 %v499_v11, %v497_v7  ;;  %v646_v3 = vld [vmem:[%s1724_s7 + $0x788] sm:$0xff] }
  0x82   : > { %1429 = vmatprep.subr.bf16.mxu0 %v1428_v17  ;;  %743 = vmatprep.mubr.f32.mxu1 %v398_v2  ;;  %v376_v17 = vld [vmem:[%s1726_s8 + $0x18] sm:$0xff]  ;;  %v1446_v22 = vpack.c.bf16 %v627_v13, %v625_v12  ;;  %v515_v61 = vld [vmem:[%s1724_s7 + $0x370] sm:$0xff]  ;;  %v641_v62 = vld [vmem:[%s1724_s7 + $0x760] sm:$0xff] }
  0x83   : > { %921 = vmatprep.mubr.f32.mxu0 %v402_v4  ;;  %744 = vmatmul.mubr.f32.gmra.mrb[6].mxu1 %v397_v5  ;;  %v643_v0 = vld [vmem:[%s1724_s7 + $0x770] sm:$0xff]  ;;  %v520_v2 = vld [vmem:[%s1724_s7 + $0x398] sm:$0xff]  ;;  %v1334_v5 = vpack.c.bf16 %v515_v61, %v513_v60  ;;  %v522_v13 = vld [vmem:[%s1724_s7 + $0x3a8] sm:$0xff] }
  0x84   : > { %1303 = vmatpush1.bf16.msra.mxu1 %v1302_v23  ;;  %922 = vmatmul.mubr.f32.gmra.mrb[6].mxu0 %v401_v8  ;;  %v1320_v23 = vpack.c.bf16 %v504_v16, %v502_v15  ;;  %v648_v4 = vld [vmem:[%s1724_s7 + $0x798] sm:$0xff]  ;;  %v1336_v7 = vpack.c.bf16 %v520_v2, %v518_v1  ;;  %v517_v8 = vld [vmem:[%s1724_s7 + $0x380] sm:$0xff]  ;;  %v647_v12 = vld [vmem:[%s1724_s7 + $0x790] sm:$0xff] }
  0x85   : > { %1431 = vmatpush1.bf16.msra.mxu0 %v1430_v26  ;;  %1305 = vmatprep.subr.bf16.mxu1 %v1304_v27  ;;  %v629_v26 = vld [vmem:[%s1724_s7 + $0x700] sm:$0xff]  ;;  %v1448_v27 = vpack.c.bf16 %v632_v19, %v630_v18  ;;  %v1464_v11 = vpack.c.bf16 %v648_v4, %v646_v3  ;;  %v650_v15 = vld [vmem:[%s1724_s7 + $0x7a8] sm:$0xff]  ;;  %v652_v16 = vld [vmem:[%s1724_s7 + $0x7b8] sm:$0xff] }
  0x86   : > { %1433 = vmatprep.subr.bf16.mxu0 %v1432_v31  ;;  %814 = vmatprep.mubr.f32.mxu1 %v376_v17  ;;  %v634_v31 = vld [vmem:[%s1724_s7 + $0x728] sm:$0xff]  ;;  %v1450_v34 = vpack.c.bf16 %v631_v28, %v629_v26  ;;  %v651_v24 = vld [vmem:[%s1724_s7 + $0x7b0] sm:$0xff]  ;;  %v528_v26 = vld [vmem:[%s1724_s7 + $0x3d8] sm:$0xff] }
  0x87   : > { %992 = vmatprep.mubr.f32.mxu0 %v380_v20  ;;  %v1452_v39 = vpack.c.bf16 %v636_v32, %v634_v31  ;;  %v521_v20 = vld [vmem:[%s1724_s7 + $0x3a0] sm:$0xff]  ;;  %v526_v25 = vld [vmem:[%s1724_s7 + $0x3c8] sm:$0xff]  ;;  %v656_v28 = vld [vmem:[%s1724_s7 + $0x7d8] sm:$0xff] }
  0x88   : > { %1307 = vmatpush1.bf16.msra.mxu1 %v1306_v38  ;;  %v633_v38 = vld [vmem:[%s1724_s7 + $0x720] sm:$0xff]  ;;  %v1344_v31 = vpack.c.bf16 %v528_v26, %v526_v25  ;;  %v655_v36 = vld [vmem:[%s1724_s7 + $0x7d0] sm:$0xff]  ;;  %v530_v37 = vld [vmem:[%s1724_s7 + $0x3e8] sm:$0xff] }
  0x89   : > { %1435 = vmatpush1.bf16.msra.mxu0 %v1434_v42  ;;  %1309 = vmatprep.subr.bf16.mxu1 %v1308_v43  ;;  %v512_v42 = vld [vmem:[%s1724_s7 + $0x358] sm:$0xff]  ;;  %v638_v43 = vld [vmem:[%s1724_s7 + $0x748] sm:$0xff]  ;;  %v1454_v46 = vpack.c.bf16 %v635_v40, %v633_v38  ;;  %v525_v32 = vld [vmem:[%s1724_s7 + $0x3c0] sm:$0xff] }
  0x8a   : > { %1437 = vmatprep.subr.bf16.mxu0 %v1436_v47  ;;  %v1328_v47 = vpack.c.bf16 %v512_v42, %v510_v41  ;;  %v1456_v51 = vpack.c.bf16 %v640_v44, %v638_v43  ;;  %v532_v38 = vld [vmem:[%s1724_s7 + $0x3f8] sm:$0xff]  ;;  %v529_v44 = vld [vmem:[%s1724_s7 + $0x3e0] sm:$0xff]  ;;  %v659_v48 = vld [vmem:[%s1724_s7 + $0x7f0] sm:$0xff] }
  0x8b   : > { %v660_v40 = vld [vmem:[%s1724_s7 + $0x7f8] sm:$0xff]  ;;  %v1348_v43 = vpack.c.bf16 %v532_v38, %v530_v37  ;;  %v395_v60 = vld [vmem:[%s1726_s8 + $0xb0] sm:$0xff]  ;;  %v365_v2 = vld [vmem:[#allocation2] sm:$0xff] }
  0x8c   : > { %1311 = vmatpush1.bf16.msra.mxu1 %v1310_v54  ;;  %v516_v54 = vld [vmem:[%s1724_s7 + $0x378] sm:$0xff]  ;;  %v370_v26 = vld [vmem:[#allocation2 + $0x28] sm:$0xff] }
  0x8d   : > { %1439 = vmatpush1.bf16.msra.mxu0 %v1438_v58  ;;  %1313 = vmatprep.subr.bf16.mxu1 %v1312_v59  ;;  %v1458_v58 = vpack.c.bf16 %v639_v52, %v637_v50  ;;  %v1332_v59 = vpack.c.bf16 %v516_v54, %v514_v53  ;;  %v379_v52 = vld [vmem:[%s1726_s8 + $0x30] sm:$0xff]  ;;  %v384_v53 = vld [vmem:[%s1726_s8 + $0x58] sm:$0xff] }
  0x8e   : > { %1441 = vmatprep.subr.bf16.mxu0 %v1440_v63  ;;  %v1460_v63 = vpack.c.bf16 %v644_v56, %v642_v55  ;;  %v388_v54 = vld [vmem:[%s1726_s8 + $0x78] sm:$0xff]  ;;  %v383_v55 = vld [vmem:[%s1726_s8 + $0x50] sm:$0xff] }
  0x8f   : > { %v387_v56 = vld [vmem:[%s1726_s8 + $0x70] sm:$0xff]  ;;  %v400_v61 = vld [vmem:[%s1726_s8 + $0xd8] sm:$0xff] }
  0x90   : > { %1315 = vmatpush1.bf16.msra.mxu1 %v1314_v6  ;;  %v1462_v6 = vpack.c.bf16 %v643_v0, %v641_v62  ;;  %v404_v62 = vld [vmem:[%s1726_s8 + $0xf8] sm:$0xff]  ;;  %v403_v0 = vld [vmem:[%s1726_s8 + $0xf0] sm:$0xff] }
  0x91   : > { %1443 = vmatpush1.bf16.msra.mxu0 %v1442_v9  ;;  %1317 = vmatprep.subr.bf16.mxu1 %v1316_v10  ;;  %v519_v9 = vld [vmem:[%s1724_s7 + $0x390] sm:$0xff]  ;;  %v645_v10 = vld [vmem:[%s1724_s7 + $0x780] sm:$0xff] }
  0x92   : > { %1445 = vmatprep.subr.bf16.mxu0 %v1444_v14  ;;  %v524_v14 = vld [vmem:[%s1724_s7 + $0x3b8] sm:$0xff]  ;;  %v1338_v17 = vpack.c.bf16 %v519_v9, %v517_v8  ;;  %v1466_v18 = vpack.c.bf16 %v647_v12, %v645_v10  ;;  %v367_v12 = vld [vmem:[#allocation2 + $0x10] sm:$0xff] }
  0x93   : > { %v1340_v19 = vpack.c.bf16 %v524_v14, %v522_v13 }
  0x94   : > { %1319 = vmatpush1.bf16.msra.mxu1 %v1318_v21  ;;  %v523_v21 = vld [vmem:[%s1724_s7 + $0x3b0] sm:$0xff] }
  0x95   : > { %1447 = vmatpush1.bf16.msra.mxu0 %v1446_v22  ;;  %1321 = vmatprep.subr.bf16.mxu1 %v1320_v23  ;;  %v649_v22 = vld [vmem:[%s1724_s7 + $0x7a0] sm:$0xff]  ;;  %v1468_v23 = vpack.c.bf16 %v652_v16, %v650_v15  ;;  %v1342_v29 = vpack.c.bf16 %v523_v21, %v521_v20  ;;  %v368_v16 = vld [vmem:[#allocation2 + $0x18] sm:$0xff] }
  0x96   : > { %1449 = vmatprep.subr.bf16.mxu0 %v1448_v27  ;;  %v654_v27 = vld [vmem:[%s1724_s7 + $0x7c8] sm:$0xff]  ;;  %v1470_v30 = vpack.c.bf16 %v651_v24, %v649_v22  ;;  %v369_v22 = vld [vmem:[#allocation2 + $0x20] sm:$0xff] }
  0x98   : > { %1323 = vmatpush1.bf16.msra.mxu1 %v1322_v33  ;;  %v527_v33 = vld [vmem:[%s1724_s7 + $0x3d0] sm:$0xff] }
  0x99   : > { %1451 = vmatpush1.bf16.msra.mxu0 %v1450_v34  ;;  %1325 = vmatprep.subr.bf16.mxu1 %v1324_v35  ;;  %v653_v34 = vld [vmem:[%s1724_s7 + $0x7c0] sm:$0xff]  ;;  %v1472_v35 = vpack.c.bf16 %v656_v28, %v654_v27  ;;  %v1346_v41 = vpack.c.bf16 %v527_v33, %v525_v32  ;;  %v371_v32 = vld [vmem:[#allocation2 + $0x30] sm:$0xff] }
  0x9a   : > { %1453 = vmatprep.subr.bf16.mxu0 %v1452_v39  ;;  %v658_v39 = vld [vmem:[%s1724_s7 + $0x7e8] sm:$0xff]  ;;  %v1474_v42 = vpack.c.bf16 %v655_v36, %v653_v34  ;;  %v372_v36 = vld [vmem:[#allocation2 + $0x38] sm:$0xff] }
  0x9c   : > { %1327 = vmatpush1.bf16.msra.mxu1 %v1326_v45  ;;  %v531_v45 = vld [vmem:[%s1724_s7 + $0x3f0] sm:$0xff] }
  0x9d   : > { %1455 = vmatpush1.bf16.msra.mxu0 %v1454_v46  ;;  %1329 = vmatprep.subr.bf16.mxu1 %v1328_v47  ;;  %v1476_v46 = vpack.c.bf16 %v660_v40, %v658_v39  ;;  %v657_v47 = vld [vmem:[%s1724_s7 + $0x7e0] sm:$0xff]  ;;  %v1350_v49 = vpack.c.bf16 %v531_v45, %v529_v44 }
  0x9e   : > { %1457 = vmatprep.subr.bf16.mxu0 %v1456_v51  ;;  %v1478_v50 = vpack.c.bf16 %v659_v48, %v657_v47  ;;  %v375_v51 = vld [vmem:[%s1726_s8 + $0x10] sm:$0xff] }
  0xa0   : > { %1331 = vmatpush1.bf16.msra.mxu1 %v1330_v57  ;;  %v392_v57 = vld [vmem:[%s1726_s8 + $0x98] sm:$0xff] }
  0xa1   : > { %1459 = vmatpush1.bf16.msra.mxu0 %v1458_v58  ;;  %1333 = vmatprep.subr.bf16.mxu1 %v1332_v59  ;;  %v396_v58 = vld [vmem:[%s1726_s8 + $0xb8] sm:$0xff]  ;;  %v391_v59 = vld [vmem:[%s1726_s8 + $0x90] sm:$0xff] }
  0xa2   : > { %1461 = vmatprep.subr.bf16.mxu0 %v1460_v63  ;;  %v399_v63 = vld [vmem:[%s1726_s8 + $0xd0] sm:$0xff] }
  0xa4   : > { %1335 = vmatpush1.bf16.msra.mxu1 %v1334_v5 }
  0xa5   : > { %1463 = vmatpush1.bf16.msra.mxu0 %v1462_v6  ;;  %1337 = vmatprep.subr.bf16.mxu1 %v1336_v7  ;;  %v366_v6 = vld [vmem:[#allocation2 + $0x8] sm:$0xff] }
  0xa6   : > { %1465 = vmatprep.subr.bf16.mxu0 %v1464_v11 }
  0xa8   : > { %1339 = vmatpush1.bf16.msra.mxu1 %v1338_v17 }
  0xa9   : > { %1467 = vmatpush1.bf16.msra.mxu0 %v1466_v18  ;;  %1341 = vmatprep.subr.bf16.mxu1 %v1340_v19 }
  0xaa   : > { %1469 = vmatprep.subr.bf16.mxu0 %v1468_v23 }
  0xac   : > { %1343 = vmatpush1.bf16.msra.mxu1 %v1342_v29 }
  0xad   : > { %1471 = vmatpush1.bf16.msra.mxu0 %v1470_v30  ;;  %1345 = vmatprep.subr.bf16.mxu1 %v1344_v31 }
  0xae   : > { %1473 = vmatprep.subr.bf16.mxu0 %v1472_v35 }
  0xb0   : > { %1347 = vmatpush1.bf16.msra.mxu1 %v1346_v41  ;;  %v1047_v41 = vlaneseq (!%p1217_p11) }
  0xb1   : > { %1475 = vmatpush1.bf16.msra.mxu0 %v1474_v42  ;;  %1349 = vmatprep.subr.bf16.mxu1 %v1348_v43  ;;  %v1045_v43 = vld [vmem:[%s2062_s2] sm:$0x3] (!%p1217_p11) }
  0xb2   : > { %1477 = vmatprep.subr.bf16.mxu0 %v1476_v46  ;;  %v1048_v42 = vshrl.u32 (!%p1217_p11), %v1047_v41, 7 }
  0xb4   : > { %1351 = vmatpush1.bf16.msra.mxu1 %v1350_v49  ;;  %v1049_v45 = vsub.s32 (!%p1217_p11), 0, %v1048_v42  ;;  %v1053_v47 = vsub.s32 (!%p1217_p11), 1, %v1048_v42 }
  0xb5   : > { %1479 = vmatpush1.bf16.msra.mxu0 %v1478_v50 }
  0xb7   : > { %815 = vmatmul.mubr.f32.vlgmr.msra.gmra.mrb[0].mxu1 %v375_v51  ;;  %v1050_v51 = vrot.slane (!%p1217_p11), %v1045_v43, %v1049_v45 }
  0xb8   : > { %993 = vmatmul.mubr.f32.vlgmr.msra.gmra.mrb[0].mxu0 %v379_v52  ;;  %820 = vmatprep.mubr.f32.mxu1 %v384_v53  ;;  %v1054_v52 = vrot.slane (!%p1217_p11), %v1045_v43, %v1053_v47 }
  0xb9   : > { %998 = vmatprep.mubr.f32.mxu0 %v388_v54 }
  0xbb   : > { %821 = vmatmul.mubr.f32.gmra.mrb[2].mxu1 %v383_v55 }
  0xbc   : > { %999 = vmatmul.mubr.f32.gmra.mrb[2].mxu0 %v387_v56  ;;  %826 = vmatprep.mubr.f32.mxu1 %v392_v57 }
  0xbd   : > { %1004 = vmatprep.mubr.f32.mxu0 %v396_v58 }
  0xbf   : > { %827 = vmatmul.mubr.f32.gmra.mrb[4].mxu1 %v391_v59 }
  0xc0   : > { %1005 = vmatmul.mubr.f32.gmra.mrb[4].mxu0 %v395_v60  ;;  %832 = vmatprep.mubr.f32.mxu1 %v400_v61 }
  0xc1   : > { %1010 = vmatprep.mubr.f32.mxu0 %v404_v62 }
  0xc3   : > { %833 = vmatmul.mubr.f32.gmra.mrb[6].mxu1 %v399_v63 }
  0xc4   : > { %1011 = vmatmul.mubr.f32.gmra.mrb[6].mxu0 %v403_v0 }
 0x18a   : > { %v816_v1 = vpop.f32.mrb[0].mxu1 }
 0x18b   : > { %v994_v3 = vpop.f32.mrb[0].mxu0  ;;  %v818_v4 = vpop.f32.mrb[1].mxu1 }
 0x18c   : > { %v1480_v5 = vadd.f32 %v994_v3, %v816_v1  ;;  %v996_v7 = vpop.f32.mrb[1].mxu0 }
 0x18d   : > { %v1481_v8 = vadd.f32 %v996_v7, %v818_v4 }
 0x18e   : > { %v1017_v9 = vadd.f32 %v1480_v5, %v365_v2  ;;  %v822_v10 = vpop.f32.mrb[2].mxu1 }
 0x18f   : > { %v1018_v11 = vadd.f32 %v1481_v8, %v366_v6  ;;  %v1000_v13 = vpop.f32.mrb[2].mxu0  ;;  %v824_v14 = vpop.f32.mrb[3].mxu1 }
 0x190   : > { %1025 = vst [vmem:[#allocation2] sm:$0xff] %v1017_v9  ;;  %v1482_v15 = vadd.f32 %v1000_v13, %v822_v10  ;;  %v1002_v17 = vpop.f32.mrb[3].mxu0 }
 0x191   : > { %1026 = vst [vmem:[#allocation2 + $0x8] sm:$0xff] %v1018_v11  ;;  %v1483_v18 = vadd.f32 %v1002_v17, %v824_v14 }
 0x192   : > { %v1019_v19 = vadd.f32 %v1482_v15, %v367_v12  ;;  %v828_v20 = vpop.f32.mrb[4].mxu1 }
 0x193   : > { %v1020_v21 = vadd.f32 %v1483_v18, %v368_v16  ;;  %v1006_v23 = vpop.f32.mrb[4].mxu0  ;;  %v830_v24 = vpop.f32.mrb[5].mxu1 }
 0x194   : > { %1027 = vst [vmem:[#allocation2 + $0x10] sm:$0xff] %v1019_v19  ;;  %v1484_v25 = vadd.f32 %v1006_v23, %v828_v20  ;;  %v1008_v27 = vpop.f32.mrb[5].mxu0 }
 0x195   : > { %1028 = vst [vmem:[#allocation2 + $0x18] sm:$0xff] %v1020_v21  ;;  %v1485_v28 = vadd.f32 %v1008_v27, %v830_v24 }
 0x196   : > { %v1021_v29 = vadd.f32 %v1484_v25, %v369_v22  ;;  %v834_v30 = vpop.f32.mrb[6].mxu1 }
 0x197   : > { %v1022_v31 = vadd.f32 %v1485_v28, %v370_v26  ;;  %v1012_v33 = vpop.f32.mrb[6].mxu0  ;;  %v836_v34 = vpop.f32.mrb[7].mxu1  ;;  %1036 = sbr.rel (%p1217_p11) target bundleno = 426 (0x1aa), region = 63  ;;  %v1037_v44 = vld [vmem:[#allocation2] sm:$0xff] (!%p1217_p11) }
 0x198   : > { %1029 = vst [vmem:[#allocation2 + $0x20] sm:$0xff] %v1021_v29  ;;  %v1486_v35 = vadd.f32 %v1012_v33, %v834_v30  ;;  %v1014_v37 = vpop.f32.mrb[7].mxu0  ;;  %v1038_v46 = vld [vmem:[#allocation2 + $0x8] sm:$0xff] (!%p1217_p11)  ;;  %v1057_v56 = vadd.f32 (!%p1217_p11), %v1050_v51, %v1037_v44 }
 0x199   : > { %1030 = vst [vmem:[#allocation2 + $0x28] sm:$0xff] %v1022_v31  ;;  %v1487_v38 = vadd.f32 %v1014_v37, %v836_v34  ;;  %v1058_v57 = vadd.f32 (!%p1217_p11), %v1054_v52, %v1038_v46 }
 0x19a   : > { %v1023_v39 = vadd.f32 %v1486_v35, %v371_v32  ;;  %v1065_v0 = vmax.f32 (!%p1217_p11), %v1057_v56, 0.0 }
 0x19b   : > { %v1024_v40 = vadd.f32 %v1487_v38, %v372_v36  ;;  %v1039_v48 = vld [vmem:[#allocation2 + $0x10] sm:$0xff] (!%p1217_p11)  ;;  %v1066_v1 = vmax.f32 (!%p1217_p11), %v1058_v57, 0.0 }
 0x19c   : > { %1031 = vst [vmem:[#allocation2 + $0x30] sm:$0xff] %v1023_v39  ;;  %v1040_v49 = vld [vmem:[#allocation2 + $0x18] sm:$0xff] (!%p1217_p11)  ;;  %v1059_v58 = vadd.f32 (!%p1217_p11), %v1050_v51, %v1039_v48  ;;  %1073 = vst [vmem:[%s2063_s3] sm:$0xff] (!%p1217_p11), %v1065_v0 }
 0x19d   : > { %1032 = vst [vmem:[#allocation2 + $0x38] sm:$0xff] %v1024_v40  ;;  %v1060_v59 = vadd.f32 (!%p1217_p11), %v1054_v52, %v1040_v49  ;;  %1074 = vst [vmem:[%s2063_s3 + $0x8] sm:$0xff] (!%p1217_p11), %v1066_v1 }
 0x19e   : > { %v1067_v2 = vmax.f32 %v1059_v58, 0.0 }
 0x19f   : > { %v1041_v50 = vld [vmem:[#allocation2 + $0x20] sm:$0xff]  ;;  %v1068_v3 = vmax.f32 %v1060_v59, 0.0 }
 0x1a0   : > { %v1042_v53 = vld [vmem:[#allocation2 + $0x28] sm:$0xff]  ;;  %v1061_v60 = vadd.f32 %v1050_v51, %v1041_v50  ;;  %1075 = vst [vmem:[%s2063_s3 + $0x10] sm:$0xff] %v1067_v2 }
 0x1a1   : > { %v1062_v61 = vadd.f32 %v1054_v52, %v1042_v53  ;;  %1076 = vst [vmem:[%s2063_s3 + $0x18] sm:$0xff] %v1068_v3 }
 0x1a2   : > { %v1069_v4 = vmax.f32 %v1061_v60, 0.0 }
 0x1a3   : > { %v1043_v54 = vld [vmem:[#allocation2 + $0x30] sm:$0xff]  ;;  %v1070_v5 = vmax.f32 %v1062_v61, 0.0 }
 0x1a4   : > { %v1044_v55 = vld [vmem:[#allocation2 + $0x38] sm:$0xff]  ;;  %v1063_v62 = vadd.f32 %v1050_v51, %v1043_v54  ;;  %1077 = vst [vmem:[%s2063_s3 + $0x20] sm:$0xff] %v1069_v4 }
 0x1a5   : > { %v1064_v63 = vadd.f32 %v1054_v52, %v1044_v55  ;;  %1078 = vst [vmem:[%s2063_s3 + $0x28] sm:$0xff] %v1070_v5 }
 0x1a6   : > { %v1071_v6 = vmax.f32 %v1063_v62, 0.0 }
 0x1a7   : > { %v1072_v7 = vmax.f32 %v1064_v63, 0.0 }
 0x1a8   : > { %1079 = vst [vmem:[%s2063_s3 + $0x30] sm:$0xff] %v1071_v6 }
 0x1a9   : > { %1080 = vst [vmem:[%s2063_s3 + $0x38] sm:$0xff] %v1072_v7 }
 0x1aa PF: > { %s13_s16 = sadd.s32 1, %s1583_s16   ;;  %s2064_s12 = smov %s1571_s13 }
 0x1ab   : > { %p10_p12 = scmp.ge.s32.totalorder %s13_s16, 5   ;;  %s2065_s13 = smov %s1641_s20 }
 0x1ac   : > { %s2066_s14 = smov %s1579_s15  ;;  %s2067_s15 = smov %s2069_s17 }
 0x1ad   :  { %12 = sbr.rel (!%p10_p12) target bundleno = 3 (0x3), region = 104 }

// kernel: adda_forward.16
= control target key start
LH: loop header
LB: loop body
LE: loop exit
PB: predicated region body
PF: predicated region fallthrough
CT: control target
= control target key end

     0   :  { %s1156_s12 = smov 0   ;;  %s1158_s13 = smov 0   ;;  %s1341_s0 = inlined_call_operand.vmem [shape: f32[8,4096], index: 0, kind: input, shape index: {}]   ;;  %s1342_s1 = inlined_call_operand.vmem [shape: f32[4096,128], index: 1, kind: input, shape index: {}]   ;;  %s1343_s2 = inlined_call_operand.vmem [shape: f32[1,128], index: 2, kind: input, shape index: {}]   ;;  %s1344_s3 = inlined_call_operand.vmem [shape: f32[8,128], index: 3, kind: output, shape index: {}]  }
   0x1   :  { %s1160_s14 = smov 0  }
   0x2 LB: > { %s25_s15 = sadd.s32 1, %s1129_s13  ;;  %p807_p0 = scmp.ge.s32.totalorder %s1133_s14, 1  ;;  %s1133_s14 = sphi %s1160_s14, %s13_s14   ;;  %s1129_s13 = sphi %s1158_s13, %s1346_s13   ;;  %s1125_s12 = sphi %s1156_s12, %s1345_s12  }
   0x3   : > { %p26_p1 = scmp.ge.s32.totalorder %s25_s15, 4  ;;  %p189_p2 = scmp.lt.s32.totalorder %s1133_s14, 5 }
   0x5   : > { %s1348_s15 = smov (%p26_p1, %s25_s15), 0  ;;  %p190_p3 = pnand %p807_p0, %p189_p2 }
   0x6   : > { %s808_s16 = sshll.u32 (!%p190_p3), %s1125_s12, 3  ;;  %s810_s17 = sshll.u32 (!%p190_p3), %s1125_s12, 7 }
   0x7   : > { %193 = sbr.rel (%p190_p3) target bundleno = 326 (0x146), region = 32  ;;  %p233_p4 = scmp.lt.s32.totalorder (!%p190_p3), %s808_s16, 31 }
   0x8   : > { %p241_p5 = scmp.lt.s32.totalorder (!%p190_p3), %s810_s17, 511  ;;  %p812_p6 = scmp.ne.s32.totalorder (!%p190_p3), %s1125_s12, 0 }
   0xe   : > { %s1350_s16 = smov (!%p233_p4, %s808_s16), 31  ;;  %s1352_s17 = smov (!%p241_p5, %s810_s17), 511 }
   0xf   : > { %s809_s18 = sshll.u32 %s1350_s16, 3  ;;  %s811_s22 = sshll.u32 %s1352_s17, 3  ;;  %v1135_v0 = vmov (!%p812_p6), 0.0  }
  0x10   : > { %s1181_s21 = scalar_lea.vmem %s1341_s0, %s809_s18  ;;  %s1186_s25 = scalar_lea.vmem %s1342_s1, %s811_s22  ;;  %263 = vst [vmem:[#allocation2] sm:$0xff] (!%p812_p6), %v1135_v0 }
  0x11   : > { %262 = sbr.rel (%p812_p6) target bundleno = 24 (0x18), region = 36 }
  0x18 PF: > { %v289_v1 = vld [vmem:[%s1186_s25 + $0x80] sm:$0xff]  ;;  %v290_v2 = vld [vmem:[%s1186_s25 + $0x88] sm:$0xff]  ;;  %v291_v12 = vld [vmem:[%s1186_s25 + $0x90] sm:$0xff]  ;;  %p813_p7 = scmp.ne.s32.totalorder %s1125_s12, 3 }
  0x19   : > { %v321_v3 = vld [vmem:[%s1186_s25 + $0x180] sm:$0xff]  ;;  %v958_v4 = vpack.c.bf16 %v290_v2, %v289_v1  ;;  %v322_v5 = vld [vmem:[%s1186_s25 + $0x188] sm:$0xff]  ;;  %v292_v14 = vld [vmem:[%s1186_s25 + $0x98] sm:$0xff] }
  0x1a   : > { %v273_v6 = vld [vmem:[%s1186_s25] sm:$0xff]  ;;  %v274_v7 = vld [vmem:[%s1186_s25 + $0x8] sm:$0xff]  ;;  %v990_v8 = vpack.c.bf16 %v322_v5, %v321_v3  ;;  %v323_v15 = vld [vmem:[%s1186_s25 + $0x190] sm:$0xff]  ;;  %v962_v17 = vpack.c.bf16 %v292_v14, %v291_v12 }
  0x1b   : > { %v960_v9 = vpack.c.bf16 %v274_v7, %v273_v6  ;;  %v305_v10 = vld [vmem:[%s1186_s25 + $0x100] sm:$0xff]  ;;  %v306_v11 = vld [vmem:[%s1186_s25 + $0x108] sm:$0xff]  ;;  %959 = vmatprep.subr.bf16.mxu0 %v958_v4  ;;  %v324_v16 = vld [vmem:[%s1186_s25 + $0x198] sm:$0xff] }
  0x1c   : > { %v992_v13 = vpack.c.bf16 %v306_v11, %v305_v10  ;;  %991 = vmatprep.subr.bf16.mxu1 %v990_v8  ;;  %v994_v18 = vpack.c.bf16 %v324_v16, %v323_v15  ;;  %v275_v19 = vld [vmem:[%s1186_s25 + $0x10] sm:$0xff]  ;;  %v276_v20 = vld [vmem:[%s1186_s25 + $0x18] sm:$0xff]  ;;  %v293_v24 = vld [vmem:[%s1186_s25 + $0xa0] sm:$0xff] }
  0x1d   : > { %961 = vmatpush3.bf16.msra.mxu0 %v960_v9  ;;  %v307_v21 = vld [vmem:[%s1186_s25 + $0x110] sm:$0xff]  ;;  %v964_v22 = vpack.c.bf16 %v276_v20, %v275_v19  ;;  %v308_v23 = vld [vmem:[%s1186_s25 + $0x118] sm:$0xff]  ;;  %v294_v25 = vld [vmem:[%s1186_s25 + $0xa8] sm:$0xff] }
  0x1e   : > { %993 = vmatpush3.bf16.msra.mxu1 %v992_v13  ;;  %963 = vmatprep.subr.bf16.mxu0 %v962_v17  ;;  %v996_v26 = vpack.c.bf16 %v308_v23, %v307_v21  ;;  %v966_v27 = vpack.c.bf16 %v294_v25, %v293_v24  ;;  %v325_v28 = vld [vmem:[%s1186_s25 + $0x1a0] sm:$0xff]  ;;  %v326_v29 = vld [vmem:[%s1186_s25 + $0x1a8] sm:$0xff]  ;;  %v295_v36 = vld [vmem:[%s1186_s25 + $0xb0] sm:$0xff] }
  0x1f   : > { %995 = vmatprep.subr.bf16.mxu1 %v994_v18  ;;  %v277_v30 = vld [vmem:[%s1186_s25 + $0x20] sm:$0xff]  ;;  %v998_v31 = vpack.c.bf16 %v326_v29, %v325_v28  ;;  %v278_v32 = vld [vmem:[%s1186_s25 + $0x28] sm:$0xff]  ;;  %v296_v37 = vld [vmem:[%s1186_s25 + $0xb8] sm:$0xff] }
  0x20   : > { %v309_v33 = vld [vmem:[%s1186_s25 + $0x120] sm:$0xff]  ;;  %v310_v34 = vld [vmem:[%s1186_s25 + $0x128] sm:$0xff]  ;;  %v968_v35 = vpack.c.bf16 %v278_v32, %v277_v30  ;;  %v327_v38 = vld [vmem:[%s1186_s25 + $0x1b0] sm:$0xff]  ;;  %v970_v40 = vpack.c.bf16 %v296_v37, %v295_v36 }
  0x21   : > { %965 = vmatpush3.bf16.msra.mxu0 %v964_v22  ;;  %v1000_v39 = vpack.c.bf16 %v310_v34, %v309_v33  ;;  %v328_v41 = vld [vmem:[%s1186_s25 + $0x1b8] sm:$0xff]  ;;  %v279_v42 = vld [vmem:[%s1186_s25 + $0x30] sm:$0xff]  ;;  %v297_v47 = vld [vmem:[%s1186_s25 + $0xc0] sm:$0xff] }
  0x22   : > { %997 = vmatpush3.bf16.msra.mxu1 %v996_v26  ;;  %967 = vmatprep.subr.bf16.mxu0 %v966_v27  ;;  %v280_v43 = vld [vmem:[%s1186_s25 + $0x38] sm:$0xff]  ;;  %v1002_v44 = vpack.c.bf16 %v328_v41, %v327_v38  ;;  %v311_v45 = vld [vmem:[%s1186_s25 + $0x130] sm:$0xff]  ;;  %v298_v48 = vld [vmem:[%s1186_s25 + $0xc8] sm:$0xff] }
  0x23   : > { %999 = vmatprep.subr.bf16.mxu1 %v998_v31  ;;  %v312_v46 = vld [vmem:[%s1186_s25 + $0x138] sm:$0xff]  ;;  %v329_v49 = vld [vmem:[%s1186_s25 + $0x1c0] sm:$0xff]  ;;  %v330_v50 = vld [vmem:[%s1186_s25 + $0x1c8] sm:$0xff]  ;;  %v972_v51 = vpack.c.bf16 %v280_v43, %v279_v42  ;;  %v974_v53 = vpack.c.bf16 %v298_v48, %v297_v47 }
  0x24   : > { %v1004_v52 = vpack.c.bf16 %v312_v46, %v311_v45  ;;  %v281_v54 = vld [vmem:[%s1186_s25 + $0x40] sm:$0xff]  ;;  %v282_v55 = vld [vmem:[%s1186_s25 + $0x48] sm:$0xff]  ;;  %v1006_v57 = vpack.c.bf16 %v330_v50, %v329_v49  ;;  %v299_v59 = vld [vmem:[%s1186_s25 + $0xd0] sm:$0xff] }
  0x25   : > { %969 = vmatpush3.bf16.msra.mxu0 %v968_v35  ;;  %v313_v56 = vld [vmem:[%s1186_s25 + $0x140] sm:$0xff]  ;;  %v314_v58 = vld [vmem:[%s1186_s25 + $0x148] sm:$0xff]  ;;  %v300_v60 = vld [vmem:[%s1186_s25 + $0xd8] sm:$0xff]  ;;  %v976_v63 = vpack.c.bf16 %v282_v55, %v281_v54 }
  0x26   : > { %1001 = vmatpush3.bf16.msra.mxu1 %v1000_v39  ;;  %971 = vmatprep.subr.bf16.mxu0 %v970_v40  ;;  %v331_v61 = vld [vmem:[%s1186_s25 + $0x1d0] sm:$0xff]  ;;  %v332_v62 = vld [vmem:[%s1186_s25 + $0x1d8] sm:$0xff]  ;;  %v1008_v0 = vpack.c.bf16 %v314_v58, %v313_v56  ;;  %v978_v1 = vpack.c.bf16 %v300_v60, %v299_v59  ;;  %v301_v7 = vld [vmem:[%s1186_s25 + $0xe0] sm:$0xff] }
  0x27   : > { %1003 = vmatprep.subr.bf16.mxu1 %v1002_v44  ;;  %v283_v2 = vld [vmem:[%s1186_s25 + $0x50] sm:$0xff]  ;;  %v284_v3 = vld [vmem:[%s1186_s25 + $0x58] sm:$0xff]  ;;  %v1010_v5 = vpack.c.bf16 %v332_v62, %v331_v61  ;;  %v302_v8 = vld [vmem:[%s1186_s25 + $0xe8] sm:$0xff] }
  0x28   : > { %v315_v4 = vld [vmem:[%s1186_s25 + $0x150] sm:$0xff]  ;;  %v316_v6 = vld [vmem:[%s1186_s25 + $0x158] sm:$0xff]  ;;  %v333_v9 = vld [vmem:[%s1186_s25 + $0x1e0] sm:$0xff]  ;;  %v980_v11 = vpack.c.bf16 %v284_v3, %v283_v2  ;;  %v982_v15 = vpack.c.bf16 %v302_v8, %v301_v7 }
  0x29   : > { %973 = vmatpush3.bf16.msra.mxu0 %v972_v51  ;;  %v334_v10 = vld [vmem:[%s1186_s25 + $0x1e8] sm:$0xff]  ;;  %v285_v12 = vld [vmem:[%s1186_s25 + $0x60] sm:$0xff]  ;;  %v1012_v14 = vpack.c.bf16 %v316_v6, %v315_v4  ;;  %v268_v18 = vld [vmem:[%s1181_s21 + $0x18] sm:$0xff] }
  0x2a   : > { %1005 = vmatpush3.bf16.msra.mxu1 %v1004_v52  ;;  %975 = vmatprep.subr.bf16.mxu0 %v974_v53  ;;  %v286_v13 = vld [vmem:[%s1186_s25 + $0x68] sm:$0xff]  ;;  %v317_v16 = vld [vmem:[%s1186_s25 + $0x160] sm:$0xff]  ;;  %v1014_v19 = vpack.c.bf16 %v334_v10, %v333_v9  ;;  %v303_v21 = vld [vmem:[%s1186_s25 + $0xf0] sm:$0xff] }
  0x2b   : > { %1007 = vmatprep.subr.bf16.mxu1 %v1006_v57  ;;  %v266_v17 = vld [vmem:[%s1181_s21 + $0x8] sm:$0xff]  ;;  %v304_v22 = vld [vmem:[%s1186_s25 + $0xf8] sm:$0xff]  ;;  %v335_v23 = vld [vmem:[%s1186_s25 + $0x1f0] sm:$0xff]  ;;  %535 = vmatprep.mubr.f32.mxu1 %v268_v18  ;;  %v984_v25 = vpack.c.bf16 %v286_v13, %v285_v12 }
  0x2c   : > { %v318_v20 = vld [vmem:[%s1186_s25 + $0x168] sm:$0xff]  ;;  %465 = vmatprep.mubr.f32.mxu0 %v266_v17  ;;  %v336_v24 = vld [vmem:[%s1186_s25 + $0x1f8] sm:$0xff]  ;;  %v986_v27 = vpack.c.bf16 %v304_v22, %v303_v21  ;;  %v287_v28 = vld [vmem:[%s1186_s25 + $0x70] sm:$0xff] }
  0x2d   : > { %977 = vmatpush3.bf16.msra.mxu0 %v976_v63  ;;  %v1016_v26 = vpack.c.bf16 %v318_v20, %v317_v16  ;;  %v288_v29 = vld [vmem:[%s1186_s25 + $0x78] sm:$0xff]  ;;  %v319_v30 = vld [vmem:[%s1186_s25 + $0x170] sm:$0xff]  ;;  %v1018_v31 = vpack.c.bf16 %v336_v24, %v335_v23  ;;  %v353_v33 = vld [vmem:[%s1186_s25 + $0x280] sm:$0xff] }
  0x2e   : > { %1009 = vmatpush3.bf16.msra.mxu1 %v1008_v0  ;;  %979 = vmatprep.subr.bf16.mxu0 %v978_v1  ;;  %v320_v32 = vld [vmem:[%s1186_s25 + $0x178] sm:$0xff]  ;;  %v354_v34 = vld [vmem:[%s1186_s25 + $0x288] sm:$0xff]  ;;  %v385_v35 = vld [vmem:[%s1186_s25 + $0x380] sm:$0xff]  ;;  %v988_v37 = vpack.c.bf16 %v288_v29, %v287_v28 }
  0x2f   : > { %1011 = vmatprep.subr.bf16.mxu1 %v1010_v5  ;;  %v386_v36 = vld [vmem:[%s1186_s25 + $0x388] sm:$0xff]  ;;  %v1020_v38 = vpack.c.bf16 %v320_v32, %v319_v30  ;;  %v1022_v39 = vpack.c.bf16 %v354_v34, %v353_v33  ;;  %v337_v40 = vld [vmem:[%s1186_s25 + $0x200] sm:$0xff]  ;;  %v355_v45 = vld [vmem:[%s1186_s25 + $0x290] sm:$0xff] }
  0x30   : > { %v338_v41 = vld [vmem:[%s1186_s25 + $0x208] sm:$0xff]  ;;  %v369_v42 = vld [vmem:[%s1186_s25 + $0x300] sm:$0xff]  ;;  %v1054_v43 = vpack.c.bf16 %v386_v36, %v385_v35  ;;  %v356_v46 = vld [vmem:[%s1186_s25 + $0x298] sm:$0xff] }
  0x31   : > { %981 = vmatpush3.bf16.msra.mxu0 %v980_v11  ;;  %v370_v44 = vld [vmem:[%s1186_s25 + $0x308] sm:$0xff]  ;;  %v387_v47 = vld [vmem:[%s1186_s25 + $0x390] sm:$0xff]  ;;  %v388_v48 = vld [vmem:[%s1186_s25 + $0x398] sm:$0xff]  ;;  %v1024_v51 = vpack.c.bf16 %v338_v41, %v337_v40  ;;  %v1026_v53 = vpack.c.bf16 %v356_v46, %v355_v45 }
  0x32   : > { %1013 = vmatpush3.bf16.msra.mxu1 %v1012_v14  ;;  %983 = vmatprep.subr.bf16.mxu0 %v982_v15  ;;  %v265_v49 = vld [vmem:[%s1181_s21] sm:$0xff]  ;;  %v267_v50 = vld [vmem:[%s1181_s21 + $0x10] sm:$0xff]  ;;  %v1056_v52 = vpack.c.bf16 %v370_v44, %v369_v42  ;;  %v340_v55 = vld [vmem:[%s1186_s25 + $0x218] sm:$0xff]  ;;  %v1058_v57 = vpack.c.bf16 %v388_v48, %v387_v47 }
  0x33   : > { %1015 = vmatprep.subr.bf16.mxu1 %v1014_v19  ;;  %v339_v54 = vld [vmem:[%s1186_s25 + $0x210] sm:$0xff]  ;;  %v372_v58 = vld [vmem:[%s1186_s25 + $0x318] sm:$0xff]  ;;  %v357_v59 = vld [vmem:[%s1186_s25 + $0x2a0] sm:$0xff] }
  0x34   : > { %v371_v56 = vld [vmem:[%s1186_s25 + $0x310] sm:$0xff]  ;;  %v358_v60 = vld [vmem:[%s1186_s25 + $0x2a8] sm:$0xff]  ;;  %v389_v61 = vld [vmem:[%s1186_s25 + $0x3a0] sm:$0xff]  ;;  %v1028_v63 = vpack.c.bf16 %v340_v55, %v339_v54 }
  0x35   : > { %985 = vmatpush3.bf16.msra.mxu0 %v984_v25  ;;  %v390_v62 = vld [vmem:[%s1186_s25 + $0x3a8] sm:$0xff]  ;;  %v1060_v0 = vpack.c.bf16 %v372_v58, %v371_v56  ;;  %v1030_v1 = vpack.c.bf16 %v358_v60, %v357_v59  ;;  %v341_v2 = vld [vmem:[%s1186_s25 + $0x220] sm:$0xff]  ;;  %v359_v7 = vld [vmem:[%s1186_s25 + $0x2b0] sm:$0xff] }
  0x36   : > { %1017 = vmatpush3.bf16.msra.mxu1 %v1016_v26  ;;  %987 = vmatprep.subr.bf16.mxu0 %v986_v27  ;;  %v342_v3 = vld [vmem:[%s1186_s25 + $0x228] sm:$0xff]  ;;  %v373_v4 = vld [vmem:[%s1186_s25 + $0x320] sm:$0xff]  ;;  %v1062_v5 = vpack.c.bf16 %v390_v62, %v389_v61  ;;  %v360_v8 = vld [vmem:[%s1186_s25 + $0x2b8] sm:$0xff] }
  0x37   : > { %1019 = vmatprep.subr.bf16.mxu1 %v1018_v31  ;;  %v374_v6 = vld [vmem:[%s1186_s25 + $0x328] sm:$0xff]  ;;  %v391_v9 = vld [vmem:[%s1186_s25 + $0x3b0] sm:$0xff]  ;;  %v392_v10 = vld [vmem:[%s1186_s25 + $0x3b8] sm:$0xff]  ;;  %v1032_v11 = vpack.c.bf16 %v342_v3, %v341_v2  ;;  %v1034_v13 = vpack.c.bf16 %v360_v8, %v359_v7 }
  0x38   : > { %v1064_v12 = vpack.c.bf16 %v374_v6, %v373_v4  ;;  %v343_v14 = vld [vmem:[%s1186_s25 + $0x230] sm:$0xff]  ;;  %v344_v15 = vld [vmem:[%s1186_s25 + $0x238] sm:$0xff]  ;;  %v1066_v17 = vpack.c.bf16 %v392_v10, %v391_v9  ;;  %v361_v19 = vld [vmem:[%s1186_s25 + $0x2c0] sm:$0xff] }
  0x39   : > { %989 = vmatpush3.bf16.msra.mxu0 %v988_v37  ;;  %v375_v16 = vld [vmem:[%s1186_s25 + $0x330] sm:$0xff]  ;;  %v376_v18 = vld [vmem:[%s1186_s25 + $0x338] sm:$0xff]  ;;  %v362_v20 = vld [vmem:[%s1186_s25 + $0x2c8] sm:$0xff]  ;;  %v1036_v23 = vpack.c.bf16 %v344_v15, %v343_v14 }
  0x3a   : > { %1021 = vmatpush3.bf16.msra.mxu1 %v1020_v38  ;;  %1023 = vmatprep.subr.bf16.mxu0 %v1022_v39  ;;  %v393_v21 = vld [vmem:[%s1186_s25 + $0x3c0] sm:$0xff]  ;;  %v394_v22 = vld [vmem:[%s1186_s25 + $0x3c8] sm:$0xff]  ;;  %v272_v25 = vld [vmem:[%s1181_s21 + $0x38] sm:$0xff]  ;;  %v1068_v26 = vpack.c.bf16 %v376_v18, %v375_v16  ;;  %v1038_v27 = vpack.c.bf16 %v362_v20, %v361_v19 }
  0x3b   : > { %1055 = vmatprep.subr.bf16.mxu1 %v1054_v43  ;;  %v270_v24 = vld [vmem:[%s1181_s21 + $0x28] sm:$0xff]  ;;  %v345_v28 = vld [vmem:[%s1186_s25 + $0x240] sm:$0xff]  ;;  %v1070_v31 = vpack.c.bf16 %v394_v22, %v393_v21  ;;  %v363_v33 = vld [vmem:[%s1186_s25 + $0x2d0] sm:$0xff] }
  0x3c   : > { %466 = vmatmul.mubr.f32.vlgmr.msra.gmra.mrb[0].mxu0 %v265_v49  ;;  %v346_v29 = vld [vmem:[%s1186_s25 + $0x248] sm:$0xff]  ;;  %v377_v30 = vld [vmem:[%s1186_s25 + $0x340] sm:$0xff]  ;;  %v364_v34 = vld [vmem:[%s1186_s25 + $0x2d8] sm:$0xff] }
  0x3d   : > { %536 = vmatmul.mubr.f32.vlgmr.msra.gmra.mrb[0].mxu1 %v267_v50  ;;  %1025 = vmatpush3.bf16.msra.mxu0 %v1024_v51  ;;  %v378_v32 = vld [vmem:[%s1186_s25 + $0x348] sm:$0xff]  ;;  %v395_v35 = vld [vmem:[%s1186_s25 + $0x3d0] sm:$0xff]  ;;  %v396_v36 = vld [vmem:[%s1186_s25 + $0x3d8] sm:$0xff]  ;;  %v1040_v37 = vpack.c.bf16 %v346_v29, %v345_v28  ;;  %v1042_v39 = vpack.c.bf16 %v364_v34, %v363_v33 }
  0x3e   : > { %1057 = vmatpush3.bf16.msra.mxu1 %v1056_v52  ;;  %1027 = vmatprep.subr.bf16.mxu0 %v1026_v53  ;;  %v1072_v38 = vpack.c.bf16 %v378_v32, %v377_v30  ;;  %v347_v40 = vld [vmem:[%s1186_s25 + $0x250] sm:$0xff]  ;;  %v348_v41 = vld [vmem:[%s1186_s25 + $0x258] sm:$0xff]  ;;  %v1074_v43 = vpack.c.bf16 %v396_v36, %v395_v35  ;;  %v365_v45 = vld [vmem:[%s1186_s25 + $0x2e0] sm:$0xff] }
  0x3f   : > { %1059 = vmatprep.subr.bf16.mxu1 %v1058_v57  ;;  %605 = vmatprep.mubr.f32.mxu0 %v270_v24  ;;  %v379_v42 = vld [vmem:[%s1186_s25 + $0x350] sm:$0xff]  ;;  %v380_v44 = vld [vmem:[%s1186_s25 + $0x358] sm:$0xff]  ;;  %v366_v46 = vld [vmem:[%s1186_s25 + $0x2e8] sm:$0xff]  ;;  %v1044_v49 = vpack.c.bf16 %v348_v41, %v347_v40 }
  0x40   : > { %675 = vmatprep.mubr.f32.mxu1 %v272_v25  ;;  %v397_v47 = vld [vmem:[%s1186_s25 + $0x3e0] sm:$0xff]  ;;  %v398_v48 = vld [vmem:[%s1186_s25 + $0x3e8] sm:$0xff]  ;;  %v1076_v50 = vpack.c.bf16 %v380_v44, %v379_v42  ;;  %v1046_v51 = vpack.c.bf16 %v366_v46, %v365_v45  ;;  %v367_v57 = vld [vmem:[%s1186_s25 + $0x2f0] sm:$0xff] }
  0x41   : > { %1029 = vmatpush3.bf16.msra.mxu0 %v1028_v63  ;;  %v349_v52 = vld [vmem:[%s1186_s25 + $0x260] sm:$0xff]  ;;  %v350_v53 = vld [vmem:[%s1186_s25 + $0x268] sm:$0xff]  ;;  %v1078_v55 = vpack.c.bf16 %v398_v48, %v397_v47  ;;  %v368_v58 = vld [vmem:[%s1186_s25 + $0x2f8] sm:$0xff] }
  0x42   : > { %1061 = vmatpush3.bf16.msra.mxu1 %v1060_v0  ;;  %1031 = vmatprep.subr.bf16.mxu0 %v1030_v1  ;;  %v381_v54 = vld [vmem:[%s1186_s25 + $0x360] sm:$0xff]  ;;  %v382_v56 = vld [vmem:[%s1186_s25 + $0x368] sm:$0xff]  ;;  %v399_v59 = vld [vmem:[%s1186_s25 + $0x3f0] sm:$0xff]  ;;  %v1048_v61 = vpack.c.bf16 %v350_v53, %v349_v52  ;;  %v1050_v63 = vpack.c.bf16 %v368_v58, %v367_v57 }
  0x43   : > { %1063 = vmatprep.subr.bf16.mxu1 %v1062_v5  ;;  %v400_v60 = vld [vmem:[%s1186_s25 + $0x3f8] sm:$0xff]  ;;  %v1080_v62 = vpack.c.bf16 %v382_v56, %v381_v54  ;;  %v351_v0 = vld [vmem:[%s1186_s25 + $0x270] sm:$0xff]  ;;  %v269_v7 = vld [vmem:[%s1181_s21 + $0x20] sm:$0xff] }
  0x44   : > { %v352_v1 = vld [vmem:[%s1186_s25 + $0x278] sm:$0xff]  ;;  %v1082_v2 = vpack.c.bf16 %v400_v60, %v399_v59  ;;  %v383_v3 = vld [vmem:[%s1186_s25 + $0x370] sm:$0xff] }
  0x45   : > { %1033 = vmatpush3.bf16.msra.mxu0 %v1032_v11  ;;  %v384_v4 = vld [vmem:[%s1186_s25 + $0x378] sm:$0xff]  ;;  %v1052_v5 = vpack.c.bf16 %v352_v1, %v351_v0  ;;  %v271_v8 = vld [vmem:[%s1181_s21 + $0x30] sm:$0xff] }
  0x46   : > { %1065 = vmatpush3.bf16.msra.mxu1 %v1064_v12  ;;  %1035 = vmatprep.subr.bf16.mxu0 %v1034_v13  ;;  %v1084_v6 = vpack.c.bf16 %v384_v4, %v383_v3 }
  0x47   : > { %1067 = vmatprep.subr.bf16.mxu1 %v1066_v17 }
  0x49   : > { %1037 = vmatpush3.bf16.msra.mxu0 %v1036_v23  ;;  %v264_v23 = vld [vmem:[#allocation2] sm:$0xff] }
  0x4a   : > { %1069 = vmatpush3.bf16.msra.mxu1 %v1068_v26  ;;  %1039 = vmatprep.subr.bf16.mxu0 %v1038_v27  ;;  %v814_v27 = vld [vmem:[%s1343_s2] ss:$0 sm:$0xff] (!%p813_p7) }
  0x4b   : > { %1071 = vmatprep.subr.bf16.mxu1 %v1070_v31 }
  0x4d   : > { %1041 = vmatpush3.bf16.msra.mxu0 %v1040_v37 }
  0x4e   : > { %1073 = vmatpush3.bf16.msra.mxu1 %v1072_v38  ;;  %1043 = vmatprep.subr.bf16.mxu0 %v1042_v39 }
  0x4f   : > { %1075 = vmatprep.subr.bf16.mxu1 %v1074_v43 }
  0x51   : > { %1045 = vmatpush3.bf16.msra.mxu0 %v1044_v49 }
  0x52   : > { %1077 = vmatpush3.bf16.msra.mxu1 %v1076_v50  ;;  %1047 = vmatprep.subr.bf16.mxu0 %v1046_v51 }
  0x53   : > { %1079 = vmatprep.subr.bf16.mxu1 %v1078_v55 }
  0x55   : > { %1049 = vmatpush3.bf16.msra.mxu0 %v1048_v61 }
  0x56   : > { %1081 = vmatpush3.bf16.msra.mxu1 %v1080_v62  ;;  %1051 = vmatprep.subr.bf16.mxu0 %v1050_v63 }
  0x57   : > { %1083 = vmatprep.subr.bf16.mxu1 %v1082_v2 }
  0x59   : > { %1053 = vmatpush3.bf16.msra.mxu0 %v1052_v5 }
  0x5a   : > { %1085 = vmatpush3.bf16.msra.mxu1 %v1084_v6 }
  0x5c   : > { %606 = vmatmul.mubr.f32.vlgmr.msra.gmra.mrb[2].mxu0 %v269_v7 }
  0x5d   : > { %676 = vmatmul.mubr.f32.vlgmr.msra.gmra.mrb[2].mxu1 %v271_v8 }
 0x10f   : > { %v850_v9 = vpop.f32.mrb[0].mxu0 }
 0x110   : > { %v885_v10 = vpop.f32.mrb[0].mxu1  ;;  %v851_v11 = vpop.f32.mrb[1].mxu0 }
 0x111   : > { %v852_v12 = vadd.f32 %v851_v11, %v850_v9  ;;  %v886_v13 = vpop.f32.mrb[1].mxu1 }
 0x112   : > { %v887_v14 = vadd.f32 %v886_v13, %v885_v10 }
 0x114   : > { %v538_v15 = vadd.f32 %v887_v14, %v852_v12 }
 0x12f   : > { %v920_v16 = vpop.f32.mrb[2].mxu0 }
 0x130   : > { %v921_v17 = vpop.f32.mrb[3].mxu0  ;;  %v955_v18 = vpop.f32.mrb[2].mxu1 }
 0x131   : > { %v922_v19 = vadd.f32 %v921_v17, %v920_v16  ;;  %v956_v20 = vpop.f32.mrb[3].mxu1 }
 0x132   : > { %v957_v21 = vadd.f32 %v956_v20, %v955_v18 }
 0x133   : > { %v608_v22 = vadd.f32 %v922_v19, %v538_v15  ;;  %686 = sbr.rel (%p813_p7) target bundleno = 326 (0x146), region = 40 }
 0x135   : > { %v678_v24 = vadd.f32 %v957_v21, %v608_v22 }
 0x137   : > { %v681_v25 = vadd.f32 %v678_v24, %v264_v23 }
 0x139   : > { %682 = vst [vmem:[#allocation2] sm:$0xff] %v681_v25 }
 0x140   : > { %v687_v26 = vld [vmem:[#allocation2] sm:$0xff] }
 0x141   : > { %v695_v28 = vadd.f32 %v814_v27, %v687_v26 }
 0x143   : > { %v696_v29 = vmax.f32 %v695_v28, 0.0 }
 0x145   : > { %697 = vst [vmem:[%s1344_s3] sm:$0xff] %v696_v29 }
 0x146 PF: > { %s13_s14 = sadd.s32 1, %s1133_s14   ;;  %s1345_s12 = smov %s1129_s13 }
 0x147   : > { %p10_p8 = scmp.ge.s32.totalorder %s13_s14, 6   ;;  %s1346_s13 = smov %s1348_s15 }
 0x149   :  { %12 = sbr.rel (!%p10_p8) target bundleno = 2 (0x2), region = 76 }

// kernel: adda_forward.17
= control target key start
LH: loop header
LB: loop body
LE: loop exit
PB: predicated region body
PF: predicated region fallthrough
CT: control target
= control target key end

     0   :  { %v190_v3 = vmov 0.0   ;;  %v137_v50 = vlaneseq  ;;  %s319_s1 = inlined_call_operand.vmem [shape: f32[128,256], index: 1, kind: input, shape index: {}]   ;;  %s320_s0 = inlined_call_operand.vmem [shape: f32[8,128], index: 0, kind: input, shape index: {}]   ;;  %s321_s2 = inlined_call_operand.vmem [shape: f32[1,256], index: 2, kind: input, shape index: {}]   ;;  %s322_s3 = inlined_call_operand.vmem [shape: f32[8,256], index: 3, kind: output, shape index: {}]  }
   0x1   :  { %v24_v0 = vld [vmem:[%s319_s1 + $0x8] sm:$0xff]  ;;  %v26_v1 = vld [vmem:[%s319_s1 + $0x18] sm:$0xff]  ;;  %v23_v2 = vld [vmem:[%s319_s1] sm:$0xff]  ;;  %119 = vmatprep.mubr.f32.mxu0 %v190_v3 }
   0x2   :  { %v157_v4 = vpack.c.bf16 %v26_v1, %v24_v0  ;;  %v25_v5 = vld [vmem:[%s319_s1 + $0x10] sm:$0xff]  ;;  %v28_v6 = vld [vmem:[%s319_s1 + $0x28] sm:$0xff]  ;;  %v30_v7 = vld [vmem:[%s319_s1 + $0x38] sm:$0xff]  ;;  %v138_v51 = vshrl.u32 %v137_v50, 7 }
   0x3   :  { %v159_v8 = vpack.c.bf16 %v25_v5, %v23_v2  ;;  %v161_v9 = vpack.c.bf16 %v30_v7, %v28_v6  ;;  %v27_v10 = vld [vmem:[%s319_s1 + $0x20] sm:$0xff]  ;;  %v29_v11 = vld [vmem:[%s319_s1 + $0x30] sm:$0xff]  ;;  %v32_v12 = vld [vmem:[%s319_s1 + $0x48] sm:$0xff] }
   0x4   :  { %158 = vmatprep.subr.bf16.mxu0 %v157_v4  ;;  %v34_v13 = vld [vmem:[%s319_s1 + $0x58] sm:$0xff]  ;;  %v163_v14 = vpack.c.bf16 %v29_v11, %v27_v10  ;;  %v31_v16 = vld [vmem:[%s319_s1 + $0x40] sm:$0xff]  ;;  %v33_v17 = vld [vmem:[%s319_s1 + $0x50] sm:$0xff]  ;;  %v139_v52 = vsub.s32 0, %v138_v51  ;;  %v143_v54 = vsub.s32 1, %v138_v51 }
   0x5   :  { %160 = vmatpush1.bf16.msra.mxu0 %v159_v8  ;;  %v165_v15 = vpack.c.bf16 %v34_v13, %v32_v12  ;;  %v36_v18 = vld [vmem:[%s319_s1 + $0x68] sm:$0xff]  ;;  %v38_v19 = vld [vmem:[%s319_s1 + $0x78] sm:$0xff]  ;;  %v167_v20 = vpack.c.bf16 %v33_v17, %v31_v16  ;;  %v35_v22 = vld [vmem:[%s319_s1 + $0x60] sm:$0xff] }
   0x6   :  { %162 = vmatprep.subr.bf16.mxu0 %v161_v9  ;;  %v169_v21 = vpack.c.bf16 %v38_v19, %v36_v18  ;;  %v37_v23 = vld [vmem:[%s319_s1 + $0x70] sm:$0xff]  ;;  %v40_v24 = vld [vmem:[%s319_s1 + $0x88] sm:$0xff]  ;;  %v42_v25 = vld [vmem:[%s319_s1 + $0x98] sm:$0xff] }
   0x7   :  { %v171_v26 = vpack.c.bf16 %v37_v23, %v35_v22  ;;  %v173_v27 = vpack.c.bf16 %v42_v25, %v40_v24  ;;  %v39_v28 = vld [vmem:[%s319_s1 + $0x80] sm:$0xff]  ;;  %v41_v29 = vld [vmem:[%s319_s1 + $0x90] sm:$0xff]  ;;  %v44_v30 = vld [vmem:[%s319_s1 + $0xa8] sm:$0xff] }
   0x8   :  { %v46_v31 = vld [vmem:[%s319_s1 + $0xb8] sm:$0xff]  ;;  %v175_v32 = vpack.c.bf16 %v41_v29, %v39_v28  ;;  %v43_v34 = vld [vmem:[%s319_s1 + $0xa0] sm:$0xff]  ;;  %v45_v35 = vld [vmem:[%s319_s1 + $0xb0] sm:$0xff] }
   0x9   :  { %164 = vmatpush1.bf16.msra.mxu0 %v163_v14  ;;  %v177_v33 = vpack.c.bf16 %v46_v31, %v44_v30  ;;  %v48_v36 = vld [vmem:[%s319_s1 + $0xc8] sm:$0xff]  ;;  %v50_v37 = vld [vmem:[%s319_s1 + $0xd8] sm:$0xff]  ;;  %v179_v38 = vpack.c.bf16 %v45_v35, %v43_v34  ;;  %v47_v40 = vld [vmem:[%s319_s1 + $0xc0] sm:$0xff] }
   0xa   :  { %166 = vmatprep.subr.bf16.mxu0 %v165_v15  ;;  %v181_v39 = vpack.c.bf16 %v50_v37, %v48_v36  ;;  %v49_v41 = vld [vmem:[%s319_s1 + $0xd0] sm:$0xff]  ;;  %v52_v42 = vld [vmem:[%s319_s1 + $0xe8] sm:$0xff]  ;;  %v54_v43 = vld [vmem:[%s319_s1 + $0xf8] sm:$0xff] }
   0xb   :  { %v183_v44 = vpack.c.bf16 %v49_v41, %v47_v40  ;;  %v185_v45 = vpack.c.bf16 %v54_v43, %v52_v42  ;;  %v51_v46 = vld [vmem:[%s319_s1 + $0xe0] sm:$0xff]  ;;  %v53_v47 = vld [vmem:[%s319_s1 + $0xf0] sm:$0xff] }
   0xc   :  { %v187_v48 = vpack.c.bf16 %v53_v47, %v51_v46  ;;  %v22_v49 = vld [vmem:[%s320_s0] sm:$0xff] }
   0xd   :  { %168 = vmatpush1.bf16.msra.mxu0 %v167_v20  ;;  %v135_v53 = vld [vmem:[%s321_s2] sm:$0x3] }
   0xe   :  { %170 = vmatprep.subr.bf16.mxu0 %v169_v21  ;;  %v140_v55 = vrot.slane %v135_v53, %v139_v52  ;;  %v144_v56 = vrot.slane %v135_v53, %v143_v54 }
  0x11   :  { %172 = vmatpush1.bf16.msra.mxu0 %v171_v26 }
  0x12   :  { %174 = vmatprep.subr.bf16.mxu0 %v173_v27 }
  0x15   :  { %176 = vmatpush1.bf16.msra.mxu0 %v175_v32 }
  0x16   :  { %178 = vmatprep.subr.bf16.mxu0 %v177_v33 }
  0x19   :  { %180 = vmatpush1.bf16.msra.mxu0 %v179_v38 }
  0x1a   :  { %182 = vmatprep.subr.bf16.mxu0 %v181_v39 }
  0x1d   :  { %184 = vmatpush1.bf16.msra.mxu0 %v183_v44 }
  0x1e   :  { %186 = vmatprep.subr.bf16.mxu0 %v185_v45 }
  0x21   :  { %188 = vmatpush1.bf16.msra.mxu0 %v187_v48 }
  0x24   :  { %120 = vmatmul.mubr.f32.vlgmr.msra.gmra.mrb[0].mxu0 %v22_v49 }
  0xf7   :  { %v121_v57 = vpop.f32.mrb[0].mxu0 }
  0xf8   :  { %v147_v58 = vadd.f32 %v140_v55, %v121_v57  ;;  %v123_v59 = vpop.f32.mrb[1].mxu0 }
  0xf9   :  { %v148_v60 = vadd.f32 %v144_v56, %v123_v59 }
  0xfa   :  { %v149_v61 = vmax.f32 %v147_v58, 0.0 }
  0xfb   :  { %v150_v62 = vmax.f32 %v148_v60, 0.0 }
  0xfc   :  { %151 = vst [vmem:[%s322_s3] sm:$0xff] %v149_v61 }
  0xfd   :  { %152 = vst [vmem:[%s322_s3 + $0x8] sm:$0xff] %v150_v62 }

// kernel: adda_forward.18
= control target key start
LH: loop header
LB: loop body
LE: loop exit
PB: predicated region body
PF: predicated region fallthrough
CT: control target
= control target key end

     0   :  { %s481_s1 = inlined_call_operand.vmem [shape: f32[256,256], index: 1, kind: input, shape index: {}]   ;;  %s482_s0 = inlined_call_operand.vmem [shape: f32[8,256], index: 0, kind: input, shape index: {}]   ;;  %s483_s2 = inlined_call_operand.vmem [shape: f32[1,256], index: 2, kind: input, shape index: {}]   ;;  %s484_s3 = inlined_call_operand.vmem [shape: f32[8,256], index: 3, kind: output, shape index: {}]  }
   0x1   :  { %v25_v0 = vld [vmem:[%s481_s1 + $0x8] sm:$0xff]  ;;  %v27_v1 = vld [vmem:[%s481_s1 + $0x18] sm:$0xff]  ;;  %v24_v2 = vld [vmem:[%s481_s1] sm:$0xff] }
   0x2   :  { %v190_v3 = vpack.c.bf16 %v27_v1, %v25_v0  ;;  %v26_v4 = vld [vmem:[%s481_s1 + $0x10] sm:$0xff]  ;;  %v29_v5 = vld [vmem:[%s481_s1 + $0x28] sm:$0xff]  ;;  %v31_v6 = vld [vmem:[%s481_s1 + $0x38] sm:$0xff] }
   0x3   :  { %v192_v7 = vpack.c.bf16 %v26_v4, %v24_v2  ;;  %v194_v8 = vpack.c.bf16 %v31_v6, %v29_v5  ;;  %v28_v9 = vld [vmem:[%s481_s1 + $0x20] sm:$0xff]  ;;  %v30_v10 = vld [vmem:[%s481_s1 + $0x30] sm:$0xff]  ;;  %v33_v11 = vld [vmem:[%s481_s1 + $0x48] sm:$0xff] }
   0x4   :  { %191 = vmatprep.subr.bf16.mxu0 %v190_v3  ;;  %v35_v12 = vld [vmem:[%s481_s1 + $0x58] sm:$0xff]  ;;  %v196_v13 = vpack.c.bf16 %v30_v10, %v28_v9  ;;  %v32_v15 = vld [vmem:[%s481_s1 + $0x40] sm:$0xff]  ;;  %v34_v16 = vld [vmem:[%s481_s1 + $0x50] sm:$0xff] }
   0x5   :  { %193 = vmatpush1.bf16.msra.mxu0 %v192_v7  ;;  %v198_v14 = vpack.c.bf16 %v35_v12, %v33_v11  ;;  %v37_v17 = vld [vmem:[%s481_s1 + $0x68] sm:$0xff]  ;;  %v39_v18 = vld [vmem:[%s481_s1 + $0x78] sm:$0xff]  ;;  %v200_v19 = vpack.c.bf16 %v34_v16, %v32_v15  ;;  %v36_v21 = vld [vmem:[%s481_s1 + $0x60] sm:$0xff] }
   0x6   :  { %195 = vmatprep.subr.bf16.mxu0 %v194_v8  ;;  %v202_v20 = vpack.c.bf16 %v39_v18, %v37_v17  ;;  %v38_v22 = vld [vmem:[%s481_s1 + $0x70] sm:$0xff]  ;;  %v41_v23 = vld [vmem:[%s481_s1 + $0x88] sm:$0xff]  ;;  %v43_v24 = vld [vmem:[%s481_s1 + $0x98] sm:$0xff] }
   0x7   :  { %v204_v25 = vpack.c.bf16 %v38_v22, %v36_v21  ;;  %v206_v26 = vpack.c.bf16 %v43_v24, %v41_v23  ;;  %v40_v27 = vld [vmem:[%s481_s1 + $0x80] sm:$0xff]  ;;  %v42_v28 = vld [vmem:[%s481_s1 + $0x90] sm:$0xff]  ;;  %v45_v29 = vld [vmem:[%s481_s1 + $0xa8] sm:$0xff] }
   0x8   :  { %v47_v30 = vld [vmem:[%s481_s1 + $0xb8] sm:$0xff]  ;;  %v208_v31 = vpack.c.bf16 %v42_v28, %v40_v27  ;;  %v44_v33 = vld [vmem:[%s481_s1 + $0xa0] sm:$0xff]  ;;  %v46_v34 = vld [vmem:[%s481_s1 + $0xb0] sm:$0xff] }
   0x9   :  { %197 = vmatpush1.bf16.msra.mxu0 %v196_v13  ;;  %v210_v32 = vpack.c.bf16 %v47_v30, %v45_v29  ;;  %v49_v35 = vld [vmem:[%s481_s1 + $0xc8] sm:$0xff]  ;;  %v51_v36 = vld [vmem:[%s481_s1 + $0xd8] sm:$0xff]  ;;  %v212_v37 = vpack.c.bf16 %v46_v34, %v44_v33  ;;  %v48_v39 = vld [vmem:[%s481_s1 + $0xc0] sm:$0xff]  ;;  %v170_v34 = vlaneseq }
   0xa   :  { %199 = vmatprep.subr.bf16.mxu0 %v198_v14  ;;  %v214_v38 = vpack.c.bf16 %v51_v36, %v49_v35  ;;  %v50_v40 = vld [vmem:[%s481_s1 + $0xd0] sm:$0xff]  ;;  %v23_v41 = vld [vmem:[%s482_s0 + $0x8] sm:$0xff]  ;;  %v55_v43 = vld [vmem:[%s481_s1 + $0xf8] sm:$0xff] }
   0xb   :  { %v53_v42 = vld [vmem:[%s481_s1 + $0xe8] sm:$0xff]  ;;  %152 = vmatprep.mubr.f32.mxu0 %v23_v41  ;;  %v216_v44 = vpack.c.bf16 %v50_v40, %v48_v39  ;;  %v52_v46 = vld [vmem:[%s481_s1 + $0xe0] sm:$0xff]  ;;  %v54_v47 = vld [vmem:[%s481_s1 + $0xf0] sm:$0xff]  ;;  %v171_v35 = vshrl.u32 %v170_v34, 7 }
   0xc   :  { %v218_v45 = vpack.c.bf16 %v55_v43, %v53_v42  ;;  %v57_v48 = vld [vmem:[%s481_s1 + $0x108] sm:$0xff]  ;;  %v59_v49 = vld [vmem:[%s481_s1 + $0x118] sm:$0xff]  ;;  %v220_v50 = vpack.c.bf16 %v54_v47, %v52_v46  ;;  %v56_v52 = vld [vmem:[%s481_s1 + $0x100] sm:$0xff] }
   0xd   :  { %201 = vmatpush1.bf16.msra.mxu0 %v200_v19  ;;  %v222_v51 = vpack.c.bf16 %v59_v49, %v57_v48  ;;  %v58_v53 = vld [vmem:[%s481_s1 + $0x110] sm:$0xff]  ;;  %v61_v54 = vld [vmem:[%s481_s1 + $0x128] sm:$0xff]  ;;  %v63_v55 = vld [vmem:[%s481_s1 + $0x138] sm:$0xff]  ;;  %v172_v36 = vsub.s32 0, %v171_v35 }
   0xe   :  { %203 = vmatprep.subr.bf16.mxu0 %v202_v20  ;;  %v224_v56 = vpack.c.bf16 %v58_v53, %v56_v52  ;;  %v226_v57 = vpack.c.bf16 %v63_v55, %v61_v54  ;;  %v60_v58 = vld [vmem:[%s481_s1 + $0x120] sm:$0xff]  ;;  %v62_v59 = vld [vmem:[%s481_s1 + $0x130] sm:$0xff]  ;;  %v65_v60 = vld [vmem:[%s481_s1 + $0x148] sm:$0xff] }
   0xf   :  { %v67_v61 = vld [vmem:[%s481_s1 + $0x158] sm:$0xff]  ;;  %v228_v62 = vpack.c.bf16 %v62_v59, %v60_v58  ;;  %v64_v0 = vld [vmem:[%s481_s1 + $0x140] sm:$0xff]  ;;  %v66_v1 = vld [vmem:[%s481_s1 + $0x150] sm:$0xff] }
  0x10   :  { %v230_v63 = vpack.c.bf16 %v67_v61, %v65_v60  ;;  %v69_v2 = vld [vmem:[%s481_s1 + $0x168] sm:$0xff]  ;;  %v71_v3 = vld [vmem:[%s481_s1 + $0x178] sm:$0xff]  ;;  %v232_v4 = vpack.c.bf16 %v66_v1, %v64_v0  ;;  %v68_v6 = vld [vmem:[%s481_s1 + $0x160] sm:$0xff] }
  0x11   :  { %205 = vmatpush1.bf16.msra.mxu0 %v204_v25  ;;  %v234_v5 = vpack.c.bf16 %v71_v3, %v69_v2  ;;  %v70_v7 = vld [vmem:[%s481_s1 + $0x170] sm:$0xff]  ;;  %v73_v8 = vld [vmem:[%s481_s1 + $0x188] sm:$0xff]  ;;  %v75_v9 = vld [vmem:[%s481_s1 + $0x198] sm:$0xff] }
  0x12   :  { %207 = vmatprep.subr.bf16.mxu0 %v206_v26  ;;  %v236_v10 = vpack.c.bf16 %v70_v7, %v68_v6  ;;  %v238_v11 = vpack.c.bf16 %v75_v9, %v73_v8  ;;  %v72_v12 = vld [vmem:[%s481_s1 + $0x180] sm:$0xff]  ;;  %v74_v13 = vld [vmem:[%s481_s1 + $0x190] sm:$0xff]  ;;  %v77_v14 = vld [vmem:[%s481_s1 + $0x1a8] sm:$0xff] }
  0x13   :  { %v79_v15 = vld [vmem:[%s481_s1 + $0x1b8] sm:$0xff]  ;;  %v240_v16 = vpack.c.bf16 %v74_v13, %v72_v12  ;;  %v76_v18 = vld [vmem:[%s481_s1 + $0x1a0] sm:$0xff]  ;;  %v78_v19 = vld [vmem:[%s481_s1 + $0x1b0] sm:$0xff] }
  0x14   :  { %v242_v17 = vpack.c.bf16 %v79_v15, %v77_v14  ;;  %v81_v20 = vld [vmem:[%s481_s1 + $0x1c8] sm:$0xff]  ;;  %v83_v21 = vld [vmem:[%s481_s1 + $0x1d8] sm:$0xff]  ;;  %v244_v22 = vpack.c.bf16 %v78_v19, %v76_v18  ;;  %v80_v24 = vld [vmem:[%s481_s1 + $0x1c0] sm:$0xff] }
  0x15   :  { %209 = vmatpush1.bf16.msra.mxu0 %v208_v31  ;;  %v246_v23 = vpack.c.bf16 %v83_v21, %v81_v20  ;;  %v82_v25 = vld [vmem:[%s481_s1 + $0x1d0] sm:$0xff]  ;;  %v85_v26 = vld [vmem:[%s481_s1 + $0x1e8] sm:$0xff]  ;;  %v87_v27 = vld [vmem:[%s481_s1 + $0x1f8] sm:$0xff] }
  0x16   :  { %211 = vmatprep.subr.bf16.mxu0 %v210_v32  ;;  %v248_v28 = vpack.c.bf16 %v82_v25, %v80_v24  ;;  %v250_v29 = vpack.c.bf16 %v87_v27, %v85_v26  ;;  %v84_v30 = vld [vmem:[%s481_s1 + $0x1e0] sm:$0xff]  ;;  %v86_v31 = vld [vmem:[%s481_s1 + $0x1f0] sm:$0xff] }
  0x17   :  { %v252_v32 = vpack.c.bf16 %v86_v31, %v84_v30  ;;  %v22_v33 = vld [vmem:[%s482_s0] sm:$0xff] }
  0x19   :  { %213 = vmatpush1.bf16.msra.mxu0 %v212_v37  ;;  %v168_v37 = vld [vmem:[%s483_s2] sm:$0x3] }
  0x1a   :  { %215 = vmatprep.subr.bf16.mxu0 %v214_v38  ;;  %v176_v38 = vsub.s32 1, %v171_v35  ;;  %v173_v39 = vrot.slane %v168_v37, %v172_v36 }
  0x1c   :  { %v177_v40 = vrot.slane %v168_v37, %v176_v38 }
  0x1d   :  { %217 = vmatpush1.bf16.msra.mxu0 %v216_v44 }
  0x1e   :  { %219 = vmatprep.subr.bf16.mxu0 %v218_v45 }
  0x21   :  { %221 = vmatpush1.bf16.msra.mxu0 %v220_v50 }
  0x22   :  { %223 = vmatprep.subr.bf16.mxu0 %v222_v51 }
  0x25   :  { %225 = vmatpush1.bf16.msra.mxu0 %v224_v56 }
  0x26   :  { %227 = vmatprep.subr.bf16.mxu0 %v226_v57 }
  0x29   :  { %229 = vmatpush1.bf16.msra.mxu0 %v228_v62 }
  0x2a   :  { %231 = vmatprep.subr.bf16.mxu0 %v230_v63 }
  0x2d   :  { %233 = vmatpush1.bf16.msra.mxu0 %v232_v4 }
  0x2e   :  { %235 = vmatprep.subr.bf16.mxu0 %v234_v5 }
  0x31   :  { %237 = vmatpush1.bf16.msra.mxu0 %v236_v10 }
  0x32   :  { %239 = vmatprep.subr.bf16.mxu0 %v238_v11 }
  0x35   :  { %241 = vmatpush1.bf16.msra.mxu0 %v240_v16 }
  0x36   :  { %243 = vmatprep.subr.bf16.mxu0 %v242_v17 }
  0x39   :  { %245 = vmatpush1.bf16.msra.mxu0 %v244_v22 }
  0x3a   :  { %247 = vmatprep.subr.bf16.mxu0 %v246_v23 }
  0x3d   :  { %249 = vmatpush1.bf16.msra.mxu0 %v248_v28 }
  0x3e   :  { %251 = vmatprep.subr.bf16.mxu0 %v250_v29 }
  0x41   :  { %253 = vmatpush1.bf16.msra.mxu0 %v252_v32 }
  0x44   :  { %153 = vmatmul.mubr.f32.vlgmr.msra.gmra.mrb[0].mxu0 %v22_v33 }
 0x117   :  { %v154_v41 = vpop.f32.mrb[0].mxu0 }
 0x118   :  { %v180_v42 = vadd.f32 %v173_v39, %v154_v41  ;;  %v156_v43 = vpop.f32.mrb[1].mxu0 }
 0x119   :  { %v181_v44 = vadd.f32 %v177_v40, %v156_v43 }
 0x11a   :  { %v182_v45 = vmax.f32 %v180_v42, 0.0 }
 0x11b   :  { %v183_v46 = vmax.f32 %v181_v44, 0.0 }
 0x11c   :  { %184 = vst [vmem:[%s484_s3] sm:$0xff] %v182_v45 }
 0x11d   :  { %185 = vst [vmem:[%s484_s3 + $0x8] sm:$0xff] %v183_v46 }

</bundles_post_ra>
